<compile_context>
chip_gen: v7x
topology: tpu7x:2x2x1
jax: 0.10.0
libtpu: 0.0.40
codegen_flags: <defaults>
</compile_context>

<pallas_src>
import functools

import jax
import jax.numpy as jnp
import numpy as np
from jax import lax
from jax.experimental import pallas as pl
from jax.experimental.pallas import tpu as pltpu

LANE = 128
SUBLANE = 8
MATMUL_DTYPE = jnp.bfloat16   # operands of the big matmuls; accumulation is f32


def _round_up(x, m):
    return (x + m - 1) // m * m


# ----------------------------------------------------------------------------
# Tiled linear kernel: y = x @ W + b, tiled over rows (used for the hoisted
# GRU input projection).
# ----------------------------------------------------------------------------
def _linear_kernel(x_ref, w_ref, b_ref, o_ref):
    o_ref[...] = (jnp.dot(x_ref[...], w_ref[...],
                          preferred_element_type=jnp.float32)
                  + b_ref[...]).astype(o_ref.dtype)


def linear_tiled(x, w_t, b_row, *, out_dtype=jnp.float32, tm=512):
    """x: (M, D), w_t: (D, N), b_row: (1, N) -> (M, N)."""
    M, D = x.shape
    N = w_t.shape[1]
    tm = min(tm, _round_up(M, SUBLANE))
    Mp = _round_up(M, tm)
    if Mp != M:
        x = jnp.pad(x, ((0, Mp - M), (0, 0)))

    y = pl.pallas_call(
        _linear_kernel,
        out_shape=jax.ShapeDtypeStruct((Mp, N), out_dtype),
        grid_spec=pltpu.PrefetchScalarGridSpec(
            num_scalar_prefetch=0,
            grid=(Mp // tm,),
            in_specs=[
                pl.BlockSpec((tm, D), lambda i: (i, 0)),
                # weights/bias: constant index_map -> stay resident across the grid
                pl.BlockSpec((D, N), lambda i: (0, 0)),
                pl.BlockSpec((1, N), lambda i: (0, 0)),
            ],
            out_specs=pl.BlockSpec((tm, N), lambda i: (i, 0)),
        ),
        compiler_params=pltpu.CompilerParams(
            dimension_semantics=("parallel",),
            vmem_limit_bytes=48 * 1024 * 1024),   # headroom; < v7x 64 MiB physical
    )(x, w_t, b_row)
    return y[:M] if Mp != M else y


# ----------------------------------------------------------------------------
# GRU recurrence kernel.  gi (input projection, with b_ih + folded b_hr/b_hz) is
# precomputed in bf16; the kernel body only does the recurrent matmul + gates for
# t_blk timesteps per grid iteration.  PyTorch gate order [r, z, n]; each gate
# occupies a 128-aligned lane slab.  Grid = (batch blocks [parallel], time [arbitrary]).
# ----------------------------------------------------------------------------
def _gru_recurrent_kernel(gi_ref, whh_ref, bhn_ref, o_ref, h_scratch,
                          *, hidden_pad, t_blk):
    Hp = hidden_pad

    @pl.when(pl.program_id(1) == 0)
    def _():
        h_scratch[...] = jnp.zeros_like(h_scratch)

    # Hoist the n-gate hidden bias load + broadcast out of the unrolled loop.
    bhn = jnp.broadcast_to(bhn_ref[...], h_scratch.shape)        # (b_blk, Hp) f32

    def step(t, h):
        gi = gi_ref[t].astype(jnp.float32)                       # (b_blk, 3Hp)
        gh = jnp.dot(h.astype(jnp.bfloat16), whh_ref[...],
                     preferred_element_type=jnp.float32)         # (b_blk, 3Hp) f32
        r = jax.nn.sigmoid(gi[:, 0:Hp] + gh[:, 0:Hp])
        z = jax.nn.sigmoid(gi[:, Hp:2 * Hp] + gh[:, Hp:2 * Hp])
        n = jnp.tanh(gi[:, 2 * Hp:3 * Hp] + r * (gh[:, 2 * Hp:3 * Hp] + bhn))
        h_new = (1.0 - z) * n + z * h
        o_ref[t] = h_new.astype(o_ref.dtype)                     # lane-dense bf16 store
        return h_new

    h_scratch[...] = lax.fori_loop(0, t_blk, step, h_scratch[...], unroll=True)


def gru_recurrent(gi_tm, whh_t, bhn_row, *, t_blk, b_blk):
    """gi_tm: (Sp, Bp, 3Hp) bf16; whh_t: (Hp, 3Hp) bf16.  Returns (Sp, Bp, Hp) bf16."""
    Sp, Bp, threeHp = gi_tm.shape
    Hp = threeHp // 3
    kernel = functools.partial(_gru_recurrent_kernel, hidden_pad=Hp, t_blk=t_blk)
    return pl.pallas_call(
        kernel,
        out_shape=jax.ShapeDtypeStruct((Sp, Bp, Hp), jnp.bfloat16),
        grid_spec=pltpu.PrefetchScalarGridSpec(
            num_scalar_prefetch=0,
            grid=(Bp // b_blk, Sp // t_blk),
            in_specs=[
                pl.BlockSpec((t_blk, b_blk, 3 * Hp), lambda b, t: (t, b, 0)),
                # recurrent weight / n-gate bias stay resident (constant index_map)
                pl.BlockSpec((Hp, 3 * Hp), lambda b, t: (0, 0)),
                pl.BlockSpec((1, Hp), lambda b, t: (0, 0)),
            ],
            out_specs=pl.BlockSpec((t_blk, b_blk, Hp), lambda b, t: (t, b, 0)),
            scratch_shapes=[pltpu.VMEM((b_blk, Hp), jnp.float32)],
        ),
        compiler_params=pltpu.CompilerParams(
            # batch blocks are independent (megacore on v7x); time carries the state
            dimension_semantics=("parallel", "arbitrary")),
    )(gi_tm, whh_t, bhn_row)


# ----------------------------------------------------------------------------
# Fused MLP head kernel: Linear -> PReLU -> Linear -> PReLU, tiled over rows.
# ----------------------------------------------------------------------------
def _mlp_kernel(x_ref, w1_ref, b1_ref, w2_ref, b2_ref, a_ref, o_ref):
    a = a_ref[0]                                                  # PReLU slope (SMEM)
    h = jnp.dot(x_ref[...], w1_ref[...],
                preferred_element_type=jnp.float32) + b1_ref[...]
    h = jnp.where(h >= 0, h, a * h)
    y = jnp.dot(h.astype(w2_ref.dtype), w2_ref[...],
                preferred_element_type=jnp.float32) + b2_ref[...]
    y = jnp.where(y >= 0, y, a * y)
    o_ref[...] = y.astype(o_ref.dtype)


def mlp_head(x, w1_t, b1, w2_t, b2, prelu_a, *, tm=512):
    """x: (M, Hp) bf16, w1_t: (Hp, 1024), w2_t: (1024, ODp).  Returns (M, ODp) f32."""
    M, Hp = x.shape
    F1 = w1_t.shape[1]
    ODp = w2_t.shape[1]
    tm = min(tm, _round_up(M, SUBLANE))
    Mp = _round_up(M, tm)
    if Mp != M:
        x = jnp.pad(x, ((0, Mp - M), (0, 0)))

    y = pl.pallas_call(
        _mlp_kernel,
        out_shape=jax.ShapeDtypeStruct((Mp, ODp), jnp.float32),
        grid_spec=pltpu.PrefetchScalarGridSpec(
            num_scalar_prefetch=0,
            grid=(Mp // tm,),
            in_specs=[
                pl.BlockSpec((tm, Hp), lambda i: (i, 0)),
                pl.BlockSpec((Hp, F1), lambda i: (0, 0)),
                pl.BlockSpec((1, F1), lambda i: (0, 0)),
                pl.BlockSpec((F1, ODp), lambda i: (0, 0)),
                pl.BlockSpec((1, ODp), lambda i: (0, 0)),
                pl.BlockSpec(memory_space=pltpu.MemorySpace.SMEM),
            ],
            out_specs=pl.BlockSpec((tm, ODp), lambda i: (i, 0)),
        ),
        compiler_params=pltpu.CompilerParams(
            dimension_semantics=("parallel",),
            vmem_limit_bytes=48 * 1024 * 1024),
    )(x, w1_t, b1, w2_t, b2, prelu_a)
    return y[:M] if Mp != M else y


# ----------------------------------------------------------------------------
# One-time parameter preparation: transpose / gate-major pad / fold biases /
# cast weights so the per-call forward does no weight reshuffling.
# ----------------------------------------------------------------------------
def _pad_gate_weight(w, H, Hp, d_in_pad):
    """w: (3H, d_in) PyTorch layout -> (d_in_pad, 3*Hp), each gate a 128-aligned slab."""
    d_in = w.shape[1]
    w3 = w.reshape(3, H, d_in)
    w3 = jnp.pad(w3, ((0, 0), (0, Hp - H), (0, d_in_pad - d_in)))
    return jnp.transpose(w3, (2, 0, 1)).reshape(d_in_pad, 3 * Hp)


def prepare_params(params, input_dim, hidden_dim, output_dim):
    H = hidden_dim
    Hp = _round_up(H, LANE)
    Dp0 = _round_up(input_dim, LANE)            # lane-dense layer-0 input features
    OD = output_dim
    ODp = _round_up(OD, LANE)

    kp = {"gru": []}
    for l, layer in enumerate(params["gru"]):
        d_in_pad = Dp0 if l == 0 else Hp
        b_ih = layer["b_ih"].reshape(3, H)
        b_hh = layer["b_hh"].reshape(3, H)
        # Fold b_hr, b_hz into the input-projection bias; only b_hn must stay inside
        # r * (W_hn h + b_hn) in the kernel.
        b_fold = jnp.stack([b_ih[0] + b_hh[0], b_ih[1] + b_hh[1], b_ih[2]], axis=0)
        kp["gru"].append({
            "wih_t": _pad_gate_weight(layer["w_ih"], H, Hp, d_in_pad).astype(MATMUL_DTYPE),
            "bih": jnp.pad(b_fold, ((0, 0), (0, Hp - H)))
                      .reshape(1, 3 * Hp).astype(jnp.float32),
            "whh_t": _pad_gate_weight(layer["w_hh"], H, Hp, Hp).astype(MATMUL_DTYPE),
            "bhn": jnp.pad(b_hh[2], (0, Hp - H)).reshape(1, Hp).astype(jnp.float32),
        })

    w1_t = jnp.pad(jnp.transpose(params["w1"]), ((0, Hp - H), (0, 0)))       # (Hp, 1024)
    w2_t = jnp.pad(jnp.transpose(params["w2"]), ((0, 0), (0, ODp - OD)))     # (1024, ODp)
    kp["w1_t"] = w1_t.astype(MATMUL_DTYPE)
    kp["b1"] = params["b1"].reshape(1, -1).astype(jnp.float32)
    kp["w2_t"] = w2_t.astype(MATMUL_DTYPE)
    kp["b2"] = jnp.pad(params["b2"], (0, ODp - OD)).reshape(1, ODp).astype(jnp.float32)
    kp["prelu_a"] = params["prelu_a"].reshape(1).astype(jnp.float32)
    return kp


# ----------------------------------------------------------------------------
# Full model forward (Pallas for the hot path, JAX glue for layout changes).
# ----------------------------------------------------------------------------
def gru_model_forward(x, kp, *, output_dim, t_blk=16):
    """x: (batch, seq, input_dim) -> (batch, seq, output_dim)."""
    B, S, D = x.shape
    Hp = kp["gru"][0]["whh_t"].shape[0]
    Dp0 = kp["gru"][0]["wih_t"].shape[0]
    ODp = kp["w2_t"].shape[1]
    Bp = _round_up(B, SUBLANE)            # sublane-aligned batch
    Sp = _round_up(S, t_blk)              # whole time-blocks
    # Split batch across TensorCores (v7x) when there is enough of it.
    b_blk = Bp // 2 if (Bp >= 16 and Bp % 16 == 0) else Bp

    x_tm = jnp.transpose(x, (1, 0, 2))    # time-major (S, B, D)
    x_tm = jnp.pad(x_tm, ((0, Sp - S), (0, Bp - B), (0, Dp0 - D))).astype(MATMUL_DTYPE)

    act = x_tm
    for layer in kp["gru"]:
        d_in = act.shape[-1]
        # (1) hoisted input projection for ALL timesteps: one large pipelined matmul,
        #     output kept bf16 to halve HBM traffic of the largest intermediate.
        gi = linear_tiled(act.reshape(Sp * Bp, d_in),
                          layer["wih_t"], layer["bih"], out_dtype=MATMUL_DTYPE)
        # (2) sequential recurrence, t_blk steps per grid iteration; bf16 output.
        act = gru_recurrent(gi.reshape(Sp, Bp, 3 * Hp),
                            layer["whh_t"], layer["bhn"], t_blk=t_blk, b_blk=b_blk)

    y = mlp_head(act.reshape(Sp * Bp, Hp),
                 kp["w1_t"], kp["b1"], kp["w2_t"], kp["b2"], kp["prelu_a"])
    y = y.reshape(Sp, Bp, ODp)[:S, :B, :output_dim]
    return jnp.transpose(y, (1, 0, 2))


# ----------------------------------------------------------------------------
# Pure-JAX f32 reference (correctness check only).
# ----------------------------------------------------------------------------
def gru_model_reference(x, params):
    B, S, D = x.shape
    out = x
    for layer in params["gru"]:
        w_ih, w_hh = layer["w_ih"], layer["w_hh"]
        b_ih, b_hh = layer["b_ih"], layer["b_hh"]
        H = w_hh.shape[1]

        def step(h, x_t):
            gi = x_t @ w_ih.T + b_ih
            gh = h @ w_hh.T + b_hh
            r = jax.nn.sigmoid(gi[:, 0:H] + gh[:, 0:H])
            z = jax.nn.sigmoid(gi[:, H:2 * H] + gh[:, H:2 * H])
            n = jnp.tanh(gi[:, 2 * H:3 * H] + r * gh[:, 2 * H:3 * H])
            h_new = (1.0 - z) * n + z * h
            return h_new, h_new

        h0 = jnp.zeros((B, H), jnp.float32)
        _, seq_h = lax.scan(step, h0, jnp.transpose(out, (1, 0, 2)))
        out = jnp.transpose(seq_h, (1, 0, 2))

    a = params["prelu_a"][0]
    h = out @ params["w1"].T + params["b1"]
    h = jnp.where(h >= 0, h, a * h)
    y = h @ params["w2"].T + params["b2"]
    y = jnp.where(y >= 0, y, a * y)
    return y


# ----------------------------------------------------------------------------
# Deterministic parameter initialization (matches PyTorch module shapes).
# ----------------------------------------------------------------------------
def init_params(key, input_dim, hidden_dim, layer_dim, output_dim):
    params = {"gru": []}
    k_gru = 1.0 / np.sqrt(hidden_dim)
    for l in range(layer_dim):
        d_in = input_dim if l == 0 else hidden_dim
        key, k1, k2, k3, k4 = jax.random.split(key, 5)
        params["gru"].append({
            "w_ih": jax.random.uniform(k1, (3 * hidden_dim, d_in), jnp.float32, -k_gru, k_gru),
            "w_hh": jax.random.uniform(k2, (3 * hidden_dim, hidden_dim), jnp.float32, -k_gru, k_gru),
            "b_ih": jax.random.uniform(k3, (3 * hidden_dim,), jnp.float32, -k_gru, k_gru),
            "b_hh": jax.random.uniform(k4, (3 * hidden_dim,), jnp.float32, -k_gru, k_gru),
        })
    key, k1, k2, k3, k4 = jax.random.split(key, 5)
    k_l1 = 1.0 / np.sqrt(hidden_dim)
    k_l2 = 1.0 / np.sqrt(1024)
    params["w1"] = jax.random.uniform(k1, (1024, hidden_dim), jnp.float32, -k_l1, k_l1)
    params["b1"] = jax.random.uniform(k2, (1024,), jnp.float32, -k_l1, k_l1)
    params["w2"] = jax.random.uniform(k3, (output_dim, 1024), jnp.float32, -k_l2, k_l2)
    params["b2"] = jax.random.uniform(k4, (output_dim,), jnp.float32, -k_l2, k_l2)
    params["prelu_a"] = jnp.array([0.25], jnp.float32)   # nn.PReLU() default
    return params


if __name__ == "__main__":
    # Small shapes consistent with the module's forward: x is (batch, seq, input_dim).
    batch, seq, input_dim = 2, 8, 16
    hidden_dim, layer_dim, output_dim = 32, 2, 10

    key = jax.random.PRNGKey(0)
    key, kx = jax.random.split(key)
    x = jax.random.normal(kx, (batch, seq, input_dim), jnp.float32)
    params = init_params(key, input_dim, hidden_dim, layer_dim, output_dim)
    kparams = prepare_params(params, input_dim, hidden_dim, output_dim)   # one-time prep

    fwd = jax.jit(functools.partial(gru_model_forward, output_dim=output_dim, t_blk=16))
    out = jax.block_until_ready(fwd(x, kparams))
    assert out.shape == (batch, seq, output_dim)

    # Loose tolerance: large-matmul operands and intermediates are bf16 (f32 accumulation);
    # reference is f32.
    ref = jax.block_until_ready(gru_model_reference(x, params))
    np.testing.assert_allclose(np.asarray(out), np.asarray(ref), rtol=3e-2, atol=3e-2)

    print("KERNEL_OK")
</pallas_src>

<mosaic_0001>
module attributes {stable_mosaic.version = 11 : i64} {
  func.func @_gru_recurrent_kernel(%arg0: i32, %arg1: i32, %arg2: memref<16x8x384xbf16, #tpu.memory_space<vmem>>, %arg3: memref<128x384xbf16, #tpu.memory_space<vmem>>, %arg4: memref<1x128xf32, #tpu.memory_space<vmem>>, %arg5: memref<16x8x128xbf16, #tpu.memory_space<vmem>>, %arg6: memref<8x128xf32, #tpu.memory_space<vmem>>) attributes {dimension_semantics = [#tpu.dimension_semantics<parallel>, #tpu.dimension_semantics<arbitrary>], iteration_bounds = array<i64: 1, 1>, scalar_prefetch = 0 : i64, scratch_operands = 1 : i64, tpu.core_type = #tpu.core_type<tc>, window_params = [{transform_indices = @transform_0, window_bounds = array<i64: 16, 8, 384>}, {pipeline_mode = #tpu.pipeline_mode<synchronous>, transform_indices = @transform_1, window_bounds = array<i64: 128, 384>}, {pipeline_mode = #tpu.pipeline_mode<synchronous>, transform_indices = @transform_2, window_bounds = array<i64: 1, 128>}, {transform_indices = @transform_3, window_bounds = array<i64: 16, 8, 128>}]} {
    %c0_i32 = arith.constant 0 : i32
    %0 = arith.cmpi eq, %arg1, %c0_i32 : i32
    %1 = arith.extui %0 : i1 to i32
    %c0_i32_0 = arith.constant 0 : i32
    %2 = arith.cmpi ne, %1, %c0_i32_0 : i32
    scf.if %2 {
      %cst_166 = arith.constant 0.000000e+00 : f32
      %632 = vector.broadcast %cst_166 : f32 to vector<8x128xf32>
      %c0_167 = arith.constant 0 : index
      %c0_168 = arith.constant 0 : index
      %633 = vector.load %arg6[%c0_167, %c0_168] : memref<8x128xf32, #tpu.memory_space<vmem>>, vector<8x128xf32>
      tpu.vector_store %arg6[%c0_167, %c0_168], %632 {strides = array<i32>} : memref<8x128xf32, #tpu.memory_space<vmem>>, vector<8x128xf32>,
    } else {
    }
    %c0 = arith.constant 0 : index
    %c0_1 = arith.constant 0 : index
    %3 = vector.load %arg4[%c0, %c0_1] : memref<1x128xf32, #tpu.memory_space<vmem>>, vector<1x128xf32>
    %4 = vector.shape_cast %3 : vector<1x128xf32> to vector<1x128xf32>
    %5 = vector.broadcast %4 : vector<1x128xf32> to vector<8x128xf32>
    %c0_2 = arith.constant 0 : index
    %c0_3 = arith.constant 0 : index
    %6 = vector.load %arg6[%c0_2, %c0_3] : memref<8x128xf32, #tpu.memory_space<vmem>>, vector<8x128xf32>
    %c0_i32_4 = arith.constant 0 : i32
    %7 = arith.index_cast %c0_i32_4 : i32 to index
    %c0_5 = arith.constant 0 : index
    %c0_6 = arith.constant 0 : index
    %8 = vector.load %arg2[%7, %c0_5, %c0_6] : memref<16x8x384xbf16, #tpu.memory_space<vmem>>, vector<1x8x384xbf16>
    %9 = vector.shape_cast %8 : vector<1x8x384xbf16> to vector<8x384xbf16>
    %10 = arith.extf %9 : vector<8x384xbf16> to vector<8x384xf32>
    %11 = arith.truncf %6 : vector<8x128xf32> to vector<8x128xbf16>
    %c0_7 = arith.constant 0 : index
    %c0_8 = arith.constant 0 : index
    %12 = vector.load %arg3[%c0_7, %c0_8] : memref<128x384xbf16, #tpu.memory_space<vmem>>, vector<128x384xbf16>
    %cst = arith.constant dense<0.000000e+00> : vector<8x384xf32>
    %13 = tpu.matmul %11, %12, %cst {dimension_numbers = #tpu.dot_dimension_numbers<[1], [0], [0], [1], [0, 0, 1, 1], [], []>} : vector<8x128xbf16>, vector<128x384xbf16>, vector<8x384xf32> -> vector<8x384xf32>
    %14 = vector.extract_strided_slice %10 {offsets = [0, 0], sizes = [8, 128], strides = [1, 1]} : vector<8x384xf32> to vector<8x128xf32>
    %15 = vector.extract_strided_slice %13 {offsets = [0, 0], sizes = [8, 128], strides = [1, 1]} : vector<8x384xf32> to vector<8x128xf32>
    %16 = arith.addf %14, %15 : vector<8x128xf32>
    %17 = arith.negf %16 : vector<8x128xf32>
    %18 = math.exp %17 : vector<8x128xf32>
    %cst_9 = arith.constant 1.000000e+00 : f32
    %19 = vector.broadcast %cst_9 : f32 to vector<8x128xf32>
    %20 = arith.addf %19, %18 : vector<8x128xf32>
    %21 = arith.divf %19, %20 : vector<8x128xf32>
    %22 = vector.extract_strided_slice %10 {offsets = [0, 128], sizes = [8, 128], strides = [1, 1]} : vector<8x384xf32> to vector<8x128xf32>
    %23 = vector.extract_strided_slice %13 {offsets = [0, 128], sizes = [8, 128], strides = [1, 1]} : vector<8x384xf32> to vector<8x128xf32>
    %24 = arith.addf %22, %23 : vector<8x128xf32>
    %25 = arith.negf %24 : vector<8x128xf32>
    %26 = math.exp %25 : vector<8x128xf32>
    %cst_10 = arith.constant 1.000000e+00 : f32
    %27 = vector.broadcast %cst_10 : f32 to vector<8x128xf32>
    %28 = arith.addf %27, %26 : vector<8x128xf32>
    %29 = arith.divf %27, %28 : vector<8x128xf32>
    %30 = vector.extract_strided_slice %10 {offsets = [0, 256], sizes = [8, 128], strides = [1, 1]} : vector<8x384xf32> to vector<8x128xf32>
    %31 = vector.extract_strided_slice %13 {offsets = [0, 256], sizes = [8, 128], strides = [1, 1]} : vector<8x384xf32> to vector<8x128xf32>
    %32 = arith.addf %31, %5 : vector<8x128xf32>
    %33 = arith.mulf %21, %32 : vector<8x128xf32>
    %34 = arith.addf %30, %33 : vector<8x128xf32>
    %35 = math.tanh %34 : vector<8x128xf32>
    %cst_11 = arith.constant 1.000000e+00 : f32
    %36 = vector.broadcast %cst_11 : f32 to vector<8x128xf32>
    %37 = arith.subf %36, %29 : vector<8x128xf32>
    %38 = arith.mulf %37, %35 : vector<8x128xf32>
    %39 = arith.mulf %29, %6 : vector<8x128xf32>
    %40 = arith.addf %38, %39 : vector<8x128xf32>
    %41 = arith.truncf %40 : vector<8x128xf32> to vector<8x128xbf16>
    %42 = arith.index_cast %c0_i32_4 : i32 to index
    %c0_12 = arith.constant 0 : index
    %c0_13 = arith.constant 0 : index
    %43 = vector.load %arg5[%42, %c0_12, %c0_13] : memref<16x8x128xbf16, #tpu.memory_space<vmem>>, vector<1x8x128xbf16>
    %44 = vector.shape_cast %43 : vector<1x8x128xbf16> to vector<8x128xbf16>
    %45 = vector.shape_cast %41 : vector<8x128xbf16> to vector<1x8x128xbf16>
    tpu.vector_store %arg5[%42, %c0_12, %c0_13], %45 {strides = array<i32>} : memref<16x8x128xbf16, #tpu.memory_space<vmem>>, vector<1x8x128xbf16>,
    %c1_i32 = arith.constant 1 : i32
    %46 = arith.index_cast %c1_i32 : i32 to index
    %c0_14 = arith.constant 0 : index
    %c0_15 = arith.constant 0 : index
    %47 = vector.load %arg2[%46, %c0_14, %c0_15] : memref<16x8x384xbf16, #tpu.memory_space<vmem>>, vector<1x8x384xbf16>
    %48 = vector.shape_cast %47 : vector<1x8x384xbf16> to vector<8x384xbf16>
    %49 = arith.extf %48 : vector<8x384xbf16> to vector<8x384xf32>
    %50 = arith.truncf %40 : vector<8x128xf32> to vector<8x128xbf16>
    %c0_16 = arith.constant 0 : index
    %c0_17 = arith.constant 0 : index
    %51 = vector.load %arg3[%c0_16, %c0_17] : memref<128x384xbf16, #tpu.memory_space<vmem>>, vector<128x384xbf16>
    %cst_18 = arith.constant dense<0.000000e+00> : vector<8x384xf32>
    %52 = tpu.matmul %50, %51, %cst_18 {dimension_numbers = #tpu.dot_dimension_numbers<[1], [0], [0], [1], [0, 0, 1, 1], [], []>} : vector<8x128xbf16>, vector<128x384xbf16>, vector<8x384xf32> -> vector<8x384xf32>
    %53 = vector.extract_strided_slice %49 {offsets = [0, 0], sizes = [8, 128], strides = [1, 1]} : vector<8x384xf32> to vector<8x128xf32>
    %54 = vector.extract_strided_slice %52 {offsets = [0, 0], sizes = [8, 128], strides = [1, 1]} : vector<8x384xf32> to vector<8x128xf32>
    %55 = arith.addf %53, %54 : vector<8x128xf32>
    %56 = arith.negf %55 : vector<8x128xf32>
    %57 = math.exp %56 : vector<8x128xf32>
    %cst_19 = arith.constant 1.000000e+00 : f32
    %58 = vector.broadcast %cst_19 : f32 to vector<8x128xf32>
    %59 = arith.addf %58, %57 : vector<8x128xf32>
    %60 = arith.divf %58, %59 : vector<8x128xf32>
    %61 = vector.extract_strided_slice %49 {offsets = [0, 128], sizes = [8, 128], strides = [1, 1]} : vector<8x384xf32> to vector<8x128xf32>
    %62 = vector.extract_strided_slice %52 {offsets = [0, 128], sizes = [8, 128], strides = [1, 1]} : vector<8x384xf32> to vector<8x128xf32>
    %63 = arith.addf %61, %62 : vector<8x128xf32>
    %64 = arith.negf %63 : vector<8x128xf32>
    %65 = math.exp %64 : vector<8x128xf32>
    %cst_20 = arith.constant 1.000000e+00 : f32
    %66 = vector.broadcast %cst_20 : f32 to vector<8x128xf32>
    %67 = arith.addf %66, %65 : vector<8x128xf32>
    %68 = arith.divf %66, %67 : vector<8x128xf32>
    %69 = vector.extract_strided_slice %49 {offsets = [0, 256], sizes = [8, 128], strides = [1, 1]} : vector<8x384xf32> to vector<8x128xf32>
    %70 = vector.extract_strided_slice %52 {offsets = [0, 256], sizes = [8, 128], strides = [1, 1]} : vector<8x384xf32> to vector<8x128xf32>
    %71 = arith.addf %70, %5 : vector<8x128xf32>
    %72 = arith.mulf %60, %71 : vector<8x128xf32>
    %73 = arith.addf %69, %72 : vector<8x128xf32>
    %74 = math.tanh %73 : vector<8x128xf32>
    %cst_21 = arith.constant 1.000000e+00 : f32
    %75 = vector.broadcast %cst_21 : f32 to vector<8x128xf32>
    %76 = arith.subf %75, %68 : vector<8x128xf32>
    %77 = arith.mulf %76, %74 : vector<8x128xf32>
    %78 = arith.mulf %68, %40 : vector<8x128xf32>
    %79 = arith.addf %77, %78 : vector<8x128xf32>
    %80 = arith.truncf %79 : vector<8x128xf32> to vector<8x128xbf16>
    %81 = arith.index_cast %c1_i32 : i32 to index
    %c0_22 = arith.constant 0 : index
    %c0_23 = arith.constant 0 : index
    %82 = vector.load %arg5[%81, %c0_22, %c0_23] : memref<16x8x128xbf16, #tpu.memory_space<vmem>>, vector<1x8x128xbf16>
    %83 = vector.shape_cast %82 : vector<1x8x128xbf16> to vector<8x128xbf16>
    %84 = vector.shape_cast %80 : vector<8x128xbf16> to vector<1x8x128xbf16>
    tpu.vector_store %arg5[%81, %c0_22, %c0_23], %84 {strides = array<i32>} : memref<16x8x128xbf16, #tpu.memory_space<vmem>>, vector<1x8x128xbf16>,
    %c2_i32 = arith.constant 2 : i32
    %85 = arith.index_cast %c2_i32 : i32 to index
    %c0_24 = arith.constant 0 : index
    %c0_25 = arith.constant 0 : index
    %86 = vector.load %arg2[%85, %c0_24, %c0_25] : memref<16x8x384xbf16, #tpu.memory_space<vmem>>, vector<1x8x384xbf16>
    %87 = vector.shape_cast %86 : vector<1x8x384xbf16> to vector<8x384xbf16>
    %88 = arith.extf %87 : vector<8x384xbf16> to vector<8x384xf32>
    %89 = arith.truncf %79 : vector<8x128xf32> to vector<8x128xbf16>
    %c0_26 = arith.constant 0 : index
    %c0_27 = arith.constant 0 : index
    %90 = vector.load %arg3[%c0_26, %c0_27] : memref<128x384xbf16, #tpu.memory_space<vmem>>, vector<128x384xbf16>
    %cst_28 = arith.constant dense<0.000000e+00> : vector<8x384xf32>
    %91 = tpu.matmul %89, %90, %cst_28 {dimension_numbers = #tpu.dot_dimension_numbers<[1], [0], [0], [1], [0, 0, 1, 1], [], []>} : vector<8x128xbf16>, vector<128x384xbf16>, vector<8x384xf32> -> vector<8x384xf32>
    %92 = vector.extract_strided_slice %88 {offsets = [0, 0], sizes = [8, 128], strides = [1, 1]} : vector<8x384xf32> to vector<8x128xf32>
    %93 = vector.extract_strided_slice %91 {offsets = [0, 0], sizes = [8, 128], strides = [1, 1]} : vector<8x384xf32> to vector<8x128xf32>
    %94 = arith.addf %92, %93 : vector<8x128xf32>
    %95 = arith.negf %94 : vector<8x128xf32>
    %96 = math.exp %95 : vector<8x128xf32>
    %cst_29 = arith.constant 1.000000e+00 : f32
    %97 = vector.broadcast %cst_29 : f32 to vector<8x128xf32>
    %98 = arith.addf %97, %96 : vector<8x128xf32>
    %99 = arith.divf %97, %98 : vector<8x128xf32>
    %100 = vector.extract_strided_slice %88 {offsets = [0, 128], sizes = [8, 128], strides = [1, 1]} : vector<8x384xf32> to vector<8x128xf32>
    %101 = vector.extract_strided_slice %91 {offsets = [0, 128], sizes = [8, 128], strides = [1, 1]} : vector<8x384xf32> to vector<8x128xf32>
    %102 = arith.addf %100, %101 : vector<8x128xf32>
    %103 = arith.negf %102 : vector<8x128xf32>
    %104 = math.exp %103 : vector<8x128xf32>
    %cst_30 = arith.constant 1.000000e+00 : f32
    %105 = vector.broadcast %cst_30 : f32 to vector<8x128xf32>
    %106 = arith.addf %105, %104 : vector<8x128xf32>
    %107 = arith.divf %105, %106 : vector<8x128xf32>
    %108 = vector.extract_strided_slice %88 {offsets = [0, 256], sizes = [8, 128], strides = [1, 1]} : vector<8x384xf32> to vector<8x128xf32>
    %109 = vector.extract_strided_slice %91 {offsets = [0, 256], sizes = [8, 128], strides = [1, 1]} : vector<8x384xf32> to vector<8x128xf32>
    %110 = arith.addf %109, %5 : vector<8x128xf32>
    %111 = arith.mulf %99, %110 : vector<8x128xf32>
    %112 = arith.addf %108, %111 : vector<8x128xf32>
    %113 = math.tanh %112 : vector<8x128xf32>
    %cst_31 = arith.constant 1.000000e+00 : f32
    %114 = vector.broadcast %cst_31 : f32 to vector<8x128xf32>
    %115 = arith.subf %114, %107 : vector<8x128xf32>
    %116 = arith.mulf %115, %113 : vector<8x128xf32>
    %117 = arith.mulf %107, %79 : vector<8x128xf32>
    %118 = arith.addf %116, %117 : vector<8x128xf32>
    %119 = arith.truncf %118 : vector<8x128xf32> to vector<8x128xbf16>
    %120 = arith.index_cast %c2_i32 : i32 to index
    %c0_32 = arith.constant 0 : index
    %c0_33 = arith.constant 0 : index
    %121 = vector.load %arg5[%120, %c0_32, %c0_33] : memref<16x8x128xbf16, #tpu.memory_space<vmem>>, vector<1x8x128xbf16>
    %122 = vector.shape_cast %121 : vector<1x8x128xbf16> to vector<8x128xbf16>
    %123 = vector.shape_cast %119 : vector<8x128xbf16> to vector<1x8x128xbf16>
    tpu.vector_store %arg5[%120, %c0_32, %c0_33], %123 {strides = array<i32>} : memref<16x8x128xbf16, #tpu.memory_space<vmem>>, vector<1x8x128xbf16>,
    %c3_i32 = arith.constant 3 : i32
    %124 = arith.index_cast %c3_i32 : i32 to index
    %c0_34 = arith.constant 0 : index
    %c0_35 = arith.constant 0 : index
    %125 = vector.load %arg2[%124, %c0_34, %c0_35] : memref<16x8x384xbf16, #tpu.memory_space<vmem>>, vector<1x8x384xbf16>
    %126 = vector.shape_cast %125 : vector<1x8x384xbf16> to vector<8x384xbf16>
    %127 = arith.extf %126 : vector<8x384xbf16> to vector<8x384xf32>
    %128 = arith.truncf %118 : vector<8x128xf32> to vector<8x128xbf16>
    %c0_36 = arith.constant 0 : index
    %c0_37 = arith.constant 0 : index
    %129 = vector.load %arg3[%c0_36, %c0_37] : memref<128x384xbf16, #tpu.memory_space<vmem>>, vector<128x384xbf16>
    %cst_38 = arith.constant dense<0.000000e+00> : vector<8x384xf32>
    %130 = tpu.matmul %128, %129, %cst_38 {dimension_numbers = #tpu.dot_dimension_numbers<[1], [0], [0], [1], [0, 0, 1, 1], [], []>} : vector<8x128xbf16>, vector<128x384xbf16>, vector<8x384xf32> -> vector<8x384xf32>
    %131 = vector.extract_strided_slice %127 {offsets = [0, 0], sizes = [8, 128], strides = [1, 1]} : vector<8x384xf32> to vector<8x128xf32>
    %132 = vector.extract_strided_slice %130 {offsets = [0, 0], sizes = [8, 128], strides = [1, 1]} : vector<8x384xf32> to vector<8x128xf32>
    %133 = arith.addf %131, %132 : vector<8x128xf32>
    %134 = arith.negf %133 : vector<8x128xf32>
    %135 = math.exp %134 : vector<8x128xf32>
    %cst_39 = arith.constant 1.000000e+00 : f32
    %136 = vector.broadcast %cst_39 : f32 to vector<8x128xf32>
    %137 = arith.addf %136, %135 : vector<8x128xf32>
    %138 = arith.divf %136, %137 : vector<8x128xf32>
    %139 = vector.extract_strided_slice %127 {offsets = [0, 128], sizes = [8, 128], strides = [1, 1]} : vector<8x384xf32> to vector<8x128xf32>
    %140 = vector.extract_strided_slice %130 {offsets = [0, 128], sizes = [8, 128], strides = [1, 1]} : vector<8x384xf32> to vector<8x128xf32>
    %141 = arith.addf %139, %140 : vector<8x128xf32>
    %142 = arith.negf %141 : vector<8x128xf32>
    %143 = math.exp %142 : vector<8x128xf32>
    %cst_40 = arith.constant 1.000000e+00 : f32
    %144 = vector.broadcast %cst_40 : f32 to vector<8x128xf32>
    %145 = arith.addf %144, %143 : vector<8x128xf32>
    %146 = arith.divf %144, %145 : vector<8x128xf32>
    %147 = vector.extract_strided_slice %127 {offsets = [0, 256], sizes = [8, 128], strides = [1, 1]} : vector<8x384xf32> to vector<8x128xf32>
    %148 = vector.extract_strided_slice %130 {offsets = [0, 256], sizes = [8, 128], strides = [1, 1]} : vector<8x384xf32> to vector<8x128xf32>
    %149 = arith.addf %148, %5 : vector<8x128xf32>
    %150 = arith.mulf %138, %149 : vector<8x128xf32>
    %151 = arith.addf %147, %150 : vector<8x128xf32>
    %152 = math.tanh %151 : vector<8x128xf32>
    %cst_41 = arith.constant 1.000000e+00 : f32
    %153 = vector.broadcast %cst_41 : f32 to vector<8x128xf32>
    %154 = arith.subf %153, %146 : vector<8x128xf32>
    %155 = arith.mulf %154, %152 : vector<8x128xf32>
    %156 = arith.mulf %146, %118 : vector<8x128xf32>
    %157 = arith.addf %155, %156 : vector<8x128xf32>
    %158 = arith.truncf %157 : vector<8x128xf32> to vector<8x128xbf16>
    %159 = arith.index_cast %c3_i32 : i32 to index
    %c0_42 = arith.constant 0 : index
    %c0_43 = arith.constant 0 : index
    %160 = vector.load %arg5[%159, %c0_42, %c0_43] : memref<16x8x128xbf16, #tpu.memory_space<vmem>>, vector<1x8x128xbf16>
    %161 = vector.shape_cast %160 : vector<1x8x128xbf16> to vector<8x128xbf16>
    %162 = vector.shape_cast %158 : vector<8x128xbf16> to vector<1x8x128xbf16>
    tpu.vector_store %arg5[%159, %c0_42, %c0_43], %162 {strides = array<i32>} : memref<16x8x128xbf16, #tpu.memory_space<vmem>>, vector<1x8x128xbf16>,
    %c4_i32 = arith.constant 4 : i32
    %163 = arith.index_cast %c4_i32 : i32 to index
    %c0_44 = arith.constant 0 : index
    %c0_45 = arith.constant 0 : index
    %164 = vector.load %arg2[%163, %c0_44, %c0_45] : memref<16x8x384xbf16, #tpu.memory_space<vmem>>, vector<1x8x384xbf16>
    %165 = vector.shape_cast %164 : vector<1x8x384xbf16> to vector<8x384xbf16>
    %166 = arith.extf %165 : vector<8x384xbf16> to vector<8x384xf32>
    %167 = arith.truncf %157 : vector<8x128xf32> to vector<8x128xbf16>
    %c0_46 = arith.constant 0 : index
    %c0_47 = arith.constant 0 : index
    %168 = vector.load %arg3[%c0_46, %c0_47] : memref<128x384xbf16, #tpu.memory_space<vmem>>, vector<128x384xbf16>
    %cst_48 = arith.constant dense<0.000000e+00> : vector<8x384xf32>
    %169 = tpu.matmul %167, %168, %cst_48 {dimension_numbers = #tpu.dot_dimension_numbers<[1], [0], [0], [1], [0, 0, 1, 1], [], []>} : vector<8x128xbf16>, vector<128x384xbf16>, vector<8x384xf32> -> vector<8x384xf32>
    %170 = vector.extract_strided_slice %166 {offsets = [0, 0], sizes = [8, 128], strides = [1, 1]} : vector<8x384xf32> to vector<8x128xf32>
    %171 = vector.extract_strided_slice %169 {offsets = [0, 0], sizes = [8, 128], strides = [1, 1]} : vector<8x384xf32> to vector<8x128xf32>
    %172 = arith.addf %170, %171 : vector<8x128xf32>
    %173 = arith.negf %172 : vector<8x128xf32>
    %174 = math.exp %173 : vector<8x128xf32>
    %cst_49 = arith.constant 1.000000e+00 : f32
    %175 = vector.broadcast %cst_49 : f32 to vector<8x128xf32>
    %176 = arith.addf %175, %174 : vector<8x128xf32>
    %177 = arith.divf %175, %176 : vector<8x128xf32>
    %178 = vector.extract_strided_slice %166 {offsets = [0, 128], sizes = [8, 128], strides = [1, 1]} : vector<8x384xf32> to vector<8x128xf32>
    %179 = vector.extract_strided_slice %169 {offsets = [0, 128], sizes = [8, 128], strides = [1, 1]} : vector<8x384xf32> to vector<8x128xf32>
    %180 = arith.addf %178, %179 : vector<8x128xf32>
    %181 = arith.negf %180 : vector<8x128xf32>
    %182 = math.exp %181 : vector<8x128xf32>
    %cst_50 = arith.constant 1.000000e+00 : f32
    %183 = vector.broadcast %cst_50 : f32 to vector<8x128xf32>
    %184 = arith.addf %183, %182 : vector<8x128xf32>
    %185 = arith.divf %183, %184 : vector<8x128xf32>
    %186 = vector.extract_strided_slice %166 {offsets = [0, 256], sizes = [8, 128], strides = [1, 1]} : vector<8x384xf32> to vector<8x128xf32>
    %187 = vector.extract_strided_slice %169 {offsets = [0, 256], sizes = [8, 128], strides = [1, 1]} : vector<8x384xf32> to vector<8x128xf32>
    %188 = arith.addf %187, %5 : vector<8x128xf32>
    %189 = arith.mulf %177, %188 : vector<8x128xf32>
    %190 = arith.addf %186, %189 : vector<8x128xf32>
    %191 = math.tanh %190 : vector<8x128xf32>
    %cst_51 = arith.constant 1.000000e+00 : f32
    %192 = vector.broadcast %cst_51 : f32 to vector<8x128xf32>
    %193 = arith.subf %192, %185 : vector<8x128xf32>
    %194 = arith.mulf %193, %191 : vector<8x128xf32>
    %195 = arith.mulf %185, %157 : vector<8x128xf32>
    %196 = arith.addf %194, %195 : vector<8x128xf32>
    %197 = arith.truncf %196 : vector<8x128xf32> to vector<8x128xbf16>
    %198 = arith.index_cast %c4_i32 : i32 to index
    %c0_52 = arith.constant 0 : index
    %c0_53 = arith.constant 0 : index
    %199 = vector.load %arg5[%198, %c0_52, %c0_53] : memref<16x8x128xbf16, #tpu.memory_space<vmem>>, vector<1x8x128xbf16>
    %200 = vector.shape_cast %199 : vector<1x8x128xbf16> to vector<8x128xbf16>
    %201 = vector.shape_cast %197 : vector<8x128xbf16> to vector<1x8x128xbf16>
    tpu.vector_store %arg5[%198, %c0_52, %c0_53], %201 {strides = array<i32>} : memref<16x8x128xbf16, #tpu.memory_space<vmem>>, vector<1x8x128xbf16>,
    %c5_i32 = arith.constant 5 : i32
    %202 = arith.index_cast %c5_i32 : i32 to index
    %c0_54 = arith.constant 0 : index
    %c0_55 = arith.constant 0 : index
    %203 = vector.load %arg2[%202, %c0_54, %c0_55] : memref<16x8x384xbf16, #tpu.memory_space<vmem>>, vector<1x8x384xbf16>
    %204 = vector.shape_cast %203 : vector<1x8x384xbf16> to vector<8x384xbf16>
    %205 = arith.extf %204 : vector<8x384xbf16> to vector<8x384xf32>
    %206 = arith.truncf %196 : vector<8x128xf32> to vector<8x128xbf16>
    %c0_56 = arith.constant 0 : index
    %c0_57 = arith.constant 0 : index
    %207 = vector.load %arg3[%c0_56, %c0_57] : memref<128x384xbf16, #tpu.memory_space<vmem>>, vector<128x384xbf16>
    %cst_58 = arith.constant dense<0.000000e+00> : vector<8x384xf32>
    %208 = tpu.matmul %206, %207, %cst_58 {dimension_numbers = #tpu.dot_dimension_numbers<[1], [0], [0], [1], [0, 0, 1, 1], [], []>} : vector<8x128xbf16>, vector<128x384xbf16>, vector<8x384xf32> -> vector<8x384xf32>
    %209 = vector.extract_strided_slice %205 {offsets = [0, 0], sizes = [8, 128], strides = [1, 1]} : vector<8x384xf32> to vector<8x128xf32>
    %210 = vector.extract_strided_slice %208 {offsets = [0, 0], sizes = [8, 128], strides = [1, 1]} : vector<8x384xf32> to vector<8x128xf32>
    %211 = arith.addf %209, %210 : vector<8x128xf32>
    %212 = arith.negf %211 : vector<8x128xf32>
    %213 = math.exp %212 : vector<8x128xf32>
    %cst_59 = arith.constant 1.000000e+00 : f32
    %214 = vector.broadcast %cst_59 : f32 to vector<8x128xf32>
    %215 = arith.addf %214, %213 : vector<8x128xf32>
    %216 = arith.divf %214, %215 : vector<8x128xf32>
    %217 = vector.extract_strided_slice %205 {offsets = [0, 128], sizes = [8, 128], strides = [1, 1]} : vector<8x384xf32> to vector<8x128xf32>
    %218 = vector.extract_strided_slice %208 {offsets = [0, 128], sizes = [8, 128], strides = [1, 1]} : vector<8x384xf32> to vector<8x128xf32>
    %219 = arith.addf %217, %218 : vector<8x128xf32>
    %220 = arith.negf %219 : vector<8x128xf32>
    %221 = math.exp %220 : vector<8x128xf32>
    %cst_60 = arith.constant 1.000000e+00 : f32
    %222 = vector.broadcast %cst_60 : f32 to vector<8x128xf32>
    %223 = arith.addf %222, %221 : vector<8x128xf32>
    %224 = arith.divf %222, %223 : vector<8x128xf32>
    %225 = vector.extract_strided_slice %205 {offsets = [0, 256], sizes = [8, 128], strides = [1, 1]} : vector<8x384xf32> to vector<8x128xf32>
    %226 = vector.extract_strided_slice %208 {offsets = [0, 256], sizes = [8, 128], strides = [1, 1]} : vector<8x384xf32> to vector<8x128xf32>
    %227 = arith.addf %226, %5 : vector<8x128xf32>
    %228 = arith.mulf %216, %227 : vector<8x128xf32>
    %229 = arith.addf %225, %228 : vector<8x128xf32>
    %230 = math.tanh %229 : vector<8x128xf32>
    %cst_61 = arith.constant 1.000000e+00 : f32
    %231 = vector.broadcast %cst_61 : f32 to vector<8x128xf32>
    %232 = arith.subf %231, %224 : vector<8x128xf32>
    %233 = arith.mulf %232, %230 : vector<8x128xf32>
    %234 = arith.mulf %224, %196 : vector<8x128xf32>
    %235 = arith.addf %233, %234 : vector<8x128xf32>
    %236 = arith.truncf %235 : vector<8x128xf32> to vector<8x128xbf16>
    %237 = arith.index_cast %c5_i32 : i32 to index
    %c0_62 = arith.constant 0 : index
    %c0_63 = arith.constant 0 : index
    %238 = vector.load %arg5[%237, %c0_62, %c0_63] : memref<16x8x128xbf16, #tpu.memory_space<vmem>>, vector<1x8x128xbf16>
    %239 = vector.shape_cast %238 : vector<1x8x128xbf16> to vector<8x128xbf16>
    %240 = vector.shape_cast %236 : vector<8x128xbf16> to vector<1x8x128xbf16>
    tpu.vector_store %arg5[%237, %c0_62, %c0_63], %240 {strides = array<i32>} : memref<16x8x128xbf16, #tpu.memory_space<vmem>>, vector<1x8x128xbf16>,
    %c6_i32 = arith.constant 6 : i32
    %241 = arith.index_cast %c6_i32 : i32 to index
    %c0_64 = arith.constant 0 : index
    %c0_65 = arith.constant 0 : index
    %242 = vector.load %arg2[%241, %c0_64, %c0_65] : memref<16x8x384xbf16, #tpu.memory_space<vmem>>, vector<1x8x384xbf16>
    %243 = vector.shape_cast %242 : vector<1x8x384xbf16> to vector<8x384xbf16>
    %244 = arith.extf %243 : vector<8x384xbf16> to vector<8x384xf32>
    %245 = arith.truncf %235 : vector<8x128xf32> to vector<8x128xbf16>
    %c0_66 = arith.constant 0 : index
    %c0_67 = arith.constant 0 : index
    %246 = vector.load %arg3[%c0_66, %c0_67] : memref<128x384xbf16, #tpu.memory_space<vmem>>, vector<128x384xbf16>
    %cst_68 = arith.constant dense<0.000000e+00> : vector<8x384xf32>
    %247 = tpu.matmul %245, %246, %cst_68 {dimension_numbers = #tpu.dot_dimension_numbers<[1], [0], [0], [1], [0, 0, 1, 1], [], []>} : vector<8x128xbf16>, vector<128x384xbf16>, vector<8x384xf32> -> vector<8x384xf32>
    %248 = vector.extract_strided_slice %244 {offsets = [0, 0], sizes = [8, 128], strides = [1, 1]} : vector<8x384xf32> to vector<8x128xf32>
    %249 = vector.extract_strided_slice %247 {offsets = [0, 0], sizes = [8, 128], strides = [1, 1]} : vector<8x384xf32> to vector<8x128xf32>
    %250 = arith.addf %248, %249 : vector<8x128xf32>
    %251 = arith.negf %250 : vector<8x128xf32>
    %252 = math.exp %251 : vector<8x128xf32>
    %cst_69 = arith.constant 1.000000e+00 : f32
    %253 = vector.broadcast %cst_69 : f32 to vector<8x128xf32>
    %254 = arith.addf %253, %252 : vector<8x128xf32>
    %255 = arith.divf %253, %254 : vector<8x128xf32>
    %256 = vector.extract_strided_slice %244 {offsets = [0, 128], sizes = [8, 128], strides = [1, 1]} : vector<8x384xf32> to vector<8x128xf32>
    %257 = vector.extract_strided_slice %247 {offsets = [0, 128], sizes = [8, 128], strides = [1, 1]} : vector<8x384xf32> to vector<8x128xf32>
    %258 = arith.addf %256, %257 : vector<8x128xf32>
    %259 = arith.negf %258 : vector<8x128xf32>
    %260 = math.exp %259 : vector<8x128xf32>
    %cst_70 = arith.constant 1.000000e+00 : f32
    %261 = vector.broadcast %cst_70 : f32 to vector<8x128xf32>
    %262 = arith.addf %261, %260 : vector<8x128xf32>
    %263 = arith.divf %261, %262 : vector<8x128xf32>
    %264 = vector.extract_strided_slice %244 {offsets = [0, 256], sizes = [8, 128], strides = [1, 1]} : vector<8x384xf32> to vector<8x128xf32>
    %265 = vector.extract_strided_slice %247 {offsets = [0, 256], sizes = [8, 128], strides = [1, 1]} : vector<8x384xf32> to vector<8x128xf32>
    %266 = arith.addf %265, %5 : vector<8x128xf32>
    %267 = arith.mulf %255, %266 : vector<8x128xf32>
    %268 = arith.addf %264, %267 : vector<8x128xf32>
    %269 = math.tanh %268 : vector<8x128xf32>
    %cst_71 = arith.constant 1.000000e+00 : f32
    %270 = vector.broadcast %cst_71 : f32 to vector<8x128xf32>
    %271 = arith.subf %270, %263 : vector<8x128xf32>
    %272 = arith.mulf %271, %269 : vector<8x128xf32>
    %273 = arith.mulf %263, %235 : vector<8x128xf32>
    %274 = arith.addf %272, %273 : vector<8x128xf32>
    %275 = arith.truncf %274 : vector<8x128xf32> to vector<8x128xbf16>
    %276 = arith.index_cast %c6_i32 : i32 to index
    %c0_72 = arith.constant 0 : index
    %c0_73 = arith.constant 0 : index
    %277 = vector.load %arg5[%276, %c0_72, %c0_73] : memref<16x8x128xbf16, #tpu.memory_space<vmem>>, vector<1x8x128xbf16>
    %278 = vector.shape_cast %277 : vector<1x8x128xbf16> to vector<8x128xbf16>
    %279 = vector.shape_cast %275 : vector<8x128xbf16> to vector<1x8x128xbf16>
    tpu.vector_store %arg5[%276, %c0_72, %c0_73], %279 {strides = array<i32>} : memref<16x8x128xbf16, #tpu.memory_space<vmem>>, vector<1x8x128xbf16>,
    %c7_i32 = arith.constant 7 : i32
    %280 = arith.index_cast %c7_i32 : i32 to index
    %c0_74 = arith.constant 0 : index
    %c0_75 = arith.constant 0 : index
    %281 = vector.load %arg2[%280, %c0_74, %c0_75] : memref<16x8x384xbf16, #tpu.memory_space<vmem>>, vector<1x8x384xbf16>
    %282 = vector.shape_cast %281 : vector<1x8x384xbf16> to vector<8x384xbf16>
    %283 = arith.extf %282 : vector<8x384xbf16> to vector<8x384xf32>
    %284 = arith.truncf %274 : vector<8x128xf32> to vector<8x128xbf16>
    %c0_76 = arith.constant 0 : index
    %c0_77 = arith.constant 0 : index
    %285 = vector.load %arg3[%c0_76, %c0_77] : memref<128x384xbf16, #tpu.memory_space<vmem>>, vector<128x384xbf16>
    %cst_78 = arith.constant dense<0.000000e+00> : vector<8x384xf32>
    %286 = tpu.matmul %284, %285, %cst_78 {dimension_numbers = #tpu.dot_dimension_numbers<[1], [0], [0], [1], [0, 0, 1, 1], [], []>} : vector<8x128xbf16>, vector<128x384xbf16>, vector<8x384xf32> -> vector<8x384xf32>
    %287 = vector.extract_strided_slice %283 {offsets = [0, 0], sizes = [8, 128], strides = [1, 1]} : vector<8x384xf32> to vector<8x128xf32>
    %288 = vector.extract_strided_slice %286 {offsets = [0, 0], sizes = [8, 128], strides = [1, 1]} : vector<8x384xf32> to vector<8x128xf32>
    %289 = arith.addf %287, %288 : vector<8x128xf32>
    %290 = arith.negf %289 : vector<8x128xf32>
    %291 = math.exp %290 : vector<8x128xf32>
    %cst_79 = arith.constant 1.000000e+00 : f32
    %292 = vector.broadcast %cst_79 : f32 to vector<8x128xf32>
    %293 = arith.addf %292, %291 : vector<8x128xf32>
    %294 = arith.divf %292, %293 : vector<8x128xf32>
    %295 = vector.extract_strided_slice %283 {offsets = [0, 128], sizes = [8, 128], strides = [1, 1]} : vector<8x384xf32> to vector<8x128xf32>
    %296 = vector.extract_strided_slice %286 {offsets = [0, 128], sizes = [8, 128], strides = [1, 1]} : vector<8x384xf32> to vector<8x128xf32>
    %297 = arith.addf %295, %296 : vector<8x128xf32>
    %298 = arith.negf %297 : vector<8x128xf32>
    %299 = math.exp %298 : vector<8x128xf32>
    %cst_80 = arith.constant 1.000000e+00 : f32
    %300 = vector.broadcast %cst_80 : f32 to vector<8x128xf32>
    %301 = arith.addf %300, %299 : vector<8x128xf32>
    %302 = arith.divf %300, %301 : vector<8x128xf32>
    %303 = vector.extract_strided_slice %283 {offsets = [0, 256], sizes = [8, 128], strides = [1, 1]} : vector<8x384xf32> to vector<8x128xf32>
    %304 = vector.extract_strided_slice %286 {offsets = [0, 256], sizes = [8, 128], strides = [1, 1]} : vector<8x384xf32> to vector<8x128xf32>
    %305 = arith.addf %304, %5 : vector<8x128xf32>
    %306 = arith.mulf %294, %305 : vector<8x128xf32>
    %307 = arith.addf %303, %306 : vector<8x128xf32>
    %308 = math.tanh %307 : vector<8x128xf32>
    %cst_81 = arith.constant 1.000000e+00 : f32
    %309 = vector.broadcast %cst_81 : f32 to vector<8x128xf32>
    %310 = arith.subf %309, %302 : vector<8x128xf32>
    %311 = arith.mulf %310, %308 : vector<8x128xf32>
    %312 = arith.mulf %302, %274 : vector<8x128xf32>
    %313 = arith.addf %311, %312 : vector<8x128xf32>
    %314 = arith.truncf %313 : vector<8x128xf32> to vector<8x128xbf16>
    %315 = arith.index_cast %c7_i32 : i32 to index
    %c0_82 = arith.constant 0 : index
    %c0_83 = arith.constant 0 : index
    %316 = vector.load %arg5[%315, %c0_82, %c0_83] : memref<16x8x128xbf16, #tpu.memory_space<vmem>>, vector<1x8x128xbf16>
    %317 = vector.shape_cast %316 : vector<1x8x128xbf16> to vector<8x128xbf16>
    %318 = vector.shape_cast %314 : vector<8x128xbf16> to vector<1x8x128xbf16>
    tpu.vector_store %arg5[%315, %c0_82, %c0_83], %318 {strides = array<i32>} : memref<16x8x128xbf16, #tpu.memory_space<vmem>>, vector<1x8x128xbf16>,
    %c8_i32 = arith.constant 8 : i32
    %319 = arith.index_cast %c8_i32 : i32 to index
    %c0_84 = arith.constant 0 : index
    %c0_85 = arith.constant 0 : index
    %320 = vector.load %arg2[%319, %c0_84, %c0_85] : memref<16x8x384xbf16, #tpu.memory_space<vmem>>, vector<1x8x384xbf16>
    %321 = vector.shape_cast %320 : vector<1x8x384xbf16> to vector<8x384xbf16>
    %322 = arith.extf %321 : vector<8x384xbf16> to vector<8x384xf32>
    %323 = arith.truncf %313 : vector<8x128xf32> to vector<8x128xbf16>
    %c0_86 = arith.constant 0 : index
    %c0_87 = arith.constant 0 : index
    %324 = vector.load %arg3[%c0_86, %c0_87] : memref<128x384xbf16, #tpu.memory_space<vmem>>, vector<128x384xbf16>
    %cst_88 = arith.constant dense<0.000000e+00> : vector<8x384xf32>
    %325 = tpu.matmul %323, %324, %cst_88 {dimension_numbers = #tpu.dot_dimension_numbers<[1], [0], [0], [1], [0, 0, 1, 1], [], []>} : vector<8x128xbf16>, vector<128x384xbf16>, vector<8x384xf32> -> vector<8x384xf32>
    %326 = vector.extract_strided_slice %322 {offsets = [0, 0], sizes = [8, 128], strides = [1, 1]} : vector<8x384xf32> to vector<8x128xf32>
    %327 = vector.extract_strided_slice %325 {offsets = [0, 0], sizes = [8, 128], strides = [1, 1]} : vector<8x384xf32> to vector<8x128xf32>
    %328 = arith.addf %326, %327 : vector<8x128xf32>
    %329 = arith.negf %328 : vector<8x128xf32>
    %330 = math.exp %329 : vector<8x128xf32>
    %cst_89 = arith.constant 1.000000e+00 : f32
    %331 = vector.broadcast %cst_89 : f32 to vector<8x128xf32>
    %332 = arith.addf %331, %330 : vector<8x128xf32>
    %333 = arith.divf %331, %332 : vector<8x128xf32>
    %334 = vector.extract_strided_slice %322 {offsets = [0, 128], sizes = [8, 128], strides = [1, 1]} : vector<8x384xf32> to vector<8x128xf32>
    %335 = vector.extract_strided_slice %325 {offsets = [0, 128], sizes = [8, 128], strides = [1, 1]} : vector<8x384xf32> to vector<8x128xf32>
    %336 = arith.addf %334, %335 : vector<8x128xf32>
    %337 = arith.negf %336 : vector<8x128xf32>
    %338 = math.exp %337 : vector<8x128xf32>
    %cst_90 = arith.constant 1.000000e+00 : f32
    %339 = vector.broadcast %cst_90 : f32 to vector<8x128xf32>
    %340 = arith.addf %339, %338 : vector<8x128xf32>
    %341 = arith.divf %339, %340 : vector<8x128xf32>
    %342 = vector.extract_strided_slice %322 {offsets = [0, 256], sizes = [8, 128], strides = [1, 1]} : vector<8x384xf32> to vector<8x128xf32>
    %343 = vector.extract_strided_slice %325 {offsets = [0, 256], sizes = [8, 128], strides = [1, 1]} : vector<8x384xf32> to vector<8x128xf32>
    %344 = arith.addf %343, %5 : vector<8x128xf32>
    %345 = arith.mulf %333, %344 : vector<8x128xf32>
    %346 = arith.addf %342, %345 : vector<8x128xf32>
    %347 = math.tanh %346 : vector<8x128xf32>
    %cst_91 = arith.constant 1.000000e+00 : f32
    %348 = vector.broadcast %cst_91 : f32 to vector<8x128xf32>
    %349 = arith.subf %348, %341 : vector<8x128xf32>
    %350 = arith.mulf %349, %347 : vector<8x128xf32>
    %351 = arith.mulf %341, %313 : vector<8x128xf32>
    %352 = arith.addf %350, %351 : vector<8x128xf32>
    %353 = arith.truncf %352 : vector<8x128xf32> to vector<8x128xbf16>
    %354 = arith.index_cast %c8_i32 : i32 to index
    %c0_92 = arith.constant 0 : index
    %c0_93 = arith.constant 0 : index
    %355 = vector.load %arg5[%354, %c0_92, %c0_93] : memref<16x8x128xbf16, #tpu.memory_space<vmem>>, vector<1x8x128xbf16>
    %356 = vector.shape_cast %355 : vector<1x8x128xbf16> to vector<8x128xbf16>
    %357 = vector.shape_cast %353 : vector<8x128xbf16> to vector<1x8x128xbf16>
    tpu.vector_store %arg5[%354, %c0_92, %c0_93], %357 {strides = array<i32>} : memref<16x8x128xbf16, #tpu.memory_space<vmem>>, vector<1x8x128xbf16>,
    %c9_i32 = arith.constant 9 : i32
    %358 = arith.index_cast %c9_i32 : i32 to index
    %c0_94 = arith.constant 0 : index
    %c0_95 = arith.constant 0 : index
    %359 = vector.load %arg2[%358, %c0_94, %c0_95] : memref<16x8x384xbf16, #tpu.memory_space<vmem>>, vector<1x8x384xbf16>
    %360 = vector.shape_cast %359 : vector<1x8x384xbf16> to vector<8x384xbf16>
    %361 = arith.extf %360 : vector<8x384xbf16> to vector<8x384xf32>
    %362 = arith.truncf %352 : vector<8x128xf32> to vector<8x128xbf16>
    %c0_96 = arith.constant 0 : index
    %c0_97 = arith.constant 0 : index
    %363 = vector.load %arg3[%c0_96, %c0_97] : memref<128x384xbf16, #tpu.memory_space<vmem>>, vector<128x384xbf16>
    %cst_98 = arith.constant dense<0.000000e+00> : vector<8x384xf32>
    %364 = tpu.matmul %362, %363, %cst_98 {dimension_numbers = #tpu.dot_dimension_numbers<[1], [0], [0], [1], [0, 0, 1, 1], [], []>} : vector<8x128xbf16>, vector<128x384xbf16>, vector<8x384xf32> -> vector<8x384xf32>
    %365 = vector.extract_strided_slice %361 {offsets = [0, 0], sizes = [8, 128], strides = [1, 1]} : vector<8x384xf32> to vector<8x128xf32>
    %366 = vector.extract_strided_slice %364 {offsets = [0, 0], sizes = [8, 128], strides = [1, 1]} : vector<8x384xf32> to vector<8x128xf32>
    %367 = arith.addf %365, %366 : vector<8x128xf32>
    %368 = arith.negf %367 : vector<8x128xf32>
    %369 = math.exp %368 : vector<8x128xf32>
    %cst_99 = arith.constant 1.000000e+00 : f32
    %370 = vector.broadcast %cst_99 : f32 to vector<8x128xf32>
    %371 = arith.addf %370, %369 : vector<8x128xf32>
    %372 = arith.divf %370, %371 : vector<8x128xf32>
    %373 = vector.extract_strided_slice %361 {offsets = [0, 128], sizes = [8, 128], strides = [1, 1]} : vector<8x384xf32> to vector<8x128xf32>
    %374 = vector.extract_strided_slice %364 {offsets = [0, 128], sizes = [8, 128], strides = [1, 1]} : vector<8x384xf32> to vector<8x128xf32>
    %375 = arith.addf %373, %374 : vector<8x128xf32>
    %376 = arith.negf %375 : vector<8x128xf32>
    %377 = math.exp %376 : vector<8x128xf32>
    %cst_100 = arith.constant 1.000000e+00 : f32
    %378 = vector.broadcast %cst_100 : f32 to vector<8x128xf32>
    %379 = arith.addf %378, %377 : vector<8x128xf32>
    %380 = arith.divf %378, %379 : vector<8x128xf32>
    %381 = vector.extract_strided_slice %361 {offsets = [0, 256], sizes = [8, 128], strides = [1, 1]} : vector<8x384xf32> to vector<8x128xf32>
    %382 = vector.extract_strided_slice %364 {offsets = [0, 256], sizes = [8, 128], strides = [1, 1]} : vector<8x384xf32> to vector<8x128xf32>
    %383 = arith.addf %382, %5 : vector<8x128xf32>
    %384 = arith.mulf %372, %383 : vector<8x128xf32>
    %385 = arith.addf %381, %384 : vector<8x128xf32>
    %386 = math.tanh %385 : vector<8x128xf32>
    %cst_101 = arith.constant 1.000000e+00 : f32
    %387 = vector.broadcast %cst_101 : f32 to vector<8x128xf32>
    %388 = arith.subf %387, %380 : vector<8x128xf32>
    %389 = arith.mulf %388, %386 : vector<8x128xf32>
    %390 = arith.mulf %380, %352 : vector<8x128xf32>
    %391 = arith.addf %389, %390 : vector<8x128xf32>
    %392 = arith.truncf %391 : vector<8x128xf32> to vector<8x128xbf16>
    %393 = arith.index_cast %c9_i32 : i32 to index
    %c0_102 = arith.constant 0 : index
    %c0_103 = arith.constant 0 : index
    %394 = vector.load %arg5[%393, %c0_102, %c0_103] : memref<16x8x128xbf16, #tpu.memory_space<vmem>>, vector<1x8x128xbf16>
    %395 = vector.shape_cast %394 : vector<1x8x128xbf16> to vector<8x128xbf16>
    %396 = vector.shape_cast %392 : vector<8x128xbf16> to vector<1x8x128xbf16>
    tpu.vector_store %arg5[%393, %c0_102, %c0_103], %396 {strides = array<i32>} : memref<16x8x128xbf16, #tpu.memory_space<vmem>>, vector<1x8x128xbf16>,
    %c10_i32 = arith.constant 10 : i32
    %397 = arith.index_cast %c10_i32 : i32 to index
    %c0_104 = arith.constant 0 : index
    %c0_105 = arith.constant 0 : index
    %398 = vector.load %arg2[%397, %c0_104, %c0_105] : memref<16x8x384xbf16, #tpu.memory_space<vmem>>, vector<1x8x384xbf16>
    %399 = vector.shape_cast %398 : vector<1x8x384xbf16> to vector<8x384xbf16>
    %400 = arith.extf %399 : vector<8x384xbf16> to vector<8x384xf32>
    %401 = arith.truncf %391 : vector<8x128xf32> to vector<8x128xbf16>
    %c0_106 = arith.constant 0 : index
    %c0_107 = arith.constant 0 : index
    %402 = vector.load %arg3[%c0_106, %c0_107] : memref<128x384xbf16, #tpu.memory_space<vmem>>, vector<128x384xbf16>
    %cst_108 = arith.constant dense<0.000000e+00> : vector<8x384xf32>
    %403 = tpu.matmul %401, %402, %cst_108 {dimension_numbers = #tpu.dot_dimension_numbers<[1], [0], [0], [1], [0, 0, 1, 1], [], []>} : vector<8x128xbf16>, vector<128x384xbf16>, vector<8x384xf32> -> vector<8x384xf32>
    %404 = vector.extract_strided_slice %400 {offsets = [0, 0], sizes = [8, 128], strides = [1, 1]} : vector<8x384xf32> to vector<8x128xf32>
    %405 = vector.extract_strided_slice %403 {offsets = [0, 0], sizes = [8, 128], strides = [1, 1]} : vector<8x384xf32> to vector<8x128xf32>
    %406 = arith.addf %404, %405 : vector<8x128xf32>
    %407 = arith.negf %406 : vector<8x128xf32>
    %408 = math.exp %407 : vector<8x128xf32>
    %cst_109 = arith.constant 1.000000e+00 : f32
    %409 = vector.broadcast %cst_109 : f32 to vector<8x128xf32>
    %410 = arith.addf %409, %408 : vector<8x128xf32>
    %411 = arith.divf %409, %410 : vector<8x128xf32>
    %412 = vector.extract_strided_slice %400 {offsets = [0, 128], sizes = [8, 128], strides = [1, 1]} : vector<8x384xf32> to vector<8x128xf32>
    %413 = vector.extract_strided_slice %403 {offsets = [0, 128], sizes = [8, 128], strides = [1, 1]} : vector<8x384xf32> to vector<8x128xf32>
    %414 = arith.addf %412, %413 : vector<8x128xf32>
    %415 = arith.negf %414 : vector<8x128xf32>
    %416 = math.exp %415 : vector<8x128xf32>
    %cst_110 = arith.constant 1.000000e+00 : f32
    %417 = vector.broadcast %cst_110 : f32 to vector<8x128xf32>
    %418 = arith.addf %417, %416 : vector<8x128xf32>
    %419 = arith.divf %417, %418 : vector<8x128xf32>
    %420 = vector.extract_strided_slice %400 {offsets = [0, 256], sizes = [8, 128], strides = [1, 1]} : vector<8x384xf32> to vector<8x128xf32>
    %421 = vector.extract_strided_slice %403 {offsets = [0, 256], sizes = [8, 128], strides = [1, 1]} : vector<8x384xf32> to vector<8x128xf32>
    %422 = arith.addf %421, %5 : vector<8x128xf32>
    %423 = arith.mulf %411, %422 : vector<8x128xf32>
    %424 = arith.addf %420, %423 : vector<8x128xf32>
    %425 = math.tanh %424 : vector<8x128xf32>
    %cst_111 = arith.constant 1.000000e+00 : f32
    %426 = vector.broadcast %cst_111 : f32 to vector<8x128xf32>
    %427 = arith.subf %426, %419 : vector<8x128xf32>
    %428 = arith.mulf %427, %425 : vector<8x128xf32>
    %429 = arith.mulf %419, %391 : vector<8x128xf32>
    %430 = arith.addf %428, %429 : vector<8x128xf32>
    %431 = arith.truncf %430 : vector<8x128xf32> to vector<8x128xbf16>
    %432 = arith.index_cast %c10_i32 : i32 to index
    %c0_112 = arith.constant 0 : index
    %c0_113 = arith.constant 0 : index
    %433 = vector.load %arg5[%432, %c0_112, %c0_113] : memref<16x8x128xbf16, #tpu.memory_space<vmem>>, vector<1x8x128xbf16>
    %434 = vector.shape_cast %433 : vector<1x8x128xbf16> to vector<8x128xbf16>
    %435 = vector.shape_cast %431 : vector<8x128xbf16> to vector<1x8x128xbf16>
    tpu.vector_store %arg5[%432, %c0_112, %c0_113], %435 {strides = array<i32>} : memref<16x8x128xbf16, #tpu.memory_space<vmem>>, vector<1x8x128xbf16>,
    %c11_i32 = arith.constant 11 : i32
    %436 = arith.index_cast %c11_i32 : i32 to index
    %c0_114 = arith.constant 0 : index
    %c0_115 = arith.constant 0 : index
    %437 = vector.load %arg2[%436, %c0_114, %c0_115] : memref<16x8x384xbf16, #tpu.memory_space<vmem>>, vector<1x8x384xbf16>
    %438 = vector.shape_cast %437 : vector<1x8x384xbf16> to vector<8x384xbf16>
    %439 = arith.extf %438 : vector<8x384xbf16> to vector<8x384xf32>
    %440 = arith.truncf %430 : vector<8x128xf32> to vector<8x128xbf16>
    %c0_116 = arith.constant 0 : index
    %c0_117 = arith.constant 0 : index
    %441 = vector.load %arg3[%c0_116, %c0_117] : memref<128x384xbf16, #tpu.memory_space<vmem>>, vector<128x384xbf16>
    %cst_118 = arith.constant dense<0.000000e+00> : vector<8x384xf32>
    %442 = tpu.matmul %440, %441, %cst_118 {dimension_numbers = #tpu.dot_dimension_numbers<[1], [0], [0], [1], [0, 0, 1, 1], [], []>} : vector<8x128xbf16>, vector<128x384xbf16>, vector<8x384xf32> -> vector<8x384xf32>
    %443 = vector.extract_strided_slice %439 {offsets = [0, 0], sizes = [8, 128], strides = [1, 1]} : vector<8x384xf32> to vector<8x128xf32>
    %444 = vector.extract_strided_slice %442 {offsets = [0, 0], sizes = [8, 128], strides = [1, 1]} : vector<8x384xf32> to vector<8x128xf32>
    %445 = arith.addf %443, %444 : vector<8x128xf32>
    %446 = arith.negf %445 : vector<8x128xf32>
    %447 = math.exp %446 : vector<8x128xf32>
    %cst_119 = arith.constant 1.000000e+00 : f32
    %448 = vector.broadcast %cst_119 : f32 to vector<8x128xf32>
    %449 = arith.addf %448, %447 : vector<8x128xf32>
    %450 = arith.divf %448, %449 : vector<8x128xf32>
    %451 = vector.extract_strided_slice %439 {offsets = [0, 128], sizes = [8, 128], strides = [1, 1]} : vector<8x384xf32> to vector<8x128xf32>
    %452 = vector.extract_strided_slice %442 {offsets = [0, 128], sizes = [8, 128], strides = [1, 1]} : vector<8x384xf32> to vector<8x128xf32>
    %453 = arith.addf %451, %452 : vector<8x128xf32>
    %454 = arith.negf %453 : vector<8x128xf32>
    %455 = math.exp %454 : vector<8x128xf32>
    %cst_120 = arith.constant 1.000000e+00 : f32
    %456 = vector.broadcast %cst_120 : f32 to vector<8x128xf32>
    %457 = arith.addf %456, %455 : vector<8x128xf32>
    %458 = arith.divf %456, %457 : vector<8x128xf32>
    %459 = vector.extract_strided_slice %439 {offsets = [0, 256], sizes = [8, 128], strides = [1, 1]} : vector<8x384xf32> to vector<8x128xf32>
    %460 = vector.extract_strided_slice %442 {offsets = [0, 256], sizes = [8, 128], strides = [1, 1]} : vector<8x384xf32> to vector<8x128xf32>
    %461 = arith.addf %460, %5 : vector<8x128xf32>
    %462 = arith.mulf %450, %461 : vector<8x128xf32>
    %463 = arith.addf %459, %462 : vector<8x128xf32>
    %464 = math.tanh %463 : vector<8x128xf32>
    %cst_121 = arith.constant 1.000000e+00 : f32
    %465 = vector.broadcast %cst_121 : f32 to vector<8x128xf32>
    %466 = arith.subf %465, %458 : vector<8x128xf32>
    %467 = arith.mulf %466, %464 : vector<8x128xf32>
    %468 = arith.mulf %458, %430 : vector<8x128xf32>
    %469 = arith.addf %467, %468 : vector<8x128xf32>
    %470 = arith.truncf %469 : vector<8x128xf32> to vector<8x128xbf16>
    %471 = arith.index_cast %c11_i32 : i32 to index
    %c0_122 = arith.constant 0 : index
    %c0_123 = arith.constant 0 : index
    %472 = vector.load %arg5[%471, %c0_122, %c0_123] : memref<16x8x128xbf16, #tpu.memory_space<vmem>>, vector<1x8x128xbf16>
    %473 = vector.shape_cast %472 : vector<1x8x128xbf16> to vector<8x128xbf16>
    %474 = vector.shape_cast %470 : vector<8x128xbf16> to vector<1x8x128xbf16>
    tpu.vector_store %arg5[%471, %c0_122, %c0_123], %474 {strides = array<i32>} : memref<16x8x128xbf16, #tpu.memory_space<vmem>>, vector<1x8x128xbf16>,
    %c12_i32 = arith.constant 12 : i32
    %475 = arith.index_cast %c12_i32 : i32 to index
    %c0_124 = arith.constant 0 : index
    %c0_125 = arith.constant 0 : index
    %476 = vector.load %arg2[%475, %c0_124, %c0_125] : memref<16x8x384xbf16, #tpu.memory_space<vmem>>, vector<1x8x384xbf16>
    %477 = vector.shape_cast %476 : vector<1x8x384xbf16> to vector<8x384xbf16>
    %478 = arith.extf %477 : vector<8x384xbf16> to vector<8x384xf32>
    %479 = arith.truncf %469 : vector<8x128xf32> to vector<8x128xbf16>
    %c0_126 = arith.constant 0 : index
    %c0_127 = arith.constant 0 : index
    %480 = vector.load %arg3[%c0_126, %c0_127] : memref<128x384xbf16, #tpu.memory_space<vmem>>, vector<128x384xbf16>
    %cst_128 = arith.constant dense<0.000000e+00> : vector<8x384xf32>
    %481 = tpu.matmul %479, %480, %cst_128 {dimension_numbers = #tpu.dot_dimension_numbers<[1], [0], [0], [1], [0, 0, 1, 1], [], []>} : vector<8x128xbf16>, vector<128x384xbf16>, vector<8x384xf32> -> vector<8x384xf32>
    %482 = vector.extract_strided_slice %478 {offsets = [0, 0], sizes = [8, 128], strides = [1, 1]} : vector<8x384xf32> to vector<8x128xf32>
    %483 = vector.extract_strided_slice %481 {offsets = [0, 0], sizes = [8, 128], strides = [1, 1]} : vector<8x384xf32> to vector<8x128xf32>
    %484 = arith.addf %482, %483 : vector<8x128xf32>
    %485 = arith.negf %484 : vector<8x128xf32>
    %486 = math.exp %485 : vector<8x128xf32>
    %cst_129 = arith.constant 1.000000e+00 : f32
    %487 = vector.broadcast %cst_129 : f32 to vector<8x128xf32>
    %488 = arith.addf %487, %486 : vector<8x128xf32>
    %489 = arith.divf %487, %488 : vector<8x128xf32>
    %490 = vector.extract_strided_slice %478 {offsets = [0, 128], sizes = [8, 128], strides = [1, 1]} : vector<8x384xf32> to vector<8x128xf32>
    %491 = vector.extract_strided_slice %481 {offsets = [0, 128], sizes = [8, 128], strides = [1, 1]} : vector<8x384xf32> to vector<8x128xf32>
    %492 = arith.addf %490, %491 : vector<8x128xf32>
    %493 = arith.negf %492 : vector<8x128xf32>
    %494 = math.exp %493 : vector<8x128xf32>
    %cst_130 = arith.constant 1.000000e+00 : f32
    %495 = vector.broadcast %cst_130 : f32 to vector<8x128xf32>
    %496 = arith.addf %495, %494 : vector<8x128xf32>
    %497 = arith.divf %495, %496 : vector<8x128xf32>
    %498 = vector.extract_strided_slice %478 {offsets = [0, 256], sizes = [8, 128], strides = [1, 1]} : vector<8x384xf32> to vector<8x128xf32>
    %499 = vector.extract_strided_slice %481 {offsets = [0, 256], sizes = [8, 128], strides = [1, 1]} : vector<8x384xf32> to vector<8x128xf32>
    %500 = arith.addf %499, %5 : vector<8x128xf32>
    %501 = arith.mulf %489, %500 : vector<8x128xf32>
    %502 = arith.addf %498, %501 : vector<8x128xf32>
    %503 = math.tanh %502 : vector<8x128xf32>
    %cst_131 = arith.constant 1.000000e+00 : f32
    %504 = vector.broadcast %cst_131 : f32 to vector<8x128xf32>
    %505 = arith.subf %504, %497 : vector<8x128xf32>
    %506 = arith.mulf %505, %503 : vector<8x128xf32>
    %507 = arith.mulf %497, %469 : vector<8x128xf32>
    %508 = arith.addf %506, %507 : vector<8x128xf32>
    %509 = arith.truncf %508 : vector<8x128xf32> to vector<8x128xbf16>
    %510 = arith.index_cast %c12_i32 : i32 to index
    %c0_132 = arith.constant 0 : index
    %c0_133 = arith.constant 0 : index
    %511 = vector.load %arg5[%510, %c0_132, %c0_133] : memref<16x8x128xbf16, #tpu.memory_space<vmem>>, vector<1x8x128xbf16>
    %512 = vector.shape_cast %511 : vector<1x8x128xbf16> to vector<8x128xbf16>
    %513 = vector.shape_cast %509 : vector<8x128xbf16> to vector<1x8x128xbf16>
    tpu.vector_store %arg5[%510, %c0_132, %c0_133], %513 {strides = array<i32>} : memref<16x8x128xbf16, #tpu.memory_space<vmem>>, vector<1x8x128xbf16>,
    %c13_i32 = arith.constant 13 : i32
    %514 = arith.index_cast %c13_i32 : i32 to index
    %c0_134 = arith.constant 0 : index
    %c0_135 = arith.constant 0 : index
    %515 = vector.load %arg2[%514, %c0_134, %c0_135] : memref<16x8x384xbf16, #tpu.memory_space<vmem>>, vector<1x8x384xbf16>
    %516 = vector.shape_cast %515 : vector<1x8x384xbf16> to vector<8x384xbf16>
    %517 = arith.extf %516 : vector<8x384xbf16> to vector<8x384xf32>
    %518 = arith.truncf %508 : vector<8x128xf32> to vector<8x128xbf16>
    %c0_136 = arith.constant 0 : index
    %c0_137 = arith.constant 0 : index
    %519 = vector.load %arg3[%c0_136, %c0_137] : memref<128x384xbf16, #tpu.memory_space<vmem>>, vector<128x384xbf16>
    %cst_138 = arith.constant dense<0.000000e+00> : vector<8x384xf32>
    %520 = tpu.matmul %518, %519, %cst_138 {dimension_numbers = #tpu.dot_dimension_numbers<[1], [0], [0], [1], [0, 0, 1, 1], [], []>} : vector<8x128xbf16>, vector<128x384xbf16>, vector<8x384xf32> -> vector<8x384xf32>
    %521 = vector.extract_strided_slice %517 {offsets = [0, 0], sizes = [8, 128], strides = [1, 1]} : vector<8x384xf32> to vector<8x128xf32>
    %522 = vector.extract_strided_slice %520 {offsets = [0, 0], sizes = [8, 128], strides = [1, 1]} : vector<8x384xf32> to vector<8x128xf32>
    %523 = arith.addf %521, %522 : vector<8x128xf32>
    %524 = arith.negf %523 : vector<8x128xf32>
    %525 = math.exp %524 : vector<8x128xf32>
    %cst_139 = arith.constant 1.000000e+00 : f32
    %526 = vector.broadcast %cst_139 : f32 to vector<8x128xf32>
    %527 = arith.addf %526, %525 : vector<8x128xf32>
    %528 = arith.divf %526, %527 : vector<8x128xf32>
    %529 = vector.extract_strided_slice %517 {offsets = [0, 128], sizes = [8, 128], strides = [1, 1]} : vector<8x384xf32> to vector<8x128xf32>
    %530 = vector.extract_strided_slice %520 {offsets = [0, 128], sizes = [8, 128], strides = [1, 1]} : vector<8x384xf32> to vector<8x128xf32>
    %531 = arith.addf %529, %530 : vector<8x128xf32>
    %532 = arith.negf %531 : vector<8x128xf32>
    %533 = math.exp %532 : vector<8x128xf32>
    %cst_140 = arith.constant 1.000000e+00 : f32
    %534 = vector.broadcast %cst_140 : f32 to vector<8x128xf32>
    %535 = arith.addf %534, %533 : vector<8x128xf32>
    %536 = arith.divf %534, %535 : vector<8x128xf32>
    %537 = vector.extract_strided_slice %517 {offsets = [0, 256], sizes = [8, 128], strides = [1, 1]} : vector<8x384xf32> to vector<8x128xf32>
    %538 = vector.extract_strided_slice %520 {offsets = [0, 256], sizes = [8, 128], strides = [1, 1]} : vector<8x384xf32> to vector<8x128xf32>
    %539 = arith.addf %538, %5 : vector<8x128xf32>
    %540 = arith.mulf %528, %539 : vector<8x128xf32>
    %541 = arith.addf %537, %540 : vector<8x128xf32>
    %542 = math.tanh %541 : vector<8x128xf32>
    %cst_141 = arith.constant 1.000000e+00 : f32
    %543 = vector.broadcast %cst_141 : f32 to vector<8x128xf32>
    %544 = arith.subf %543, %536 : vector<8x128xf32>
    %545 = arith.mulf %544, %542 : vector<8x128xf32>
    %546 = arith.mulf %536, %508 : vector<8x128xf32>
    %547 = arith.addf %545, %546 : vector<8x128xf32>
    %548 = arith.truncf %547 : vector<8x128xf32> to vector<8x128xbf16>
    %549 = arith.index_cast %c13_i32 : i32 to index
    %c0_142 = arith.constant 0 : index
    %c0_143 = arith.constant 0 : index
    %550 = vector.load %arg5[%549, %c0_142, %c0_143] : memref<16x8x128xbf16, #tpu.memory_space<vmem>>, vector<1x8x128xbf16>
    %551 = vector.shape_cast %550 : vector<1x8x128xbf16> to vector<8x128xbf16>
    %552 = vector.shape_cast %548 : vector<8x128xbf16> to vector<1x8x128xbf16>
    tpu.vector_store %arg5[%549, %c0_142, %c0_143], %552 {strides = array<i32>} : memref<16x8x128xbf16, #tpu.memory_space<vmem>>, vector<1x8x128xbf16>,
    %c14_i32 = arith.constant 14 : i32
    %553 = arith.index_cast %c14_i32 : i32 to index
    %c0_144 = arith.constant 0 : index
    %c0_145 = arith.constant 0 : index
    %554 = vector.load %arg2[%553, %c0_144, %c0_145] : memref<16x8x384xbf16, #tpu.memory_space<vmem>>, vector<1x8x384xbf16>
    %555 = vector.shape_cast %554 : vector<1x8x384xbf16> to vector<8x384xbf16>
    %556 = arith.extf %555 : vector<8x384xbf16> to vector<8x384xf32>
    %557 = arith.truncf %547 : vector<8x128xf32> to vector<8x128xbf16>
    %c0_146 = arith.constant 0 : index
    %c0_147 = arith.constant 0 : index
    %558 = vector.load %arg3[%c0_146, %c0_147] : memref<128x384xbf16, #tpu.memory_space<vmem>>, vector<128x384xbf16>
    %cst_148 = arith.constant dense<0.000000e+00> : vector<8x384xf32>
    %559 = tpu.matmul %557, %558, %cst_148 {dimension_numbers = #tpu.dot_dimension_numbers<[1], [0], [0], [1], [0, 0, 1, 1], [], []>} : vector<8x128xbf16>, vector<128x384xbf16>, vector<8x384xf32> -> vector<8x384xf32>
    %560 = vector.extract_strided_slice %556 {offsets = [0, 0], sizes = [8, 128], strides = [1, 1]} : vector<8x384xf32> to vector<8x128xf32>
    %561 = vector.extract_strided_slice %559 {offsets = [0, 0], sizes = [8, 128], strides = [1, 1]} : vector<8x384xf32> to vector<8x128xf32>
    %562 = arith.addf %560, %561 : vector<8x128xf32>
    %563 = arith.negf %562 : vector<8x128xf32>
    %564 = math.exp %563 : vector<8x128xf32>
    %cst_149 = arith.constant 1.000000e+00 : f32
    %565 = vector.broadcast %cst_149 : f32 to vector<8x128xf32>
    %566 = arith.addf %565, %564 : vector<8x128xf32>
    %567 = arith.divf %565, %566 : vector<8x128xf32>
    %568 = vector.extract_strided_slice %556 {offsets = [0, 128], sizes = [8, 128], strides = [1, 1]} : vector<8x384xf32> to vector<8x128xf32>
    %569 = vector.extract_strided_slice %559 {offsets = [0, 128], sizes = [8, 128], strides = [1, 1]} : vector<8x384xf32> to vector<8x128xf32>
    %570 = arith.addf %568, %569 : vector<8x128xf32>
    %571 = arith.negf %570 : vector<8x128xf32>
    %572 = math.exp %571 : vector<8x128xf32>
    %cst_150 = arith.constant 1.000000e+00 : f32
    %573 = vector.broadcast %cst_150 : f32 to vector<8x128xf32>
    %574 = arith.addf %573, %572 : vector<8x128xf32>
    %575 = arith.divf %573, %574 : vector<8x128xf32>
    %576 = vector.extract_strided_slice %556 {offsets = [0, 256], sizes = [8, 128], strides = [1, 1]} : vector<8x384xf32> to vector<8x128xf32>
    %577 = vector.extract_strided_slice %559 {offsets = [0, 256], sizes = [8, 128], strides = [1, 1]} : vector<8x384xf32> to vector<8x128xf32>
    %578 = arith.addf %577, %5 : vector<8x128xf32>
    %579 = arith.mulf %567, %578 : vector<8x128xf32>
    %580 = arith.addf %576, %579 : vector<8x128xf32>
    %581 = math.tanh %580 : vector<8x128xf32>
    %cst_151 = arith.constant 1.000000e+00 : f32
    %582 = vector.broadcast %cst_151 : f32 to vector<8x128xf32>
    %583 = arith.subf %582, %575 : vector<8x128xf32>
    %584 = arith.mulf %583, %581 : vector<8x128xf32>
    %585 = arith.mulf %575, %547 : vector<8x128xf32>
    %586 = arith.addf %584, %585 : vector<8x128xf32>
    %587 = arith.truncf %586 : vector<8x128xf32> to vector<8x128xbf16>
    %588 = arith.index_cast %c14_i32 : i32 to index
    %c0_152 = arith.constant 0 : index
    %c0_153 = arith.constant 0 : index
    %589 = vector.load %arg5[%588, %c0_152, %c0_153] : memref<16x8x128xbf16, #tpu.memory_space<vmem>>, vector<1x8x128xbf16>
    %590 = vector.shape_cast %589 : vector<1x8x128xbf16> to vector<8x128xbf16>
    %591 = vector.shape_cast %587 : vector<8x128xbf16> to vector<1x8x128xbf16>
    tpu.vector_store %arg5[%588, %c0_152, %c0_153], %591 {strides = array<i32>} : memref<16x8x128xbf16, #tpu.memory_space<vmem>>, vector<1x8x128xbf16>,
    %c15_i32 = arith.constant 15 : i32
    %592 = arith.index_cast %c15_i32 : i32 to index
    %c0_154 = arith.constant 0 : index
    %c0_155 = arith.constant 0 : index
    %593 = vector.load %arg2[%592, %c0_154, %c0_155] : memref<16x8x384xbf16, #tpu.memory_space<vmem>>, vector<1x8x384xbf16>
    %594 = vector.shape_cast %593 : vector<1x8x384xbf16> to vector<8x384xbf16>
    %595 = arith.extf %594 : vector<8x384xbf16> to vector<8x384xf32>
    %596 = arith.truncf %586 : vector<8x128xf32> to vector<8x128xbf16>
    %c0_156 = arith.constant 0 : index
    %c0_157 = arith.constant 0 : index
    %597 = vector.load %arg3[%c0_156, %c0_157] : memref<128x384xbf16, #tpu.memory_space<vmem>>, vector<128x384xbf16>
    %cst_158 = arith.constant dense<0.000000e+00> : vector<8x384xf32>
    %598 = tpu.matmul %596, %597, %cst_158 {dimension_numbers = #tpu.dot_dimension_numbers<[1], [0], [0], [1], [0, 0, 1, 1], [], []>} : vector<8x128xbf16>, vector<128x384xbf16>, vector<8x384xf32> -> vector<8x384xf32>
    %599 = vector.extract_strided_slice %595 {offsets = [0, 0], sizes = [8, 128], strides = [1, 1]} : vector<8x384xf32> to vector<8x128xf32>
    %600 = vector.extract_strided_slice %598 {offsets = [0, 0], sizes = [8, 128], strides = [1, 1]} : vector<8x384xf32> to vector<8x128xf32>
    %601 = arith.addf %599, %600 : vector<8x128xf32>
    %602 = arith.negf %601 : vector<8x128xf32>
    %603 = math.exp %602 : vector<8x128xf32>
    %cst_159 = arith.constant 1.000000e+00 : f32
    %604 = vector.broadcast %cst_159 : f32 to vector<8x128xf32>
    %605 = arith.addf %604, %603 : vector<8x128xf32>
    %606 = arith.divf %604, %605 : vector<8x128xf32>
    %607 = vector.extract_strided_slice %595 {offsets = [0, 128], sizes = [8, 128], strides = [1, 1]} : vector<8x384xf32> to vector<8x128xf32>
    %608 = vector.extract_strided_slice %598 {offsets = [0, 128], sizes = [8, 128], strides = [1, 1]} : vector<8x384xf32> to vector<8x128xf32>
    %609 = arith.addf %607, %608 : vector<8x128xf32>
    %610 = arith.negf %609 : vector<8x128xf32>
    %611 = math.exp %610 : vector<8x128xf32>
    %cst_160 = arith.constant 1.000000e+00 : f32
    %612 = vector.broadcast %cst_160 : f32 to vector<8x128xf32>
    %613 = arith.addf %612, %611 : vector<8x128xf32>
    %614 = arith.divf %612, %613 : vector<8x128xf32>
    %615 = vector.extract_strided_slice %595 {offsets = [0, 256], sizes = [8, 128], strides = [1, 1]} : vector<8x384xf32> to vector<8x128xf32>
    %616 = vector.extract_strided_slice %598 {offsets = [0, 256], sizes = [8, 128], strides = [1, 1]} : vector<8x384xf32> to vector<8x128xf32>
    %617 = arith.addf %616, %5 : vector<8x128xf32>
    %618 = arith.mulf %606, %617 : vector<8x128xf32>
    %619 = arith.addf %615, %618 : vector<8x128xf32>
    %620 = math.tanh %619 : vector<8x128xf32>
    %cst_161 = arith.constant 1.000000e+00 : f32
    %621 = vector.broadcast %cst_161 : f32 to vector<8x128xf32>
    %622 = arith.subf %621, %614 : vector<8x128xf32>
    %623 = arith.mulf %622, %620 : vector<8x128xf32>
    %624 = arith.mulf %614, %586 : vector<8x128xf32>
    %625 = arith.addf %623, %624 : vector<8x128xf32>
    %626 = arith.truncf %625 : vector<8x128xf32> to vector<8x128xbf16>
    %627 = arith.index_cast %c15_i32 : i32 to index
    %c0_162 = arith.constant 0 : index
    %c0_163 = arith.constant 0 : index
    %628 = vector.load %arg5[%627, %c0_162, %c0_163] : memref<16x8x128xbf16, #tpu.memory_space<vmem>>, vector<1x8x128xbf16>
    %629 = vector.shape_cast %628 : vector<1x8x128xbf16> to vector<8x128xbf16>
    %630 = vector.shape_cast %626 : vector<8x128xbf16> to vector<1x8x128xbf16>
    tpu.vector_store %arg5[%627, %c0_162, %c0_163], %630 {strides = array<i32>} : memref<16x8x128xbf16, #tpu.memory_space<vmem>>, vector<1x8x128xbf16>,
    %c16_i32 = arith.constant 16 : i32
    %c0_164 = arith.constant 0 : index
    %c0_165 = arith.constant 0 : index
    %631 = vector.load %arg6[%c0_164, %c0_165] : memref<8x128xf32, #tpu.memory_space<vmem>>, vector<8x128xf32>
    tpu.vector_store %arg6[%c0_164, %c0_165], %625 {strides = array<i32>} : memref<8x128xf32, #tpu.memory_space<vmem>>, vector<8x128xf32>,
    return
  }
  func.func @transform_0(%arg0: i32, %arg1: i32) -> (i32, i32, i32) {
    %c0_i32 = arith.constant 0 : i32
    %c0_i32_0 = arith.constant 0 : i32
    return %arg1, %arg0, %c0_i32 : i32, i32, i32
  }
  func.func @transform_1(%arg0: i32, %arg1: i32) -> (i32, i32) {
    %c0_i32 = arith.constant 0 : i32
    %c0_i32_0 = arith.constant 0 : i32
    %c0_i32_1 = arith.constant 0 : i32
    return %c0_i32, %c0_i32_0 : i32, i32
  }
  func.func @transform_2(%arg0: i32, %arg1: i32) -> (i32, i32) {
    %c0_i32 = arith.constant 0 : i32
    %c0_i32_0 = arith.constant 0 : i32
    %c0_i32_1 = arith.constant 0 : i32
    return %c0_i32, %c0_i32_0 : i32, i32
  }
  func.func @transform_3(%arg0: i32, %arg1: i32) -> (i32, i32, i32) {
    %c0_i32 = arith.constant 0 : i32
    %c0_i32_0 = arith.constant 0 : i32
    return %arg1, %arg0, %c0_i32 : i32, i32, i32
  }
}

module attributes {stable_mosaic.version = 11 : i64} {
  func.func @_linear_kernel(%arg0: i32, %arg1: memref<128x128xbf16, #tpu.memory_space<vmem>>, %arg2: memref<128x384xbf16, #tpu.memory_space<vmem>>, %arg3: memref<1x384xf32, #tpu.memory_space<vmem>>, %arg4: memref<128x384xbf16, #tpu.memory_space<vmem>>) attributes {dimension_semantics = [#tpu.dimension_semantics<parallel>], iteration_bounds = array<i64: 1>, scalar_prefetch = 0 : i64, scratch_operands = 0 : i64, tpu.core_type = #tpu.core_type<tc>, window_params = [{transform_indices = @transform_0, window_bounds = array<i64: 128, 128>}, {pipeline_mode = #tpu.pipeline_mode<synchronous>, transform_indices = @transform_1, window_bounds = array<i64: 128, 384>}, {pipeline_mode = #tpu.pipeline_mode<synchronous>, transform_indices = @transform_2, window_bounds = array<i64: 1, 384>}, {transform_indices = @transform_3, window_bounds = array<i64: 128, 384>}]} {
    %c0 = arith.constant 0 : index
    %c0_0 = arith.constant 0 : index
    %0 = vector.load %arg1[%c0, %c0_0] : memref<128x128xbf16, #tpu.memory_space<vmem>>, vector<128x128xbf16>
    %c0_1 = arith.constant 0 : index
    %c0_2 = arith.constant 0 : index
    %1 = vector.load %arg2[%c0_1, %c0_2] : memref<128x384xbf16, #tpu.memory_space<vmem>>, vector<128x384xbf16>
    %cst = arith.constant dense<0.000000e+00> : vector<128x384xf32>
    %2 = tpu.matmul %0, %1, %cst {dimension_numbers = #tpu.dot_dimension_numbers<[1], [0], [0], [1], [0, 0, 1, 1], [], []>} : vector<128x128xbf16>, vector<128x384xbf16>, vector<128x384xf32> -> vector<128x384xf32>
    %c0_3 = arith.constant 0 : index
    %c0_4 = arith.constant 0 : index
    %3 = vector.load %arg3[%c0_3, %c0_4] : memref<1x384xf32, #tpu.memory_space<vmem>>, vector<1x384xf32>
    %4 = vector.broadcast %3 : vector<1x384xf32> to vector<128x384xf32>
    %5 = arith.addf %2, %4 : vector<128x384xf32>
    %6 = arith.truncf %5 : vector<128x384xf32> to vector<128x384xbf16>
    %c0_5 = arith.constant 0 : index
    %c0_6 = arith.constant 0 : index
    %7 = vector.load %arg4[%c0_5, %c0_6] : memref<128x384xbf16, #tpu.memory_space<vmem>>, vector<128x384xbf16>
    tpu.vector_store %arg4[%c0_5, %c0_6], %6 {strides = array<i32>} : memref<128x384xbf16, #tpu.memory_space<vmem>>, vector<128x384xbf16>,
    return
  }
  func.func @transform_0(%arg0: i32) -> (i32, i32) {
    %c0_i32 = arith.constant 0 : i32
    %c0_i32_0 = arith.constant 0 : i32
    return %arg0, %c0_i32 : i32, i32
  }
  func.func @transform_1(%arg0: i32) -> (i32, i32) {
    %c0_i32 = arith.constant 0 : i32
    %c0_i32_0 = arith.constant 0 : i32
    %c0_i32_1 = arith.constant 0 : i32
    return %c0_i32, %c0_i32_0 : i32, i32
  }
  func.func @transform_2(%arg0: i32) -> (i32, i32) {
    %c0_i32 = arith.constant 0 : i32
    %c0_i32_0 = arith.constant 0 : i32
    %c0_i32_1 = arith.constant 0 : i32
    return %c0_i32, %c0_i32_0 : i32, i32
  }
  func.func @transform_3(%arg0: i32) -> (i32, i32) {
    %c0_i32 = arith.constant 0 : i32
    %c0_i32_0 = arith.constant 0 : i32
    return %arg0, %c0_i32 : i32, i32
  }
}

module attributes {stable_mosaic.version = 11 : i64} {
  func.func @_linear_kernel(%arg0: i32, %arg1: memref<128x128xbf16, #tpu.memory_space<vmem>>, %arg2: memref<128x384xbf16, #tpu.memory_space<vmem>>, %arg3: memref<1x384xf32, #tpu.memory_space<vmem>>, %arg4: memref<128x384xbf16, #tpu.memory_space<vmem>>) attributes {dimension_semantics = [#tpu.dimension_semantics<parallel>], iteration_bounds = array<i64: 1>, scalar_prefetch = 0 : i64, scratch_operands = 0 : i64, tpu.core_type = #tpu.core_type<tc>, window_params = [{transform_indices = @transform_0, window_bounds = array<i64: 128, 128>}, {pipeline_mode = #tpu.pipeline_mode<synchronous>, transform_indices = @transform_1, window_bounds = array<i64: 128, 384>}, {pipeline_mode = #tpu.pipeline_mode<synchronous>, transform_indices = @transform_2, window_bounds = array<i64: 1, 384>}, {transform_indices = @transform_3, window_bounds = array<i64: 128, 384>}]} {
    %c0 = arith.constant 0 : index
    %c0_0 = arith.constant 0 : index
    %0 = vector.load %arg1[%c0, %c0_0] : memref<128x128xbf16, #tpu.memory_space<vmem>>, vector<128x128xbf16>
    %c0_1 = arith.constant 0 : index
    %c0_2 = arith.constant 0 : index
    %1 = vector.load %arg2[%c0_1, %c0_2] : memref<128x384xbf16, #tpu.memory_space<vmem>>, vector<128x384xbf16>
    %cst = arith.constant dense<0.000000e+00> : vector<128x384xf32>
    %2 = tpu.matmul %0, %1, %cst {dimension_numbers = #tpu.dot_dimension_numbers<[1], [0], [0], [1], [0, 0, 1, 1], [], []>} : vector<128x128xbf16>, vector<128x384xbf16>, vector<128x384xf32> -> vector<128x384xf32>
    %c0_3 = arith.constant 0 : index
    %c0_4 = arith.constant 0 : index
    %3 = vector.load %arg3[%c0_3, %c0_4] : memref<1x384xf32, #tpu.memory_space<vmem>>, vector<1x384xf32>
    %4 = vector.broadcast %3 : vector<1x384xf32> to vector<128x384xf32>
    %5 = arith.addf %2, %4 : vector<128x384xf32>
    %6 = arith.truncf %5 : vector<128x384xf32> to vector<128x384xbf16>
    %c0_5 = arith.constant 0 : index
    %c0_6 = arith.constant 0 : index
    %7 = vector.load %arg4[%c0_5, %c0_6] : memref<128x384xbf16, #tpu.memory_space<vmem>>, vector<128x384xbf16>
    tpu.vector_store %arg4[%c0_5, %c0_6], %6 {strides = array<i32>} : memref<128x384xbf16, #tpu.memory_space<vmem>>, vector<128x384xbf16>,
    return
  }
  func.func @transform_0(%arg0: i32) -> (i32, i32) {
    %c0_i32 = arith.constant 0 : i32
    %c0_i32_0 = arith.constant 0 : i32
    return %arg0, %c0_i32 : i32, i32
  }
  func.func @transform_1(%arg0: i32) -> (i32, i32) {
    %c0_i32 = arith.constant 0 : i32
    %c0_i32_0 = arith.constant 0 : i32
    %c0_i32_1 = arith.constant 0 : i32
    return %c0_i32, %c0_i32_0 : i32, i32
  }
  func.func @transform_2(%arg0: i32) -> (i32, i32) {
    %c0_i32 = arith.constant 0 : i32
    %c0_i32_0 = arith.constant 0 : i32
    %c0_i32_1 = arith.constant 0 : i32
    return %c0_i32, %c0_i32_0 : i32, i32
  }
  func.func @transform_3(%arg0: i32) -> (i32, i32) {
    %c0_i32 = arith.constant 0 : i32
    %c0_i32_0 = arith.constant 0 : i32
    return %arg0, %c0_i32 : i32, i32
  }
}

module attributes {stable_mosaic.version = 11 : i64} {
  func.func @_mlp_kernel(%arg0: i32, %arg1: memref<128x128xbf16, #tpu.memory_space<vmem>>, %arg2: memref<128x1024xbf16, #tpu.memory_space<vmem>>, %arg3: memref<1x1024xf32, #tpu.memory_space<vmem>>, %arg4: memref<1024x128xbf16, #tpu.memory_space<vmem>>, %arg5: memref<1x128xf32, #tpu.memory_space<vmem>>, %arg6: memref<1xf32, #tpu.memory_space<smem>>, %arg7: memref<128x128xf32, #tpu.memory_space<vmem>>) attributes {dimension_semantics = [#tpu.dimension_semantics<parallel>], iteration_bounds = array<i64: 1>, scalar_prefetch = 0 : i64, scratch_operands = 0 : i64, tpu.core_type = #tpu.core_type<tc>, window_params = [{transform_indices = @transform_0, window_bounds = array<i64: 128, 128>}, {pipeline_mode = #tpu.pipeline_mode<synchronous>, transform_indices = @transform_1, window_bounds = array<i64: 128, 1024>}, {pipeline_mode = #tpu.pipeline_mode<synchronous>, transform_indices = @transform_2, window_bounds = array<i64: 1, 1024>}, {pipeline_mode = #tpu.pipeline_mode<synchronous>, transform_indices = @transform_3, window_bounds = array<i64: 1024, 128>}, {pipeline_mode = #tpu.pipeline_mode<synchronous>, transform_indices = @transform_4, window_bounds = array<i64: 1, 128>}, {transform_indices = @transform_5, window_bounds = array<i64: 1>}, {transform_indices = @transform_6, window_bounds = array<i64: 128, 128>}]} {
    %c0 = arith.constant 0 : index
    %0 = memref.load %arg6[%c0] : memref<1xf32, #tpu.memory_space<smem>>
    %c0_0 = arith.constant 0 : index
    %c0_1 = arith.constant 0 : index
    %1 = vector.load %arg1[%c0_0, %c0_1] : memref<128x128xbf16, #tpu.memory_space<vmem>>, vector<128x128xbf16>
    %c0_2 = arith.constant 0 : index
    %c0_3 = arith.constant 0 : index
    %2 = vector.load %arg2[%c0_2, %c0_3] : memref<128x1024xbf16, #tpu.memory_space<vmem>>, vector<128x1024xbf16>
    %cst = arith.constant dense<0.000000e+00> : vector<128x1024xf32>
    %3 = tpu.matmul %1, %2, %cst {dimension_numbers = #tpu.dot_dimension_numbers<[1], [0], [0], [1], [0, 0, 1, 1], [], []>} : vector<128x128xbf16>, vector<128x1024xbf16>, vector<128x1024xf32> -> vector<128x1024xf32>
    %c0_4 = arith.constant 0 : index
    %c0_5 = arith.constant 0 : index
    %4 = vector.load %arg3[%c0_4, %c0_5] : memref<1x1024xf32, #tpu.memory_space<vmem>>, vector<1x1024xf32>
    %5 = vector.broadcast %4 : vector<1x1024xf32> to vector<128x1024xf32>
    %6 = arith.addf %3, %5 : vector<128x1024xf32>
    %cst_6 = arith.constant 0.000000e+00 : f32
    %7 = vector.broadcast %cst_6 : f32 to vector<128x1024xf32>
    %8 = arith.cmpf oge, %6, %7 : vector<128x1024xf32>
    %9 = vector.broadcast %0 : f32 to vector<128x1024xf32>
    %10 = arith.mulf %9, %6 : vector<128x1024xf32>
    %11 = arith.select %8, %6, %10 : vector<128x1024xi1>, vector<128x1024xf32>
    %12 = arith.truncf %11 : vector<128x1024xf32> to vector<128x1024xbf16>
    %c0_7 = arith.constant 0 : index
    %c0_8 = arith.constant 0 : index
    %13 = vector.load %arg4[%c0_7, %c0_8] : memref<1024x128xbf16, #tpu.memory_space<vmem>>, vector<1024x128xbf16>
    %cst_9 = arith.constant dense<0.000000e+00> : vector<128x128xf32>
    %14 = tpu.matmul %12, %13, %cst_9 {dimension_numbers = #tpu.dot_dimension_numbers<[1], [0], [0], [1], [0, 0, 1, 1], [], []>} : vector<128x1024xbf16>, vector<1024x128xbf16>, vector<128x128xf32> -> vector<128x128xf32>
    %c0_10 = arith.constant 0 : index
    %c0_11 = arith.constant 0 : index
    %15 = vector.load %arg5[%c0_10, %c0_11] : memref<1x128xf32, #tpu.memory_space<vmem>>, vector<1x128xf32>
    %16 = vector.broadcast %15 : vector<1x128xf32> to vector<128x128xf32>
    %17 = arith.addf %14, %16 : vector<128x128xf32>
    %cst_12 = arith.constant 0.000000e+00 : f32
    %18 = vector.broadcast %cst_12 : f32 to vector<128x128xf32>
    %19 = arith.cmpf oge, %17, %18 : vector<128x128xf32>
    %20 = vector.broadcast %0 : f32 to vector<128x128xf32>
    %21 = arith.mulf %20, %17 : vector<128x128xf32>
    %22 = arith.select %19, %17, %21 : vector<128x128xi1>, vector<128x128xf32>
    %c0_13 = arith.constant 0 : index
    %c0_14 = arith.constant 0 : index
    %23 = vector.load %arg7[%c0_13, %c0_14] : memref<128x128xf32, #tpu.memory_space<vmem>>, vector<128x128xf32>
    tpu.vector_store %arg7[%c0_13, %c0_14], %22 {strides = array<i32>} : memref<128x128xf32, #tpu.memory_space<vmem>>, vector<128x128xf32>,
    return
  }
  func.func @transform_0(%arg0: i32) -> (i32, i32) {
    %c0_i32 = arith.constant 0 : i32
    %c0_i32_0 = arith.constant 0 : i32
    return %arg0, %c0_i32 : i32, i32
  }
  func.func @transform_1(%arg0: i32) -> (i32, i32) {
    %c0_i32 = arith.constant 0 : i32
    %c0_i32_0 = arith.constant 0 : i32
    %c0_i32_1 = arith.constant 0 : i32
    return %c0_i32, %c0_i32_0 : i32, i32
  }
  func.func @transform_2(%arg0: i32) -> (i32, i32) {
    %c0_i32 = arith.constant 0 : i32
    %c0_i32_0 = arith.constant 0 : i32
    %c0_i32_1 = arith.constant 0 : i32
    return %c0_i32, %c0_i32_0 : i32, i32
  }
  func.func @transform_3(%arg0: i32) -> (i32, i32) {
    %c0_i32 = arith.constant 0 : i32
    %c0_i32_0 = arith.constant 0 : i32
    %c0_i32_1 = arith.constant 0 : i32
    return %c0_i32, %c0_i32_0 : i32, i32
  }
  func.func @transform_4(%arg0: i32) -> (i32, i32) {
    %c0_i32 = arith.constant 0 : i32
    %c0_i32_0 = arith.constant 0 : i32
    %c0_i32_1 = arith.constant 0 : i32
    return %c0_i32, %c0_i32_0 : i32, i32
  }
  func.func @transform_5(%arg0: i32) -> i32 {
    %c0_i32 = arith.constant 0 : i32
    %c0_i32_0 = arith.constant 0 : i32
    return %c0_i32 : i32
  }
  func.func @transform_6(%arg0: i32) -> (i32, i32) {
    %c0_i32 = arith.constant 0 : i32
    %c0_i32_0 = arith.constant 0 : i32
    return %arg0, %c0_i32 : i32, i32
  }
}

</mosaic_0001>

<bundles_post_ra>
// kernel: gru_model_forward.7
= control target key start
LH: loop header
LB: loop body
LE: loop exit
PB: predicated region body
PF: predicated region fallthrough
CT: control target
= control target key end

     0   :  { %v847_v1 = vmov 0   ;;  %v65_v33 = vlaneseq  ;;  %s1125_s1 = inlined_call_operand.vmem [shape: bf16[128,384], index: 1, kind: input, shape index: {}]   ;;  %s1126_s0 = inlined_call_operand.vmem [shape: bf16[128,128], index: 0, kind: input, shape index: {}]   ;;  %s1127_s2 = inlined_call_operand.vmem [shape: f32[1,384], index: 2, kind: input, shape index: {}]   ;;  %s1128_s3 = inlined_call_operand.vmem [shape: bf16[128,384], index: 3, kind: output, shape index: {}]  }
   0x1   :  { %v807_v0 = vld [vmem:[%s1125_s1 + $0x4] ss:$12 sps:$4 sm:$0xff]   ;;  %288 = vmatprep.mubr.bf16.mxu0 %v847_v1  ;;  %v809_v2 = vld [vmem:[%s1125_s1] ss:$12 sps:$4 sm:$0xff]   ;;  %v810_v3 = vld [vmem:[%s1125_s1 + $0x1c] ss:$12 sps:$4 sm:$0xff]  }
   0x2   :  { %256 = vmatprep.subr.bf16.mxu0 %v807_v0  ;;  %v812_v4 = vld [vmem:[%s1125_s1 + $0x18] ss:$12 sps:$4 sm:$0xff]   ;;  %v813_v5 = vld [vmem:[%s1125_s1 + $0x34] ss:$12 sps:$4 sm:$0xff]   ;;  %v815_v6 = vld [vmem:[%s1125_s1 + $0x30] ss:$12 sps:$4 sm:$0xff]  }
   0x3   :  { %257 = vmatpush1.bf16.msra.mxu0 %v809_v2  ;;  %v816_v7 = vld [vmem:[%s1125_s1 + $0x4c] ss:$12 sps:$4 sm:$0xff]   ;;  %v818_v8 = vld [vmem:[%s1125_s1 + $0x48] ss:$12 sps:$4 sm:$0xff]   ;;  %v819_v9 = vld [vmem:[%s1125_s1 + $0x64] ss:$12 sps:$4 sm:$0xff]  }
   0x4   :  { %258 = vmatprep.subr.bf16.mxu0 %v810_v3  ;;  %v831_v10 = vld [vmem:[%s1125_s1 + $0x8] ss:$12 sps:$4 sm:$0xff]   ;;  %v832_v11 = vld [vmem:[%s1126_s0] sm:$0xff]   ;;  %v836_v17 = vld [vmem:[%s1125_s1 + $0x50] ss:$12 sps:$4 sm:$0xff]   ;;  %v66_v34 = vshrl.u32 %v65_v33, 7 }
   0x5   :  { %774 = vmatprep.subr.bf16.mxu1 %v831_v10  ;;  %v833_v12 = vld [vmem:[%s1125_s1 + $0x20] ss:$12 sps:$4 sm:$0xff]   ;;  %790 = vmatprep.mubr.bf16.mxu1 %v832_v11  ;;  %v834_v14 = vld [vmem:[%s1125_s1 + $0x38] ss:$12 sps:$4 sm:$0xff]   ;;  %v822_v15 = vld [vmem:[%s1125_s1 + $0x7c] ss:$12 sps:$4 sm:$0xff]  }
   0x6   :  { %v821_v13 = vld [vmem:[%s1125_s1 + $0x60] ss:$12 sps:$4 sm:$0xff]   ;;  %775 = vmatpush3.bf16.msra.mxu1 %v831_v10  ;;  %v824_v16 = vld [vmem:[%s1125_s1 + $0x78] ss:$12 sps:$4 sm:$0xff]   ;;  %v827_v19 = vld [vmem:[%s1125_s1 + $0x90] ss:$12 sps:$4 sm:$0xff]  }
   0x7   :  { %259 = vmatpush1.bf16.msra.mxu0 %v812_v4  ;;  %776 = vmatprep.subr.bf16.mxu1 %v833_v12  ;;  %v825_v18 = vld [vmem:[%s1125_s1 + $0x94] ss:$12 sps:$4 sm:$0xff]   ;;  %v828_v21 = vld [vmem:[%s1125_s1 + $0xac] ss:$12 sps:$4 sm:$0xff]   ;;  %v842_v25 = vld [vmem:[%s1125_s1 + $0xb0] ss:$12 sps:$4 sm:$0xff]  }
   0x8   :  { %260 = vmatprep.subr.bf16.mxu0 %v813_v5  ;;  %v837_v20 = vld [vmem:[%s1125_s1 + $0x68] ss:$12 sps:$4 sm:$0xff]   ;;  %v839_v23 = vld [vmem:[%s1125_s1 + $0x80] ss:$12 sps:$4 sm:$0xff]   ;;  %v840_v24 = vld [vmem:[%s1125_s1 + $0x98] ss:$12 sps:$4 sm:$0xff]  }
   0x9   :  { %v830_v22 = vld [vmem:[%s1125_s1 + $0xa8] ss:$12 sps:$4 sm:$0xff]   ;;  %v841_v28 = vld [vmem:[%s1126_s0 + $0x18] sm:$0xff]   ;;  %v843_v29 = vld [vmem:[%s1126_s0 + $0x20] sm:$0xff]   ;;  %v67_v35 = vsub.s32 0, %v66_v34  ;;  %v71_v37 = vsub.s32 1, %v66_v34 }
   0xa   :  { %777 = vmatpush3.bf16.msra.mxu1 %v833_v12  ;;  %v835_v26 = vld [vmem:[%s1126_s0 + $0x8] sm:$0xff]   ;;  %v838_v27 = vld [vmem:[%s1126_s0 + $0x10] sm:$0xff]   ;;  %v846_v32 = vld [vmem:[%s1126_s0 + $0x38] sm:$0xff]   ;;  %v75_v49 = vsub.s32 2, %v66_v34 }
   0xb   :  { %261 = vmatpush1.bf16.msra.mxu0 %v815_v6  ;;  %778 = vmatprep.subr.bf16.mxu1 %v834_v14  ;;  %v844_v30 = vld [vmem:[%s1126_s0 + $0x28] sm:$0xff]   ;;  %v845_v31 = vld [vmem:[%s1126_s0 + $0x30] sm:$0xff]   ;;  %v63_v36 = vld [vmem:[%s1127_s2] sm:$0x7] }
   0xc   :  { %262 = vmatprep.subr.bf16.mxu0 %v816_v7  ;;  %v975_v38 = vrot.slane %v63_v36, %v67_v35  ;;  %v977_v39 = vrot.slane %v63_v36, %v71_v37  ;;  %v989_v52 = vrot.slane %v63_v36, %v75_v49 }
   0xe   :  { %779 = vmatpush3.bf16.msra.mxu1 %v834_v14 }
   0xf   :  { %263 = vmatpush1.bf16.msra.mxu0 %v818_v8  ;;  %780 = vmatprep.subr.bf16.mxu1 %v836_v17 }
  0x10   :  { %264 = vmatprep.subr.bf16.mxu0 %v819_v9 }
  0x12   :  { %781 = vmatpush3.bf16.msra.mxu1 %v836_v17 }
  0x13   :  { %265 = vmatpush1.bf16.msra.mxu0 %v821_v13  ;;  %782 = vmatprep.subr.bf16.mxu1 %v837_v20 }
  0x14   :  { %266 = vmatprep.subr.bf16.mxu0 %v822_v15 }
  0x16   :  { %783 = vmatpush3.bf16.msra.mxu1 %v837_v20 }
  0x17   :  { %267 = vmatpush1.bf16.msra.mxu0 %v824_v16  ;;  %784 = vmatprep.subr.bf16.mxu1 %v839_v23 }
  0x18   :  { %268 = vmatprep.subr.bf16.mxu0 %v825_v18 }
  0x1a   :  { %785 = vmatpush3.bf16.msra.mxu1 %v839_v23 }
  0x1b   :  { %269 = vmatpush1.bf16.msra.mxu0 %v827_v19  ;;  %786 = vmatprep.subr.bf16.mxu1 %v840_v24 }
  0x1c   :  { %270 = vmatprep.subr.bf16.mxu0 %v828_v21 }
  0x1e   :  { %787 = vmatpush3.bf16.msra.mxu1 %v840_v24 }
  0x1f   :  { %271 = vmatpush1.bf16.msra.mxu0 %v830_v22  ;;  %788 = vmatprep.subr.bf16.mxu1 %v842_v25 }
  0x22   :  { %289 = vmatmul.mubr.bf16.vlgmr.msra.gmra.mrb[0].mxu0 %v832_v11  ;;  %789 = vmatpush3.bf16.msra.mxu1 %v842_v25 }
  0x23   :  { %298 = vmatprep.mubr.bf16.mxu0 %v847_v1 }
  0x25   :  { %791 = vmatmul.mubr.bf16.vlgmr.msra.gmra.mrb[0].mxu1 %v835_v26 }
  0x26   :  { %794 = vmatprep.mubr.bf16.mxu1 %v838_v27 }
  0x2a   :  { %299 = vmatmul.mubr.bf16.gmra.mrb[4].mxu0 %v835_v26 }
  0x2b   :  { %308 = vmatprep.mubr.bf16.mxu0 %v847_v1 }
  0x2d   :  { %795 = vmatmul.mubr.bf16.gmra.mrb[4].mxu1 %v841_v28 }
  0x2e   :  { %798 = vmatprep.mubr.bf16.mxu1 %v843_v29 }
  0x32   :  { %309 = vmatmul.mubr.bf16.gmra.mrb[8].mxu0 %v838_v27 }
  0x33   :  { %318 = vmatprep.mubr.bf16.mxu0 %v847_v1 }
  0x35   :  { %799 = vmatmul.mubr.bf16.gmra.mrb[8].mxu1 %v844_v30 }
  0x36   :  { %802 = vmatprep.mubr.bf16.mxu1 %v845_v31 }
  0x3a   :  { %319 = vmatmul.mubr.bf16.gmra.mrb[12].mxu0 %v841_v28 }
  0x3b   :  { %328 = vmatprep.mubr.bf16.mxu0 %v847_v1 }
  0x3d   :  { %803 = vmatmul.mubr.bf16.gmra.mrb[12].mxu1 %v846_v32 }
  0x42   :  { %329 = vmatmul.mubr.bf16.gmra.mrb[16].mxu0 %v843_v29 }
  0x43   :  { %338 = vmatprep.mubr.bf16.mxu0 %v847_v1 }
  0x4a   :  { %339 = vmatmul.mubr.bf16.gmra.mrb[20].mxu0 %v844_v30 }
  0x4b   :  { %348 = vmatprep.mubr.bf16.mxu0 %v847_v1 }
  0x52   :  { %349 = vmatmul.mubr.bf16.gmra.mrb[24].mxu0 %v845_v31 }
  0x53   :  { %358 = vmatprep.mubr.bf16.mxu0 %v847_v1 }
  0x5a   :  { %359 = vmatmul.mubr.bf16.gmra.mrb[28].mxu0 %v846_v32 }
  0xf5   :  { %v290_v40 = vpop.f32.mrb[0].mxu0 }
  0xf6   :  { %v291_v41 = vadd.f32 %v290_v40, %v975_v38  ;;  %v292_v42 = vpop.f32.mrb[1].mxu0 }
  0xf7   :  { %v293_v43 = vadd.f32 %v292_v42, %v977_v39  ;;  %v294_v44 = vpop.f32.mrb[2].mxu0 }
  0xf8   :  { %v295_v45 = vadd.f32 %v294_v44, %v975_v38  ;;  %v296_v46 = vpop.f32.mrb[3].mxu0  ;;  %v792_v59 = vpop.f32.mrb[0].mxu1 }
  0xf9   :  { %v726_v47 = vpack.c.bf16 %v293_v43, %v291_v41  ;;  %v297_v48 = vadd.f32 %v296_v46, %v977_v39  ;;  %v412_v62 = vadd.f32 %v792_v59, %v989_v52  ;;  %v403_v63 = vpop.f32.mrb[1].mxu1 }
  0xfa   :  { %v404_v0 = vadd.f32 %v403_v63, %v989_v52  ;;  %v793_v1 = vpop.f32.mrb[2].mxu1 }
  0xfb   :  { %626 = vst [vmem:[%s1128_s3] sm:$0xff] %v726_v47  ;;  %v728_v50 = vpack.c.bf16 %v297_v48, %v295_v45  ;;  %v731_v3 = vpack.c.bf16 %v412_v62, %v412_v62  ;;  %v415_v4 = vadd.f32 %v793_v1, %v989_v52  ;;  %v406_v5 = vpop.f32.mrb[3].mxu1 }
  0xfc   :  { %v727_v6 = vpack.c.bf16 %v404_v0, %v404_v0  ;;  %v407_v7 = vadd.f32 %v406_v5, %v989_v52 }
  0xfd   :  { %628 = vst [vmem:[%s1128_s3 + $0xc] sm:$0xff] %v728_v50  ;;  %v300_v51 = vpop.f32.mrb[4].mxu0  ;;  %631 = vst [vmem:[%s1128_s3 + $0x20] sm:$0xf] %v731_v3  ;;  %v733_v9 = vpack.c.bf16 %v415_v4, %v415_v4 }
  0xfe   :  { %v301_v53 = vadd.f32 %v300_v51, %v975_v38  ;;  %v302_v54 = vpop.f32.mrb[5].mxu0  ;;  %627 = vst [vmem:[%s1128_s3 + $0x8] sm:$0xf] %v727_v6  ;;  %v729_v12 = vpack.c.bf16 %v407_v7, %v407_v7 }
  0xff   :  { %v303_v55 = vadd.f32 %v302_v54, %v977_v39  ;;  %v304_v56 = vpop.f32.mrb[6].mxu0  ;;  %633 = vst [vmem:[%s1128_s3 + $0x2c] sm:$0xf] %v733_v9 }
 0x100   :  { %v305_v57 = vadd.f32 %v304_v56, %v975_v38  ;;  %v306_v58 = vpop.f32.mrb[7].mxu0  ;;  %629 = vst [vmem:[%s1128_s3 + $0x14] sm:$0xf] %v729_v12  ;;  %v796_v17 = vpop.f32.mrb[4].mxu1 }
 0x101   :  { %v730_v60 = vpack.c.bf16 %v303_v55, %v301_v53  ;;  %v307_v61 = vadd.f32 %v306_v58, %v977_v39  ;;  %v428_v20 = vadd.f32 %v796_v17, %v989_v52  ;;  %v419_v21 = vpop.f32.mrb[5].mxu1 }
 0x102   :  { %v420_v22 = vadd.f32 %v419_v21, %v989_v52  ;;  %v797_v23 = vpop.f32.mrb[6].mxu1 }
 0x103   :  { %630 = vst [vmem:[%s1128_s3 + $0x18] sm:$0xff] %v730_v60  ;;  %v732_v2 = vpack.c.bf16 %v307_v61, %v305_v57  ;;  %v739_v25 = vpack.c.bf16 %v428_v20, %v428_v20  ;;  %v431_v26 = vadd.f32 %v797_v23, %v989_v52  ;;  %v422_v27 = vpop.f32.mrb[7].mxu1 }
 0x104   :  { %v735_v28 = vpack.c.bf16 %v420_v22, %v420_v22  ;;  %v423_v29 = vadd.f32 %v422_v27, %v989_v52 }
 0x105   :  { %632 = vst [vmem:[%s1128_s3 + $0x24] sm:$0xff] %v732_v2  ;;  %v310_v8 = vpop.f32.mrb[8].mxu0  ;;  %639 = vst [vmem:[%s1128_s3 + $0x50] sm:$0xf] %v739_v25  ;;  %v741_v31 = vpack.c.bf16 %v431_v26, %v431_v26 }
 0x106   :  { %v311_v10 = vadd.f32 %v310_v8, %v975_v38  ;;  %v312_v11 = vpop.f32.mrb[9].mxu0  ;;  %635 = vst [vmem:[%s1128_s3 + $0x38] sm:$0xf] %v735_v28  ;;  %v737_v34 = vpack.c.bf16 %v423_v29, %v423_v29 }
 0x107   :  { %v313_v13 = vadd.f32 %v312_v11, %v977_v39  ;;  %v314_v14 = vpop.f32.mrb[10].mxu0  ;;  %641 = vst [vmem:[%s1128_s3 + $0x5c] sm:$0xf] %v741_v31 }
 0x108   :  { %v315_v15 = vadd.f32 %v314_v14, %v975_v38  ;;  %v316_v16 = vpop.f32.mrb[11].mxu0  ;;  %637 = vst [vmem:[%s1128_s3 + $0x44] sm:$0xf] %v737_v34  ;;  %v800_v41 = vpop.f32.mrb[8].mxu1 }
 0x109   :  { %v734_v18 = vpack.c.bf16 %v313_v13, %v311_v10  ;;  %v317_v19 = vadd.f32 %v316_v16, %v977_v39  ;;  %v444_v44 = vadd.f32 %v800_v41, %v989_v52  ;;  %v435_v45 = vpop.f32.mrb[9].mxu1 }
 0x10a   :  { %v436_v46 = vadd.f32 %v435_v45, %v989_v52  ;;  %v801_v47 = vpop.f32.mrb[10].mxu1 }
 0x10b   :  { %634 = vst [vmem:[%s1128_s3 + $0x30] sm:$0xff] %v734_v18  ;;  %v736_v24 = vpack.c.bf16 %v317_v19, %v315_v15  ;;  %v747_v49 = vpack.c.bf16 %v444_v44, %v444_v44  ;;  %v447_v50 = vadd.f32 %v801_v47, %v989_v52  ;;  %v438_v51 = vpop.f32.mrb[11].mxu1 }
 0x10c   :  { %v743_v53 = vpack.c.bf16 %v436_v46, %v436_v46  ;;  %v439_v54 = vadd.f32 %v438_v51, %v989_v52 }
 0x10d   :  { %636 = vst [vmem:[%s1128_s3 + $0x3c] sm:$0xff] %v736_v24  ;;  %v320_v30 = vpop.f32.mrb[12].mxu0  ;;  %647 = vst [vmem:[%s1128_s3 + $0x80] sm:$0xf] %v747_v49  ;;  %v749_v56 = vpack.c.bf16 %v447_v50, %v447_v50 }
 0x10e   :  { %v321_v32 = vadd.f32 %v320_v30, %v975_v38  ;;  %v322_v33 = vpop.f32.mrb[13].mxu0  ;;  %643 = vst [vmem:[%s1128_s3 + $0x68] sm:$0xf] %v743_v53  ;;  %v745_v59 = vpack.c.bf16 %v439_v54, %v439_v54 }
 0x10f   :  { %v323_v35 = vadd.f32 %v322_v33, %v977_v39  ;;  %v324_v36 = vpop.f32.mrb[14].mxu0  ;;  %649 = vst [vmem:[%s1128_s3 + $0x8c] sm:$0xf] %v749_v56 }
 0x110   :  { %v325_v37 = vadd.f32 %v324_v36, %v975_v38  ;;  %v326_v40 = vpop.f32.mrb[15].mxu0  ;;  %645 = vst [vmem:[%s1128_s3 + $0x74] sm:$0xf] %v745_v59  ;;  %v804_v0 = vpop.f32.mrb[12].mxu1 }
 0x111   :  { %v738_v42 = vpack.c.bf16 %v323_v35, %v321_v32  ;;  %v327_v43 = vadd.f32 %v326_v40, %v977_v39  ;;  %v460_v3 = vadd.f32 %v804_v0, %v989_v52  ;;  %v451_v4 = vpop.f32.mrb[13].mxu1 }
 0x112   :  { %v452_v5 = vadd.f32 %v451_v4, %v989_v52  ;;  %v805_v6 = vpop.f32.mrb[14].mxu1 }
 0x113   :  { %638 = vst [vmem:[%s1128_s3 + $0x48] sm:$0xff] %v738_v42  ;;  %v740_v48 = vpack.c.bf16 %v327_v43, %v325_v37  ;;  %v755_v8 = vpack.c.bf16 %v460_v3, %v460_v3  ;;  %v463_v9 = vadd.f32 %v805_v6, %v989_v52  ;;  %v454_v10 = vpop.f32.mrb[15].mxu1 }
 0x114   :  { %v751_v11 = vpack.c.bf16 %v452_v5, %v452_v5  ;;  %v455_v12 = vadd.f32 %v454_v10, %v989_v52 }
 0x115   :  { %640 = vst [vmem:[%s1128_s3 + $0x54] sm:$0xff] %v740_v48  ;;  %v330_v55 = vpop.f32.mrb[16].mxu0  ;;  %655 = vst [vmem:[%s1128_s3 + $0xb0] sm:$0xf] %v755_v8  ;;  %v757_v14 = vpack.c.bf16 %v463_v9, %v463_v9 }
 0x116   :  { %v331_v57 = vadd.f32 %v330_v55, %v975_v38  ;;  %v332_v58 = vpop.f32.mrb[17].mxu0  ;;  %651 = vst [vmem:[%s1128_s3 + $0x98] sm:$0xf] %v751_v11  ;;  %v753_v17 = vpack.c.bf16 %v455_v12, %v455_v12 }
 0x117   :  { %v333_v60 = vadd.f32 %v332_v58, %v977_v39  ;;  %v334_v61 = vpop.f32.mrb[18].mxu0  ;;  %657 = vst [vmem:[%s1128_s3 + $0xbc] sm:$0xf] %v757_v14 }
 0x118   :  { %v335_v62 = vadd.f32 %v334_v61, %v975_v38  ;;  %v336_v63 = vpop.f32.mrb[19].mxu0  ;;  %653 = vst [vmem:[%s1128_s3 + $0xa4] sm:$0xf] %v753_v17 }
 0x119   :  { %v742_v1 = vpack.c.bf16 %v333_v60, %v331_v57  ;;  %v337_v2 = vadd.f32 %v336_v63, %v977_v39 }
 0x11b   :  { %642 = vst [vmem:[%s1128_s3 + $0x60] sm:$0xff] %v742_v1  ;;  %v744_v7 = vpack.c.bf16 %v337_v2, %v335_v62 }
 0x11d   :  { %644 = vst [vmem:[%s1128_s3 + $0x6c] sm:$0xff] %v744_v7  ;;  %v340_v13 = vpop.f32.mrb[20].mxu0 }
 0x11e   :  { %v341_v15 = vadd.f32 %v340_v13, %v975_v38  ;;  %v342_v16 = vpop.f32.mrb[21].mxu0 }
 0x11f   :  { %v343_v52 = vadd.f32 %v342_v16, %v977_v39  ;;  %v344_v18 = vpop.f32.mrb[22].mxu0 }
 0x120   :  { %v345_v19 = vadd.f32 %v344_v18, %v975_v38  ;;  %v346_v20 = vpop.f32.mrb[23].mxu0 }
 0x121   :  { %v746_v21 = vpack.c.bf16 %v343_v52, %v341_v15  ;;  %v347_v22 = vadd.f32 %v346_v20, %v977_v39 }
 0x123   :  { %646 = vst [vmem:[%s1128_s3 + $0x78] sm:$0xff] %v746_v21  ;;  %v748_v23 = vpack.c.bf16 %v347_v22, %v345_v19 }
 0x125   :  { %648 = vst [vmem:[%s1128_s3 + $0x84] sm:$0xff] %v748_v23  ;;  %v350_v24 = vpop.f32.mrb[24].mxu0 }
 0x126   :  { %v351_v25 = vadd.f32 %v350_v24, %v975_v38  ;;  %v352_v26 = vpop.f32.mrb[25].mxu0 }
 0x127   :  { %v353_v27 = vadd.f32 %v352_v26, %v977_v39  ;;  %v354_v28 = vpop.f32.mrb[26].mxu0 }
 0x128   :  { %v355_v29 = vadd.f32 %v354_v28, %v975_v38  ;;  %v356_v30 = vpop.f32.mrb[27].mxu0 }
 0x129   :  { %v750_v31 = vpack.c.bf16 %v353_v27, %v351_v25  ;;  %v357_v32 = vadd.f32 %v356_v30, %v977_v39 }
 0x12b   :  { %650 = vst [vmem:[%s1128_s3 + $0x90] sm:$0xff] %v750_v31  ;;  %v752_v33 = vpack.c.bf16 %v357_v32, %v355_v29 }
 0x12d   :  { %652 = vst [vmem:[%s1128_s3 + $0x9c] sm:$0xff] %v752_v33  ;;  %v360_v34 = vpop.f32.mrb[28].mxu0 }
 0x12e   :  { %v361_v35 = vadd.f32 %v360_v34, %v975_v38  ;;  %v362_v36 = vpop.f32.mrb[29].mxu0 }
 0x12f   :  { %v363_v37 = vadd.f32 %v362_v36, %v977_v39  ;;  %v364_v40 = vpop.f32.mrb[30].mxu0 }
 0x130   :  { %v365_v41 = vadd.f32 %v364_v40, %v975_v38  ;;  %v366_v42 = vpop.f32.mrb[31].mxu0 }
 0x131   :  { %v754_v43 = vpack.c.bf16 %v363_v37, %v361_v35  ;;  %v367_v44 = vadd.f32 %v366_v42, %v977_v39 }
 0x133   :  { %654 = vst [vmem:[%s1128_s3 + $0xa8] sm:$0xff] %v754_v43  ;;  %v756_v45 = vpack.c.bf16 %v367_v44, %v365_v41 }
 0x135   :  { %656 = vst [vmem:[%s1128_s3 + $0xb4] sm:$0xff] %v756_v45 }

// kernel: gru_model_forward.5
= control target key start
LH: loop header
LB: loop body
LE: loop exit
PB: predicated region body
PF: predicated region fallthrough
CT: control target
= control target key end

     0   :  { %8 = vsyncpa [#allocation3], 0  ;;  %s889_s12 = smov [#allocation2]   ;;  %s1110_s0 = inlined_call_operand.vmem [shape: bf16[128,128], index: 0, kind: input, shape index: {}]   ;;  %s1111_s1 = inlined_call_operand.hbm [shape: bf16[128,384], index: 1, kind: input, shape index: {}]   ;;  %s1112_s2 = inlined_call_operand.vmem [shape: f32[1,384], index: 2, kind: input, shape index: {}]   ;;  %s1113_s3 = inlined_call_operand.vmem [shape: bf16[128,384], index: 3, kind: output, shape index: {}]  }
   0x1   :  { %s16_s13 = sshll.u32 %s889_s12, 4  ;;  %s865_s16 = scalar_lea.hbm %s1111_s1, 3072  ;;  %s17_s13 = int_to_ptr.vmem [resolvable:$true] %s16_s13 }
   0x2   :  { %p866_p0 = scmp.ne.s32.totalorder %s1111_s1, %s865_s16  ;;  %p869_p1 = scmp.lt.u32.totalorder %s865_s16, %s1111_s1 }
   0x4   :  { %p871_p2 = pnand %p869_p1, %p866_p0 }
   0x6   :  { %874 = shalt.err (!%p871_p2)
}
   0x7   :  { %s875_s21 = scalar_lea.vmem %s17_s13, 3072  ;;  %p880_p4 = scmp.lt.s32.totalorder %s17_s13, %s17_s13 }
   0x8   :  { %p876_p3 = scmp.ne.s32.totalorder %s17_s13, %s875_s21  ;;  %p881_p5 = scmp.lt.s32.totalorder %s875_s21, %s875_s21 }
   0xa   :  { %p882_p6 = por %p881_p5, %p880_p4 }
   0xc   :  { %p883_p7 = pnand %p882_p6, %p876_p3 }
   0xe   :  { %886 = shalt.err (!%p883_p7)
}
   0xf   :  { %s890_s22 = smov 192   ;;  %s891_s23 = smov 12  }
  0x10   :  { %22 = dma.hbm_to_vmem [thread:$0]  %s1111_s1, 3072, %s17_s13, [#allocation3], %s890_s22, %s890_s22, %s891_s23  }
  0x11   :  { %887 = dma.done.wait [#allocation3], 3072  }
  0x12   :  { %888 = vsyncadd [#allocation3], 4294964224  ;;  %v892_v0 = vmov 0   ;;  %v825_v1 = vld [vmem:[#allocation2 + $0x4] ss:$12 sps:$4 sm:$0xff]   ;;  %v853_v26 = vld [vmem:[%s1110_s0 + $0x8] sm:$0xff]   ;;  %v79_v33 = vlaneseq }
  0x13   :  { %302 = vmatprep.mubr.bf16.mxu0 %v892_v0  ;;  %v827_v2 = vld [vmem:[#allocation2] ss:$12 sps:$4 sm:$0xff]   ;;  %270 = vmatprep.subr.bf16.mxu0 %v825_v1  ;;  %v828_v3 = vld [vmem:[#allocation2 + $0x1c] ss:$12 sps:$4 sm:$0xff]   ;;  %v830_v4 = vld [vmem:[#allocation2 + $0x18] ss:$12 sps:$4 sm:$0xff]  }
  0x14   :  { %271 = vmatpush1.bf16.msra.mxu0 %v827_v2  ;;  %v831_v5 = vld [vmem:[#allocation2 + $0x34] ss:$12 sps:$4 sm:$0xff]   ;;  %v833_v6 = vld [vmem:[#allocation2 + $0x30] ss:$12 sps:$4 sm:$0xff]   ;;  %v834_v7 = vld [vmem:[#allocation2 + $0x4c] ss:$12 sps:$4 sm:$0xff]  }
  0x15   :  { %272 = vmatprep.subr.bf16.mxu0 %v828_v3  ;;  %v836_v8 = vld [vmem:[#allocation2 + $0x48] ss:$12 sps:$4 sm:$0xff]   ;;  %v837_v9 = vld [vmem:[#allocation2 + $0x64] ss:$12 sps:$4 sm:$0xff]   ;;  %v851_v12 = vld [vmem:[#allocation2 + $0x20] ss:$12 sps:$4 sm:$0xff]  }
  0x16   :  { %v849_v10 = vld [vmem:[#allocation2 + $0x8] ss:$12 sps:$4 sm:$0xff]   ;;  %v850_v11 = vld [vmem:[%s1110_s0] sm:$0xff]   ;;  %v854_v17 = vld [vmem:[#allocation2 + $0x50] ss:$12 sps:$4 sm:$0xff]   ;;  %v80_v34 = vshrl.u32 %v79_v33, 7 }
  0x17   :  { %789 = vmatprep.subr.bf16.mxu1 %v849_v10  ;;  %v839_v13 = vld [vmem:[#allocation2 + $0x60] ss:$12 sps:$4 sm:$0xff]   ;;  %805 = vmatprep.mubr.bf16.mxu1 %v850_v11  ;;  %v852_v14 = vld [vmem:[#allocation2 + $0x38] ss:$12 sps:$4 sm:$0xff]   ;;  %v840_v15 = vld [vmem:[#allocation2 + $0x7c] ss:$12 sps:$4 sm:$0xff]  }
  0x18   :  { %273 = vmatpush1.bf16.msra.mxu0 %v830_v4  ;;  %790 = vmatpush3.bf16.msra.mxu1 %v849_v10  ;;  %v842_v16 = vld [vmem:[#allocation2 + $0x78] ss:$12 sps:$4 sm:$0xff]   ;;  %v843_v18 = vld [vmem:[#allocation2 + $0x94] ss:$12 sps:$4 sm:$0xff]   ;;  %v845_v19 = vld [vmem:[#allocation2 + $0x90] ss:$12 sps:$4 sm:$0xff]  }
  0x19   :  { %274 = vmatprep.subr.bf16.mxu0 %v831_v5  ;;  %791 = vmatprep.subr.bf16.mxu1 %v851_v12  ;;  %v855_v20 = vld [vmem:[#allocation2 + $0x68] ss:$12 sps:$4 sm:$0xff]   ;;  %v846_v21 = vld [vmem:[#allocation2 + $0xac] ss:$12 sps:$4 sm:$0xff]   ;;  %v860_v25 = vld [vmem:[#allocation2 + $0xb0] ss:$12 sps:$4 sm:$0xff]  }
  0x1a   :  { %v848_v22 = vld [vmem:[#allocation2 + $0xa8] ss:$12 sps:$4 sm:$0xff]   ;;  %v857_v23 = vld [vmem:[#allocation2 + $0x80] ss:$12 sps:$4 sm:$0xff]   ;;  %v858_v24 = vld [vmem:[#allocation2 + $0x98] ss:$12 sps:$4 sm:$0xff]  }
  0x1b   :  { %v856_v27 = vld [vmem:[%s1110_s0 + $0x10] sm:$0xff]   ;;  %v859_v28 = vld [vmem:[%s1110_s0 + $0x18] sm:$0xff]   ;;  %v861_v29 = vld [vmem:[%s1110_s0 + $0x20] sm:$0xff]   ;;  %v81_v35 = vsub.s32 0, %v80_v34  ;;  %v85_v37 = vsub.s32 1, %v80_v34  ;;  %v89_v49 = vsub.s32 2, %v80_v34 }
  0x1c   :  { %275 = vmatpush1.bf16.msra.mxu0 %v833_v6  ;;  %792 = vmatpush3.bf16.msra.mxu1 %v851_v12  ;;  %v862_v30 = vld [vmem:[%s1110_s0 + $0x28] sm:$0xff]   ;;  %v863_v31 = vld [vmem:[%s1110_s0 + $0x30] sm:$0xff]   ;;  %v864_v32 = vld [vmem:[%s1110_s0 + $0x38] sm:$0xff]  }
  0x1d   :  { %276 = vmatprep.subr.bf16.mxu0 %v834_v7  ;;  %793 = vmatprep.subr.bf16.mxu1 %v852_v14  ;;  %v77_v36 = vld [vmem:[%s1112_s2] sm:$0x7] }
  0x1e   :  { %v960_v38 = vrot.slane %v77_v36, %v81_v35  ;;  %v962_v39 = vrot.slane %v77_v36, %v85_v37  ;;  %v974_v52 = vrot.slane %v77_v36, %v89_v49 }
  0x20   :  { %277 = vmatpush1.bf16.msra.mxu0 %v836_v8  ;;  %794 = vmatpush3.bf16.msra.mxu1 %v852_v14 }
  0x21   :  { %278 = vmatprep.subr.bf16.mxu0 %v837_v9  ;;  %795 = vmatprep.subr.bf16.mxu1 %v854_v17 }
  0x24   :  { %279 = vmatpush1.bf16.msra.mxu0 %v839_v13  ;;  %796 = vmatpush3.bf16.msra.mxu1 %v854_v17 }
  0x25   :  { %280 = vmatprep.subr.bf16.mxu0 %v840_v15  ;;  %797 = vmatprep.subr.bf16.mxu1 %v855_v20 }
  0x28   :  { %281 = vmatpush1.bf16.msra.mxu0 %v842_v16  ;;  %798 = vmatpush3.bf16.msra.mxu1 %v855_v20 }
  0x29   :  { %282 = vmatprep.subr.bf16.mxu0 %v843_v18  ;;  %799 = vmatprep.subr.bf16.mxu1 %v857_v23 }
  0x2c   :  { %283 = vmatpush1.bf16.msra.mxu0 %v845_v19  ;;  %800 = vmatpush3.bf16.msra.mxu1 %v857_v23 }
  0x2d   :  { %284 = vmatprep.subr.bf16.mxu0 %v846_v21  ;;  %801 = vmatprep.subr.bf16.mxu1 %v858_v24 }
  0x30   :  { %285 = vmatpush1.bf16.msra.mxu0 %v848_v22  ;;  %802 = vmatpush3.bf16.msra.mxu1 %v858_v24 }
  0x31   :  { %803 = vmatprep.subr.bf16.mxu1 %v860_v25 }
  0x33   :  { %303 = vmatmul.mubr.bf16.vlgmr.msra.gmra.mrb[0].mxu0 %v850_v11 }
  0x34   :  { %312 = vmatprep.mubr.bf16.mxu0 %v892_v0  ;;  %804 = vmatpush3.bf16.msra.mxu1 %v860_v25 }
  0x37   :  { %806 = vmatmul.mubr.bf16.vlgmr.msra.gmra.mrb[0].mxu1 %v853_v26 }
  0x38   :  { %809 = vmatprep.mubr.bf16.mxu1 %v856_v27 }
  0x3b   :  { %313 = vmatmul.mubr.bf16.gmra.mrb[4].mxu0 %v853_v26 }
  0x3c   :  { %322 = vmatprep.mubr.bf16.mxu0 %v892_v0 }
  0x3f   :  { %810 = vmatmul.mubr.bf16.gmra.mrb[4].mxu1 %v859_v28 }
  0x40   :  { %813 = vmatprep.mubr.bf16.mxu1 %v861_v29 }
  0x43   :  { %323 = vmatmul.mubr.bf16.gmra.mrb[8].mxu0 %v856_v27 }
  0x44   :  { %332 = vmatprep.mubr.bf16.mxu0 %v892_v0 }
  0x47   :  { %814 = vmatmul.mubr.bf16.gmra.mrb[8].mxu1 %v862_v30 }
  0x48   :  { %817 = vmatprep.mubr.bf16.mxu1 %v863_v31 }
  0x4b   :  { %333 = vmatmul.mubr.bf16.gmra.mrb[12].mxu0 %v859_v28 }
  0x4c   :  { %342 = vmatprep.mubr.bf16.mxu0 %v892_v0 }
  0x4f   :  { %818 = vmatmul.mubr.bf16.gmra.mrb[12].mxu1 %v864_v32 }
  0x53   :  { %343 = vmatmul.mubr.bf16.gmra.mrb[16].mxu0 %v861_v29 }
  0x54   :  { %352 = vmatprep.mubr.bf16.mxu0 %v892_v0 }
  0x5b   :  { %353 = vmatmul.mubr.bf16.gmra.mrb[20].mxu0 %v862_v30 }
  0x5c   :  { %362 = vmatprep.mubr.bf16.mxu0 %v892_v0 }
  0x63   :  { %363 = vmatmul.mubr.bf16.gmra.mrb[24].mxu0 %v863_v31 }
  0x64   :  { %372 = vmatprep.mubr.bf16.mxu0 %v892_v0 }
  0x6b   :  { %373 = vmatmul.mubr.bf16.gmra.mrb[28].mxu0 %v864_v32 }
 0x106   :  { %v304_v40 = vpop.f32.mrb[0].mxu0 }
 0x107   :  { %v305_v41 = vadd.f32 %v304_v40, %v960_v38  ;;  %v306_v42 = vpop.f32.mrb[1].mxu0 }
 0x108   :  { %v307_v43 = vadd.f32 %v306_v42, %v962_v39  ;;  %v308_v44 = vpop.f32.mrb[2].mxu0 }
 0x109   :  { %v309_v45 = vadd.f32 %v308_v44, %v960_v38  ;;  %v310_v46 = vpop.f32.mrb[3].mxu0 }
 0x10a   :  { %v741_v47 = vpack.c.bf16 %v307_v43, %v305_v41  ;;  %v311_v48 = vadd.f32 %v310_v46, %v962_v39  ;;  %v807_v59 = vpop.f32.mrb[0].mxu1 }
 0x10b   :  { %v426_v62 = vadd.f32 %v807_v59, %v974_v52  ;;  %v417_v63 = vpop.f32.mrb[1].mxu1 }
 0x10c   :  { %640 = vst [vmem:[%s1113_s3] sm:$0xff] %v741_v47  ;;  %v743_v50 = vpack.c.bf16 %v311_v48, %v309_v45  ;;  %v418_v0 = vadd.f32 %v417_v63, %v974_v52  ;;  %v808_v1 = vpop.f32.mrb[2].mxu1 }
 0x10d   :  { %v746_v3 = vpack.c.bf16 %v426_v62, %v426_v62  ;;  %v429_v4 = vadd.f32 %v808_v1, %v974_v52  ;;  %v420_v5 = vpop.f32.mrb[3].mxu1 }
 0x10e   :  { %642 = vst [vmem:[%s1113_s3 + $0xc] sm:$0xff] %v743_v50  ;;  %v314_v51 = vpop.f32.mrb[4].mxu0  ;;  %v742_v6 = vpack.c.bf16 %v418_v0, %v418_v0  ;;  %v421_v7 = vadd.f32 %v420_v5, %v974_v52 }
 0x10f   :  { %v315_v53 = vadd.f32 %v314_v51, %v960_v38  ;;  %v316_v54 = vpop.f32.mrb[5].mxu0  ;;  %645 = vst [vmem:[%s1113_s3 + $0x20] sm:$0xf] %v746_v3  ;;  %v748_v9 = vpack.c.bf16 %v429_v4, %v429_v4 }
 0x110   :  { %v317_v55 = vadd.f32 %v316_v54, %v962_v39  ;;  %v318_v56 = vpop.f32.mrb[6].mxu0  ;;  %641 = vst [vmem:[%s1113_s3 + $0x8] sm:$0xf] %v742_v6  ;;  %v744_v12 = vpack.c.bf16 %v421_v7, %v421_v7 }
 0x111   :  { %v319_v57 = vadd.f32 %v318_v56, %v960_v38  ;;  %v320_v58 = vpop.f32.mrb[7].mxu0  ;;  %647 = vst [vmem:[%s1113_s3 + $0x2c] sm:$0xf] %v748_v9 }
 0x112   :  { %v745_v60 = vpack.c.bf16 %v317_v55, %v315_v53  ;;  %v321_v61 = vadd.f32 %v320_v58, %v962_v39  ;;  %643 = vst [vmem:[%s1113_s3 + $0x14] sm:$0xf] %v744_v12  ;;  %v811_v17 = vpop.f32.mrb[4].mxu1 }
 0x113   :  { %v442_v20 = vadd.f32 %v811_v17, %v974_v52  ;;  %v433_v21 = vpop.f32.mrb[5].mxu1 }
 0x114   :  { %644 = vst [vmem:[%s1113_s3 + $0x18] sm:$0xff] %v745_v60  ;;  %v747_v2 = vpack.c.bf16 %v321_v61, %v319_v57  ;;  %v434_v22 = vadd.f32 %v433_v21, %v974_v52  ;;  %v812_v23 = vpop.f32.mrb[6].mxu1 }
 0x115   :  { %v754_v25 = vpack.c.bf16 %v442_v20, %v442_v20  ;;  %v445_v26 = vadd.f32 %v812_v23, %v974_v52  ;;  %v436_v27 = vpop.f32.mrb[7].mxu1 }
 0x116   :  { %646 = vst [vmem:[%s1113_s3 + $0x24] sm:$0xff] %v747_v2  ;;  %v324_v8 = vpop.f32.mrb[8].mxu0  ;;  %v750_v28 = vpack.c.bf16 %v434_v22, %v434_v22  ;;  %v437_v29 = vadd.f32 %v436_v27, %v974_v52 }
 0x117   :  { %v325_v10 = vadd.f32 %v324_v8, %v960_v38  ;;  %v326_v11 = vpop.f32.mrb[9].mxu0  ;;  %653 = vst [vmem:[%s1113_s3 + $0x50] sm:$0xf] %v754_v25  ;;  %v756_v31 = vpack.c.bf16 %v445_v26, %v445_v26 }
 0x118   :  { %v327_v13 = vadd.f32 %v326_v11, %v962_v39  ;;  %v328_v14 = vpop.f32.mrb[10].mxu0  ;;  %649 = vst [vmem:[%s1113_s3 + $0x38] sm:$0xf] %v750_v28  ;;  %v752_v34 = vpack.c.bf16 %v437_v29, %v437_v29 }
 0x119   :  { %v329_v15 = vadd.f32 %v328_v14, %v960_v38  ;;  %v330_v16 = vpop.f32.mrb[11].mxu0  ;;  %655 = vst [vmem:[%s1113_s3 + $0x5c] sm:$0xf] %v756_v31 }
 0x11a   :  { %v749_v18 = vpack.c.bf16 %v327_v13, %v325_v10  ;;  %v331_v19 = vadd.f32 %v330_v16, %v962_v39  ;;  %651 = vst [vmem:[%s1113_s3 + $0x44] sm:$0xf] %v752_v34  ;;  %v815_v41 = vpop.f32.mrb[8].mxu1 }
 0x11b   :  { %v458_v44 = vadd.f32 %v815_v41, %v974_v52  ;;  %v449_v45 = vpop.f32.mrb[9].mxu1 }
 0x11c   :  { %648 = vst [vmem:[%s1113_s3 + $0x30] sm:$0xff] %v749_v18  ;;  %v751_v24 = vpack.c.bf16 %v331_v19, %v329_v15  ;;  %v450_v46 = vadd.f32 %v449_v45, %v974_v52  ;;  %v816_v47 = vpop.f32.mrb[10].mxu1 }
 0x11d   :  { %v762_v49 = vpack.c.bf16 %v458_v44, %v458_v44  ;;  %v461_v50 = vadd.f32 %v816_v47, %v974_v52  ;;  %v452_v51 = vpop.f32.mrb[11].mxu1 }
 0x11e   :  { %650 = vst [vmem:[%s1113_s3 + $0x3c] sm:$0xff] %v751_v24  ;;  %v334_v30 = vpop.f32.mrb[12].mxu0  ;;  %v758_v53 = vpack.c.bf16 %v450_v46, %v450_v46  ;;  %v453_v54 = vadd.f32 %v452_v51, %v974_v52 }
 0x11f   :  { %v335_v32 = vadd.f32 %v334_v30, %v960_v38  ;;  %v336_v33 = vpop.f32.mrb[13].mxu0  ;;  %661 = vst [vmem:[%s1113_s3 + $0x80] sm:$0xf] %v762_v49  ;;  %v764_v56 = vpack.c.bf16 %v461_v50, %v461_v50 }
 0x120   :  { %v337_v35 = vadd.f32 %v336_v33, %v962_v39  ;;  %v338_v36 = vpop.f32.mrb[14].mxu0  ;;  %657 = vst [vmem:[%s1113_s3 + $0x68] sm:$0xf] %v758_v53  ;;  %v760_v59 = vpack.c.bf16 %v453_v54, %v453_v54 }
 0x121   :  { %v339_v37 = vadd.f32 %v338_v36, %v960_v38  ;;  %v340_v40 = vpop.f32.mrb[15].mxu0  ;;  %663 = vst [vmem:[%s1113_s3 + $0x8c] sm:$0xf] %v764_v56 }
 0x122   :  { %v753_v42 = vpack.c.bf16 %v337_v35, %v335_v32  ;;  %v341_v43 = vadd.f32 %v340_v40, %v962_v39  ;;  %659 = vst [vmem:[%s1113_s3 + $0x74] sm:$0xf] %v760_v59  ;;  %v819_v0 = vpop.f32.mrb[12].mxu1 }
 0x123   :  { %v474_v3 = vadd.f32 %v819_v0, %v974_v52  ;;  %v465_v4 = vpop.f32.mrb[13].mxu1 }
 0x124   :  { %652 = vst [vmem:[%s1113_s3 + $0x48] sm:$0xff] %v753_v42  ;;  %v755_v48 = vpack.c.bf16 %v341_v43, %v339_v37  ;;  %v466_v5 = vadd.f32 %v465_v4, %v974_v52  ;;  %v820_v6 = vpop.f32.mrb[14].mxu1 }
 0x125   :  { %v770_v8 = vpack.c.bf16 %v474_v3, %v474_v3  ;;  %v477_v9 = vadd.f32 %v820_v6, %v974_v52  ;;  %v468_v10 = vpop.f32.mrb[15].mxu1 }
 0x126   :  { %654 = vst [vmem:[%s1113_s3 + $0x54] sm:$0xff] %v755_v48  ;;  %v344_v55 = vpop.f32.mrb[16].mxu0  ;;  %v766_v11 = vpack.c.bf16 %v466_v5, %v466_v5  ;;  %v469_v12 = vadd.f32 %v468_v10, %v974_v52 }
 0x127   :  { %v345_v57 = vadd.f32 %v344_v55, %v960_v38  ;;  %v346_v58 = vpop.f32.mrb[17].mxu0  ;;  %669 = vst [vmem:[%s1113_s3 + $0xb0] sm:$0xf] %v770_v8  ;;  %v772_v14 = vpack.c.bf16 %v477_v9, %v477_v9 }
 0x128   :  { %v347_v60 = vadd.f32 %v346_v58, %v962_v39  ;;  %v348_v61 = vpop.f32.mrb[18].mxu0  ;;  %665 = vst [vmem:[%s1113_s3 + $0x98] sm:$0xf] %v766_v11  ;;  %v768_v17 = vpack.c.bf16 %v469_v12, %v469_v12 }
 0x129   :  { %v349_v62 = vadd.f32 %v348_v61, %v960_v38  ;;  %v350_v63 = vpop.f32.mrb[19].mxu0  ;;  %671 = vst [vmem:[%s1113_s3 + $0xbc] sm:$0xf] %v772_v14 }
 0x12a   :  { %v757_v1 = vpack.c.bf16 %v347_v60, %v345_v57  ;;  %v351_v2 = vadd.f32 %v350_v63, %v962_v39  ;;  %667 = vst [vmem:[%s1113_s3 + $0xa4] sm:$0xf] %v768_v17 }
 0x12c   :  { %656 = vst [vmem:[%s1113_s3 + $0x60] sm:$0xff] %v757_v1  ;;  %v759_v7 = vpack.c.bf16 %v351_v2, %v349_v62 }
 0x12e   :  { %658 = vst [vmem:[%s1113_s3 + $0x6c] sm:$0xff] %v759_v7  ;;  %v354_v13 = vpop.f32.mrb[20].mxu0 }
 0x12f   :  { %v355_v15 = vadd.f32 %v354_v13, %v960_v38  ;;  %v356_v16 = vpop.f32.mrb[21].mxu0 }
 0x130   :  { %v357_v52 = vadd.f32 %v356_v16, %v962_v39  ;;  %v358_v18 = vpop.f32.mrb[22].mxu0 }
 0x131   :  { %v359_v19 = vadd.f32 %v358_v18, %v960_v38  ;;  %v360_v20 = vpop.f32.mrb[23].mxu0 }
 0x132   :  { %v761_v21 = vpack.c.bf16 %v357_v52, %v355_v15  ;;  %v361_v22 = vadd.f32 %v360_v20, %v962_v39 }
 0x134   :  { %660 = vst [vmem:[%s1113_s3 + $0x78] sm:$0xff] %v761_v21  ;;  %v763_v23 = vpack.c.bf16 %v361_v22, %v359_v19 }
 0x136   :  { %662 = vst [vmem:[%s1113_s3 + $0x84] sm:$0xff] %v763_v23  ;;  %v364_v24 = vpop.f32.mrb[24].mxu0 }
 0x137   :  { %v365_v25 = vadd.f32 %v364_v24, %v960_v38  ;;  %v366_v26 = vpop.f32.mrb[25].mxu0 }
 0x138   :  { %v367_v27 = vadd.f32 %v366_v26, %v962_v39  ;;  %v368_v28 = vpop.f32.mrb[26].mxu0 }
 0x139   :  { %v369_v29 = vadd.f32 %v368_v28, %v960_v38  ;;  %v370_v30 = vpop.f32.mrb[27].mxu0 }
 0x13a   :  { %v765_v31 = vpack.c.bf16 %v367_v27, %v365_v25  ;;  %v371_v32 = vadd.f32 %v370_v30, %v962_v39 }
 0x13c   :  { %664 = vst [vmem:[%s1113_s3 + $0x90] sm:$0xff] %v765_v31  ;;  %v767_v33 = vpack.c.bf16 %v371_v32, %v369_v29 }
 0x13e   :  { %666 = vst [vmem:[%s1113_s3 + $0x9c] sm:$0xff] %v767_v33  ;;  %v374_v34 = vpop.f32.mrb[28].mxu0 }
 0x13f   :  { %v375_v35 = vadd.f32 %v374_v34, %v960_v38  ;;  %v376_v36 = vpop.f32.mrb[29].mxu0 }
 0x140   :  { %v377_v37 = vadd.f32 %v376_v36, %v962_v39  ;;  %v378_v40 = vpop.f32.mrb[30].mxu0 }
 0x141   :  { %v379_v41 = vadd.f32 %v378_v40, %v960_v38  ;;  %v380_v42 = vpop.f32.mrb[31].mxu0 }
 0x142   :  { %v769_v43 = vpack.c.bf16 %v377_v37, %v375_v35  ;;  %v381_v44 = vadd.f32 %v380_v42, %v962_v39 }
 0x144   :  { %668 = vst [vmem:[%s1113_s3 + $0xa8] sm:$0xff] %v769_v43  ;;  %v771_v45 = vpack.c.bf16 %v381_v44, %v379_v41 }
 0x146   :  { %670 = vst [vmem:[%s1113_s3 + $0xb4] sm:$0xff] %v771_v45 }
 0x147   :  { %676 = vsyncpa [#allocation3], 1 }

// kernel: gru_model_forward.9
= control target key start
LH: loop header
LB: loop body
LE: loop exit
PB: predicated region body
PF: predicated region fallthrough
CT: control target
= control target key end

     0   :  { %v2858_v3 = vmov 0   ;;  %s4545_s1 = inlined_call_operand.vmem [shape: bf16[128,1024], index: 1, kind: input, shape index: {}]   ;;  %s4546_s0 = inlined_call_operand.vmem [shape: bf16[128,128], index: 0, kind: input, shape index: {}]   ;;  %s4547_s3 = inlined_call_operand.vmem [shape: bf16[1024,128], index: 3, kind: input, shape index: {}]   ;;  %s4548_s2 = inlined_call_operand.vmem [shape: f32[1,1024], index: 2, kind: input, shape index: {}]   ;;  %s4549_s5 = inlined_call_operand.<no memory space> [shape: f32[1], index: 5, kind: input, shape index: {}]   ;;  %s4550_s4 = inlined_call_operand.vmem [shape: f32[1,128], index: 4, kind: input, shape index: {}]   ;;  %s4551_s6 = inlined_call_operand.vmem [shape: f32[128,128], index: 6, kind: output, shape index: {}]  }
   0x1   :  { %v42_v0 = vld [vmem:[%s4545_s1] sm:$0xff]  ;;  %v43_v2 = vld [vmem:[%s4545_s1 + $0x8] sm:$0xff]  ;;  %548 = vmatprep.mubr.bf16.mxu0 %v2858_v3  ;;  %661 = vmatprep.mubr.bf16.mxu1 %v2858_v3  ;;  %v44_v63 = vld [vmem:[%s4545_s1 + $0x10] sm:$0xff] }
   0x2   :  { %v46_v1 = vld [vmem:[%s4545_s1 + $0x20] sm:$0xff]  ;;  %v47_v5 = vld [vmem:[%s4545_s1 + $0x28] sm:$0xff] }
   0x3   :  { %v2401_v4 = vcombine.high %v42_v0, %v46_v1  ;;  %v2400_v6 = vcombine.low %v42_v0, %v46_v1  ;;  %v50_v7 = vld [vmem:[%s4545_s1 + $0x40] sm:$0xff]  ;;  %v2403_v9 = vcombine.high %v43_v2, %v47_v5  ;;  %v2402_v10 = vcombine.low %v43_v2, %v47_v5  ;;  %v51_v12 = vld [vmem:[%s4545_s1 + $0x48] sm:$0xff]  ;;  %v48_v0 = vld [vmem:[%s4545_s1 + $0x30] sm:$0xff] }
   0x4   :  { %v54_v8 = vld [vmem:[%s4545_s1 + $0x60] sm:$0xff]  ;;  %v55_v13 = vld [vmem:[%s4545_s1 + $0x68] sm:$0xff]  ;;  %v45_v1 = vld [vmem:[%s4545_s1 + $0x18] sm:$0xff] }
   0x5   :  { %v2409_v11 = vcombine.high %v50_v7, %v54_v8  ;;  %v58_v14 = vld [vmem:[%s4545_s1 + $0x80] sm:$0xff]  ;;  %516 = vmatprep.subr.bf16.mxu0 %v2401_v4  ;;  %v2411_v15 = vcombine.high %v51_v12, %v55_v13  ;;  %v59_v17 = vld [vmem:[%s4545_s1 + $0x88] sm:$0xff]  ;;  %629 = vmatprep.subr.bf16.mxu1 %v2403_v9  ;;  %v2408_v19 = vcombine.low %v50_v7, %v54_v8  ;;  %v49_v2 = vld [vmem:[%s4545_s1 + $0x38] sm:$0xff] }
   0x6   :  { %v62_v16 = vld [vmem:[%s4545_s1 + $0xa0] sm:$0xff]  ;;  %v63_v18 = vld [vmem:[%s4545_s1 + $0xa8] sm:$0xff]  ;;  %517 = vmatpush1.bf16.msra.mxu0 %v2400_v6  ;;  %630 = vmatpush1.bf16.msra.mxu1 %v2402_v10  ;;  %v2410_v20 = vcombine.low %v51_v12, %v55_v13  ;;  %v2405_v7 = vcombine.high %v44_v63, %v48_v0  ;;  %v52_v8 = vld [vmem:[%s4545_s1 + $0x50] sm:$0xff]  ;;  %v2407_v10 = vcombine.high %v45_v1, %v49_v2 }
   0x7   :  { %518 = vmatprep.subr.bf16.mxu0 %v2409_v11  ;;  %v2417_v21 = vcombine.high %v58_v14, %v62_v16  ;;  %631 = vmatprep.subr.bf16.mxu1 %v2411_v15  ;;  %v2419_v22 = vcombine.high %v59_v17, %v63_v18  ;;  %v66_v23 = vld [vmem:[%s4545_s1 + $0xc0] sm:$0xff]  ;;  %v67_v25 = vld [vmem:[%s4545_s1 + $0xc8] sm:$0xff]  ;;  %v2416_v27 = vcombine.low %v58_v14, %v62_v16  ;;  %v56_v9 = vld [vmem:[%s4545_s1 + $0x70] sm:$0xff] }
   0x8   :  { %v70_v24 = vld [vmem:[%s4545_s1 + $0xe0] sm:$0xff]  ;;  %v71_v26 = vld [vmem:[%s4545_s1 + $0xe8] sm:$0xff]  ;;  %v2418_v28 = vcombine.low %v59_v17, %v63_v18  ;;  %v53_v11 = vld [vmem:[%s4545_s1 + $0x58] sm:$0xff]  ;;  %v2404_v13 = vcombine.low %v44_v63, %v48_v0  ;;  %v2406_v15 = vcombine.low %v45_v1, %v49_v2  ;;  %v2413_v17 = vcombine.high %v52_v8, %v56_v9 }
   0x9   :  { %v2425_v29 = vcombine.high %v66_v23, %v70_v24  ;;  %v2427_v30 = vcombine.high %v67_v25, %v71_v26  ;;  %v74_v31 = vld [vmem:[%s4545_s1 + $0x100] sm:$0xff]  ;;  %v75_v33 = vld [vmem:[%s4545_s1 + $0x108] sm:$0xff]  ;;  %v2424_v35 = vcombine.low %v66_v23, %v70_v24  ;;  %v2426_v36 = vcombine.low %v67_v25, %v71_v26  ;;  %v57_v12 = vld [vmem:[%s4545_s1 + $0x78] sm:$0xff] }
   0xa   :  { %519 = vmatpush1.bf16.msra.mxu0 %v2408_v19  ;;  %632 = vmatpush1.bf16.msra.mxu1 %v2410_v20  ;;  %v78_v32 = vld [vmem:[%s4545_s1 + $0x120] sm:$0xff]  ;;  %v79_v34 = vld [vmem:[%s4545_s1 + $0x128] sm:$0xff]  ;;  %v60_v14 = vld [vmem:[%s4545_s1 + $0x90] sm:$0xff]  ;;  %v2415_v19 = vcombine.high %v53_v11, %v57_v12  ;;  %v2414_v23 = vcombine.low %v53_v11, %v57_v12 }
   0xb   :  { %520 = vmatprep.subr.bf16.mxu0 %v2417_v21  ;;  %633 = vmatprep.subr.bf16.mxu1 %v2419_v22  ;;  %v2433_v37 = vcombine.high %v74_v31, %v78_v32  ;;  %v2435_v38 = vcombine.high %v75_v33, %v79_v34  ;;  %v82_v39 = vld [vmem:[%s4545_s1 + $0x140] sm:$0xff]  ;;  %v83_v41 = vld [vmem:[%s4545_s1 + $0x148] sm:$0xff]  ;;  %v2432_v43 = vcombine.low %v74_v31, %v78_v32  ;;  %v64_v16 = vld [vmem:[%s4545_s1 + $0xb0] sm:$0xff] }
   0xc   :  { %v86_v40 = vld [vmem:[%s4545_s1 + $0x160] sm:$0xff]  ;;  %v87_v42 = vld [vmem:[%s4545_s1 + $0x168] sm:$0xff]  ;;  %v2434_v44 = vcombine.low %v75_v33, %v79_v34  ;;  %v61_v18 = vld [vmem:[%s4545_s1 + $0x98] sm:$0xff]  ;;  %v2412_v21 = vcombine.low %v52_v8, %v56_v9  ;;  %v2421_v24 = vcombine.high %v60_v14, %v64_v16 }
   0xd   :  { %v2441_v45 = vcombine.high %v82_v39, %v86_v40  ;;  %v2443_v46 = vcombine.high %v83_v41, %v87_v42  ;;  %v90_v47 = vld [vmem:[%s4545_s1 + $0x180] sm:$0xff]  ;;  %v91_v49 = vld [vmem:[%s4545_s1 + $0x188] sm:$0xff]  ;;  %v2440_v51 = vcombine.low %v82_v39, %v86_v40  ;;  %v2442_v52 = vcombine.low %v83_v41, %v87_v42  ;;  %v65_v20 = vld [vmem:[%s4545_s1 + $0xb8] sm:$0xff] }
   0xe   :  { %521 = vmatpush1.bf16.msra.mxu0 %v2416_v27  ;;  %634 = vmatpush1.bf16.msra.mxu1 %v2418_v28  ;;  %v94_v48 = vld [vmem:[%s4545_s1 + $0x1a0] sm:$0xff]  ;;  %v95_v50 = vld [vmem:[%s4545_s1 + $0x1a8] sm:$0xff]  ;;  %v68_v25 = vld [vmem:[%s4545_s1 + $0xd0] sm:$0xff]  ;;  %v2423_v26 = vcombine.high %v61_v18, %v65_v20  ;;  %v2422_v32 = vcombine.low %v61_v18, %v65_v20 }
   0xf   :  { %522 = vmatprep.subr.bf16.mxu0 %v2425_v29  ;;  %635 = vmatprep.subr.bf16.mxu1 %v2427_v30  ;;  %v2449_v53 = vcombine.high %v90_v47, %v94_v48  ;;  %v98_v54 = vld [vmem:[%s4545_s1 + $0x1c0] sm:$0xff]  ;;  %v2451_v55 = vcombine.high %v91_v49, %v95_v50  ;;  %v99_v57 = vld [vmem:[%s4545_s1 + $0x1c8] sm:$0xff]  ;;  %v2448_v59 = vcombine.low %v90_v47, %v94_v48  ;;  %v72_v27 = vld [vmem:[%s4545_s1 + $0xf0] sm:$0xff] }
  0x10   :  { %v102_v56 = vld [vmem:[%s4545_s1 + $0x1e0] sm:$0xff]  ;;  %v103_v58 = vld [vmem:[%s4545_s1 + $0x1e8] sm:$0xff]  ;;  %v2450_v60 = vcombine.low %v91_v49, %v95_v50  ;;  %v69_v28 = vld [vmem:[%s4545_s1 + $0xd8] sm:$0xff]  ;;  %v2420_v30 = vcombine.low %v60_v14, %v64_v16  ;;  %v2429_v33 = vcombine.high %v68_v25, %v72_v27  ;;  %v2428_v39 = vcombine.low %v68_v25, %v72_v27 }
  0x11   :  { %v2457_v61 = vcombine.high %v98_v54, %v102_v56  ;;  %v2459_v62 = vcombine.high %v99_v57, %v103_v58  ;;  %v2456_v4 = vcombine.low %v98_v54, %v102_v56  ;;  %v2458_v5 = vcombine.low %v99_v57, %v103_v58  ;;  %v3007_v6 = vld [vmem:[%s4546_s0] sm:$0xff]   ;;  %v3039_v22 = vld [vmem:[%s4546_s0 + $0x8] sm:$0xff]   ;;  %v73_v29 = vld [vmem:[%s4545_s1 + $0xf8] sm:$0xff] }
  0x12   :  { %523 = vmatpush1.bf16.msra.mxu0 %v2424_v35  ;;  %636 = vmatpush1.bf16.msra.mxu1 %v2426_v36  ;;  %v76_v31 = vld [vmem:[%s4545_s1 + $0x110] sm:$0xff]  ;;  %v2431_v35 = vcombine.high %v69_v28, %v73_v29  ;;  %v77_v36 = vld [vmem:[%s4545_s1 + $0x118] sm:$0xff]  ;;  %v2430_v41 = vcombine.low %v69_v28, %v73_v29  ;;  %v2796_v9 = vld [vmem:[%s4547_s3 + $0xc0] sm:$0xff]  }
  0x13   :  { %524 = vmatprep.subr.bf16.mxu0 %v2433_v37  ;;  %637 = vmatprep.subr.bf16.mxu1 %v2435_v38  ;;  %v80_v34 = vld [vmem:[%s4545_s1 + $0x130] sm:$0xff]  ;;  %v81_v37 = vld [vmem:[%s4545_s1 + $0x138] sm:$0xff]  ;;  %v3142_v11 = vld [vmem:[%s4546_s0 + $0x28] sm:$0xff]  }
  0x14   :  { %v3073_v38 = vld [vmem:[%s4546_s0 + $0x10] sm:$0xff]   ;;  %v2437_v42 = vcombine.high %v76_v31, %v80_v34  ;;  %v2436_v47 = vcombine.low %v76_v31, %v80_v34  ;;  %v2438_v49 = vcombine.low %v77_v36, %v81_v37  ;;  %v97_v54 = vld [vmem:[%s4545_s1 + $0x1b8] sm:$0xff]  ;;  %v2795_v14 = vld [vmem:[%s4547_s3] sm:$0xff]  }
  0x15   :  { %v84_v40 = vld [vmem:[%s4545_s1 + $0x150] sm:$0xff]  ;;  %v105_v63 = vld [vmem:[%s4545_s1 + $0x1f8] sm:$0xff]  ;;  %v2798_v16 = vld [vmem:[%s4547_s3 + $0x48] sm:$0xff]  }
  0x16   :  { %525 = vmatpush1.bf16.msra.mxu0 %v2432_v43  ;;  %638 = vmatpush1.bf16.msra.mxu1 %v2434_v44  ;;  %v88_v43 = vld [vmem:[%s4545_s1 + $0x170] sm:$0xff]  ;;  %v2439_v44 = vcombine.high %v77_v36, %v81_v37  ;;  %v2799_v18 = vld [vmem:[%s4547_s3 + $0x8] sm:$0xff]   ;;  %v2808_v25 = vld [vmem:[%s4547_s3 + $0xd8] sm:$0xff]  }
  0x17   :  { %526 = vmatprep.subr.bf16.mxu0 %v2441_v45  ;;  %639 = vmatprep.subr.bf16.mxu1 %v2443_v46  ;;  %v85_v45 = vld [vmem:[%s4545_s1 + $0x158] sm:$0xff]  ;;  %v92_v48 = vld [vmem:[%s4545_s1 + $0x190] sm:$0xff]  ;;  %v2445_v50 = vcombine.high %v84_v40, %v88_v43  ;;  %v2444_v56 = vcombine.low %v84_v40, %v88_v43  ;;  %v2810_v28 = vld [vmem:[%s4547_s3 + $0x60] sm:$0xff]  }
  0x18   :  { %v89_v46 = vld [vmem:[%s4545_s1 + $0x178] sm:$0xff]  ;;  %v100_v57 = vld [vmem:[%s4545_s1 + $0x1d0] sm:$0xff]  ;;  %v2811_v29 = vld [vmem:[%s4547_s3 + $0x20] sm:$0xff]  }
  0x19   :  { %v2446_v58 = vcombine.low %v85_v45, %v89_v46  ;;  %v3151_v12 = vld [vmem:[%s4546_s0 + $0x30] sm:$0xff]   ;;  %v2809_v27 = vld [vmem:[%s4547_s3 + $0x98] sm:$0xff]   ;;  %v2814_v31 = vld [vmem:[%s4547_s3 + $0x68] sm:$0xff]  }
  0x1a   :  { %527 = vmatpush1.bf16.msra.mxu0 %v2440_v51  ;;  %640 = vmatpush1.bf16.msra.mxu1 %v2442_v52  ;;  %v96_v51 = vld [vmem:[%s4545_s1 + $0x1b0] sm:$0xff]  ;;  %v2447_v52 = vcombine.high %v85_v45, %v89_v46  ;;  %v2817_v34 = vld [vmem:[%s4547_s3 + $0xa8] sm:$0xff]   ;;  %v2824_v40 = vld [vmem:[%s4547_s3 + $0xf8] sm:$0xff]   ;;  %v108_v45 = vlaneseq }
  0x1b   :  { %528 = vmatprep.subr.bf16.mxu0 %v2449_v53  ;;  %641 = vmatprep.subr.bf16.mxu1 %v2451_v55  ;;  %v93_v53 = vld [vmem:[%s4545_s1 + $0x198] sm:$0xff]  ;;  %v2452_v0 = vcombine.low %v92_v48, %v96_v51  ;;  %v2802_v20 = vld [vmem:[%s4547_s3 + $0x50] sm:$0xff]   ;;  %v2826_v43 = vld [vmem:[%s4547_s3 + $0x140] sm:$0xff]  }
  0x1c   :  { %v3106_v55 = vld [vmem:[%s4546_s0 + $0x18] sm:$0xff]   ;;  %v2454_v1 = vcombine.low %v93_v53, %v97_v54  ;;  %v2820_v36 = vld [vmem:[%s4547_s3 + $0xf0] sm:$0xff]   ;;  %v3292_v46 = vshrl.u32 %v108_v45, 7 }
  0x1d   :  { %v2819_v37 = vld [vmem:[%s4547_s3 + $0x30] sm:$0xff]  }
  0x1e   :  { %529 = vmatpush1.bf16.msra.mxu0 %v2448_v59  ;;  %642 = vmatpush1.bf16.msra.mxu1 %v2450_v60  ;;  %v2453_v59 = vcombine.high %v92_v48, %v96_v51  ;;  %v104_v60 = vld [vmem:[%s4545_s1 + $0x1f0] sm:$0xff]  ;;  %v3298_v48 = vld [vmem:[%s4548_s2] sm:$0xff] }
  0x1f   :  { %530 = vmatprep.subr.bf16.mxu0 %v2457_v61  ;;  %643 = vmatprep.subr.bf16.mxu1 %v2459_v62  ;;  %v2455_v61 = vcombine.high %v93_v53, %v97_v54  ;;  %v101_v62 = vld [vmem:[%s4545_s1 + $0x1d8] sm:$0xff]  ;;  %v2461_v2 = vcombine.high %v100_v57, %v104_v60  ;;  %v2460_v8 = vcombine.low %v100_v57, %v104_v60 }
  0x22   :  { %531 = vmatpush1.bf16.msra.mxu0 %v2456_v4  ;;  %644 = vmatpush1.bf16.msra.mxu1 %v2458_v5  ;;  %v2463_v4 = vcombine.high %v101_v62, %v105_v63  ;;  %v2794_v5 = vld [vmem:[%s4547_s3 + $0x40] sm:$0xff]  }
  0x23   :  { %742 = vmatprep.subr.bf16.mxu0 %v2405_v7  ;;  %855 = vmatprep.subr.bf16.mxu1 %v2407_v10  ;;  %v3130_v7 = vld [vmem:[%s4546_s0 + $0x20] sm:$0xff]   ;;  %v2462_v10 = vcombine.low %v101_v62, %v105_v63 }
  0x25   :  { %549 = vmatmul.mubr.bf16.vlgmr.msra.gmra.mrb[0].mxu0 %v3007_v6  ;;  %662 = vmatmul.mubr.bf16.vlgmr.msra.gmra.mrb[0].mxu1 %v3007_v6 }
  0x26   :  { %743 = vmatpush1.bf16.msra.mxu0 %v2404_v13  ;;  %856 = vmatpush1.bf16.msra.mxu1 %v2406_v15  ;;  %v3160_v13 = vld [vmem:[%s4546_s0 + $0x38] sm:$0xff]   ;;  %v2797_v15 = vld [vmem:[%s4547_s3 + $0x80] sm:$0xff]  }
  0x27   :  { %558 = vmatprep.mubr.bf16.mxu0 %v2858_v3  ;;  %671 = vmatprep.mubr.bf16.mxu1 %v2858_v3 }
  0x28   :  { %744 = vmatprep.subr.bf16.mxu0 %v2413_v17  ;;  %857 = vmatprep.subr.bf16.mxu1 %v2415_v19  ;;  %v2800_v17 = vld [vmem:[%s4547_s3 + $0xc8] sm:$0xff]  }
  0x29   :  { %v2801_v19 = vld [vmem:[%s4547_s3 + $0x88] sm:$0xff]  }
  0x2a   :  { %745 = vmatpush1.bf16.msra.mxu0 %v2412_v21  ;;  %858 = vmatpush1.bf16.msra.mxu1 %v2414_v23  ;;  %v2803_v21 = vld [vmem:[%s4547_s3 + $0x10] sm:$0xff]  }
  0x2b   :  { %746 = vmatprep.subr.bf16.mxu0 %v2421_v24  ;;  %859 = vmatprep.subr.bf16.mxu1 %v2423_v26  ;;  %v2805_v23 = vld [vmem:[%s4547_s3 + $0x90] sm:$0xff]   ;;  %v2806_v24 = vld [vmem:[%s4547_s3 + $0x58] sm:$0xff]  }
  0x2c   :  { %v2807_v26 = vld [vmem:[%s4547_s3 + $0x18] sm:$0xff]  }
  0x2d   :  { %559 = vmatmul.mubr.bf16.gmra.mrb[4].mxu0 %v3039_v22  ;;  %672 = vmatmul.mubr.bf16.gmra.mrb[4].mxu1 %v3039_v22 }
  0x2e   :  { %568 = vmatprep.mubr.bf16.mxu0 %v2858_v3  ;;  %681 = vmatprep.mubr.bf16.mxu1 %v2858_v3 }
  0x2f   :  { %747 = vmatpush1.bf16.msra.mxu0 %v2420_v30  ;;  %860 = vmatpush1.bf16.msra.mxu1 %v2422_v32  ;;  %v2813_v30 = vld [vmem:[%s4547_s3 + $0xa0] sm:$0xff]   ;;  %v2816_v32 = vld [vmem:[%s4547_s3 + $0xe8] sm:$0xff]  }
  0x30   :  { %748 = vmatprep.subr.bf16.mxu0 %v2429_v33  ;;  %861 = vmatprep.subr.bf16.mxu1 %v2431_v35  ;;  %v2815_v33 = vld [vmem:[%s4547_s3 + $0x28] sm:$0xff]   ;;  %v2818_v35 = vld [vmem:[%s4547_s3 + $0x70] sm:$0xff]  }
  0x33   :  { %749 = vmatpush1.bf16.msra.mxu0 %v2428_v39  ;;  %862 = vmatpush1.bf16.msra.mxu1 %v2430_v41  ;;  %v2822_v39 = vld [vmem:[%s4547_s3 + $0x78] sm:$0xff]  }
  0x34   :  { %750 = vmatprep.subr.bf16.mxu0 %v2437_v42  ;;  %863 = vmatprep.subr.bf16.mxu1 %v2439_v44  ;;  %v2823_v41 = vld [vmem:[%s4547_s3 + $0x38] sm:$0xff]   ;;  %v2828_v44 = vld [vmem:[%s4547_s3 + $0x1c0] sm:$0xff]  }
  0x35   :  { %569 = vmatmul.mubr.bf16.gmra.mrb[8].mxu0 %v3073_v38  ;;  %682 = vmatmul.mubr.bf16.gmra.mrb[8].mxu1 %v3073_v38  ;;  %v2825_v42 = vld [vmem:[%s4547_s3 + $0xb8] sm:$0xff]  }
  0x36   :  { %578 = vmatprep.mubr.bf16.mxu0 %v2858_v3  ;;  %691 = vmatprep.mubr.bf16.mxu1 %v2858_v3 }
  0x37   :  { %751 = vmatpush1.bf16.msra.mxu0 %v2436_v47  ;;  %864 = vmatpush1.bf16.msra.mxu1 %v2438_v49  ;;  %v110_v47 = vsub.s32 0, %v3292_v46  ;;  %v118_v49 = vsub.s32 2, %v3292_v46 }
  0x38   :  { %752 = vmatprep.subr.bf16.mxu0 %v2445_v50  ;;  %865 = vmatprep.subr.bf16.mxu1 %v2447_v52  ;;  %v122_v52 = vsub.s32 3, %v3292_v46 }
  0x39   :  { %v3302_v50 = vrot.slane %v3298_v48, %v110_v47  ;;  %v3306_v51 = vrot.slane %v3298_v48, %v118_v49  ;;  %v2827_v47 = vld [vmem:[%s4547_s3 + $0x100] sm:$0xff]  }
  0x3a   :  { %v3320_v62 = vrot.slane %v3298_v48, %v122_v52 }
  0x3b   :  { %753 = vmatpush1.bf16.msra.mxu0 %v2444_v56  ;;  %866 = vmatpush1.bf16.msra.mxu1 %v2446_v58 }
  0x3c   :  { %754 = vmatprep.subr.bf16.mxu0 %v2453_v59  ;;  %867 = vmatprep.subr.bf16.mxu1 %v2455_v61 }
  0x3d   :  { %579 = vmatmul.mubr.bf16.gmra.mrb[12].mxu0 %v3106_v55  ;;  %692 = vmatmul.mubr.bf16.gmra.mrb[12].mxu1 %v3106_v55 }
  0x3e   :  { %588 = vmatprep.mubr.bf16.mxu0 %v2858_v3  ;;  %701 = vmatprep.mubr.bf16.mxu1 %v2858_v3 }
  0x3f   :  { %755 = vmatpush1.bf16.msra.mxu0 %v2452_v0  ;;  %868 = vmatpush1.bf16.msra.mxu1 %v2454_v1 }
  0x40   :  { %756 = vmatprep.subr.bf16.mxu0 %v2461_v2  ;;  %869 = vmatprep.subr.bf16.mxu1 %v2463_v4 }
  0x43   :  { %757 = vmatpush1.bf16.msra.mxu0 %v2460_v8  ;;  %870 = vmatpush1.bf16.msra.mxu1 %v2462_v10 }
  0x44   :  { %2529 = vmatprep.subr.bf16.mxu0 %v2794_v5  ;;  %2593 = vmatprep.subr.bf16.mxu1 %v2796_v9 }
  0x45   :  { %589 = vmatmul.mubr.bf16.gmra.mrb[16].mxu0 %v3130_v7  ;;  %702 = vmatmul.mubr.bf16.gmra.mrb[16].mxu1 %v3130_v7 }
  0x46   :  { %598 = vmatprep.mubr.bf16.mxu0 %v2858_v3  ;;  %711 = vmatprep.mubr.bf16.mxu1 %v2858_v3 }
  0x4d   :  { %599 = vmatmul.mubr.bf16.gmra.mrb[20].mxu0 %v3142_v11  ;;  %712 = vmatmul.mubr.bf16.gmra.mrb[20].mxu1 %v3142_v11 }
  0x4e   :  { %608 = vmatprep.mubr.bf16.mxu0 %v2858_v3  ;;  %721 = vmatprep.mubr.bf16.mxu1 %v2858_v3 }
  0x55   :  { %609 = vmatmul.mubr.bf16.gmra.mrb[24].mxu0 %v3151_v12  ;;  %722 = vmatmul.mubr.bf16.gmra.mrb[24].mxu1 %v3151_v12 }
  0x56   :  { %618 = vmatprep.mubr.bf16.mxu0 %v2858_v3  ;;  %731 = vmatprep.mubr.bf16.mxu1 %v2858_v3 }
  0x5d   :  { %619 = vmatmul.mubr.bf16.gmra.mrb[28].mxu0 %v3160_v13  ;;  %732 = vmatmul.mubr.bf16.gmra.mrb[28].mxu1 %v3160_v13 }
  0x5e   :  { %774 = vmatprep.mubr.bf16.mxu0 %v2858_v3  ;;  %887 = vmatprep.mubr.bf16.mxu1 %v2858_v3 }
  0x65   :  { %775 = vmatmul.mubr.bf16.vlgmr.msra.gmra.mrb[32].mxu0 %v3007_v6  ;;  %888 = vmatmul.mubr.bf16.vlgmr.msra.gmra.mrb[32].mxu1 %v3007_v6  ;;  %v2804_v6 = vld [vmem:[%s4547_s3 + $0xd0] sm:$0xff]  }
  0x66   :  { %784 = vmatprep.mubr.bf16.mxu0 %v2858_v3  ;;  %897 = vmatprep.mubr.bf16.mxu1 %v2858_v3 }
  0x67   :  { %2530 = vmatpush3.bf16.msra.mxu0 %v2795_v14  ;;  %2594 = vmatpush3.bf16.msra.mxu1 %v2797_v15 }
  0x68   :  { %2531 = vmatprep.subr.bf16.mxu0 %v2798_v16  ;;  %2595 = vmatprep.subr.bf16.mxu1 %v2800_v17 }
  0x6b   :  { %2532 = vmatpush3.bf16.msra.mxu0 %v2799_v18  ;;  %2596 = vmatpush3.bf16.msra.mxu1 %v2801_v19 }
  0x6c   :  { %2533 = vmatprep.subr.bf16.mxu0 %v2802_v20  ;;  %2597 = vmatprep.subr.bf16.mxu1 %v2804_v6 }
  0x6d   :  { %785 = vmatmul.mubr.bf16.gmra.mrb[36].mxu0 %v3039_v22  ;;  %898 = vmatmul.mubr.bf16.gmra.mrb[36].mxu1 %v3039_v22  ;;  %v2812_v22 = vld [vmem:[%s4547_s3 + $0xe0] sm:$0xff]  }
  0x6e   :  { %794 = vmatprep.mubr.bf16.mxu0 %v2858_v3  ;;  %907 = vmatprep.mubr.bf16.mxu1 %v2858_v3 }
  0x6f   :  { %2534 = vmatpush3.bf16.msra.mxu0 %v2803_v21  ;;  %2598 = vmatpush3.bf16.msra.mxu1 %v2805_v23  ;;  %v134_v21 = vsub.s32 6, %v3292_v46 }
  0x70   :  { %2535 = vmatprep.subr.bf16.mxu0 %v2806_v24  ;;  %2599 = vmatprep.subr.bf16.mxu1 %v2808_v25 }
  0x73   :  { %2536 = vmatpush3.bf16.msra.mxu0 %v2807_v26  ;;  %2600 = vmatpush3.bf16.msra.mxu1 %v2809_v27 }
  0x74   :  { %2537 = vmatprep.subr.bf16.mxu0 %v2810_v28  ;;  %2601 = vmatprep.subr.bf16.mxu1 %v2812_v22 }
  0x75   :  { %795 = vmatmul.mubr.bf16.gmra.mrb[40].mxu0 %v3073_v38  ;;  %908 = vmatmul.mubr.bf16.gmra.mrb[40].mxu1 %v3073_v38  ;;  %v2821_v38 = vld [vmem:[%s4547_s3 + $0xb0] sm:$0xff]  }
  0x76   :  { %804 = vmatprep.mubr.bf16.mxu0 %v2858_v3  ;;  %917 = vmatprep.mubr.bf16.mxu1 %v2858_v3 }
  0x77   :  { %2538 = vmatpush3.bf16.msra.mxu0 %v2811_v29  ;;  %2602 = vmatpush3.bf16.msra.mxu1 %v2813_v30 }
  0x78   :  { %2539 = vmatprep.subr.bf16.mxu0 %v2814_v31  ;;  %2603 = vmatprep.subr.bf16.mxu1 %v2816_v32  ;;  %v130_v31 = vsub.s32 5, %v3292_v46 }
  0x7b   :  { %2540 = vmatpush3.bf16.msra.mxu0 %v2815_v33  ;;  %2604 = vmatpush3.bf16.msra.mxu1 %v2817_v34 }
  0x7c   :  { %2541 = vmatprep.subr.bf16.mxu0 %v2818_v35  ;;  %2605 = vmatprep.subr.bf16.mxu1 %v2820_v36  ;;  %v138_v35 = vsub.s32 7, %v3292_v46 }
  0x7d   :  { %805 = vmatmul.mubr.bf16.gmra.mrb[44].mxu0 %v3106_v55  ;;  %918 = vmatmul.mubr.bf16.gmra.mrb[44].mxu1 %v3106_v55  ;;  %v3313_v55 = vstv %s4549_s5 }
  0x7e   :  { %814 = vmatprep.mubr.bf16.mxu0 %v2858_v3  ;;  %927 = vmatprep.mubr.bf16.mxu1 %v2858_v3 }
  0x7f   :  { %2542 = vmatpush3.bf16.msra.mxu0 %v2819_v37  ;;  %2606 = vmatpush3.bf16.msra.mxu1 %v2821_v38  ;;  %v3349_v38 = vrot.slane %v3298_v48, %v134_v21 }
  0x80   :  { %2543 = vmatprep.subr.bf16.mxu0 %v2822_v39  ;;  %2607 = vmatprep.subr.bf16.mxu1 %v2824_v40 }
  0x83   :  { %2544 = vmatpush3.bf16.msra.mxu0 %v2823_v41  ;;  %2608 = vmatpush3.bf16.msra.mxu1 %v2825_v42 }
  0x84   :  { %2657 = vmatprep.subr.bf16.mxu0 %v2826_v43  ;;  %2721 = vmatprep.subr.bf16.mxu1 %v2828_v44 }
  0x85   :  { %815 = vmatmul.mubr.bf16.gmra.mrb[48].mxu0 %v3130_v7  ;;  %928 = vmatmul.mubr.bf16.gmra.mrb[48].mxu1 %v3130_v7 }
  0x86   :  { %824 = vmatprep.mubr.bf16.mxu0 %v2858_v3  ;;  %937 = vmatprep.mubr.bf16.mxu1 %v2858_v3 }
  0x8d   :  { %825 = vmatmul.mubr.bf16.gmra.mrb[52].mxu0 %v3142_v11  ;;  %938 = vmatmul.mubr.bf16.gmra.mrb[52].mxu1 %v3142_v11 }
  0x8e   :  { %834 = vmatprep.mubr.bf16.mxu0 %v2858_v3  ;;  %947 = vmatprep.mubr.bf16.mxu1 %v2858_v3 }
  0x95   :  { %835 = vmatmul.mubr.bf16.gmra.mrb[56].mxu0 %v3151_v12  ;;  %948 = vmatmul.mubr.bf16.gmra.mrb[56].mxu1 %v3151_v12 }
  0x96   :  { %844 = vmatprep.mubr.bf16.mxu0 %v2858_v3  ;;  %957 = vmatprep.mubr.bf16.mxu1 %v2858_v3  ;;  %v114_v3 = vsub.s32 1, %v3292_v46 }
  0x98   :  { %v3316_v57 = vrot.slane %v3298_v48, %v114_v3 }
  0x9d   :  { %845 = vmatmul.mubr.bf16.gmra.mrb[60].mxu0 %v3160_v13  ;;  %958 = vmatmul.mubr.bf16.gmra.mrb[60].mxu1 %v3160_v13  ;;  %v126_v13 = vsub.s32 4, %v3292_v46 }
  0x9f   :  { %v3346_v37 = vrot.slane %v3298_v48, %v126_v13 }
  0xf8   :  { %v550_v53 = vpop.f32.mrb[0].mxu0  ;;  %v663_v56 = vpop.f32.mrb[0].mxu1 }
  0xf9   :  { %v551_v54 = vadd.f32 %v550_v53, %v3302_v50  ;;  %v552_v58 = vpop.f32.mrb[1].mxu0  ;;  %v664_v59 = vadd.f32 %v663_v56, %v3306_v51  ;;  %v665_v60 = vpop.f32.mrb[1].mxu1  ;;  %v2830_v53 = vld [vmem:[%s4547_s3 + $0x148] sm:$0xff]  }
  0xfa   :  { %v554_v61 = vpop.f32.mrb[2].mxu0  ;;  %v667_v0 = vpop.f32.mrb[2].mxu1  ;;  %v553_v5 = vadd.f32 %v552_v58, %v3316_v57  ;;  %v666_v11 = vadd.f32 %v665_v60, %v3320_v62 }
  0xfb   :  { %v555_v63 = vadd.f32 %v554_v61, %v3302_v50  ;;  %v556_v1 = vpop.f32.mrb[3].mxu0  ;;  %v1097_v2 = vmul.f32 %v3313_v55, %v551_v54  ;;  %v669_v4 = vpop.f32.mrb[3].mxu1  ;;  %vm968_vm0 = vcmp.ge.f32.partialorder %v551_v54, 0.0  ;;  %v1099_v7 = vmul.f32 %v3313_v55, %v664_v59  ;;  %v2829_v61 = vld [vmem:[%s4547_s3 + $0x180] sm:$0xff]  }
  0xfc   :  { %v668_v9 = vadd.f32 %v667_v0, %v3306_v51  ;;  %v557_v10 = vadd.f32 %v556_v1, %v3316_v57  ;;  %vm970_vm2 = vcmp.ge.f32.partialorder %v664_v59, 0.0  ;;  %v670_v12 = vadd.f32 %v669_v4, %v3320_v62 }
  0xfd   :  { %vm976_vm1 = vcmp.ge.f32.partialorder %v555_v63, 0.0  ;;  %v1105_v8 = vmul.f32 %v3313_v55, %v555_v63  ;;  %v1225_v14 = vsel %vm968_vm0, %v551_v54, %v1097_v2  ;;  %v3335_v23 = vsel %vm970_vm2, %v664_v59, %v1099_v7  ;;  %v2832_v7 = vld [vmem:[%s4547_s3 + $0x1c8] sm:$0xff]  }
  0xfe   :  { %vm978_vm3 = vcmp.ge.f32.partialorder %v668_v9, 0.0  ;;  %v1107_v16 = vmul.f32 %v3313_v55, %v668_v9  ;;  %vm977_vm4 = vcmp.ge.f32.partialorder %v557_v10, 0.0  ;;  %v1106_v19 = vmul.f32 %v3313_v55, %v557_v10 }
  0xff   :  { %v1233_v15 = vsel %vm976_vm1, %v555_v63, %v1105_v8  ;;  %v1098_v24 = vmul.f32 %v3313_v55, %v553_v5  ;;  %vm969_vm5 = vcmp.ge.f32.partialorder %v553_v5, 0.0  ;;  %v1108_v22 = vmul.f32 %v3313_v55, %v670_v12 }
 0x100   :  { %v560_v17 = vpop.f32.mrb[4].mxu0  ;;  %v1353_v18 = vpack.c.bf16 %v1233_v15, %v1225_v14  ;;  %v673_v20 = vpop.f32.mrb[4].mxu1  ;;  %v1235_v25 = vsel %vm978_vm3, %v668_v9, %v1107_v16  ;;  %v1100_v32 = vmul.f32 %v3313_v55, %v666_v11  ;;  %vm979_vm6 = vcmp.ge.f32.partialorder %v670_v12, 0.0  ;;  %v2831_v14 = vld [vmem:[%s4547_s3 + $0x108] sm:$0xff]   ;;  %v2834_v16 = vld [vmem:[%s4547_s3 + $0x150] sm:$0xff]  }
 0x101   :  { %v562_v6 = vpop.f32.mrb[5].mxu0  ;;  %v675_v26 = vpop.f32.mrb[5].mxu1  ;;  %v1355_v28 = vpack.c.bf16 %v1235_v25, %v3335_v23  ;;  %v1234_v34 = vsel %vm977_vm4, %v557_v10, %v1106_v19  ;;  %vm971_vm7 = vcmp.ge.f32.partialorder %v666_v11, 0.0  ;;  %v3352_v39 = vadd.f32 %v560_v17, %v3302_v50  ;;  %v2833_v19 = vld [vmem:[%s4547_s3 + $0x188] sm:$0xff]  }
 0x102   :  { %v564_v27 = vpop.f32.mrb[6].mxu0  ;;  %v677_v29 = vpop.f32.mrb[6].mxu1  ;;  %v563_v36 = vadd.f32 %v562_v6, %v3316_v57  ;;  %v676_v40 = vadd.f32 %v675_v26, %v3320_v62  ;;  %v1226_v42 = vsel %vm969_vm5, %v553_v5, %v1098_v24  ;;  %v1236_v46 = vsel %vm979_vm6, %v670_v12, %v1108_v22  ;;  %v2836_v24 = vld [vmem:[%s4547_s3 + $0x1d0] sm:$0xff]  }
 0x103   :  { %v566_v30 = vpop.f32.mrb[7].mxu0  ;;  %v679_v33 = vpop.f32.mrb[7].mxu1  ;;  %v565_v43 = vadd.f32 %v564_v27, %v3302_v50  ;;  %v1354_v45 = vpack.c.bf16 %v1234_v34, %v1226_v42  ;;  %v1228_v3 = vsel %vm971_vm7, %v666_v11, %v1100_v32  ;;  %v3367_v54 = vrot.slane %v3298_v48, %v130_v31  ;;  %v2835_v32 = vld [vmem:[%s4547_s3 + $0x110] sm:$0xff]  }
 0x104   :  { %v567_v41 = vadd.f32 %v566_v30, %v3316_v57  ;;  %v680_v44 = vadd.f32 %v679_v33, %v3320_v62  ;;  %v3370_v56 = vadd.f32 %v673_v20, %v3306_v51  ;;  %v1114_v58 = vmul.f32 %v3313_v55, %v563_v36 }
 0x105   :  { %v3374_v59 = vadd.f32 %v677_v29, %v3306_v51  ;;  %1968 = vmatprep.mubr.bf16.mxu0 %v1354_v45  ;;  %v1356_v60 = vpack.c.bf16 %v1236_v46, %v1228_v3  ;;  %v1113_v1 = vmul.f32 %v3313_v55, %v3352_v39  ;;  %vm985_vm9 = vcmp.ge.f32.partialorder %v563_v36, 0.0 }
 0x106   :  { %vm993_vm8 = vcmp.ge.f32.partialorder %v567_v41, 0.0  ;;  %v1122_v49 = vmul.f32 %v3313_v55, %v567_v41  ;;  %v1116_v2 = vmul.f32 %v3313_v55, %v676_v40  ;;  %1969 = vmatmul.mubr.bf16.vlgmr.msra.gmra.mrb[64].mxu0 %v1353_v18  ;;  %v3386_v8 = vrot.slane %v3298_v48, %v138_v35 }
 0x107   :  { %vm984_vm10 = vcmp.ge.f32.partialorder %v3352_v39, 0.0  ;;  %v1121_v9 = vmul.f32 %v3313_v55, %v565_v43  ;;  %v1124_v10 = vmul.f32 %v3313_v55, %v680_v44  ;;  %2065 = vmatprep.mubr.bf16.mxu1 %v1356_v60  ;;  %2658 = vmatpush3.bf16.msra.mxu0 %v2827_v47  ;;  %vm987_vm11 = vcmp.ge.f32.partialorder %v676_v40, 0.0  ;;  %v2837_v47 = vld [vmem:[%s4547_s3 + $0x190] sm:$0xff]  }
 0x108   :  { %v570_v52 = vpop.f32.mrb[8].mxu0  ;;  %v683_v63 = vpop.f32.mrb[8].mxu1  ;;  %v1250_v13 = vsel %vm993_vm8, %v567_v41, %v1122_v49  ;;  %vm992_vm12 = vcmp.ge.f32.partialorder %v565_v43, 0.0  ;;  %vm995_vm13 = vcmp.ge.f32.partialorder %v680_v44, 0.0  ;;  %2066 = vmatmul.mubr.bf16.vlgmr.msra.gmra.mrb[64].mxu1 %v1355_v28  ;;  %2659 = vmatprep.subr.bf16.mxu0 %v2830_v53  ;;  %vm986_vm14 = vcmp.ge.f32.partialorder %v3370_v56, 0.0 }
 0x109   :  { %v572_v0 = vpop.f32.mrb[9].mxu0  ;;  %v685_v4 = vpop.f32.mrb[9].mxu1  ;;  %v3396_v48 = vadd.f32 %v570_v52, %v3302_v50  ;;  %v1115_v17 = vmul.f32 %v3313_v55, %v3370_v56  ;;  %vm994_vm15 = vcmp.ge.f32.partialorder %v3374_v59, 0.0  ;;  %2722 = vmatpush3.bf16.msra.mxu1 %v2829_v61  ;;  %v1242_v18 = vsel %vm985_vm9, %v563_v36, %v1114_v58  ;;  %v2840_v58 = vld [vmem:[%s4547_s3 + $0x1d8] sm:$0xff]  }
 0x10a   :  { %v574_v5 = vpop.f32.mrb[10].mxu0  ;;  %v687_v11 = vpop.f32.mrb[10].mxu1  ;;  %v1123_v20 = vmul.f32 %v3313_v55, %v3374_v59  ;;  %v3412_v6 = vadd.f32 %v683_v63, %v3306_v51  ;;  %v3415_v21 = vadd.f32 %v572_v0, %v3316_v57  ;;  %v1362_v23 = vpack.c.bf16 %v1250_v13, %v1242_v18  ;;  %2723 = vmatprep.subr.bf16.mxu1 %v2832_v7  ;;  %v2839_v63 = vld [vmem:[%s4547_s3 + $0x118] sm:$0xff]  }
 0x10b   :  { %v576_v12 = vpop.f32.mrb[11].mxu0  ;;  %v689_v15 = vpop.f32.mrb[11].mxu1  ;;  %v1244_v26 = vsel %vm987_vm11, %v676_v40, %v1116_v2  ;;  %v1252_v27 = vsel %vm995_vm13, %v680_v44, %v1124_v10  ;;  %v1249_v28 = vsel %vm992_vm12, %v565_v43, %v1121_v9  ;;  %2660 = vmatpush3.bf16.msra.mxu0 %v2831_v14  ;;  %vm1000_vm0 = vcmp.ge.f32.partialorder %v3396_v48, 0.0  ;;  %v2841_v9 = vld [vmem:[%s4547_s3 + $0x198] sm:$0xff]  }
 0x10c   :  { %v577_v25 = vadd.f32 %v576_v12, %v3316_v57  ;;  %v3427_v22 = vmul.f32 %v3313_v55, %v3396_v48  ;;  %v3430_v29 = vadd.f32 %v685_v4, %v3320_v62  ;;  %1976 = vmatprep.mubr.bf16.mxu0 %v1362_v23  ;;  %v1241_v30 = vsel %vm984_vm10, %v3352_v39, %v1113_v1  ;;  %v2838_v39 = vld [vmem:[%s4547_s3 + $0x158] sm:$0xff]   ;;  %v2842_v4 = vld [vmem:[%s4547_s3 + $0x160] sm:$0xff]  }
 0x10d   :  { %2661 = vmatprep.subr.bf16.mxu0 %v2834_v16  ;;  %v3439_v33 = vadd.f32 %v574_v5, %v3302_v50  ;;  %v690_v34 = vadd.f32 %v689_v15, %v3320_v62  ;;  %v1364_v35 = vpack.c.bf16 %v1252_v27, %v1244_v26  ;;  %v1361_v36 = vpack.c.bf16 %v1249_v28, %v1241_v30 }
 0x10e   :  { %2724 = vmatpush3.bf16.msra.mxu1 %v2833_v19  ;;  %vm1002_vm1 = vcmp.ge.f32.partialorder %v3412_v6, 0.0  ;;  %v3447_v42 = vadd.f32 %v687_v11, %v3306_v51  ;;  %v1243_v43 = vsel %vm986_vm14, %v3370_v56, %v1115_v17  ;;  %v1251_v44 = vsel %vm994_vm15, %v3374_v59, %v1123_v20 }
 0x10f   :  { %2725 = vmatprep.subr.bf16.mxu1 %v2836_v24  ;;  %v1131_v49 = vmul.f32 %v3313_v55, %v3412_v6  ;;  %vm1001_vm2 = vcmp.ge.f32.partialorder %v3415_v21, 0.0  ;;  %v1138_v3 = vmul.f32 %v3313_v55, %v577_v25  ;;  %2073 = vmatprep.mubr.bf16.mxu1 %v1364_v35  ;;  %v1363_v52 = vpack.c.bf16 %v1251_v44, %v1243_v43  ;;  %v2848_v43 = vld [vmem:[%s4547_s3 + $0x1e8] sm:$0xff]  }
 0x110   :  { %v580_v31 = vpop.f32.mrb[12].mxu0  ;;  %v693_v40 = vpop.f32.mrb[12].mxu1  ;;  %1977 = vmatmul.mubr.bf16.gmra.mrb[68].mxu0 %v1361_v36  ;;  %v1130_v59 = vmul.f32 %v3313_v55, %v3415_v21  ;;  %vm1003_vm3 = vcmp.ge.f32.partialorder %v3430_v29, 0.0  ;;  %vm1009_vm4 = vcmp.ge.f32.partialorder %v577_v25, 0.0  ;;  %v1132_v0 = vmul.f32 %v3313_v55, %v3430_v29  ;;  %v2845_v36 = vld [vmem:[%s4547_s3 + $0x1a0] sm:$0xff]  }
 0x111   :  { %v582_v41 = vpop.f32.mrb[13].mxu0  ;;  %v695_v45 = vpop.f32.mrb[13].mxu1  ;;  %v3469_v60 = vadd.f32 %v580_v31, %v3302_v50  ;;  %2662 = vmatpush3.bf16.msra.mxu0 %v2835_v32  ;;  %vm1008_vm5 = vcmp.ge.f32.partialorder %v3439_v33, 0.0  ;;  %v1140_v1 = vmul.f32 %v3313_v55, %v690_v34  ;;  %2074 = vmatmul.mubr.bf16.gmra.mrb[68].mxu1 %v1363_v52  ;;  %v3479_v2 = vadd.f32 %v693_v40, %v3306_v51  ;;  %v2843_v31 = vld [vmem:[%s4547_s3 + $0x120] sm:$0xff]   ;;  %v2846_v40 = vld [vmem:[%s4547_s3 + $0x168] sm:$0xff]  }
 0x112   :  { %v584_v46 = vpop.f32.mrb[14].mxu0  ;;  %v697_v53 = vpop.f32.mrb[14].mxu1  ;;  %2663 = vmatprep.subr.bf16.mxu0 %v2838_v39  ;;  %v1137_v5 = vmul.f32 %v3313_v55, %v3439_v33  ;;  %vm1010_vm6 = vcmp.ge.f32.partialorder %v3447_v42, 0.0  ;;  %v1139_v7 = vmul.f32 %v3313_v55, %v3447_v42  ;;  %vm1011_vm7 = vcmp.ge.f32.partialorder %v690_v34, 0.0  ;;  %2726 = vmatpush3.bf16.msra.mxu1 %v2837_v47 }
 0x113   :  { %v586_v56 = vpop.f32.mrb[15].mxu0  ;;  %v699_v61 = vpop.f32.mrb[15].mxu1  ;;  %v3493_v10 = vadd.f32 %v582_v41, %v3316_v57  ;;  %v3496_v11 = vadd.f32 %v695_v45, %v3320_v62  ;;  %v3499_v12 = vadd.f32 %v584_v46, %v3302_v50  ;;  %v1266_v13 = vsel %vm1009_vm4, %v577_v25, %v1138_v3  ;;  %2727 = vmatprep.subr.bf16.mxu1 %v2840_v58  ;;  %v2844_v25 = vld [vmem:[%s4547_s3 + $0x1e0] sm:$0xff]   ;;  %v2847_v3 = vld [vmem:[%s4547_s3 + $0x128] sm:$0xff]  }
 0x114   :  { %vm1016_vm8 = vcmp.ge.f32.partialorder %v3469_v60, 0.0  ;;  %v3505_v14 = vmul.f32 %v3313_v55, %v3469_v60  ;;  %v587_v15 = vadd.f32 %v586_v56, %v3316_v57  ;;  %v1258_v16 = vsel %vm1001_vm2, %v3415_v21, %v1130_v59  ;;  %v2849_v56 = vld [vmem:[%s4547_s3 + $0x1a8] sm:$0xff]  }
 0x115   :  { %2664 = vmatpush3.bf16.msra.mxu0 %v2839_v63  ;;  %vm1018_vm9 = vcmp.ge.f32.partialorder %v3479_v2, 0.0  ;;  %v1370_v18 = vpack.c.bf16 %v1266_v13, %v1258_v16  ;;  %v1260_v19 = vsel %vm1003_vm3, %v3430_v29, %v1132_v0  ;;  %v1268_v20 = vsel %vm1011_vm7, %v690_v34, %v1140_v1 }
 0x116   :  { %2665 = vmatprep.subr.bf16.mxu0 %v2842_v4  ;;  %v700_v21 = vadd.f32 %v699_v61, %v3320_v62  ;;  %v1372_v26 = vpack.c.bf16 %v1268_v20, %v1260_v19  ;;  %v1257_v27 = vsel %vm1000_vm0, %v3396_v48, %v3427_v22  ;;  %v1265_v28 = vsel %vm1008_vm5, %v3439_v33, %v1137_v5 }
 0x117   :  { %2728 = vmatpush3.bf16.msra.mxu1 %v2841_v9  ;;  %v3531_v32 = vadd.f32 %v697_v53, %v3306_v51  ;;  %1984 = vmatprep.mubr.bf16.mxu0 %v1370_v18  ;;  %v1369_v34 = vpack.c.bf16 %v1265_v28, %v1257_v27  ;;  %v1259_v48 = vsel %vm1002_vm1, %v3412_v6, %v1131_v49  ;;  %vm1017_vm10 = vcmp.ge.f32.partialorder %v3493_v10, 0.0 }
 0x118   :  { %v590_v17 = vpop.f32.mrb[16].mxu0  ;;  %v703_v23 = vpop.f32.mrb[16].mxu1  ;;  %v1267_v22 = vsel %vm1010_vm6, %v3447_v42, %v1139_v7  ;;  %v1147_v41 = vmul.f32 %v3313_v55, %v3479_v2  ;;  %v1154_v6 = vmul.f32 %v3313_v55, %v587_v15  ;;  %2081 = vmatprep.mubr.bf16.mxu1 %v1372_v26  ;;  %v1146_v44 = vmul.f32 %v3313_v55, %v3493_v10  ;;  %v2851_v26 = vld [vmem:[%s4547_s3 + $0x130] sm:$0xff]  }
 0x119   :  { %v592_v24 = vpop.f32.mrb[17].mxu0  ;;  %v705_v29 = vpop.f32.mrb[17].mxu1  ;;  %v1371_v39 = vpack.c.bf16 %v1267_v22, %v1259_v48  ;;  %vm1019_vm11 = vcmp.ge.f32.partialorder %v3496_v11, 0.0  ;;  %vm1025_vm12 = vcmp.ge.f32.partialorder %v587_v15, 0.0  ;;  %1985 = vmatmul.mubr.bf16.gmra.mrb[72].mxu0 %v1369_v34  ;;  %v3556_v45 = vadd.f32 %v590_v17, %v3302_v50  ;;  %2729 = vmatprep.subr.bf16.mxu1 %v2844_v25 }
 0x11a   :  { %v594_v30 = vpop.f32.mrb[18].mxu0  ;;  %v707_v33 = vpop.f32.mrb[18].mxu1  ;;  %v1148_v46 = vmul.f32 %v3313_v55, %v3496_v11  ;;  %vm1024_vm13 = vcmp.ge.f32.partialorder %v3499_v12, 0.0  ;;  %v1156_v47 = vmul.f32 %v3313_v55, %v700_v21  ;;  %v3563_v49 = vadd.f32 %v703_v23, %v3306_v51  ;;  %2666 = vmatpush3.bf16.msra.mxu0 %v2843_v31 }
 0x11b   :  { %v596_v35 = vpop.f32.mrb[19].mxu0  ;;  %v709_v42 = vpop.f32.mrb[19].mxu1  ;;  %2082 = vmatmul.mubr.bf16.gmra.mrb[72].mxu1 %v1371_v39  ;;  %v1153_v52 = vmul.f32 %v3313_v55, %v3499_v12  ;;  %vm1026_vm14 = vcmp.ge.f32.partialorder %v3531_v32, 0.0  ;;  %v1155_v53 = vmul.f32 %v3313_v55, %v3531_v32  ;;  %vm1027_vm15 = vcmp.ge.f32.partialorder %v700_v21, 0.0  ;;  %2667 = vmatprep.subr.bf16.mxu0 %v2846_v40 }
 0x11c   :  { %2730 = vmatpush3.bf16.msra.mxu1 %v2845_v36  ;;  %v3577_v58 = vadd.f32 %v592_v24, %v3316_v57  ;;  %v3580_v59 = vadd.f32 %v705_v29, %v3320_v62  ;;  %v3583_v61 = vadd.f32 %v594_v30, %v3302_v50  ;;  %v1282_v63 = vsel %vm1025_vm12, %v587_v15, %v1154_v6  ;;  %v2852_v29 = vld [vmem:[%s4547_s3 + $0x1f0] sm:$0xff]   ;;  %v2854_v30 = vld [vmem:[%s4547_s3 + $0x178] sm:$0xff]  }
 0x11d   :  { %2731 = vmatprep.subr.bf16.mxu1 %v2848_v43  ;;  %vm1032_vm0 = vcmp.ge.f32.partialorder %v3556_v45, 0.0  ;;  %v3589_v1 = vmul.f32 %v3313_v55, %v3556_v45  ;;  %v597_v4 = vadd.f32 %v596_v35, %v3316_v57  ;;  %v1274_v5 = vsel %vm1017_vm10, %v3493_v10, %v1146_v44  ;;  %v2850_v10 = vld [vmem:[%s4547_s3 + $0x170] sm:$0xff]   ;;  %v2856_v35 = vld [vmem:[%s4547_s3 + $0x1f8] sm:$0xff]  }
 0x11e   :  { %vm1034_vm1 = vcmp.ge.f32.partialorder %v3563_v49, 0.0  ;;  %v3598_v13 = vmul.f32 %v3313_v55, %v3563_v49  ;;  %v1378_v15 = vpack.c.bf16 %v1282_v63, %v1274_v5  ;;  %v1276_v16 = vsel %vm1019_vm11, %v3496_v11, %v1148_v46  ;;  %2668 = vmatpush3.bf16.msra.mxu0 %v2847_v3 }
 0x11f   :  { %v1284_v17 = vsel %vm1027_vm15, %v700_v21, %v1156_v47  ;;  %v3608_v20 = vadd.f32 %v709_v42, %v3320_v62  ;;  %v1273_v24 = vsel %vm1016_vm8, %v3469_v60, %v3505_v14  ;;  %v1281_v11 = vsel %vm1024_vm13, %v3499_v12, %v1153_v52  ;;  %2669 = vmatprep.subr.bf16.mxu0 %v2850_v10 }
 0x120   :  { %v600_v0 = vpop.f32.mrb[20].mxu0  ;;  %v713_v7 = vpop.f32.mrb[20].mxu1  ;;  %v1380_v23 = vpack.c.bf16 %v1284_v17, %v1276_v16  ;;  %2732 = vmatpush3.bf16.msra.mxu1 %v2849_v56  ;;  %v3621_v27 = vadd.f32 %v707_v33, %v3306_v51  ;;  %1992 = vmatprep.mubr.bf16.mxu0 %v1378_v15  ;;  %v1377_v28 = vpack.c.bf16 %v1281_v11, %v1273_v24  ;;  %vm1033_vm2 = vcmp.ge.f32.partialorder %v3577_v58, 0.0 }
 0x121   :  { %v602_v9 = vpop.f32.mrb[21].mxu0  ;;  %v715_v18 = vpop.f32.mrb[21].mxu1  ;;  %v1275_v60 = vsel %vm1018_vm9, %v3479_v2, %v1147_v41  ;;  %v1283_v12 = vsel %vm1026_vm14, %v3531_v32, %v1155_v53  ;;  %v1170_v31 = vmul.f32 %v3313_v55, %v597_v4  ;;  %v3638_v2 = vadd.f32 %v600_v0, %v3302_v50  ;;  %v2853_v32 = vld [vmem:[%s4547_s3 + $0x1b0] sm:$0xff]   ;;  %v2855_v41 = vld [vmem:[%s4547_s3 + $0x138] sm:$0xff]   ;;  %2733 = vmatprep.subr.bf16.mxu1 %v2852_v29 }
 0x122   :  { %v604_v19 = vpop.f32.mrb[22].mxu0  ;;  %v717_v25 = vpop.f32.mrb[22].mxu1  ;;  %2089 = vmatprep.mubr.bf16.mxu1 %v1380_v23  ;;  %v1379_v34 = vpack.c.bf16 %v1283_v12, %v1275_v60  ;;  %v1162_v48 = vmul.f32 %v3313_v55, %v3577_v58  ;;  %vm1041_vm3 = vcmp.ge.f32.partialorder %v597_v4, 0.0  ;;  %1993 = vmatmul.mubr.bf16.gmra.mrb[76].mxu0 %v1377_v28  ;;  %v3646_v22 = vadd.f32 %v713_v7, %v3306_v51 }
 0x123   :  { %v606_v21 = vpop.f32.mrb[23].mxu0  ;;  %v719_v14 = vpop.f32.mrb[23].mxu1  ;;  %v3649_v33 = vadd.f32 %v602_v9, %v3316_v57  ;;  %vm1035_vm4 = vcmp.ge.f32.partialorder %v3580_v59, 0.0  ;;  %v1164_v36 = vmul.f32 %v3313_v55, %v3580_v59  ;;  %vm1040_vm5 = vcmp.ge.f32.partialorder %v3583_v61, 0.0  ;;  %2670 = vmatpush3.bf16.msra.mxu0 %v2851_v26 }
 0x124   :  { %v1172_v40 = vmul.f32 %v3313_v55, %v3608_v20  ;;  %2090 = vmatmul.mubr.bf16.gmra.mrb[76].mxu1 %v1379_v34  ;;  %v1169_v6 = vmul.f32 %v3313_v55, %v3583_v61  ;;  %vm1042_vm6 = vcmp.ge.f32.partialorder %v3621_v27, 0.0  ;;  %v1171_v39 = vmul.f32 %v3313_v55, %v3621_v27  ;;  %2671 = vmatprep.subr.bf16.mxu0 %v2854_v30 }
 0x125   :  { %vm1043_vm7 = vcmp.ge.f32.partialorder %v3608_v20, 0.0  ;;  %v3671_v43 = vmul.f32 %v3313_v55, %v3638_v2  ;;  %v3674_v44 = vadd.f32 %v715_v18, %v3320_v62  ;;  %v3677_v46 = vadd.f32 %v604_v19, %v3302_v50  ;;  %2734 = vmatpush3.bf16.msra.mxu1 %v2853_v32 }
 0x126   :  { %v1298_v47 = vsel %vm1041_vm3, %v597_v4, %v1170_v31  ;;  %vm1048_vm8 = vcmp.ge.f32.partialorder %v3638_v2, 0.0  ;;  %vm1050_vm9 = vcmp.ge.f32.partialorder %v3646_v22, 0.0  ;;  %v3684_v53 = vmul.f32 %v3313_v55, %v3646_v22  ;;  %2735 = vmatprep.subr.bf16.mxu1 %v2856_v35 }
 0x127   :  { %vm1049_vm10 = vcmp.ge.f32.partialorder %v3649_v33, 0.0  ;;  %v607_v56 = vadd.f32 %v606_v21, %v3316_v57  ;;  %v1290_v63 = vsel %vm1033_vm2, %v3577_v58, %v1162_v48  ;;  %v3692_v5 = vadd.f32 %v717_v25, %v3306_v51  ;;  %2672 = vmatpush3.bf16.msra.mxu0 %v2855_v41  ;;  %v2857_v58 = vld [vmem:[%s4547_s3 + $0x1b8] sm:$0xff]  }
 0x128   :  { %v610_v42 = vpop.f32.mrb[24].mxu0  ;;  %v723_v3 = vpop.f32.mrb[24].mxu1  ;;  %v1386_v7 = vpack.c.bf16 %v1298_v47, %v1290_v63  ;;  %v1292_v9 = vsel %vm1035_vm4, %v3580_v59, %v1164_v36  ;;  %v1300_v15 = vsel %vm1043_vm7, %v3608_v20, %v1172_v40  ;;  %v720_v18 = vadd.f32 %v719_v14, %v3320_v62 }
 0x129   :  { %v612_v52 = vpop.f32.mrb[25].mxu0  ;;  %v725_v0 = vpop.f32.mrb[25].mxu1  ;;  %v1388_v19 = vpack.c.bf16 %v1300_v15, %v1292_v9  ;;  %v1289_v10 = vsel %vm1032_vm0, %v3556_v45, %v3589_v1  ;;  %v1297_v59 = vsel %vm1040_vm5, %v3583_v61, %v1169_v6  ;;  %v1178_v23 = vmul.f32 %v3313_v55, %v3649_v33  ;;  %2736 = vmatpush3.bf16.msra.mxu1 %v2857_v58 }
 0x12a   :  { %v614_v4 = vpop.f32.mrb[26].mxu0  ;;  %v727_v16 = vpop.f32.mrb[26].mxu1  ;;  %2000 = vmatprep.mubr.bf16.mxu0 %v1386_v7  ;;  %v1385_v24 = vpack.c.bf16 %v1297_v59, %v1289_v10  ;;  %v1291_v11 = vsel %vm1034_vm1, %v3563_v49, %v3598_v13  ;;  %v1299_v25 = vsel %vm1042_vm6, %v3621_v27, %v1171_v39  ;;  %v1186_v45 = vmul.f32 %v3313_v55, %v607_v56 }
 0x12b   :  { %v616_v17 = vpop.f32.mrb[27].mxu0  ;;  %v729_v20 = vpop.f32.mrb[27].mxu1  ;;  %2097 = vmatprep.mubr.bf16.mxu1 %v1388_v19  ;;  %v1387_v1 = vpack.c.bf16 %v1299_v25, %v1291_v11  ;;  %v3722_v61 = vadd.f32 %v610_v42, %v3302_v50  ;;  %v3725_v21 = vadd.f32 %v723_v3, %v3306_v51  ;;  %vm1051_vm11 = vcmp.ge.f32.partialorder %v3674_v44, 0.0 }
 0x12c   :  { %v1180_v26 = vmul.f32 %v3313_v55, %v3674_v44  ;;  %vm1057_vm12 = vcmp.ge.f32.partialorder %v607_v56, 0.0  ;;  %2001 = vmatmul.mubr.bf16.gmra.mrb[80].mxu0 %v1385_v24  ;;  %v3731_v49 = vadd.f32 %v612_v52, %v3316_v57  ;;  %vm1056_vm13 = vcmp.ge.f32.partialorder %v3677_v46, 0.0 }
 0x12d   :  { %v1185_v13 = vmul.f32 %v3313_v55, %v3677_v46  ;;  %vm1058_vm14 = vcmp.ge.f32.partialorder %v3692_v5, 0.0  ;;  %v1188_v27 = vmul.f32 %v3313_v55, %v720_v18  ;;  %2098 = vmatmul.mubr.bf16.gmra.mrb[80].mxu1 %v1387_v1  ;;  %v1187_v60 = vmul.f32 %v3313_v55, %v3692_v5 }
 0x12e   :  { %vm1059_vm15 = vcmp.ge.f32.partialorder %v720_v18, 0.0  ;;  %v3741_v12 = vadd.f32 %v725_v0, %v3320_v62  ;;  %v617_v14 = vadd.f32 %v616_v17, %v3316_v57  ;;  %v3746_v31 = vmul.f32 %v3313_v55, %v3722_v61 }
 0x12f   :  { %v3750_v34 = vmul.f32 %v3313_v55, %v3725_v21  ;;  %v3753_v32 = vadd.f32 %v614_v4, %v3302_v50  ;;  %v1314_v48 = vsel %vm1057_vm12, %v607_v56, %v1186_v45  ;;  %vm1064_vm0 = vcmp.ge.f32.partialorder %v3722_v61, 0.0 }
 0x130   :  { %v620_v28 = vpop.f32.mrb[28].mxu0  ;;  %v733_v29 = vpop.f32.mrb[28].mxu1  ;;  %vm1066_vm1 = vcmp.ge.f32.partialorder %v3725_v21, 0.0  ;;  %vm1065_vm2 = vcmp.ge.f32.partialorder %v3731_v49, 0.0  ;;  %v3760_v40 = vadd.f32 %v727_v16, %v3306_v51  ;;  %v730_v41 = vadd.f32 %v729_v20, %v3320_v62 }
 0x131   :  { %v622_v30 = vpop.f32.mrb[29].mxu0  ;;  %v735_v35 = vpop.f32.mrb[29].mxu1  ;;  %v1306_v6 = vsel %vm1049_vm10, %v3649_v33, %v1178_v23  ;;  %v1202_v47 = vmul.f32 %v3313_v55, %v617_v14  ;;  %v1308_v52 = vsel %vm1051_vm11, %v3674_v44, %v1180_v26  ;;  %v1316_v56 = vsel %vm1059_vm15, %v720_v18, %v1188_v27 }
 0x132   :  { %v624_v36 = vpop.f32.mrb[30].mxu0  ;;  %v737_v39 = vpop.f32.mrb[30].mxu1  ;;  %v1394_v3 = vpack.c.bf16 %v1314_v48, %v1306_v6  ;;  %v1396_v0 = vpack.c.bf16 %v1316_v56, %v1308_v52  ;;  %v1305_v4 = vsel %vm1048_vm8, %v3638_v2, %v3671_v43  ;;  %v1313_v33 = vsel %vm1056_vm13, %v3677_v46, %v1185_v13 }
 0x133   :  { %v626_v42 = vpop.f32.mrb[31].mxu0  ;;  %v739_v63 = vpop.f32.mrb[31].mxu1  ;;  %v1307_v7 = vsel %vm1050_vm9, %v3646_v22, %v3684_v53  ;;  %v1393_v44 = vpack.c.bf16 %v1313_v33, %v1305_v4  ;;  %v1315_v9 = vsel %vm1058_vm14, %v3692_v5, %v1187_v60  ;;  %v3786_v15 = vadd.f32 %v620_v28, %v3302_v50 }
 0x134   :  { %2008 = vmatprep.mubr.bf16.mxu0 %v1394_v3  ;;  %v3789_v2 = vadd.f32 %v733_v29, %v3306_v51  ;;  %2105 = vmatprep.mubr.bf16.mxu1 %v1396_v0  ;;  %v1395_v43 = vpack.c.bf16 %v1315_v9, %v1307_v7  ;;  %v3792_v46 = vadd.f32 %v622_v30, %v3316_v57  ;;  %vm1067_vm3 = vcmp.ge.f32.partialorder %v3741_v12, 0.0 }
 0x135   :  { %v3795_v16 = vadd.f32 %v735_v35, %v3320_v62  ;;  %v3798_v22 = vadd.f32 %v624_v36, %v3302_v50  ;;  %v1194_v53 = vmul.f32 %v3313_v55, %v3731_v49  ;;  %v1196_v5 = vmul.f32 %v3313_v55, %v3741_v12  ;;  %2009 = vmatmul.mubr.bf16.gmra.mrb[84].mxu0 %v1393_v44 }
 0x136   :  { %vm1073_vm4 = vcmp.ge.f32.partialorder %v617_v14, 0.0  ;;  %vm1072_vm5 = vcmp.ge.f32.partialorder %v3753_v32, 0.0  ;;  %v1201_v58 = vmul.f32 %v3313_v55, %v3753_v32  ;;  %vm1074_vm6 = vcmp.ge.f32.partialorder %v3760_v40, 0.0  ;;  %2106 = vmatmul.mubr.bf16.gmra.mrb[84].mxu1 %v1395_v43 }
 0x137   :  { %v1204_v50 = vmul.f32 %v3313_v55, %v730_v41  ;;  %v1203_v10 = vmul.f32 %v3313_v55, %v3760_v40  ;;  %vm1075_vm7 = vcmp.ge.f32.partialorder %v730_v41, 0.0  ;;  %v3813_v59 = vadd.f32 %v737_v39, %v3306_v51 }
 0x138   :  { %v776_v17 = vpop.f32.mrb[32].mxu0  ;;  %v889_v18 = vpop.f32.mrb[32].mxu1  ;;  %v3816_v20 = vadd.f32 %v626_v42, %v3316_v57  ;;  %v3820_v11 = vmul.f32 %v3313_v55, %v3786_v15  ;;  %v3824_v25 = vmul.f32 %v3313_v55, %v3789_v2  ;;  %v740_v45 = vadd.f32 %v739_v63, %v3320_v62 }
 0x139   :  { %v778_v19 = vpop.f32.mrb[33].mxu0  ;;  %v891_v23 = vpop.f32.mrb[33].mxu1  ;;  %v1330_v1 = vsel %vm1073_vm4, %v617_v14, %v1202_v47  ;;  %vm1081_vm8 = vcmp.ge.f32.partialorder %v3792_v46, 0.0  ;;  %v1210_v57 = vmul.f32 %v3313_v55, %v3792_v46  ;;  %vm1083_vm9 = vcmp.ge.f32.partialorder %v3795_v16, 0.0 }
 0x13a   :  { %v780_v24 = vpop.f32.mrb[34].mxu0  ;;  %v893_v26 = vpop.f32.mrb[34].mxu1  ;;  %v1322_v13 = vsel %vm1065_vm2, %v3731_v49, %v1194_v53  ;;  %vm1080_vm10 = vcmp.ge.f32.partialorder %v3786_v15, 0.0  ;;  %v1212_v62 = vmul.f32 %v3313_v55, %v3795_v16  ;;  %v1324_v60 = vsel %vm1067_vm3, %v3741_v12, %v1196_v5 }
 0x13b   :  { %v782_v51 = vpop.f32.mrb[35].mxu0  ;;  %v895_v27 = vpop.f32.mrb[35].mxu1  ;;  %v1402_v28 = vpack.c.bf16 %v1330_v1, %v1322_v13  ;;  %v1332_v14 = vsel %vm1075_vm7, %v730_v41, %v1204_v50  ;;  %vm1082_vm11 = vcmp.ge.f32.partialorder %v3789_v2, 0.0  ;;  %v1321_v49 = vsel %vm1064_vm0, %v3722_v61, %v3746_v31 }
 0x13c   :  { %v1404_v29 = vpack.c.bf16 %v1332_v14, %v1324_v60  ;;  %v1329_v30 = vsel %vm1072_vm5, %v3753_v32, %v1201_v58  ;;  %v1323_v48 = vsel %vm1066_vm1, %v3725_v21, %v3750_v34  ;;  %v1331_v35 = vsel %vm1074_vm6, %v3760_v40, %v1203_v10 }
 0x13d   :  { %2016 = vmatprep.mubr.bf16.mxu0 %v1402_v28  ;;  %v1401_v12 = vpack.c.bf16 %v1329_v30, %v1321_v49  ;;  %v777_v36 = vadd.f32 %v776_v17, %v3346_v37  ;;  %v890_v41 = vadd.f32 %v889_v18, %v3349_v38  ;;  %vm1088_vm12 = vcmp.ge.f32.partialorder %v3798_v22, 0.0 }
 0x13e   :  { %v1218_v61 = vmul.f32 %v3313_v55, %v3816_v20  ;;  %2113 = vmatprep.mubr.bf16.mxu1 %v1404_v29  ;;  %v1403_v31 = vpack.c.bf16 %v1331_v35, %v1323_v48  ;;  %v781_v32 = vadd.f32 %v780_v24, %v3346_v37  ;;  %v1220_v34 = vmul.f32 %v3313_v55, %v740_v45 }
 0x13f   :  { %2017 = vmatmul.mubr.bf16.gmra.mrb[88].mxu0 %v1401_v12  ;;  %vm972_vm13 = vcmp.ge.f32.partialorder %v777_v36, 0.0  ;;  %v1101_v40 = vmul.f32 %v3313_v55, %v777_v36  ;;  %v1103_v6 = vmul.f32 %v3313_v55, %v890_v41  ;;  %v1217_v47 = vmul.f32 %v3313_v55, %v3798_v22 }
 0x140   :  { %v3863_v21 = vpop.f32.mrb[36].mxu0  ;;  %v899_v39 = vpop.f32.mrb[36].mxu1  ;;  %vm1089_vm14 = vcmp.ge.f32.partialorder %v3816_v20, 0.0  ;;  %vm1091_vm15 = vcmp.ge.f32.partialorder %v740_v45, 0.0  ;;  %2114 = vmatmul.mubr.bf16.gmra.mrb[88].mxu1 %v1403_v31  ;;  %vm974_vm0 = vcmp.ge.f32.partialorder %v890_v41, 0.0  ;;  %vm1090_vm1 = vcmp.ge.f32.partialorder %v3813_v59, 0.0 }
 0x141   :  { %v788_v42 = vpop.f32.mrb[37].mxu0  ;;  %v901_v3 = vpop.f32.mrb[37].mxu1  ;;  %v1219_v56 = vmul.f32 %v3313_v55, %v3813_v59  ;;  %vm980_vm2 = vcmp.ge.f32.partialorder %v781_v32, 0.0  ;;  %v1109_v63 = vmul.f32 %v3313_v55, %v781_v32  ;;  %v3876_v33 = vsel %vm972_vm13, %v777_v36, %v1101_v40 }
 0x142   :  { %v790_v52 = vpop.f32.mrb[38].mxu0  ;;  %v903_v0 = vpop.f32.mrb[38].mxu1  ;;  %v779_v7 = vadd.f32 %v778_v19, %v3367_v54  ;;  %v892_v44 = vadd.f32 %v891_v23, %v3386_v8  ;;  %v894_v9 = vadd.f32 %v893_v26, %v3349_v38  ;;  %v3881_v53 = vsel %vm974_vm0, %v890_v41, %v1103_v6 }
 0x143   :  { %v792_v4 = vpop.f32.mrb[39].mxu0  ;;  %v905_v43 = vpop.f32.mrb[39].mxu1  ;;  %v3883_v5 = vsel %vm980_vm2, %v781_v32, %v1109_v63  ;;  %v1346_v17 = vsel %vm1089_vm14, %v3816_v20, %v1218_v61  ;;  %v1348_v58 = vsel %vm1091_vm15, %v740_v45, %v1220_v34  ;;  %v1338_v19 = vsel %vm1081_vm8, %v3792_v46, %v1210_v57 }
 0x144   :  { %v1357_v50 = vpack.c.bf16 %v3883_v5, %v3876_v33  ;;  %vm982_vm3 = vcmp.ge.f32.partialorder %v894_v9, 0.0  ;;  %v1111_v18 = vmul.f32 %v3313_v55, %v894_v9  ;;  %v783_v10 = vadd.f32 %v782_v51, %v3367_v54 }
 0x145   :  { %v896_v23 = vadd.f32 %v895_v27, %v3386_v8  ;;  %v1410_v24 = vpack.c.bf16 %v1346_v17, %v1338_v19  ;;  %v1340_v20 = vsel %vm1083_vm9, %v3795_v16, %v1212_v62  ;;  %v1337_v26 = vsel %vm1080_vm10, %v3786_v15, %v3820_v11 }
 0x146   :  { %v3900_v45 = vsel %vm982_vm3, %v894_v9, %v1111_v18  ;;  %v1412_v1 = vpack.c.bf16 %v1348_v58, %v1340_v20  ;;  %v1345_v46 = vsel %vm1088_vm12, %v3798_v22, %v1217_v47  ;;  %v1339_v16 = vsel %vm1082_vm11, %v3789_v2, %v3824_v25 }
 0x147   :  { %v1359_v57 = vpack.c.bf16 %v3900_v45, %v3881_v53  ;;  %2024 = vmatprep.mubr.bf16.mxu0 %v1410_v24  ;;  %v1409_v13 = vpack.c.bf16 %v1345_v46, %v1337_v26  ;;  %v1347_v27 = vsel %vm1090_vm1, %v3813_v59, %v1219_v56  ;;  %vm973_vm4 = vcmp.ge.f32.partialorder %v779_v7, 0.0 }
 0x148   :  { %v796_v51 = vpop.f32.mrb[40].mxu0  ;;  %v909_v15 = vpop.f32.mrb[40].mxu1  ;;  %2121 = vmatprep.mubr.bf16.mxu1 %v1412_v1  ;;  %v1411_v22 = vpack.c.bf16 %v1347_v27, %v1339_v16  ;;  %v1102_v29 = vmul.f32 %v3313_v55, %v779_v7  ;;  %v1104_v2 = vmul.f32 %v3313_v55, %v892_v44  ;;  %v1110_v25 = vmul.f32 %v3313_v55, %v783_v10 }
 0x149   :  { %v3918_v11 = vpop.f32.mrb[41].mxu0  ;;  %v911_v62 = vpop.f32.mrb[41].mxu1  ;;  %2025 = vmatmul.mubr.bf16.gmra.mrb[92].mxu0 %v1409_v13  ;;  %v1112_v59 = vmul.f32 %v3313_v55, %v896_v23  ;;  %vm975_vm5 = vcmp.ge.f32.partialorder %v892_v44, 0.0  ;;  %vm981_vm6 = vcmp.ge.f32.partialorder %v783_v10, 0.0  ;;  %vm983_vm7 = vcmp.ge.f32.partialorder %v896_v23, 0.0 }
 0x14a   :  { %v800_v28 = vpop.f32.mrb[42].mxu0  ;;  %v913_v60 = vpop.f32.mrb[42].mxu1  ;;  %2122 = vmatmul.mubr.bf16.gmra.mrb[92].mxu1 %v1411_v22  ;;  %v787_v30 = vadd.f32 %v3863_v21, %v3346_v37  ;;  %v3929_v48 = vadd.f32 %v899_v39, %v3349_v38  ;;  %v789_v12 = vadd.f32 %v788_v42, %v3367_v54  ;;  %v902_v35 = vadd.f32 %v901_v3, %v3386_v8 }
 0x14b   :  { %v3920_v14 = vpop.f32.mrb[43].mxu0  ;;  %v915_v49 = vpop.f32.mrb[43].mxu1  ;;  %v791_v36 = vadd.f32 %v790_v52, %v3346_v37  ;;  %v793_v41 = vadd.f32 %v792_v4, %v3367_v54  ;;  %v906_v61 = vadd.f32 %v905_v43, %v3386_v8  ;;  %v1230_v31 = vsel %vm973_vm4, %v779_v7, %v1102_v29 }
 0x14c   :  { %v1238_v32 = vsel %vm981_vm6, %v783_v10, %v1110_v25  ;;  %v1232_v34 = vsel %vm975_vm5, %v892_v44, %v1104_v2  ;;  %v1240_v40 = vsel %vm983_vm7, %v896_v23, %v1112_v59  ;;  %vm988_vm8 = vcmp.ge.f32.partialorder %v787_v30, 0.0 }
 0x14d   :  { %v904_v21 = vadd.f32 %v903_v0, %v3349_v38  ;;  %v1358_v39 = vpack.c.bf16 %v1238_v32, %v1230_v31  ;;  %v1360_v42 = vpack.c.bf16 %v1240_v40, %v1232_v34  ;;  %v1117_v52 = vmul.f32 %v3313_v55, %v787_v30 }
 0x14e   :  { %vm990_vm9 = vcmp.ge.f32.partialorder %v3929_v48, 0.0  ;;  %v1119_v56 = vmul.f32 %v3313_v55, %v3929_v48  ;;  %v3947_v63 = vadd.f32 %v796_v51, %v3346_v37  ;;  %vm989_vm10 = vcmp.ge.f32.partialorder %v789_v12, 0.0 }
 0x14f   :  { %v1118_v0 = vmul.f32 %v3313_v55, %v789_v12  ;;  %v1126_v44 = vmul.f32 %v3313_v55, %v793_v41  ;;  %v1128_v9 = vmul.f32 %v3313_v55, %v906_v61  ;;  %2162 = vmatprep.mubr.bf16.mxu0 %v1358_v39  ;;  %2259 = vmatprep.mubr.bf16.mxu1 %v1360_v42  ;;  %vm997_vm11 = vcmp.ge.f32.partialorder %v793_v41, 0.0 }
 0x150   :  { %v3937_v6 = vpop.f32.mrb[44].mxu0  ;;  %v919_v47 = vpop.f32.mrb[44].mxu1  ;;  %v1120_v17 = vmul.f32 %v3313_v55, %v902_v35  ;;  %vm999_vm12 = vcmp.ge.f32.partialorder %v906_v61, 0.0  ;;  %v3965_v58 = vadd.f32 %v909_v15, %v3349_v38  ;;  %vm991_vm13 = vcmp.ge.f32.partialorder %v902_v35, 0.0 }
 0x151   :  { %v3940_v3 = vpop.f32.mrb[45].mxu0  ;;  %v3949_v4 = vpop.f32.mrb[45].mxu1  ;;  %2163 = vmatmul.mubr.bf16.vlgmr.msra.gmra.mrb[96].mxu0 %v1357_v50  ;;  %vm996_vm14 = vcmp.ge.f32.partialorder %v791_v36, 0.0  ;;  %v1125_v19 = vmul.f32 %v3313_v55, %v791_v36  ;;  %vm998_vm15 = vcmp.ge.f32.partialorder %v904_v21, 0.0  ;;  %v1127_v10 = vmul.f32 %v3313_v55, %v904_v21 }
 0x152   :  { %v3951_v7 = vpop.f32.mrb[46].mxu0  ;;  %v3956_v43 = vpop.f32.mrb[46].mxu1  ;;  %2260 = vmatmul.mubr.bf16.vlgmr.msra.gmra.mrb[96].mxu1 %v1359_v57  ;;  %v3973_v23 = vmul.f32 %v3313_v55, %v3947_v63  ;;  %v799_v33 = vadd.f32 %v3918_v11, %v3367_v54  ;;  %v912_v5 = vadd.f32 %v911_v62, %v3386_v8  ;;  %vm1004_vm0 = vcmp.ge.f32.partialorder %v3947_v63, 0.0 }
 0x153   :  { %v3958_v53 = vpop.f32.mrb[47].mxu0  ;;  %v3967_v18 = vpop.f32.mrb[47].mxu1  ;;  %v3980_v50 = vadd.f32 %v800_v28, %v3346_v37  ;;  %v3983_v24 = vadd.f32 %v913_v60, %v3349_v38  ;;  %v1254_v20 = vsel %vm997_vm11, %v793_v41, %v1126_v44  ;;  %v1256_v45 = vsel %vm999_vm12, %v906_v61, %v1128_v9 }
 0x154   :  { %vm1006_vm1 = vcmp.ge.f32.partialorder %v3965_v58, 0.0  ;;  %v803_v1 = vadd.f32 %v3920_v14, %v3367_v54  ;;  %v916_v26 = vadd.f32 %v915_v49, %v3386_v8  ;;  %v1246_v46 = vsel %vm989_vm10, %v789_v12, %v1118_v0 }
 0x155   :  { %v1248_v51 = vsel %vm991_vm13, %v902_v35, %v1120_v17  ;;  %v1366_v13 = vpack.c.bf16 %v1254_v20, %v1246_v46  ;;  %v1245_v27 = vsel %vm988_vm8, %v787_v30, %v1117_v52  ;;  %v1253_v15 = vsel %vm996_vm14, %v791_v36, %v1125_v19 }
 0x156   :  { %v1368_v16 = vpack.c.bf16 %v1256_v45, %v1248_v51  ;;  %v1135_v62 = vmul.f32 %v3313_v55, %v3965_v58  ;;  %v1365_v28 = vpack.c.bf16 %v1253_v15, %v1245_v27  ;;  %v1247_v60 = vsel %vm990_vm9, %v3929_v48, %v1119_v56 }
 0x157   :  { %v1255_v14 = vsel %vm998_vm15, %v904_v21, %v1127_v10  ;;  %vm1005_vm2 = vcmp.ge.f32.partialorder %v799_v33, 0.0  ;;  %2170 = vmatprep.mubr.bf16.mxu0 %v1366_v13  ;;  %v4013_v59 = vadd.f32 %v3937_v6, %v3346_v37  ;;  %v4016_v49 = vadd.f32 %v919_v47, %v3349_v38 }
 0x158   :  { %v3993_v57 = vpop.f32.mrb[48].mxu0  ;;  %v3997_v11 = vpop.f32.mrb[48].mxu1  ;;  %2267 = vmatprep.mubr.bf16.mxu1 %v1368_v16  ;;  %v1367_v25 = vpack.c.bf16 %v1255_v14, %v1247_v60  ;;  %v1134_v12 = vmul.f32 %v3313_v55, %v799_v33  ;;  %v1142_v35 = vmul.f32 %v3313_v55, %v803_v1  ;;  %v1144_v36 = vmul.f32 %v3313_v55, %v916_v26 }
 0x159   :  { %v3999_v22 = vpop.f32.mrb[49].mxu0  ;;  %v4007_v29 = vpop.f32.mrb[49].mxu1  ;;  %2171 = vmatmul.mubr.bf16.gmra.mrb[100].mxu0 %v1365_v28  ;;  %v4027_v41 = vadd.f32 %v3940_v3, %v3367_v54  ;;  %vm1007_vm3 = vcmp.ge.f32.partialorder %v912_v5, 0.0  ;;  %v1136_v31 = vmul.f32 %v3313_v55, %v912_v5  ;;  %vm1013_vm4 = vcmp.ge.f32.partialorder %v803_v1, 0.0 }
 0x15a   :  { %v4009_v2 = vpop.f32.mrb[50].mxu0  ;;  %v4018_v30 = vpop.f32.mrb[50].mxu1  ;;  %vm1015_vm5 = vcmp.ge.f32.partialorder %v916_v26, 0.0  ;;  %2268 = vmatmul.mubr.bf16.gmra.mrb[100].mxu1 %v1367_v25  ;;  %vm1012_vm6 = vcmp.ge.f32.partialorder %v3980_v50, 0.0  ;;  %v1141_v32 = vmul.f32 %v3313_v55, %v3980_v50  ;;  %vm1014_vm7 = vcmp.ge.f32.partialorder %v3983_v24, 0.0 }
 0x15b   :  { %v4020_v48 = vpop.f32.mrb[51].mxu0  ;;  %v4029_v61 = vpop.f32.mrb[51].mxu1  ;;  %v1143_v34 = vmul.f32 %v3313_v55, %v3983_v24  ;;  %v4040_v40 = vmul.f32 %v3313_v55, %v4013_v59  ;;  %v4044_v6 = vmul.f32 %v3313_v55, %v4016_v49  ;;  %v4048_v21 = vadd.f32 %v3949_v4, %v3386_v8 }
 0x15c   :  { %v4052_v39 = vadd.f32 %v3951_v7, %v3346_v37  ;;  %vm1020_vm8 = vcmp.ge.f32.partialorder %v4013_v59, 0.0  ;;  %vm1021_vm9 = vcmp.ge.f32.partialorder %v4027_v41, 0.0  ;;  %v1150_v42 = vmul.f32 %v3313_v55, %v4027_v41 }
 0x15d   :  { %v1270_v47 = vsel %vm1013_vm4, %v803_v1, %v1142_v35  ;;  %v1272_v3 = vsel %vm1015_vm5, %v916_v26, %v1144_v36  ;;  %vm1022_vm10 = vcmp.ge.f32.partialorder %v4016_v49, 0.0  ;;  %v4063_v56 = vadd.f32 %v3956_v43, %v3349_v38 }
 0x15e   :  { %v813_v4 = vadd.f32 %v3958_v53, %v3367_v54  ;;  %v1262_v7 = vsel %vm1005_vm2, %v799_v33, %v1134_v12  ;;  %v1264_v0 = vsel %vm1007_vm3, %v912_v5, %v1136_v31  ;;  %v926_v17 = vadd.f32 %v3967_v18, %v3386_v8 }
 0x15f   :  { %v1374_v19 = vpack.c.bf16 %v1270_v47, %v1262_v7  ;;  %v1376_v10 = vpack.c.bf16 %v1272_v3, %v1264_v0  ;;  %v1261_v43 = vsel %vm1004_vm0, %v3947_v63, %v3973_v23  ;;  %v1269_v33 = vsel %vm1012_vm6, %v3980_v50, %v1141_v32 }
 0x160   :  { %v4058_v52 = vpop.f32.mrb[52].mxu0  ;;  %v4069_v44 = vpop.f32.mrb[52].mxu1  ;;  %v1263_v5 = vsel %vm1006_vm1, %v3965_v58, %v1135_v62  ;;  %v1271_v18 = vsel %vm1014_vm7, %v3983_v24, %v1143_v34  ;;  %v4094_v45 = vadd.f32 %v3993_v57, %v3346_v37  ;;  %vm1023_vm11 = vcmp.ge.f32.partialorder %v4048_v21, 0.0 }
 0x161   :  { %v4071_v9 = vpop.f32.mrb[53].mxu0  ;;  %v4079_v20 = vpop.f32.mrb[53].mxu1  ;;  %2178 = vmatprep.mubr.bf16.mxu0 %v1374_v19  ;;  %2275 = vmatprep.mubr.bf16.mxu1 %v1376_v10  ;;  %v1373_v50 = vpack.c.bf16 %v1269_v33, %v1261_v43  ;;  %v1375_v1 = vpack.c.bf16 %v1271_v18, %v1263_v5  ;;  %v4103_v58 = vadd.f32 %v3997_v11, %v3349_v38  ;;  %vm1028_vm12 = vcmp.ge.f32.partialorder %v4052_v39, 0.0 }
 0x162   :  { %v4081_v53 = vpop.f32.mrb[54].mxu0  ;;  %v4096_v63 = vpop.f32.mrb[54].mxu1  ;;  %v1152_v24 = vmul.f32 %v3313_v55, %v4048_v21  ;;  %v1158_v46 = vmul.f32 %v3313_v55, %v813_v4  ;;  %v4112_v51 = vadd.f32 %v3999_v22, %v3367_v54  ;;  %v4116_v57 = vadd.f32 %v4007_v29, %v3386_v8 }
 0x163   :  { %v4098_v23 = vpop.f32.mrb[55].mxu0  ;;  %v4105_v26 = vpop.f32.mrb[55].mxu1  ;;  %v1157_v13 = vmul.f32 %v3313_v55, %v4052_v39  ;;  %vm1029_vm13 = vcmp.ge.f32.partialorder %v813_v4, 0.0  ;;  %v1160_v16 = vmul.f32 %v3313_v55, %v926_v17  ;;  %2179 = vmatmul.mubr.bf16.gmra.mrb[104].mxu0 %v1373_v50  ;;  %2276 = vmatmul.mubr.bf16.gmra.mrb[104].mxu1 %v1375_v1  ;;  %vm1030_vm14 = vcmp.ge.f32.partialorder %v4063_v56, 0.0 }
 0x164   :  { %v1159_v27 = vmul.f32 %v3313_v55, %v4063_v56  ;;  %vm1031_vm15 = vcmp.ge.f32.partialorder %v926_v17, 0.0  ;;  %v4127_v15 = vadd.f32 %v4009_v2, %v3346_v37  ;;  %v4131_v11 = vmul.f32 %v3313_v55, %v4094_v45 }
 0x165   :  { %v4135_v22 = vmul.f32 %v3313_v55, %v4103_v58  ;;  %vm1037_vm0 = vcmp.ge.f32.partialorder %v4112_v51, 0.0  ;;  %v4140_v62 = vadd.f32 %v4018_v30, %v3349_v38  ;;  %vm1036_vm1 = vcmp.ge.f32.partialorder %v4094_v45, 0.0 }
 0x166   :  { %v1166_v60 = vmul.f32 %v3313_v55, %v4112_v51  ;;  %vm1039_vm2 = vcmp.ge.f32.partialorder %v4116_v57, 0.0  ;;  %v1278_v14 = vsel %vm1021_vm9, %v4027_v41, %v1150_v42  ;;  %v1286_v29 = vsel %vm1029_vm13, %v813_v4, %v1158_v46 }
 0x167   :  { %vm1038_vm3 = vcmp.ge.f32.partialorder %v4103_v58, 0.0  ;;  %v1168_v30 = vmul.f32 %v3313_v55, %v4116_v57  ;;  %v823_v12 = vadd.f32 %v4020_v48, %v3367_v54  ;;  %v1382_v35 = vpack.c.bf16 %v1286_v29, %v1278_v14 }
 0x168   :  { %v4142_v28 = vpop.f32.mrb[56].mxu0  ;;  %v4152_v2 = vpop.f32.mrb[56].mxu1  ;;  %v1288_v36 = vsel %vm1031_vm15, %v926_v17, %v1160_v16  ;;  %vm1044_vm4 = vcmp.ge.f32.partialorder %v4127_v15, 0.0  ;;  %v936_v32 = vadd.f32 %v4029_v61, %v3386_v8  ;;  %v1280_v34 = vsel %vm1023_vm11, %v4048_v21, %v1152_v24 }
 0x169   :  { %v4154_v25 = vpop.f32.mrb[57].mxu0  ;;  %v4162_v31 = vpop.f32.mrb[57].mxu1  ;;  %v1277_v48 = vsel %vm1020_vm8, %v4013_v59, %v4040_v40  ;;  %2186 = vmatprep.mubr.bf16.mxu0 %v1382_v35  ;;  %v1384_v3 = vpack.c.bf16 %v1288_v36, %v1280_v34  ;;  %v1285_v4 = vsel %vm1028_vm12, %v4052_v39, %v1157_v13  ;;  %v1279_v61 = vsel %vm1022_vm10, %v4016_v49, %v4044_v6 }
 0x16a   :  { %v4164_v41 = vpop.f32.mrb[58].mxu0  ;;  %v4176_v42 = vpop.f32.mrb[58].mxu1  ;;  %v1287_v21 = vsel %vm1030_vm14, %v4063_v56, %v1159_v27  ;;  %v1381_v40 = vpack.c.bf16 %v1285_v4, %v1277_v48  ;;  %v4194_v0 = vadd.f32 %v4058_v52, %v3346_v37  ;;  %v4198_v39 = vadd.f32 %v4069_v44, %v3349_v38 }
 0x16b   :  { %v4178_v47 = vpop.f32.mrb[59].mxu0  ;;  %v4190_v59 = vpop.f32.mrb[59].mxu1  ;;  %v1383_v7 = vpack.c.bf16 %v1287_v21, %v1279_v61  ;;  %v1173_v17 = vmul.f32 %v3313_v55, %v4127_v15  ;;  %v1174_v49 = vmul.f32 %v3313_v55, %v823_v12  ;;  %2283 = vmatprep.mubr.bf16.mxu1 %v1384_v3  ;;  %v4205_v6 = vadd.f32 %v4071_v9, %v3367_v54 }
 0x16c   :  { %v4209_v56 = vadd.f32 %v4079_v20, %v3386_v8  ;;  %vm1045_vm5 = vcmp.ge.f32.partialorder %v823_v12, 0.0  ;;  %v1176_v52 = vmul.f32 %v3313_v55, %v936_v32  ;;  %2187 = vmatmul.mubr.bf16.gmra.mrb[108].mxu0 %v1381_v40  ;;  %v4214_v44 = vadd.f32 %v4081_v53, %v3346_v37 }
 0x16d   :  { %2284 = vmatmul.mubr.bf16.gmra.mrb[108].mxu1 %v1383_v7  ;;  %v4218_v19 = vadd.f32 %v4096_v63, %v3349_v38  ;;  %vm1046_vm6 = vcmp.ge.f32.partialorder %v4140_v62, 0.0  ;;  %v1175_v9 = vmul.f32 %v3313_v55, %v4140_v62  ;;  %vm1047_vm7 = vcmp.ge.f32.partialorder %v936_v32, 0.0 }
 0x16e   :  { %v4225_v10 = vmul.f32 %v3313_v55, %v4194_v0  ;;  %vm1052_vm8 = vcmp.ge.f32.partialorder %v4194_v0, 0.0  ;;  %v4232_v20 = vmul.f32 %v3313_v55, %v4198_v39  ;;  %vm1053_vm9 = vcmp.ge.f32.partialorder %v4205_v6, 0.0 }
 0x16f   :  { %v1182_v53 = vmul.f32 %v3313_v55, %v4205_v6  ;;  %vm1055_vm10 = vcmp.ge.f32.partialorder %v4209_v56, 0.0  ;;  %v1184_v18 = vmul.f32 %v3313_v55, %v4209_v56  ;;  %v833_v63 = vadd.f32 %v4098_v23, %v3367_v54 }
 0x170   :  { %v4227_v43 = vpop.f32.mrb[60].mxu0  ;;  %v4238_v33 = vpop.f32.mrb[60].mxu1  ;;  %v1294_v50 = vsel %vm1037_vm0, %v4112_v51, %v1166_v60  ;;  %v1302_v1 = vsel %vm1045_vm5, %v823_v12, %v1174_v49  ;;  %vm1054_vm11 = vcmp.ge.f32.partialorder %v4198_v39, 0.0  ;;  %vm1060_vm12 = vcmp.ge.f32.partialorder %v4214_v44, 0.0 }
 0x171   :  { %v4240_v5 = vpop.f32.mrb[61].mxu0  ;;  %v4250_v24 = vpop.f32.mrb[61].mxu1  ;;  %v1189_v13 = vmul.f32 %v3313_v55, %v4214_v44  ;;  %vm1062_vm13 = vcmp.ge.f32.partialorder %v4218_v19, 0.0  ;;  %v1390_v23 = vpack.c.bf16 %v1302_v1, %v1294_v50  ;;  %v1304_v16 = vsel %vm1047_vm7, %v936_v32, %v1176_v52 }
 0x172   :  { %v4252_v46 = vpop.f32.mrb[62].mxu0  ;;  %v4260_v27 = vpop.f32.mrb[62].mxu1  ;;  %v1190_v60 = vmul.f32 %v3313_v55, %v833_v63  ;;  %v946_v14 = vadd.f32 %v4105_v26, %v3386_v8  ;;  %v1296_v29 = vsel %vm1039_vm2, %v4116_v57, %v1168_v30  ;;  %v1293_v12 = vsel %vm1036_vm1, %v4094_v45, %v4131_v11 }
 0x173   :  { %v4262_v51 = vpop.f32.mrb[63].mxu0  ;;  %v4274_v35 = vpop.f32.mrb[63].mxu1  ;;  %2194 = vmatprep.mubr.bf16.mxu0 %v1390_v23  ;;  %v1392_v36 = vpack.c.bf16 %v1304_v16, %v1296_v29  ;;  %v1301_v32 = vsel %vm1044_vm4, %v4127_v15, %v1173_v17  ;;  %v1295_v26 = vsel %vm1038_vm3, %v4103_v58, %v4135_v22  ;;  %v1303_v57 = vsel %vm1046_vm6, %v4140_v62, %v1175_v9 }
 0x174   :  { %v1389_v30 = vpack.c.bf16 %v1301_v32, %v1293_v12  ;;  %v1391_v34 = vpack.c.bf16 %v1303_v57, %v1295_v26  ;;  %v4288_v45 = vadd.f32 %v4142_v28, %v3346_v37  ;;  %v4292_v11 = vadd.f32 %v4152_v2, %v3349_v38 }
 0x175   :  { %2291 = vmatprep.mubr.bf16.mxu1 %v1392_v36  ;;  %v4296_v15 = vadd.f32 %v4154_v25, %v3367_v54  ;;  %v4300_v58 = vadd.f32 %v4162_v31, %v3386_v8  ;;  %v4304_v22 = vadd.f32 %v4164_v41, %v3346_v37  ;;  %v4308_v62 = vadd.f32 %v4176_v42, %v3349_v38 }
 0x176   :  { %v1191_v28 = vmul.f32 %v3313_v55, %v4218_v19  ;;  %vm1061_vm14 = vcmp.ge.f32.partialorder %v833_v63, 0.0  ;;  %vm1063_vm15 = vcmp.ge.f32.partialorder %v946_v14, 0.0  ;;  %v1192_v2 = vmul.f32 %v3313_v55, %v946_v14  ;;  %2195 = vmatmul.mubr.bf16.gmra.mrb[112].mxu0 %v1389_v30  ;;  %2292 = vmatmul.mubr.bf16.gmra.mrb[112].mxu1 %v1391_v34 }
 0x177   :  { %v1197_v25 = vmul.f32 %v3313_v55, %v4288_v45  ;;  %v4317_v31 = vmul.f32 %v3313_v55, %v4292_v11  ;;  %vm1069_vm0 = vcmp.ge.f32.partialorder %v4296_v15, 0.0  ;;  %v1198_v41 = vmul.f32 %v3313_v55, %v4296_v15 }
 0x178   :  { %vm1068_vm1 = vcmp.ge.f32.partialorder %v4288_v45, 0.0  ;;  %vm1071_vm2 = vcmp.ge.f32.partialorder %v4300_v58, 0.0  ;;  %v1200_v48 = vmul.f32 %v3313_v55, %v4300_v58  ;;  %v1205_v42 = vmul.f32 %v3313_v55, %v4304_v22 }
 0x179   :  { %v1207_v3 = vmul.f32 %v3313_v55, %v4308_v62  ;;  %v843_v4 = vadd.f32 %v4178_v47, %v3367_v54  ;;  %v956_v61 = vadd.f32 %v4190_v59, %v3386_v8  ;;  %v1310_v21 = vsel %vm1053_vm9, %v4205_v6, %v1182_v53 }
 0x17a   :  { %v1318_v40 = vsel %vm1061_vm14, %v833_v63, %v1190_v60  ;;  %vm1070_vm3 = vcmp.ge.f32.partialorder %v4292_v11, 0.0  ;;  %vm1076_vm4 = vcmp.ge.f32.partialorder %v4304_v22, 0.0  ;;  %vm1078_vm5 = vcmp.ge.f32.partialorder %v4308_v62, 0.0 }
 0x17b   :  { %v1398_v7 = vpack.c.bf16 %v1318_v40, %v1310_v21  ;;  %v1312_v47 = vsel %vm1055_vm10, %v4209_v56, %v1184_v18  ;;  %v1320_v17 = vsel %vm1063_vm15, %v946_v14, %v1192_v2  ;;  %v1309_v59 = vsel %vm1052_vm8, %v4194_v0, %v4225_v10 }
 0x17c   :  { %vm1077_vm6 = vcmp.ge.f32.partialorder %v843_v4, 0.0  ;;  %v1206_v49 = vmul.f32 %v3313_v55, %v843_v4  ;;  %vm1079_vm7 = vcmp.ge.f32.partialorder %v956_v61, 0.0  ;;  %v1208_v6 = vmul.f32 %v3313_v55, %v956_v61 }
 0x17d   :  { %2202 = vmatprep.mubr.bf16.mxu0 %v1398_v7  ;;  %v1400_v52 = vpack.c.bf16 %v1320_v17, %v1312_v47  ;;  %v1317_v9 = vsel %vm1060_vm12, %v4214_v44, %v1189_v13  ;;  %v1311_v56 = vsel %vm1054_vm11, %v4198_v39, %v4232_v20  ;;  %v1319_v0 = vsel %vm1062_vm13, %v4218_v19, %v1191_v28 }
 0x17e   :  { %v1397_v10 = vpack.c.bf16 %v1317_v9, %v1309_v59  ;;  %v1399_v53 = vpack.c.bf16 %v1319_v0, %v1311_v56  ;;  %v847_v18 = vadd.f32 %v4227_v43, %v3346_v37  ;;  %v960_v63 = vadd.f32 %v4238_v33, %v3349_v38 }
 0x17f   :  { %2299 = vmatprep.mubr.bf16.mxu1 %v1400_v52  ;;  %v849_v44 = vadd.f32 %v4240_v5, %v3367_v54  ;;  %v962_v50 = vadd.f32 %v4250_v24, %v3386_v8  ;;  %v851_v39 = vadd.f32 %v4252_v46, %v3346_v37  ;;  %v964_v19 = vadd.f32 %v4260_v27, %v3349_v38 }
 0x180   :  { %2203 = vmatmul.mubr.bf16.gmra.mrb[116].mxu0 %v1397_v10  ;;  %2300 = vmatmul.mubr.bf16.gmra.mrb[116].mxu1 %v1399_v53  ;;  %vm1084_vm8 = vcmp.ge.f32.partialorder %v847_v18, 0.0  ;;  %v1213_v43 = vmul.f32 %v3313_v55, %v847_v18  ;;  %vm1086_vm9 = vcmp.ge.f32.partialorder %v960_v63, 0.0  ;;  %v1215_v20 = vmul.f32 %v3313_v55, %v960_v63 }
 0x181   :  { %vm1085_vm10 = vcmp.ge.f32.partialorder %v849_v44, 0.0  ;;  %v1214_v33 = vmul.f32 %v3313_v55, %v849_v44  ;;  %vm1087_vm11 = vcmp.ge.f32.partialorder %v962_v50, 0.0  ;;  %v1216_v5 = vmul.f32 %v3313_v55, %v962_v50 }
 0x182   :  { %vm1092_vm12 = vcmp.ge.f32.partialorder %v851_v39, 0.0  ;;  %v1221_v37 = vmul.f32 %v3313_v55, %v851_v39  ;;  %vm1094_vm13 = vcmp.ge.f32.partialorder %v964_v19, 0.0  ;;  %v1223_v38 = vmul.f32 %v3313_v55, %v964_v19 }
 0x183   :  { %v853_v1 = vadd.f32 %v4262_v51, %v3367_v54  ;;  %v966_v24 = vadd.f32 %v4274_v35, %v3386_v8  ;;  %v1326_v46 = vsel %vm1069_vm0, %v4296_v15, %v1198_v41  ;;  %v1334_v13 = vsel %vm1077_vm6, %v843_v4, %v1206_v49 }
 0x184   :  { %v1406_v23 = vpack.c.bf16 %v1334_v13, %v1326_v46  ;;  %v1328_v16 = vsel %vm1071_vm2, %v4300_v58, %v1200_v48  ;;  %v1336_v27 = vsel %vm1079_vm7, %v956_v61, %v1208_v6  ;;  %v1325_v54 = vsel %vm1068_vm1, %v4288_v45, %v1197_v25  ;;  %v4415_v25 = vld [vmem:[%s4550_s4] ss:$0 sm:$0xff] }
 0x185   :  { %vm1093_vm14 = vcmp.ge.f32.partialorder %v853_v1, 0.0  ;;  %v1222_v8 = vmul.f32 %v3313_v55, %v853_v1  ;;  %vm1095_vm15 = vcmp.ge.f32.partialorder %v966_v24, 0.0  ;;  %v1224_v51 = vmul.f32 %v3313_v55, %v966_v24 }
 0x186   :  { %2210 = vmatprep.mubr.bf16.mxu0 %v1406_v23  ;;  %v1408_v60 = vpack.c.bf16 %v1336_v27, %v1328_v16  ;;  %v1333_v14 = vsel %vm1076_vm4, %v4304_v22, %v1205_v42  ;;  %v1327_v29 = vsel %vm1070_vm3, %v4292_v11, %v4317_v31  ;;  %v1335_v12 = vsel %vm1078_vm5, %v4308_v62, %v1207_v3 }
 0x187   :  { %v1405_v35 = vpack.c.bf16 %v1333_v14, %v1325_v54  ;;  %v1407_v36 = vpack.c.bf16 %v1335_v12, %v1327_v29  ;;  %v1342_v32 = vsel %vm1085_vm10, %v849_v44, %v1214_v33  ;;  %v1350_v26 = vsel %vm1093_vm14, %v853_v1, %v1222_v8 }
 0x188   :  { %2307 = vmatprep.mubr.bf16.mxu1 %v1408_v60  ;;  %v1414_v57 = vpack.c.bf16 %v1350_v26, %v1342_v32  ;;  %v1344_v30 = vsel %vm1087_vm11, %v962_v50, %v1216_v5  ;;  %v1352_v34 = vsel %vm1095_vm15, %v966_v24, %v1224_v51  ;;  %v1341_v15 = vsel %vm1084_vm8, %v847_v18, %v1213_v43 }
 0x189   :  { %2211 = vmatmul.mubr.bf16.gmra.mrb[120].mxu0 %v1405_v35  ;;  %2308 = vmatmul.mubr.bf16.gmra.mrb[120].mxu1 %v1407_v36  ;;  %v1416_v45 = vpack.c.bf16 %v1352_v34, %v1344_v30  ;;  %v1349_v11 = vsel %vm1092_vm12, %v851_v39, %v1221_v37  ;;  %v1343_v22 = vsel %vm1086_vm9, %v960_v63, %v1215_v20 }
 0x18a   :  { %2218 = vmatprep.mubr.bf16.mxu0 %v1414_v57  ;;  %v1413_v58 = vpack.c.bf16 %v1349_v11, %v1341_v15  ;;  %v1351_v62 = vsel %vm1094_vm13, %v964_v19, %v1223_v38 }
 0x18b   :  { %2315 = vmatprep.mubr.bf16.mxu1 %v1416_v45  ;;  %v1415_v28 = vpack.c.bf16 %v1351_v62, %v1343_v22 }
 0x191   :  { %2219 = vmatmul.mubr.bf16.gmra.mrb[124].mxu0 %v1413_v58  ;;  %2316 = vmatmul.mubr.bf16.gmra.mrb[124].mxu1 %v1415_v28 }
 0x1d9   :  { %v2545_v2 = vpop.f32.mrb[64].mxu0 }
 0x1da   :  { %v2546_v31 = vpop.f32.mrb[65].mxu0 }
 0x1db   :  { %v2609_v41 = vpop.f32.mrb[64].mxu1  ;;  %v2547_v48 = vadd.f32 %v2546_v31, %v2545_v2  ;;  %v2548_v42 = vpop.f32.mrb[66].mxu0 }
 0x1dc   :  { %v2610_v3 = vpop.f32.mrb[65].mxu1  ;;  %v2549_v4 = vpop.f32.mrb[67].mxu0 }
 0x1dd   :  { %v1971_v61 = vadd.f32 %v2547_v48, %v4415_v25  ;;  %v2611_v21 = vadd.f32 %v2610_v3, %v2609_v41  ;;  %v2612_v40 = vpop.f32.mrb[66].mxu1  ;;  %v2550_v7 = vadd.f32 %v2549_v4, %v2548_v42 }
 0x1de   :  { %v2613_v47 = vpop.f32.mrb[67].mxu1 }
 0x1df   :  { %v4418_v17 = vadd.f32 %v2611_v21, %v1971_v61  ;;  %v1974_v59 = vadd.f32 %v2550_v7, %v4415_v25  ;;  %v2614_v49 = vadd.f32 %v2613_v47, %v2612_v40 }
 0x1e1   :  { %v4421_v6 = vadd.f32 %v2614_v49, %v1974_v59 }
 0x1e3   :  { %v2551_v52 = vpop.f32.mrb[68].mxu0 }
 0x1e4   :  { %v2552_v9 = vpop.f32.mrb[69].mxu0  ;;  %v2615_v56 = vpop.f32.mrb[68].mxu1 }
 0x1e5   :  { %v2553_v0 = vadd.f32 %v2552_v9, %v2551_v52  ;;  %v2554_v10 = vpop.f32.mrb[70].mxu0  ;;  %v2616_v53 = vpop.f32.mrb[69].mxu1 }
 0x1e6   :  { %v2555_v18 = vpop.f32.mrb[71].mxu0  ;;  %v2617_v44 = vadd.f32 %v2616_v53, %v2615_v56  ;;  %v2618_v50 = vpop.f32.mrb[70].mxu1 }
 0x1e7   :  { %v1979_v63 = vadd.f32 %v2553_v0, %v4415_v25  ;;  %v2556_v39 = vadd.f32 %v2555_v18, %v2554_v10  ;;  %v2619_v19 = vpop.f32.mrb[71].mxu1 }
 0x1e8   :  { %v2620_v33 = vadd.f32 %v2619_v19, %v2618_v50 }
 0x1e9   :  { %v4424_v43 = vadd.f32 %v2617_v44, %v1979_v63  ;;  %v1982_v20 = vadd.f32 %v2556_v39, %v4415_v25 }
 0x1eb   :  { %v4427_v5 = vadd.f32 %v2620_v33, %v1982_v20 }
 0x1ec   :  { %v2557_v37 = vpop.f32.mrb[72].mxu0 }
 0x1ed   :  { %v2558_v1 = vpop.f32.mrb[73].mxu0 }
 0x1ee   :  { %v2621_v38 = vpop.f32.mrb[72].mxu1  ;;  %v2559_v24 = vadd.f32 %v2558_v1, %v2557_v37  ;;  %v2560_v13 = vpop.f32.mrb[74].mxu0 }
 0x1ef   :  { %v2622_v46 = vpop.f32.mrb[73].mxu1  ;;  %v2561_v27 = vpop.f32.mrb[75].mxu0 }
 0x1f0   :  { %v2623_v23 = vadd.f32 %v2622_v46, %v2621_v38  ;;  %v2624_v16 = vpop.f32.mrb[74].mxu1  ;;  %v1987_v54 = vadd.f32 %v2559_v24, %v4415_v25  ;;  %v2562_v8 = vadd.f32 %v2561_v27, %v2560_v13 }
 0x1f1   :  { %v2625_v51 = vpop.f32.mrb[75].mxu1 }
 0x1f2   :  { %v2626_v60 = vadd.f32 %v2625_v51, %v2624_v16  ;;  %v4430_v14 = vadd.f32 %v2623_v23, %v1987_v54  ;;  %v1990_v29 = vadd.f32 %v2562_v8, %v4415_v25 }
 0x1f4   :  { %v4433_v12 = vadd.f32 %v2626_v60, %v1990_v29 }
 0x1f5   :  { %v2563_v35 = vpop.f32.mrb[76].mxu0 }
 0x1f6   :  { %v2564_v32 = vpop.f32.mrb[77].mxu0 }
 0x1f7   :  { %v2627_v36 = vpop.f32.mrb[76].mxu1  ;;  %v2565_v26 = vadd.f32 %v2564_v32, %v2563_v35  ;;  %v2566_v30 = vpop.f32.mrb[78].mxu0 }
 0x1f8   :  { %v2628_v57 = vpop.f32.mrb[77].mxu1  ;;  %v2567_v15 = vpop.f32.mrb[79].mxu0 }
 0x1f9   :  { %v2629_v34 = vadd.f32 %v2628_v57, %v2627_v36  ;;  %v2630_v45 = vpop.f32.mrb[78].mxu1  ;;  %v1995_v11 = vadd.f32 %v2565_v26, %v4415_v25  ;;  %v2568_v58 = vadd.f32 %v2567_v15, %v2566_v30 }
 0x1fa   :  { %v2631_v22 = vpop.f32.mrb[79].mxu1 }
 0x1fb   :  { %v2632_v62 = vadd.f32 %v2631_v22, %v2630_v45  ;;  %v4436_v28 = vadd.f32 %v2629_v34, %v1995_v11  ;;  %v1998_v2 = vadd.f32 %v2568_v58, %v4415_v25 }
 0x1fd   :  { %v4439_v31 = vadd.f32 %v2632_v62, %v1998_v2 }
 0x1ff   :  { %v2569_v41 = vpop.f32.mrb[80].mxu0 }
 0x200   :  { %v2633_v48 = vpop.f32.mrb[80].mxu1  ;;  %v2570_v42 = vpop.f32.mrb[81].mxu0 }
 0x201   :  { %v2571_v3 = vadd.f32 %v2570_v42, %v2569_v41  ;;  %v2634_v4 = vpop.f32.mrb[81].mxu1  ;;  %v2572_v61 = vpop.f32.mrb[82].mxu0 }
 0x202   :  { %v2635_v21 = vadd.f32 %v2634_v4, %v2633_v48  ;;  %v2636_v40 = vpop.f32.mrb[82].mxu1  ;;  %v2573_v7 = vpop.f32.mrb[83].mxu0 }
 0x203   :  { %v2003_v47 = vadd.f32 %v2571_v3, %v4415_v25  ;;  %v2574_v59 = vadd.f32 %v2573_v7, %v2572_v61  ;;  %v2637_v49 = vpop.f32.mrb[83].mxu1 }
 0x204   :  { %v2638_v52 = vadd.f32 %v2637_v49, %v2636_v40 }
 0x205   :  { %v4442_v9 = vadd.f32 %v2635_v21, %v2003_v47  ;;  %v2006_v56 = vadd.f32 %v2574_v59, %v4415_v25 }
 0x207   :  { %v4445_v0 = vadd.f32 %v2638_v52, %v2006_v56 }
 0x208   :  { %v2575_v10 = vpop.f32.mrb[84].mxu0 }
 0x209   :  { %v2639_v53 = vpop.f32.mrb[84].mxu1  ;;  %v2576_v18 = vpop.f32.mrb[85].mxu0 }
 0x20a   :  { %v2577_v63 = vadd.f32 %v2576_v18, %v2575_v10  ;;  %v2640_v44 = vpop.f32.mrb[85].mxu1  ;;  %v2578_v50 = vpop.f32.mrb[86].mxu0 }
 0x20b   :  { %v2641_v39 = vadd.f32 %v2640_v44, %v2639_v53  ;;  %v2642_v19 = vpop.f32.mrb[86].mxu1  ;;  %v2579_v20 = vpop.f32.mrb[87].mxu0 }
 0x20c   :  { %v2011_v33 = vadd.f32 %v2577_v63, %v4415_v25  ;;  %v2580_v37 = vadd.f32 %v2579_v20, %v2578_v50  ;;  %v2643_v38 = vpop.f32.mrb[87].mxu1 }
 0x20d   :  { %v2644_v1 = vadd.f32 %v2643_v38, %v2642_v19 }
 0x20e   :  { %v4448_v24 = vadd.f32 %v2641_v39, %v2011_v33  ;;  %v2014_v46 = vadd.f32 %v2580_v37, %v4415_v25 }
 0x210   :  { %v4451_v13 = vadd.f32 %v2644_v1, %v2014_v46 }
 0x212   :  { %v2581_v23 = vpop.f32.mrb[88].mxu0 }
 0x213   :  { %v2645_v16 = vpop.f32.mrb[88].mxu1  ;;  %v2582_v27 = vpop.f32.mrb[89].mxu0 }
 0x214   :  { %v2583_v54 = vadd.f32 %v2582_v27, %v2581_v23  ;;  %v2646_v8 = vpop.f32.mrb[89].mxu1  ;;  %v2584_v51 = vpop.f32.mrb[90].mxu0 }
 0x215   :  { %v2647_v60 = vadd.f32 %v2646_v8, %v2645_v16  ;;  %v2648_v29 = vpop.f32.mrb[90].mxu1  ;;  %v2585_v35 = vpop.f32.mrb[91].mxu0 }
 0x216   :  { %v2019_v36 = vadd.f32 %v2583_v54, %v4415_v25  ;;  %v2586_v32 = vadd.f32 %v2585_v35, %v2584_v51  ;;  %v2649_v26 = vpop.f32.mrb[91].mxu1 }
 0x217   :  { %v2650_v57 = vadd.f32 %v2649_v26, %v2648_v29 }
 0x218   :  { %v4454_v30 = vadd.f32 %v2647_v60, %v2019_v36  ;;  %v2022_v34 = vadd.f32 %v2586_v32, %v4415_v25 }
 0x21a   :  { %v4457_v45 = vadd.f32 %v2650_v57, %v2022_v34 }
 0x21c   :  { %v2587_v15 = vpop.f32.mrb[92].mxu0 }
 0x21d   :  { %v2651_v11 = vpop.f32.mrb[92].mxu1  ;;  %v2588_v58 = vpop.f32.mrb[93].mxu0 }
 0x21e   :  { %v2589_v22 = vadd.f32 %v2588_v58, %v2587_v15  ;;  %v2652_v62 = vpop.f32.mrb[93].mxu1  ;;  %v2590_v2 = vpop.f32.mrb[94].mxu0 }
 0x21f   :  { %v2653_v41 = vadd.f32 %v2652_v62, %v2651_v11  ;;  %v2654_v48 = vpop.f32.mrb[94].mxu1  ;;  %v2591_v42 = vpop.f32.mrb[95].mxu0 }
 0x220   :  { %v2027_v3 = vadd.f32 %v2589_v22, %v4415_v25  ;;  %v2592_v4 = vadd.f32 %v2591_v42, %v2590_v2  ;;  %v2655_v61 = vpop.f32.mrb[95].mxu1 }
 0x221   :  { %v2656_v21 = vadd.f32 %v2655_v61, %v2654_v48 }
 0x222   :  { %v4460_v40 = vadd.f32 %v2653_v41, %v2027_v3  ;;  %v2030_v7 = vadd.f32 %v2592_v4, %v4415_v25 }
 0x224   :  { %v4463_v47 = vadd.f32 %v2656_v21, %v2030_v7  ;;  %v2673_v59 = vpop.f32.mrb[96].mxu0 }
 0x225   :  { %v2737_v49 = vpop.f32.mrb[96].mxu1  ;;  %v2674_v52 = vpop.f32.mrb[97].mxu0 }
 0x226   :  { %v2738_v56 = vpop.f32.mrb[97].mxu1  ;;  %v2675_v10 = vadd.f32 %v2674_v52, %v2673_v59  ;;  %v2676_v18 = vpop.f32.mrb[98].mxu0 }
 0x227   :  { %v2739_v53 = vadd.f32 %v2738_v56, %v2737_v49  ;;  %v2740_v63 = vpop.f32.mrb[98].mxu1  ;;  %v2677_v44 = vpop.f32.mrb[99].mxu0 }
 0x228   :  { %v2741_v50 = vpop.f32.mrb[99].mxu1  ;;  %v2165_v39 = vadd.f32 %v2675_v10, %v4418_v17  ;;  %v2678_v19 = vadd.f32 %v2677_v44, %v2676_v18 }
 0x229   :  { %v2742_v20 = vadd.f32 %v2741_v50, %v2740_v63 }
 0x22a   :  { %v2262_v33 = vadd.f32 %v2739_v53, %v2165_v39  ;;  %v2168_v37 = vadd.f32 %v2678_v19, %v4421_v6 }
 0x22c   :  { %vm2324_vm0 = vcmp.ge.f32.partialorder %v2262_v33, 0.0  ;;  %v2340_v25 = vmul.f32 %v2262_v33, %v3313_v55  ;;  %v2265_v38 = vadd.f32 %v2742_v20, %v2168_v37  ;;  %v2679_v1 = vpop.f32.mrb[100].mxu0 }
 0x22d   :  { %v2743_v46 = vpop.f32.mrb[100].mxu1  ;;  %v2680_v23 = vpop.f32.mrb[101].mxu0 }
 0x22e   :  { %v2356_v16 = vsel %vm2324_vm0, %v2262_v33, %v2340_v25  ;;  %vm2325_vm1 = vcmp.ge.f32.partialorder %v2265_v38, 0.0  ;;  %v2341_v27 = vmul.f32 %v2265_v38, %v3313_v55  ;;  %v2681_v54 = vadd.f32 %v2680_v23, %v2679_v1  ;;  %v2744_v8 = vpop.f32.mrb[101].mxu1  ;;  %v2682_v51 = vpop.f32.mrb[102].mxu0 }
 0x22f   :  { %2372 = vst [vmem:[%s4551_s6] sm:$0xff] %v2356_v16  ;;  %v2745_v17 = vadd.f32 %v2744_v8, %v2743_v46  ;;  %v2746_v6 = vpop.f32.mrb[102].mxu1  ;;  %v2683_v60 = vpop.f32.mrb[103].mxu0 }
 0x230   :  { %v2357_v29 = vsel %vm2325_vm1, %v2265_v38, %v2341_v27  ;;  %v2173_v35 = vadd.f32 %v2681_v54, %v4424_v43  ;;  %v2684_v36 = vadd.f32 %v2683_v60, %v2682_v51  ;;  %v2747_v32 = vpop.f32.mrb[103].mxu1 }
 0x231   :  { %2373 = vst [vmem:[%s4551_s6 + $0x8] sm:$0xff] %v2357_v29  ;;  %v2748_v26 = vadd.f32 %v2747_v32, %v2746_v6 }
 0x232   :  { %v2270_v57 = vadd.f32 %v2745_v17, %v2173_v35  ;;  %v2176_v34 = vadd.f32 %v2684_v36, %v4427_v5 }
 0x234   :  { %vm2326_vm2 = vcmp.ge.f32.partialorder %v2270_v57, 0.0  ;;  %v2342_v15 = vmul.f32 %v2270_v57, %v3313_v55  ;;  %v2273_v11 = vadd.f32 %v2748_v26, %v2176_v34 }
 0x236   :  { %v2358_v58 = vsel %vm2326_vm2, %v2270_v57, %v2342_v15  ;;  %vm2327_vm3 = vcmp.ge.f32.partialorder %v2273_v11, 0.0  ;;  %v2343_v22 = vmul.f32 %v2273_v11, %v3313_v55  ;;  %v2685_v62 = vpop.f32.mrb[104].mxu0  ;;  %v2749_v43 = vpop.f32.mrb[104].mxu1 }
 0x237   :  { %2374 = vst [vmem:[%s4551_s6 + $0x10] sm:$0xff] %v2358_v58  ;;  %v2686_v2 = vpop.f32.mrb[105].mxu0  ;;  %v2750_v41 = vpop.f32.mrb[105].mxu1 }
 0x238   :  { %v2359_v48 = vsel %vm2327_vm3, %v2273_v11, %v2343_v22  ;;  %v2687_v42 = vadd.f32 %v2686_v2, %v2685_v62  ;;  %v2751_v3 = vadd.f32 %v2750_v41, %v2749_v43  ;;  %v2688_v5 = vpop.f32.mrb[106].mxu0  ;;  %v2752_v4 = vpop.f32.mrb[106].mxu1 }
 0x239   :  { %2375 = vst [vmem:[%s4551_s6 + $0x18] sm:$0xff] %v2359_v48  ;;  %v2689_v61 = vpop.f32.mrb[107].mxu0  ;;  %v2753_v21 = vpop.f32.mrb[107].mxu1 }
 0x23a   :  { %v2181_v7 = vadd.f32 %v2687_v42, %v4430_v14  ;;  %v2690_v59 = vadd.f32 %v2689_v61, %v2688_v5  ;;  %v2754_v49 = vadd.f32 %v2753_v21, %v2752_v4 }
 0x23c   :  { %v2278_v52 = vadd.f32 %v2751_v3, %v2181_v7  ;;  %v2184_v56 = vadd.f32 %v2690_v59, %v4433_v12 }
 0x23e   :  { %vm2328_vm4 = vcmp.ge.f32.partialorder %v2278_v52, 0.0  ;;  %v2344_v10 = vmul.f32 %v2278_v52, %v3313_v55  ;;  %v2281_v53 = vadd.f32 %v2754_v49, %v2184_v56 }
 0x23f   :  { %v2691_v18 = vpop.f32.mrb[108].mxu0 }
 0x240   :  { %v2755_v63 = vpop.f32.mrb[108].mxu1  ;;  %v2360_v44 = vsel %vm2328_vm4, %v2278_v52, %v2344_v10  ;;  %vm2329_vm5 = vcmp.ge.f32.partialorder %v2281_v53, 0.0  ;;  %v2345_v50 = vmul.f32 %v2281_v53, %v3313_v55  ;;  %v2692_v39 = vpop.f32.mrb[109].mxu0 }
 0x241   :  { %v2756_v19 = vpop.f32.mrb[109].mxu1  ;;  %2376 = vst [vmem:[%s4551_s6 + $0x20] sm:$0xff] %v2360_v44  ;;  %v2693_v14 = vadd.f32 %v2692_v39, %v2691_v18  ;;  %v2694_v33 = vpop.f32.mrb[110].mxu0 }
 0x242   :  { %v2757_v20 = vadd.f32 %v2756_v19, %v2755_v63  ;;  %v2758_v12 = vpop.f32.mrb[110].mxu1  ;;  %v2361_v37 = vsel %vm2329_vm5, %v2281_v53, %v2345_v50  ;;  %v2695_v25 = vpop.f32.mrb[111].mxu0 }
 0x243   :  { %v2759_v38 = vpop.f32.mrb[111].mxu1  ;;  %2377 = vst [vmem:[%s4551_s6 + $0x28] sm:$0xff] %v2361_v37  ;;  %v2189_v1 = vadd.f32 %v2693_v14, %v4436_v28  ;;  %v2696_v46 = vadd.f32 %v2695_v25, %v2694_v33 }
 0x244   :  { %v2760_v23 = vadd.f32 %v2759_v38, %v2758_v12 }
 0x245   :  { %v2286_v16 = vadd.f32 %v2757_v20, %v2189_v1  ;;  %v2192_v27 = vadd.f32 %v2696_v46, %v4439_v31 }
 0x247   :  { %vm2330_vm6 = vcmp.ge.f32.partialorder %v2286_v16, 0.0  ;;  %v2346_v54 = vmul.f32 %v2286_v16, %v3313_v55  ;;  %v2289_v8 = vadd.f32 %v2760_v23, %v2192_v27 }
 0x249   :  { %v2697_v51 = vpop.f32.mrb[112].mxu0  ;;  %v2761_v17 = vpop.f32.mrb[112].mxu1  ;;  %v2362_v6 = vsel %vm2330_vm6, %v2286_v16, %v2346_v54  ;;  %vm2331_vm7 = vcmp.ge.f32.partialorder %v2289_v8, 0.0  ;;  %v2347_v60 = vmul.f32 %v2289_v8, %v3313_v55 }
 0x24a   :  { %v2698_v29 = vpop.f32.mrb[113].mxu0  ;;  %v2762_v35 = vpop.f32.mrb[113].mxu1  ;;  %2378 = vst [vmem:[%s4551_s6 + $0x30] sm:$0xff] %v2362_v6 }
 0x24b   :  { %v2699_v28 = vadd.f32 %v2698_v29, %v2697_v51  ;;  %v2763_v36 = vadd.f32 %v2762_v35, %v2761_v17  ;;  %v2700_v32 = vpop.f32.mrb[114].mxu0  ;;  %v2764_v31 = vpop.f32.mrb[114].mxu1  ;;  %v2363_v26 = vsel %vm2331_vm7, %v2289_v8, %v2347_v60 }
 0x24c   :  { %v2701_v57 = vpop.f32.mrb[115].mxu0  ;;  %v2765_v34 = vpop.f32.mrb[115].mxu1  ;;  %2379 = vst [vmem:[%s4551_s6 + $0x38] sm:$0xff] %v2363_v26 }
 0x24d   :  { %v2197_v15 = vadd.f32 %v2699_v28, %v4442_v9  ;;  %v2702_v11 = vadd.f32 %v2701_v57, %v2700_v32  ;;  %v2766_v58 = vadd.f32 %v2765_v34, %v2764_v31 }
 0x24f   :  { %v2294_v22 = vadd.f32 %v2763_v36, %v2197_v15  ;;  %v2200_v62 = vadd.f32 %v2702_v11, %v4445_v0 }
 0x251   :  { %vm2332_vm8 = vcmp.ge.f32.partialorder %v2294_v22, 0.0  ;;  %v2348_v43 = vmul.f32 %v2294_v22, %v3313_v55  ;;  %v2297_v2 = vadd.f32 %v2766_v58, %v2200_v62 }
 0x253   :  { %v2703_v41 = vpop.f32.mrb[116].mxu0  ;;  %v2767_v48 = vpop.f32.mrb[116].mxu1  ;;  %v2364_v42 = vsel %vm2332_vm8, %v2294_v22, %v2348_v43  ;;  %vm2333_vm9 = vcmp.ge.f32.partialorder %v2297_v2, 0.0  ;;  %v2349_v3 = vmul.f32 %v2297_v2, %v3313_v55 }
 0x254   :  { %v2704_v5 = vpop.f32.mrb[117].mxu0  ;;  %v2768_v4 = vpop.f32.mrb[117].mxu1  ;;  %2380 = vst [vmem:[%s4551_s6 + $0x40] sm:$0xff] %v2364_v42 }
 0x255   :  { %v2705_v9 = vadd.f32 %v2704_v5, %v2703_v41  ;;  %v2769_v61 = vadd.f32 %v2768_v4, %v2767_v48  ;;  %v2706_v21 = vpop.f32.mrb[118].mxu0  ;;  %v2770_v0 = vpop.f32.mrb[118].mxu1  ;;  %v2365_v7 = vsel %vm2333_vm9, %v2297_v2, %v2349_v3 }
 0x256   :  { %v2707_v59 = vpop.f32.mrb[119].mxu0  ;;  %v2771_v49 = vpop.f32.mrb[119].mxu1  ;;  %2381 = vst [vmem:[%s4551_s6 + $0x48] sm:$0xff] %v2365_v7 }
 0x257   :  { %v2205_v52 = vadd.f32 %v2705_v9, %v4448_v24  ;;  %v2708_v56 = vadd.f32 %v2707_v59, %v2706_v21  ;;  %v2772_v10 = vadd.f32 %v2771_v49, %v2770_v0 }
 0x259   :  { %v2302_v53 = vadd.f32 %v2769_v61, %v2205_v52  ;;  %v2208_v18 = vadd.f32 %v2708_v56, %v4451_v13 }
 0x25b   :  { %vm2334_vm10 = vcmp.ge.f32.partialorder %v2302_v53, 0.0  ;;  %v2350_v63 = vmul.f32 %v2302_v53, %v3313_v55  ;;  %v2305_v44 = vadd.f32 %v2772_v10, %v2208_v18 }
 0x25c   :  { %v2709_v50 = vpop.f32.mrb[120].mxu0  ;;  %v2773_v39 = vpop.f32.mrb[120].mxu1 }
 0x25d   :  { %v2366_v19 = vsel %vm2334_vm10, %v2302_v53, %v2350_v63  ;;  %vm2335_vm11 = vcmp.ge.f32.partialorder %v2305_v44, 0.0  ;;  %v2351_v14 = vmul.f32 %v2305_v44, %v3313_v55  ;;  %v2710_v20 = vpop.f32.mrb[121].mxu0  ;;  %v2774_v33 = vpop.f32.mrb[121].mxu1 }
 0x25e   :  { %2382 = vst [vmem:[%s4551_s6 + $0x50] sm:$0xff] %v2366_v19  ;;  %v2711_v24 = vadd.f32 %v2710_v20, %v2709_v50  ;;  %v2775_v12 = vadd.f32 %v2774_v33, %v2773_v39  ;;  %v2712_v37 = vpop.f32.mrb[122].mxu0  ;;  %v2776_v13 = vpop.f32.mrb[122].mxu1 }
 0x25f   :  { %v2367_v25 = vsel %vm2335_vm11, %v2305_v44, %v2351_v14  ;;  %v2713_v38 = vpop.f32.mrb[123].mxu0  ;;  %v2777_v1 = vpop.f32.mrb[123].mxu1 }
 0x260   :  { %2383 = vst [vmem:[%s4551_s6 + $0x58] sm:$0xff] %v2367_v25  ;;  %v2213_v46 = vadd.f32 %v2711_v24, %v4454_v30  ;;  %v2714_v23 = vadd.f32 %v2713_v38, %v2712_v37  ;;  %v2778_v16 = vadd.f32 %v2777_v1, %v2776_v13 }
 0x262   :  { %v2310_v27 = vadd.f32 %v2775_v12, %v2213_v46  ;;  %v2216_v54 = vadd.f32 %v2714_v23, %v4457_v45 }
 0x264   :  { %vm2336_vm12 = vcmp.ge.f32.partialorder %v2310_v27, 0.0  ;;  %v2352_v8 = vmul.f32 %v2310_v27, %v3313_v55  ;;  %v2313_v51 = vadd.f32 %v2778_v16, %v2216_v54  ;;  %v2715_v17 = vpop.f32.mrb[124].mxu0  ;;  %v2779_v6 = vpop.f32.mrb[124].mxu1 }
 0x265   :  { %v2716_v60 = vpop.f32.mrb[125].mxu0  ;;  %v2780_v29 = vpop.f32.mrb[125].mxu1 }
 0x266   :  { %v2368_v35 = vsel %vm2336_vm12, %v2310_v27, %v2352_v8  ;;  %vm2337_vm13 = vcmp.ge.f32.partialorder %v2313_v51, 0.0  ;;  %v2353_v28 = vmul.f32 %v2313_v51, %v3313_v55  ;;  %v2717_v36 = vadd.f32 %v2716_v60, %v2715_v17  ;;  %v2718_v32 = vpop.f32.mrb[126].mxu0  ;;  %v2782_v30 = vpop.f32.mrb[126].mxu1 }
 0x267   :  { %2384 = vst [vmem:[%s4551_s6 + $0x60] sm:$0xff] %v2368_v35  ;;  %v2781_v45 = vadd.f32 %v2780_v29, %v2779_v6  ;;  %v2719_v31 = vpop.f32.mrb[127].mxu0  ;;  %v2783_v26 = vpop.f32.mrb[127].mxu1 }
 0x268   :  { %v2369_v57 = vsel %vm2337_vm13, %v2313_v51, %v2353_v28  ;;  %v2221_v34 = vadd.f32 %v2717_v36, %v4460_v40  ;;  %v2720_v15 = vadd.f32 %v2719_v31, %v2718_v32  ;;  %v2784_v11 = vadd.f32 %v2783_v26, %v2782_v30 }
 0x269   :  { %2385 = vst [vmem:[%s4551_s6 + $0x68] sm:$0xff] %v2369_v57 }
 0x26a   :  { %v2318_v58 = vadd.f32 %v2781_v45, %v2221_v34  ;;  %v2224_v22 = vadd.f32 %v2720_v15, %v4463_v47 }
 0x26c   :  { %vm2338_vm14 = vcmp.ge.f32.partialorder %v2318_v58, 0.0  ;;  %v2354_v62 = vmul.f32 %v2318_v58, %v3313_v55  ;;  %v2321_v43 = vadd.f32 %v2784_v11, %v2224_v22 }
 0x26e   :  { %v2370_v2 = vsel %vm2338_vm14, %v2318_v58, %v2354_v62  ;;  %vm2339_vm15 = vcmp.ge.f32.partialorder %v2321_v43, 0.0  ;;  %v2355_v41 = vmul.f32 %v2321_v43, %v3313_v55 }
 0x26f   :  { %2386 = vst [vmem:[%s4551_s6 + $0x70] sm:$0xff] %v2370_v2 }
 0x270   :  { %v2371_v40 = vsel %vm2339_vm15, %v2321_v43, %v2355_v41 }
 0x271   :  { %2387 = vst [vmem:[%s4551_s6 + $0x78] sm:$0xff] %v2371_v40 }

// kernel: gru_model_forward.6
= control target key start
LH: loop header
LB: loop body
LE: loop exit
PB: predicated region body
PF: predicated region fallthrough
CT: control target
= control target key end

     0   :  { %v5710_v1 = vmov 0.0   ;;  %v5711_v2 = vmov 0   ;;  %vm5712_vm0 = vmmov 0   ;;  %v5713_v28 = vmov 0.0|0.0   ;;  %s7134_s1 = inlined_call_operand.vmem [shape: bf16[128,384], index: 1, kind: input, shape index: {}]   ;;  %s7135_s0 = inlined_call_operand.vmem [shape: bf16[16,8,384], index: 0, kind: input, shape index: {}]   ;;  %s7136_s2 = inlined_call_operand.vmem [shape: f32[1,128], index: 2, kind: input, shape index: {}]   ;;  %s7137_s3 = inlined_call_operand.vmem [shape: bf16[16,8,128], index: 3, kind: output, shape index: {}]  }
   0x1   :  { %v5737_v0 = vld [vmem:[%s7134_s1 + $0x4] ss:$12 sps:$4 sm:$0xff]   ;;  %4990 = vmatprep.subr.bf16.mxu1 %v5710_v1  ;;  %226 = vmatprep.mubr.bf16.mxu0 %v5711_v2  ;;  %v5744_v3 = vld [vmem:[%s7134_s1] ss:$12 sps:$4 sm:$0xff]   ;;  %v5752_v4 = vld [vmem:[%s7134_s1 + $0x1c] ss:$12 sps:$4 sm:$0xff]  }
   0x2   :  { %5006 = vmatprep.mubr.msk.bf16.mxu1 %vm5712_vm0, %v5710_v1  ;;  %194 = vmatprep.subr.bf16.mxu0 %v5737_v0  ;;  %v5757_v5 = vld [vmem:[%s7134_s1 + $0x18] ss:$12 sps:$4 sm:$0xff]   ;;  %v42_v6 = vld [vmem:[%s7134_s1 + $0x30] sm:$0xff]  ;;  %v44_v7 = vld [vmem:[%s7134_s1 + $0x3c] sm:$0xff] }
   0x3   :  { %195 = vmatpush1.bf16.msra.mxu0 %v5744_v3  ;;  %v5767_v8 = vcombine.high %v42_v6, %v44_v7  ;;  %v5770_v9 = vcombine.low %v42_v6, %v44_v7  ;;  %v5776_v10 = vld [vmem:[%s7134_s1 + $0x4c] ss:$12 sps:$4 sm:$0xff]   ;;  %v5333_v11 = vld [vmem:[%s7134_s1 + $0x8] ss:$12 sps:$4 sm:$0xff]   ;;  %v5794_v14 = vld [vmem:[%s7134_s1 + $0x64] ss:$12 sps:$4 sm:$0xff]  }
   0x4   :  { %196 = vmatprep.subr.bf16.mxu0 %v5752_v4  ;;  %v5785_v12 = vld [vmem:[%s7134_s1 + $0x48] ss:$12 sps:$4 sm:$0xff]   ;;  %4991 = vmatpush3.bf16.msra.mxu1 %v5333_v11  ;;  %v5337_v13 = vld [vmem:[%s7134_s1 + $0x20] ss:$12 sps:$4 sm:$0xff]   ;;  %v5339_v16 = vld [vmem:[%s7134_s1 + $0x38] ss:$12 sps:$4 sm:$0xff]  }
   0x5   :  { %4992 = vmatprep.subr.bf16.mxu1 %v5710_v1  ;;  %v5800_v15 = vld [vmem:[%s7134_s1 + $0x60] ss:$12 sps:$4 sm:$0xff]   ;;  %v5810_v17 = vld [vmem:[%s7134_s1 + $0x7c] ss:$12 sps:$4 sm:$0xff]   ;;  %v5816_v18 = vld [vmem:[%s7134_s1 + $0x78] ss:$12 sps:$4 sm:$0xff]  }
   0x6   :  { %v5821_v19 = vld [vmem:[%s7134_s1 + $0x94] ss:$12 sps:$4 sm:$0xff]   ;;  %v5340_v20 = vld [vmem:[%s7134_s1 + $0x50] ss:$12 sps:$4 sm:$0xff]   ;;  %v5840_v23 = vld [vmem:[%s7134_s1 + $0xac] ss:$12 sps:$4 sm:$0xff]  }
   0x7   :  { %197 = vmatpush1.bf16.msra.mxu0 %v5757_v5  ;;  %v5832_v21 = vld [vmem:[%s7134_s1 + $0x90] ss:$12 sps:$4 sm:$0xff]   ;;  %v5341_v22 = vld [vmem:[%s7134_s1 + $0x68] ss:$12 sps:$4 sm:$0xff]   ;;  %v5342_v25 = vld [vmem:[%s7134_s1 + $0x80] ss:$12 sps:$4 sm:$0xff]  }
   0x8   :  { %198 = vmatprep.subr.bf16.mxu0 %v5767_v8  ;;  %4993 = vmatpush3.bf16.msra.mxu1 %v5337_v13  ;;  %v5848_v24 = vld [vmem:[%s7134_s1 + $0xa8] ss:$12 sps:$4 sm:$0xff]   ;;  %v5343_v26 = vld [vmem:[%s7134_s1 + $0x98] ss:$12 sps:$4 sm:$0xff]   ;;  %v5344_v27 = vld [vmem:[%s7134_s1 + $0xb0] ss:$12 sps:$4 sm:$0xff]  }
   0x9   :  { %4994 = vmatprep.subr.bf16.mxu1 %v5710_v1  ;;  %v5345_v29 = vld [vmem:[%s7134_s1 + $0x8] ss:$12 sps:$4 sm:$0xff]   ;;  %v5346_v30 = vld [vmem:[%s7134_s1 + $0x20] ss:$12 sps:$4 sm:$0xff]   ;;  %v5347_v31 = vld [vmem:[%s7134_s1 + $0x38] ss:$12 sps:$4 sm:$0xff]  }
   0xa   :  { %v5348_v32 = vld [vmem:[%s7134_s1 + $0x50] ss:$12 sps:$4 sm:$0xff]   ;;  %v5349_v33 = vld [vmem:[%s7134_s1 + $0x68] ss:$12 sps:$4 sm:$0xff]   ;;  %v5350_v34 = vld [vmem:[%s7134_s1 + $0x80] ss:$12 sps:$4 sm:$0xff]  }
   0xb   :  { %199 = vmatpush1.bf16.msra.mxu0 %v5770_v9  ;;  %v5351_v35 = vld [vmem:[%s7134_s1 + $0x98] ss:$12 sps:$4 sm:$0xff]   ;;  %v5352_v36 = vld [vmem:[%s7134_s1 + $0xb0] ss:$12 sps:$4 sm:$0xff]   ;;  %v5924_v55 = vld [vmem:[%s7136_s2] ss:$0 sm:$0xff] }
   0xc   :  { %200 = vmatprep.subr.bf16.mxu0 %v5776_v10  ;;  %4995 = vmatpush3.bf16.msra.mxu1 %v5339_v16  ;;  %v28_v37 = vld [vmem:[%s7135_s0] sm:$0xff]  ;;  %v29_v56 = vld [vmem:[%s7135_s0 + $0x8] sm:$0xf] }
   0xd   :  { %4996 = vmatprep.subr.bf16.mxu1 %v5710_v1  ;;  %v30_v38 = vunpack.c.l.bf16 %v28_v37  ;;  %v31_v40 = vunpack.c.h.bf16 %v28_v37  ;;  %v32_v59 = vunpack.c.l.bf16 %v29_v56 }
   0xf   :  { %201 = vmatpush1.bf16.msra.mxu0 %v5785_v12 }
  0x10   :  { %202 = vmatprep.subr.bf16.mxu0 %v5794_v14  ;;  %4997 = vmatpush3.bf16.msra.mxu1 %v5340_v20 }
  0x11   :  { %4998 = vmatprep.subr.bf16.mxu1 %v5710_v1 }
  0x13   :  { %203 = vmatpush1.bf16.msra.mxu0 %v5800_v15 }
  0x14   :  { %204 = vmatprep.subr.bf16.mxu0 %v5810_v17  ;;  %4999 = vmatpush3.bf16.msra.mxu1 %v5341_v22  ;;  %v4411_v22 = vld [vmem:[%s7135_s0 + $0xc] sm:$0xff] }
  0x15   :  { %5000 = vmatprep.subr.bf16.mxu1 %v5710_v1 }
  0x17   :  { %205 = vmatpush1.bf16.msra.mxu0 %v5816_v18 }
  0x18   :  { %206 = vmatprep.subr.bf16.mxu0 %v5821_v19  ;;  %5001 = vmatpush3.bf16.msra.mxu1 %v5342_v25  ;;  %v302_v25 = vunpack.c.l.bf16 %v4411_v22 }
  0x19   :  { %5002 = vmatprep.subr.bf16.mxu1 %v5710_v1 }
  0x1b   :  { %207 = vmatpush1.bf16.msra.mxu0 %v5832_v21 }
  0x1c   :  { %208 = vmatprep.subr.bf16.mxu0 %v5840_v23  ;;  %5003 = vmatpush3.bf16.msra.mxu1 %v5343_v26 }
  0x1d   :  { %5004 = vmatprep.subr.bf16.mxu1 %v5710_v1 }
  0x1f   :  { %209 = vmatpush1.bf16.msra.mxu0 %v5848_v24 }
  0x20   :  { %465 = vmatprep.subr.bf16.mxu0 %v5737_v0  ;;  %5005 = vmatpush3.bf16.msra.mxu1 %v5344_v27 }
  0x21   :  { %5010 = vmatprep.subr.bf16.mxu1 %v5710_v1 }
  0x22   :  { %227 = vmatmul.mubr.bf16.vlgmr.msra.gmra.mrb[0].mxu0 %v5713_v28 }
  0x23   :  { %466 = vmatpush1.bf16.msra.mxu0 %v5744_v3  ;;  %497 = vmatprep.mubr.bf16.mxu0 %v5711_v2 }
  0x24   :  { %467 = vmatprep.subr.bf16.mxu0 %v5752_v4  ;;  %5007 = vmatmul.mubr.bf16.vlgmr.msra.gmra.mrb[0].mxu1 %v5713_v28  ;;  %v303_v28 = vunpack.c.h.bf16 %v4411_v22 }
  0x25   :  { %5026 = vmatprep.mubr.msk.bf16.mxu1 %vm5712_vm0, %v5710_v1  ;;  %5011 = vmatpush3.bf16.msra.mxu1 %v5345_v29 }
  0x26   :  { %5012 = vmatprep.subr.bf16.mxu1 %v5710_v1 }
  0x27   :  { %468 = vmatpush1.bf16.msra.mxu0 %v5757_v5 }
  0x28   :  { %469 = vmatprep.subr.bf16.mxu0 %v5767_v8 }
  0x29   :  { %5013 = vmatpush3.bf16.msra.mxu1 %v5346_v30 }
  0x2a   :  { %5014 = vmatprep.subr.bf16.mxu1 %v5710_v1 }
  0x2b   :  { %470 = vmatpush1.bf16.msra.mxu0 %v5770_v9 }
  0x2c   :  { %471 = vmatprep.subr.bf16.mxu0 %v5776_v10 }
  0x2d   :  { %5015 = vmatpush3.bf16.msra.mxu1 %v5347_v31 }
  0x2e   :  { %5016 = vmatprep.subr.bf16.mxu1 %v5710_v1 }
  0x2f   :  { %472 = vmatpush1.bf16.msra.mxu0 %v5785_v12 }
  0x30   :  { %473 = vmatprep.subr.bf16.mxu0 %v5794_v14 }
  0x31   :  { %5017 = vmatpush3.bf16.msra.mxu1 %v5348_v32 }
  0x32   :  { %5018 = vmatprep.subr.bf16.mxu1 %v5710_v1 }
  0x33   :  { %474 = vmatpush1.bf16.msra.mxu0 %v5800_v15 }
  0x34   :  { %475 = vmatprep.subr.bf16.mxu0 %v5810_v17 }
  0x35   :  { %5019 = vmatpush3.bf16.msra.mxu1 %v5349_v33 }
  0x36   :  { %5020 = vmatprep.subr.bf16.mxu1 %v5710_v1 }
  0x37   :  { %476 = vmatpush1.bf16.msra.mxu0 %v5816_v18 }
  0x38   :  { %477 = vmatprep.subr.bf16.mxu0 %v5821_v19 }
  0x39   :  { %5021 = vmatpush3.bf16.msra.mxu1 %v5350_v34 }
  0x3a   :  { %5022 = vmatprep.subr.bf16.mxu1 %v5710_v1 }
  0x3b   :  { %478 = vmatpush1.bf16.msra.mxu0 %v5832_v21 }
  0x3c   :  { %479 = vmatprep.subr.bf16.mxu0 %v5840_v23 }
  0x3d   :  { %5023 = vmatpush3.bf16.msra.mxu1 %v5351_v35 }
  0x3e   :  { %5024 = vmatprep.subr.bf16.mxu1 %v5710_v1 }
  0x3f   :  { %480 = vmatpush1.bf16.msra.mxu0 %v5848_v24 }
  0x40   :  { %737 = vmatprep.subr.bf16.mxu0 %v5737_v0 }
  0x41   :  { %5025 = vmatpush3.bf16.msra.mxu1 %v5352_v36 }
  0x42   :  { %5030 = vmatprep.subr.bf16.mxu1 %v5710_v1 }
  0xf5   :  { %v228_v39 = vpop.f32.mrb[0].mxu0 }
  0xf6   :  { %v275_v41 = vadd.f32 %v228_v39, %v30_v38  ;;  %v230_v42 = vpop.f32.mrb[1].mxu0 }
  0xf7   :  { %v232_v43 = vpop.f32.mrb[2].mxu0  ;;  %v282_v46 = vadd.f32 %v230_v42, %v31_v40  ;;  %v269_v48 = vpop.f32.mrb[0].mxu1  ;;  %v5994_v42 = vld [vmem:[%s7135_s0 + $0x14] ss:$12 sps:$4 sm:$0xff]  }
  0xf8   :  { %v4409_v44 = vmul.f32 -1.442695, %v275_v41  ;;  %v233_v45 = vpop.f32.mrb[3].mxu0  ;;  %v5008_v49 = vpop.f32.mrb[1].mxu1  ;;  %v289_v58 = vadd.f32 %v5924_v55, %v269_v48 }
  0xf9   :  { %v4410_v47 = vmul.f32 -1.442695, %v282_v46  ;;  %v272_v50 = vpop.f32.mrb[2].mxu1 }
  0xfa   :  { %5538 = vpow2.f32 %v4409_v44  ;;  %v5009_v51 = vpop.f32.mrb[3].mxu1  ;;  %v304_v44 = vunpack.c.l.bf16 %v5994_v42 }
  0xfb   :  { %5540 = vpow2.f32 %v4410_v47 }
 0x104   :  { %v5539_v52 = vpop.eup %5538 }
 0x105   :  { %v279_v53 = vadd.f32 1.0, %v5539_v52  ;;  %v5541_v54 = vpop.eup %5540 }
 0x106   :  { %v286_v57 = vadd.f32 1.0, %v5541_v54 }
 0x107   :  { %5542 = vrcp.f32 %v279_v53 }
 0x108   :  { %5544 = vrcp.f32 %v286_v57  ;;  %v6009_v57 = vld [vmem:[%s7134_s1] ss:$12 sps:$4 sm:$0xff]  }
 0x111   :  { %v5543_v60 = vpop.eup %5542 }
 0x112   :  { %v290_v61 = vmul.f32 %v5543_v60, %v289_v58  ;;  %v5545_v63 = vpop.eup %5544  ;;  %v6016_v58 = vld [vmem:[%s7134_s1 + $0x1c] ss:$12 sps:$4 sm:$0xff]   ;;  %v5701_v60 = vld [vmem:[%s7134_s1 + $0x4c] ss:$12 sps:$4 sm:$0xff]  }
 0x113   :  { %v293_v6 = vsub.f32 1.0, %v5545_v63  ;;  %v295_v13 = vmul.f32 0.0, %v5545_v63  ;;  %v5705_v63 = vld [vmem:[%s7134_s1 + $0x4] ss:$12 sps:$4 sm:$0xff]  }
 0x114   :  { %v291_v62 = vadd.f32 %v290_v61, %v32_v59  ;;  %v6024_v59 = vld [vmem:[%s7134_s1 + $0x18] ss:$12 sps:$4 sm:$0xff]   ;;  %v5702_v61 = vld [vmem:[%s7134_s1 + $0x48] ss:$12 sps:$4 sm:$0xff]  }
 0x116   :  { %5546 = vtanh.f32 %v291_v62  ;;  %v5703_v62 = vld [vmem:[%s7134_s1 + $0x64] ss:$12 sps:$4 sm:$0xff]  }
 0x120   :  { %v5547_v7 = vpop.eup %5546 }
 0x121   :  { %v294_v11 = vmul.f32 %v5547_v7, %v293_v6  ;;  %v5361_v6 = vld [vmem:[%s7134_s1 + $0x8] ss:$12 sps:$4 sm:$0xff]   ;;  %v5368_v7 = vld [vmem:[%s7134_s1 + $0xb0] ss:$12 sps:$4 sm:$0xff]  }
 0x123   :  { %v5930_v16 = vadd.f32 %v295_v13, %v294_v11  ;;  %v4440_v11 = vld [vmem:[%s7135_s0 + $0x18] sm:$0xff] }
 0x124   :  { %v574_v13 = vunpack.c.l.bf16 %v4440_v11 }
 0x125   :  { %v297_v20 = vpack.c.bf16 %v5930_v16, %v5930_v16 }
 0x127   :  { %298 = vst [vmem:[%s7137_s3] sm:$0xf] %v297_v20  ;;  %498 = vmatmul.mubr.bf16.vlgmr.msra.gmra.mrb[4].mxu0 %v297_v20  ;;  %5027 = vmatmul.mubr.bf16.vlgmr.msra.gmra.mrb[4].mxu1 %v297_v20 }
 0x128   :  { %738 = vmatpush1.bf16.msra.mxu0 %v5744_v3  ;;  %769 = vmatprep.mubr.bf16.mxu0 %v5711_v2  ;;  %v5353_v3 = vld [vmem:[%s7134_s1 + $0x8] ss:$12 sps:$4 sm:$0xff]  }
 0x129   :  { %739 = vmatprep.subr.bf16.mxu0 %v5752_v4  ;;  %5046 = vmatprep.mubr.msk.bf16.mxu1 %vm5712_vm0, %v5710_v1  ;;  %v5354_v4 = vld [vmem:[%s7134_s1 + $0x20] ss:$12 sps:$4 sm:$0xff]  }
 0x12a   :  { %5031 = vmatpush3.bf16.msra.mxu1 %v5353_v3  ;;  %v575_v3 = vunpack.c.h.bf16 %v4440_v11 }
 0x12b   :  { %5032 = vmatprep.subr.bf16.mxu1 %v5710_v1 }
 0x12c   :  { %740 = vmatpush1.bf16.msra.mxu0 %v5757_v5  ;;  %v5355_v5 = vld [vmem:[%s7134_s1 + $0x38] ss:$12 sps:$4 sm:$0xff]  }
 0x12d   :  { %741 = vmatprep.subr.bf16.mxu0 %v5767_v8 }
 0x12e   :  { %5033 = vmatpush3.bf16.msra.mxu1 %v5354_v4 }
 0x12f   :  { %5034 = vmatprep.subr.bf16.mxu1 %v5710_v1 }
 0x130   :  { %742 = vmatpush1.bf16.msra.mxu0 %v5770_v9 }
 0x131   :  { %743 = vmatprep.subr.bf16.mxu0 %v5776_v10  ;;  %v5357_v10 = vld [vmem:[%s7134_s1 + $0x68] ss:$12 sps:$4 sm:$0xff]  }
 0x132   :  { %5035 = vmatpush3.bf16.msra.mxu1 %v5355_v5 }
 0x133   :  { %5036 = vmatprep.subr.bf16.mxu1 %v5710_v1 }
 0x134   :  { %744 = vmatpush1.bf16.msra.mxu0 %v5785_v12  ;;  %v5358_v12 = vld [vmem:[%s7134_s1 + $0x80] ss:$12 sps:$4 sm:$0xff]  }
 0x135   :  { %745 = vmatprep.subr.bf16.mxu0 %v5794_v14  ;;  %v5359_v14 = vld [vmem:[%s7134_s1 + $0x98] ss:$12 sps:$4 sm:$0xff]  }
 0x138   :  { %746 = vmatpush1.bf16.msra.mxu0 %v5800_v15  ;;  %v5360_v15 = vld [vmem:[%s7134_s1 + $0xb0] ss:$12 sps:$4 sm:$0xff]  }
 0x139   :  { %747 = vmatprep.subr.bf16.mxu0 %v5810_v17 }
 0x13c   :  { %748 = vmatpush1.bf16.msra.mxu0 %v5816_v18 }
 0x13d   :  { %749 = vmatprep.subr.bf16.mxu0 %v5821_v19 }
 0x140   :  { %750 = vmatpush1.bf16.msra.mxu0 %v5832_v21 }
 0x141   :  { %751 = vmatprep.subr.bf16.mxu0 %v5840_v23 }
 0x144   :  { %752 = vmatpush1.bf16.msra.mxu0 %v5848_v24 }
 0x145   :  { %1009 = vmatprep.subr.bf16.mxu0 %v5737_v0  ;;  %v5356_v0 = vld [vmem:[%s7134_s1 + $0x50] ss:$12 sps:$4 sm:$0xff]  }
 0x146   :  { %5037 = vmatpush3.bf16.msra.mxu1 %v5356_v0 }
 0x147   :  { %5038 = vmatprep.subr.bf16.mxu1 %v5710_v1 }
 0x14a   :  { %5039 = vmatpush3.bf16.msra.mxu1 %v5357_v10 }
 0x14b   :  { %5040 = vmatprep.subr.bf16.mxu1 %v5710_v1 }
 0x14e   :  { %5041 = vmatpush3.bf16.msra.mxu1 %v5358_v12 }
 0x14f   :  { %5042 = vmatprep.subr.bf16.mxu1 %v5710_v1 }
 0x152   :  { %5043 = vmatpush3.bf16.msra.mxu1 %v5359_v14 }
 0x153   :  { %5044 = vmatprep.subr.bf16.mxu1 %v5710_v1 }
 0x156   :  { %5045 = vmatpush3.bf16.msra.mxu1 %v5360_v15 }
 0x157   :  { %5050 = vmatprep.subr.bf16.mxu1 %v5710_v1 }
 0x1fa   :  { %v499_v26 = vpop.f32.mrb[4].mxu0  ;;  %v540_v27 = vpop.f32.mrb[4].mxu1 }
 0x1fb   :  { %v546_v29 = vadd.f32 %v499_v26, %v302_v25  ;;  %v501_v30 = vpop.f32.mrb[5].mxu0  ;;  %v5028_v31 = vpop.f32.mrb[5].mxu1  ;;  %v560_v45 = vadd.f32 %v5924_v55, %v540_v27 }
 0x1fc   :  { %v503_v32 = vpop.f32.mrb[6].mxu0  ;;  %v543_v33 = vpop.f32.mrb[6].mxu1  ;;  %v553_v37 = vadd.f32 %v501_v30, %v303_v28  ;;  %v576_v31 = vunpack.c.h.bf16 %v5994_v42  ;;  %v5369_v42 = vld [vmem:[%s7134_s1 + $0x8] ss:$12 sps:$4 sm:$0xff]  }
 0x1fd   :  { %v4437_v34 = vmul.f32 -1.442695, %v546_v29  ;;  %v504_v35 = vpop.f32.mrb[7].mxu0  ;;  %v5029_v36 = vpop.f32.mrb[7].mxu1 }
 0x1fe   :  { %v4438_v38 = vmul.f32 -1.442695, %v553_v37 }
 0x1ff   :  { %5548 = vpow2.f32 %v4437_v34 }
 0x200   :  { %5550 = vpow2.f32 %v4438_v38 }
 0x209   :  { %v5549_v39 = vpop.eup %5548 }
 0x20a   :  { %v550_v40 = vadd.f32 1.0, %v5549_v39  ;;  %v5551_v41 = vpop.eup %5550 }
 0x20b   :  { %v557_v43 = vadd.f32 1.0, %v5551_v41 }
 0x20c   :  { %5552 = vrcp.f32 %v550_v40 }
 0x20d   :  { %5554 = vrcp.f32 %v557_v43 }
 0x216   :  { %v5553_v46 = vpop.eup %5552 }
 0x217   :  { %v561_v47 = vmul.f32 %v5553_v46, %v560_v45  ;;  %v5555_v49 = vpop.eup %5554  ;;  %v5706_v45 = vld [vmem:[%s7134_s1 + $0x30] sm:$0xff]  ;;  %v5707_v46 = vld [vmem:[%s7134_s1 + $0x3c] sm:$0xff] }
 0x218   :  { %v564_v50 = vsub.f32 1.0, %v5555_v49  ;;  %v566_v53 = vmul.f32 %v5555_v49, %v5930_v16  ;;  %v6122_v49 = vld [vmem:[%s7134_s1 + $0x4c] ss:$12 sps:$4 sm:$0xff]  }
 0x219   :  { %v562_v48 = vadd.f32 %v561_v47, %v304_v44  ;;  %v5370_v44 = vld [vmem:[%s7134_s1 + $0x20] ss:$12 sps:$4 sm:$0xff]   ;;  %v4507_v47 = vcombine.high %v5706_v45, %v5707_v46  ;;  %v5406_v45 = vld [vmem:[%s7134_s1 + $0x68] ss:$12 sps:$4 sm:$0xff]  }
 0x21a   :  { %v5407_v46 = vld [vmem:[%s7134_s1 + $0x80] ss:$12 sps:$4 sm:$0xff]  }
 0x21b   :  { %5556 = vtanh.f32 %v562_v48  ;;  %v5372_v48 = vld [vmem:[%s7134_s1 + $0x38] ss:$12 sps:$4 sm:$0xff]  }
 0x225   :  { %v5557_v51 = vpop.eup %5556 }
 0x226   :  { %v565_v52 = vmul.f32 %v5557_v51, %v564_v50  ;;  %v6128_v50 = vld [vmem:[%s7134_s1 + $0x48] ss:$12 sps:$4 sm:$0xff]   ;;  %v5376_v51 = vld [vmem:[%s7134_s1 + $0x50] ss:$12 sps:$4 sm:$0xff]  }
 0x228   :  { %v5999_v54 = vadd.f32 %v566_v53, %v565_v52  ;;  %v6144_v52 = vld [vmem:[%s7134_s1 + $0x60] ss:$12 sps:$4 sm:$0xff]   ;;  %v5380_v53 = vld [vmem:[%s7134_s1 + $0x68] ss:$12 sps:$4 sm:$0xff]  }
 0x22a   :  { %v568_v56 = vpack.c.bf16 %v5999_v54, %v5999_v54 }
 0x22c   :  { %4439 = vst [vmem:[%s7137_s3 + $0x4] sm:$0xf] %v568_v56  ;;  %770 = vmatmul.mubr.bf16.vlgmr.msra.gmra.mrb[8].mxu0 %v568_v56  ;;  %5047 = vmatmul.mubr.bf16.vlgmr.msra.gmra.mrb[8].mxu1 %v568_v56  ;;  %v6159_v56 = vld [vmem:[%s7134_s1 + $0x78] ss:$12 sps:$4 sm:$0xff]  }
 0x22d   :  { %1010 = vmatpush1.bf16.msra.mxu0 %v6009_v57  ;;  %1041 = vmatprep.mubr.bf16.mxu0 %v5711_v2 }
 0x22e   :  { %1011 = vmatprep.subr.bf16.mxu0 %v6016_v58  ;;  %5066 = vmatprep.mubr.msk.bf16.mxu1 %vm5712_vm0, %v5710_v1 }
 0x22f   :  { %5051 = vmatpush3.bf16.msra.mxu1 %v5361_v6 }
 0x230   :  { %5052 = vmatprep.subr.bf16.mxu1 %v5710_v1 }
 0x231   :  { %1012 = vmatpush1.bf16.msra.mxu0 %v6024_v59 }
 0x232   :  { %1013 = vmatprep.subr.bf16.mxu0 %v5767_v8  ;;  %v5704_v8 = vld [vmem:[%s7134_s1 + $0x60] ss:$12 sps:$4 sm:$0xff]  }
 0x235   :  { %1014 = vmatpush1.bf16.msra.mxu0 %v5770_v9 }
 0x236   :  { %1015 = vmatprep.subr.bf16.mxu0 %v5701_v60  ;;  %v5388_v60 = vld [vmem:[%s7134_s1 + $0x98] ss:$12 sps:$4 sm:$0xff]  }
 0x239   :  { %1016 = vmatpush1.bf16.msra.mxu0 %v5702_v61  ;;  %v6185_v61 = vld [vmem:[%s7134_s1 + $0xac] ss:$12 sps:$4 sm:$0xff]  }
 0x23a   :  { %1017 = vmatprep.subr.bf16.mxu0 %v5703_v62  ;;  %v6191_v62 = vld [vmem:[%s7134_s1 + $0xa8] ss:$12 sps:$4 sm:$0xff]  }
 0x23d   :  { %1018 = vmatpush1.bf16.msra.mxu0 %v5704_v8  ;;  %v5392_v8 = vld [vmem:[%s7134_s1 + $0xb0] ss:$12 sps:$4 sm:$0xff]  }
 0x23e   :  { %1019 = vmatprep.subr.bf16.mxu0 %v5810_v17  ;;  %v5362_v17 = vld [vmem:[%s7134_s1 + $0x20] ss:$12 sps:$4 sm:$0xff]  }
 0x23f   :  { %5053 = vmatpush3.bf16.msra.mxu1 %v5362_v17 }
 0x240   :  { %5054 = vmatprep.subr.bf16.mxu1 %v5710_v1 }
 0x241   :  { %1020 = vmatpush1.bf16.msra.mxu0 %v5816_v18  ;;  %v5363_v18 = vld [vmem:[%s7134_s1 + $0x38] ss:$12 sps:$4 sm:$0xff]  }
 0x242   :  { %1021 = vmatprep.subr.bf16.mxu0 %v5821_v19  ;;  %v5364_v19 = vld [vmem:[%s7134_s1 + $0x50] ss:$12 sps:$4 sm:$0xff]  }
 0x243   :  { %5055 = vmatpush3.bf16.msra.mxu1 %v5363_v18 }
 0x244   :  { %5056 = vmatprep.subr.bf16.mxu1 %v5710_v1 }
 0x245   :  { %1022 = vmatpush1.bf16.msra.mxu0 %v5832_v21  ;;  %v5365_v21 = vld [vmem:[%s7134_s1 + $0x68] ss:$12 sps:$4 sm:$0xff]  }
 0x246   :  { %1023 = vmatprep.subr.bf16.mxu0 %v5840_v23  ;;  %v5366_v23 = vld [vmem:[%s7134_s1 + $0x80] ss:$12 sps:$4 sm:$0xff]  }
 0x247   :  { %5057 = vmatpush3.bf16.msra.mxu1 %v5364_v19 }
 0x248   :  { %5058 = vmatprep.subr.bf16.mxu1 %v5710_v1 }
 0x249   :  { %1024 = vmatpush1.bf16.msra.mxu0 %v5848_v24  ;;  %v5367_v24 = vld [vmem:[%s7134_s1 + $0x98] ss:$12 sps:$4 sm:$0xff]  }
 0x24a   :  { %1281 = vmatprep.subr.bf16.mxu0 %v5705_v63  ;;  %v4469_v63 = vld [vmem:[%s7135_s0 + $0x24] sm:$0xff] }
 0x24b   :  { %5059 = vmatpush3.bf16.msra.mxu1 %v5365_v21  ;;  %v846_v6 = vunpack.c.l.bf16 %v4469_v63  ;;  %v847_v19 = vunpack.c.h.bf16 %v4469_v63 }
 0x24c   :  { %5060 = vmatprep.subr.bf16.mxu1 %v5710_v1 }
 0x24f   :  { %5061 = vmatpush3.bf16.msra.mxu1 %v5366_v23 }
 0x250   :  { %5062 = vmatprep.subr.bf16.mxu1 %v5710_v1 }
 0x253   :  { %5063 = vmatpush3.bf16.msra.mxu1 %v5367_v24 }
 0x254   :  { %5064 = vmatprep.subr.bf16.mxu1 %v5710_v1 }
 0x257   :  { %5065 = vmatpush3.bf16.msra.mxu1 %v5368_v7 }
 0x258   :  { %5070 = vmatprep.subr.bf16.mxu1 %v5710_v1 }
 0x2ff   :  { %v771_v16 = vpop.f32.mrb[8].mxu0  ;;  %v812_v20 = vpop.f32.mrb[8].mxu1 }
 0x300   :  { %v818_v4 = vadd.f32 %v771_v16, %v574_v13  ;;  %v773_v5 = vpop.f32.mrb[9].mxu0  ;;  %v5048_v0 = vpop.f32.mrb[9].mxu1  ;;  %v832_v32 = vadd.f32 %v5924_v55, %v812_v20 }
 0x301   :  { %v775_v10 = vpop.f32.mrb[10].mxu0  ;;  %v815_v12 = vpop.f32.mrb[10].mxu1  ;;  %v825_v25 = vadd.f32 %v773_v5, %v575_v3 }
 0x302   :  { %v4466_v14 = vmul.f32 -1.442695, %v818_v4  ;;  %v776_v15 = vpop.f32.mrb[11].mxu0  ;;  %v5049_v22 = vpop.f32.mrb[11].mxu1  ;;  %v6206_v12 = vld [vmem:[%s7135_s0 + $0x2c] ss:$12 sps:$4 sm:$0xff]  }
 0x303   :  { %v4467_v26 = vmul.f32 -1.442695, %v825_v25  ;;  %v848_v15 = vunpack.c.l.bf16 %v6206_v12 }
 0x304   :  { %5558 = vpow2.f32 %v4466_v14 }
 0x305   :  { %5560 = vpow2.f32 %v4467_v26 }
 0x30e   :  { %v5559_v27 = vpop.eup %5558 }
 0x30f   :  { %v822_v28 = vadd.f32 1.0, %v5559_v27  ;;  %v5561_v29 = vpop.eup %5560 }
 0x310   :  { %v829_v30 = vadd.f32 1.0, %v5561_v29 }
 0x311   :  { %5562 = vrcp.f32 %v822_v28 }
 0x312   :  { %5564 = vrcp.f32 %v829_v30 }
 0x31b   :  { %v5563_v33 = vpop.eup %5562 }
 0x31c   :  { %v833_v34 = vmul.f32 %v5563_v33, %v832_v32  ;;  %v5565_v36 = vpop.eup %5564 }
 0x31d   :  { %v836_v37 = vsub.f32 1.0, %v5565_v36  ;;  %v838_v40 = vmul.f32 %v5565_v36, %v5999_v54  ;;  %v6153_v54 = vld [vmem:[%s7134_s1 + $0x7c] ss:$12 sps:$4 sm:$0xff]   ;;  %v6229_v36 = vld [vmem:[%s7134_s1] ss:$12 sps:$4 sm:$0xff]  }
 0x31e   :  { %v834_v35 = vadd.f32 %v833_v34, %v576_v31 }
 0x320   :  { %5566 = vtanh.f32 %v834_v35  ;;  %v6224_v35 = vld [vmem:[%s7134_s1 + $0x4] ss:$12 sps:$4 sm:$0xff]  }
 0x32a   :  { %v5567_v38 = vpop.eup %5566 }
 0x32b   :  { %v837_v39 = vmul.f32 %v5567_v38, %v836_v37  ;;  %v5396_v37 = vld [vmem:[%s7134_s1 + $0x8] ss:$12 sps:$4 sm:$0xff]  }
 0x32c   :  { %v6239_v38 = vld [vmem:[%s7134_s1 + $0x1c] ss:$12 sps:$4 sm:$0xff]  }
 0x32d   :  { %v6088_v41 = vadd.f32 %v838_v40, %v837_v39  ;;  %v6245_v39 = vld [vmem:[%s7134_s1 + $0x18] ss:$12 sps:$4 sm:$0xff]   ;;  %v5400_v40 = vld [vmem:[%s7134_s1 + $0x20] ss:$12 sps:$4 sm:$0xff]  }
 0x32f   :  { %v840_v43 = vpack.c.bf16 %v6088_v41, %v6088_v41 }
 0x331   :  { %4468 = vst [vmem:[%s7137_s3 + $0x8] sm:$0xf] %v840_v43  ;;  %1042 = vmatmul.mubr.bf16.vlgmr.msra.gmra.mrb[12].mxu0 %v840_v43  ;;  %5067 = vmatmul.mubr.bf16.vlgmr.msra.gmra.mrb[12].mxu1 %v840_v43  ;;  %v6261_v43 = vld [vmem:[%s7134_s1 + $0x30] ss:$12 sps:$4 sm:$0xff]  }
 0x332   :  { %1282 = vmatpush1.bf16.msra.mxu0 %v6009_v57  ;;  %1313 = vmatprep.mubr.bf16.mxu0 %v5711_v2  ;;  %v5384_v57 = vld [vmem:[%s7134_s1 + $0x80] ss:$12 sps:$4 sm:$0xff]  }
 0x333   :  { %1283 = vmatprep.subr.bf16.mxu0 %v6016_v58  ;;  %5086 = vmatprep.mubr.msk.bf16.mxu1 %vm5712_vm0, %v5710_v1  ;;  %v6169_v58 = vld [vmem:[%s7134_s1 + $0x94] ss:$12 sps:$4 sm:$0xff]  }
 0x334   :  { %5071 = vmatpush3.bf16.msra.mxu1 %v5369_v42  ;;  %v5404_v42 = vld [vmem:[%s7134_s1 + $0x38] ss:$12 sps:$4 sm:$0xff]  }
 0x335   :  { %5072 = vmatprep.subr.bf16.mxu1 %v5710_v1 }
 0x336   :  { %1284 = vmatpush1.bf16.msra.mxu0 %v6024_v59  ;;  %v6175_v59 = vld [vmem:[%s7134_s1 + $0x90] ss:$12 sps:$4 sm:$0xff]  }
 0x337   :  { %1285 = vmatprep.subr.bf16.mxu0 %v4507_v47  ;;  %v5408_v47 = vld [vmem:[%s7134_s1 + $0x98] ss:$12 sps:$4 sm:$0xff]  }
 0x338   :  { %5073 = vmatpush3.bf16.msra.mxu1 %v5370_v44  ;;  %v5405_v44 = vld [vmem:[%s7134_s1 + $0x50] ss:$12 sps:$4 sm:$0xff]  }
 0x339   :  { %5074 = vmatprep.subr.bf16.mxu1 %v5710_v1 }
 0x33a   :  { %1286 = vmatpush1.bf16.msra.mxu0 %v5770_v9  ;;  %v6138_v9 = vld [vmem:[%s7134_s1 + $0x64] ss:$12 sps:$4 sm:$0xff]  }
 0x33b   :  { %1287 = vmatprep.subr.bf16.mxu0 %v6122_v49 }
 0x33c   :  { %5075 = vmatpush3.bf16.msra.mxu1 %v5372_v48  ;;  %v5409_v48 = vld [vmem:[%s7134_s1 + $0xb0] ss:$12 sps:$4 sm:$0xff]  }
 0x33d   :  { %5076 = vmatprep.subr.bf16.mxu1 %v5710_v1 }
 0x33e   :  { %1288 = vmatpush1.bf16.msra.mxu0 %v6128_v50 }
 0x33f   :  { %1289 = vmatprep.subr.bf16.mxu0 %v6138_v9 }
 0x340   :  { %5077 = vmatpush3.bf16.msra.mxu1 %v5376_v51  ;;  %v4498_v51 = vld [vmem:[%s7135_s0 + $0x30] sm:$0xff] }
 0x341   :  { %5078 = vmatprep.subr.bf16.mxu1 %v5710_v1 }
 0x342   :  { %1290 = vmatpush1.bf16.msra.mxu0 %v6144_v52 }
 0x343   :  { %1291 = vmatprep.subr.bf16.mxu0 %v6153_v54 }
 0x344   :  { %5079 = vmatpush3.bf16.msra.mxu1 %v5380_v53  ;;  %v1118_v53 = vunpack.c.l.bf16 %v4498_v51 }
 0x345   :  { %5080 = vmatprep.subr.bf16.mxu1 %v5710_v1 }
 0x346   :  { %1292 = vmatpush1.bf16.msra.mxu0 %v6159_v56 }
 0x347   :  { %1293 = vmatprep.subr.bf16.mxu0 %v6169_v58 }
 0x348   :  { %5081 = vmatpush3.bf16.msra.mxu1 %v5384_v57 }
 0x349   :  { %5082 = vmatprep.subr.bf16.mxu1 %v5710_v1 }
 0x34a   :  { %1294 = vmatpush1.bf16.msra.mxu0 %v6175_v59 }
 0x34b   :  { %1295 = vmatprep.subr.bf16.mxu0 %v6185_v61 }
 0x34c   :  { %5083 = vmatpush3.bf16.msra.mxu1 %v5388_v60 }
 0x34d   :  { %5084 = vmatprep.subr.bf16.mxu1 %v5710_v1 }
 0x34e   :  { %1296 = vmatpush1.bf16.msra.mxu0 %v6191_v62 }
 0x34f   :  { %1553 = vmatprep.subr.bf16.mxu0 %v6224_v35 }
 0x350   :  { %5085 = vmatpush3.bf16.msra.mxu1 %v5392_v8  ;;  %v1119_v8 = vunpack.c.h.bf16 %v4498_v51 }
 0x351   :  { %5090 = vmatprep.subr.bf16.mxu1 %v5710_v1 }
 0x404   :  { %v1043_v17 = vpop.f32.mrb[12].mxu0  ;;  %v1084_v18 = vpop.f32.mrb[12].mxu1 }
 0x405   :  { %v1090_v21 = vadd.f32 %v1043_v17, %v846_v6  ;;  %v1045_v23 = vpop.f32.mrb[13].mxu0  ;;  %v5068_v24 = vpop.f32.mrb[13].mxu1  ;;  %v1104_v22 = vadd.f32 %v5924_v55, %v1084_v18 }
 0x406   :  { %v1047_v7 = vpop.f32.mrb[14].mxu0  ;;  %v1087_v11 = vpop.f32.mrb[14].mxu1  ;;  %v1097_v3 = vadd.f32 %v1045_v23, %v847_v19 }
 0x407   :  { %v4495_v13 = vmul.f32 -1.442695, %v1090_v21  ;;  %v1048_v16 = vpop.f32.mrb[15].mxu0  ;;  %v5069_v20 = vpop.f32.mrb[15].mxu1 }
 0x408   :  { %v4496_v4 = vmul.f32 -1.442695, %v1097_v3 }
 0x409   :  { %5568 = vpow2.f32 %v4495_v13 }
 0x40a   :  { %5570 = vpow2.f32 %v4496_v4  ;;  %v1120_v4 = vunpack.c.h.bf16 %v6206_v12  ;;  %v5410_v12 = vld [vmem:[%s7134_s1 + $0x8] ss:$12 sps:$4 sm:$0xff]  }
 0x413   :  { %v5569_v5 = vpop.eup %5568 }
 0x414   :  { %v1094_v0 = vadd.f32 1.0, %v5569_v5  ;;  %v5571_v10 = vpop.eup %5570 }
 0x415   :  { %v1101_v14 = vadd.f32 1.0, %v5571_v10 }
 0x416   :  { %5572 = vrcp.f32 %v1094_v0 }
 0x417   :  { %5574 = vrcp.f32 %v1101_v14 }
 0x420   :  { %v5573_v25 = vpop.eup %5572 }
 0x421   :  { %v1105_v26 = vmul.f32 %v5573_v25, %v1104_v22  ;;  %v5575_v28 = vpop.eup %5574 }
 0x422   :  { %v1108_v29 = vsub.f32 1.0, %v5575_v28  ;;  %v1110_v32 = vmul.f32 %v5575_v28, %v6088_v41  ;;  %v6255_v41 = vld [vmem:[%s7134_s1 + $0x34] ss:$12 sps:$4 sm:$0xff]  }
 0x423   :  { %v1106_v27 = vadd.f32 %v1105_v26, %v848_v15 }
 0x425   :  { %5576 = vtanh.f32 %v1106_v27 }
 0x42f   :  { %v5577_v30 = vpop.eup %5576 }
 0x430   :  { %v1109_v31 = vmul.f32 %v5577_v30, %v1108_v29  ;;  %v5411_v30 = vld [vmem:[%s7134_s1 + $0x20] ss:$12 sps:$4 sm:$0xff]  }
 0x432   :  { %v6211_v33 = vadd.f32 %v1110_v32, %v1109_v31  ;;  %v5412_v31 = vld [vmem:[%s7134_s1 + $0x38] ss:$12 sps:$4 sm:$0xff]   ;;  %v5413_v32 = vld [vmem:[%s7134_s1 + $0x50] ss:$12 sps:$4 sm:$0xff]  }
 0x434   :  { %v1112_v34 = vpack.c.bf16 %v6211_v33, %v6211_v33 }
 0x436   :  { %4497 = vst [vmem:[%s7137_s3 + $0xc] sm:$0xf] %v1112_v34  ;;  %1314 = vmatmul.mubr.bf16.vlgmr.msra.gmra.mrb[16].mxu0 %v1112_v34  ;;  %5087 = vmatmul.mubr.bf16.vlgmr.msra.gmra.mrb[16].mxu1 %v1112_v34  ;;  %v5415_v34 = vld [vmem:[%s7134_s1 + $0x80] ss:$12 sps:$4 sm:$0xff]  }
 0x437   :  { %1585 = vmatprep.mubr.bf16.mxu0 %v5711_v2  ;;  %5106 = vmatprep.mubr.msk.bf16.mxu1 %vm5712_vm0, %v5710_v1 }
 0x438   :  { %1554 = vmatpush1.bf16.msra.mxu0 %v6229_v36  ;;  %5091 = vmatpush3.bf16.msra.mxu1 %v5396_v37  ;;  %v5416_v37 = vld [vmem:[%s7134_s1 + $0x98] ss:$12 sps:$4 sm:$0xff]  }
 0x439   :  { %5092 = vmatprep.subr.bf16.mxu1 %v5710_v1  ;;  %1555 = vmatprep.subr.bf16.mxu0 %v6239_v38 }
 0x43c   :  { %1556 = vmatpush1.bf16.msra.mxu0 %v6245_v39  ;;  %5093 = vmatpush3.bf16.msra.mxu1 %v5400_v40  ;;  %v5417_v40 = vld [vmem:[%s7134_s1 + $0xb0] ss:$12 sps:$4 sm:$0xff]  }
 0x43d   :  { %5094 = vmatprep.subr.bf16.mxu1 %v5710_v1  ;;  %1557 = vmatprep.subr.bf16.mxu0 %v6255_v41 }
 0x440   :  { %1558 = vmatpush1.bf16.msra.mxu0 %v6261_v43  ;;  %5095 = vmatpush3.bf16.msra.mxu1 %v5404_v42  ;;  %v4527_v42 = vld [vmem:[%s7135_s0 + $0x3c] sm:$0xff] }
 0x441   :  { %1559 = vmatprep.subr.bf16.mxu0 %v6122_v49  ;;  %5096 = vmatprep.subr.bf16.mxu1 %v5710_v1 }
 0x444   :  { %1560 = vmatpush1.bf16.msra.mxu0 %v6128_v50  ;;  %5097 = vmatpush3.bf16.msra.mxu1 %v5405_v44  ;;  %v1390_v44 = vunpack.c.l.bf16 %v4527_v42 }
 0x445   :  { %1561 = vmatprep.subr.bf16.mxu0 %v6138_v9  ;;  %5098 = vmatprep.subr.bf16.mxu1 %v5710_v1 }
 0x448   :  { %1562 = vmatpush1.bf16.msra.mxu0 %v6144_v52  ;;  %5099 = vmatpush3.bf16.msra.mxu1 %v5406_v45 }
 0x449   :  { %1563 = vmatprep.subr.bf16.mxu0 %v6153_v54  ;;  %5100 = vmatprep.subr.bf16.mxu1 %v5710_v1 }
 0x44c   :  { %1564 = vmatpush1.bf16.msra.mxu0 %v6159_v56  ;;  %5101 = vmatpush3.bf16.msra.mxu1 %v5407_v46 }
 0x44d   :  { %1565 = vmatprep.subr.bf16.mxu0 %v6169_v58  ;;  %5102 = vmatprep.subr.bf16.mxu1 %v5710_v1 }
 0x450   :  { %1566 = vmatpush1.bf16.msra.mxu0 %v6175_v59  ;;  %5103 = vmatpush3.bf16.msra.mxu1 %v5408_v47  ;;  %v1391_v47 = vunpack.c.h.bf16 %v4527_v42 }
 0x451   :  { %1567 = vmatprep.subr.bf16.mxu0 %v6185_v61  ;;  %5104 = vmatprep.subr.bf16.mxu1 %v5710_v1 }
 0x454   :  { %1568 = vmatpush1.bf16.msra.mxu0 %v6191_v62  ;;  %5105 = vmatpush3.bf16.msra.mxu1 %v5409_v48 }
 0x455   :  { %1825 = vmatprep.subr.bf16.mxu0 %v6224_v35  ;;  %5110 = vmatprep.subr.bf16.mxu1 %v5710_v1 }
 0x509   :  { %v1315_v57 = vpop.f32.mrb[16].mxu0  ;;  %v1356_v60 = vpop.f32.mrb[16].mxu1 }
 0x50a   :  { %v1362_v63 = vadd.f32 %v1315_v57, %v1118_v53  ;;  %v1317_v6 = vpop.f32.mrb[17].mxu0  ;;  %v5088_v17 = vpop.f32.mrb[17].mxu1  ;;  %v1376_v5 = vadd.f32 %v5924_v55, %v1356_v60 }
 0x50b   :  { %v1319_v18 = vpop.f32.mrb[18].mxu0  ;;  %v1359_v19 = vpop.f32.mrb[18].mxu1  ;;  %v1369_v7 = vadd.f32 %v1317_v6, %v1119_v8 }
 0x50c   :  { %v4524_v21 = vmul.f32 -1.442695, %v1362_v63  ;;  %v1320_v23 = vpop.f32.mrb[19].mxu0  ;;  %v5089_v24 = vpop.f32.mrb[19].mxu1 }
 0x50d   :  { %v4525_v11 = vmul.f32 -1.442695, %v1369_v7  ;;  %v6370_v24 = vld [vmem:[%s7135_s0 + $0x44] ss:$12 sps:$4 sm:$0xff]  }
 0x50e   :  { %5578 = vpow2.f32 %v4524_v21 }
 0x50f   :  { %5580 = vpow2.f32 %v4525_v11  ;;  %v1392_v11 = vunpack.c.l.bf16 %v6370_v24 }
 0x518   :  { %v5579_v13 = vpop.eup %5578 }
 0x519   :  { %v1366_v16 = vadd.f32 1.0, %v5579_v13  ;;  %v5581_v20 = vpop.eup %5580 }
 0x51a   :  { %v1373_v3 = vadd.f32 1.0, %v5581_v20 }
 0x51b   :  { %5582 = vrcp.f32 %v1366_v16 }
 0x51c   :  { %5584 = vrcp.f32 %v1373_v3 }
 0x525   :  { %v5583_v0 = vpop.eup %5582 }
 0x526   :  { %v1377_v10 = vmul.f32 %v5583_v0, %v1376_v5  ;;  %v5585_v15 = vpop.eup %5584 }
 0x527   :  { %v1380_v22 = vsub.f32 1.0, %v5585_v15  ;;  %v1382_v27 = vmul.f32 %v5585_v15, %v6211_v33  ;;  %v5414_v33 = vld [vmem:[%s7134_s1 + $0x68] ss:$12 sps:$4 sm:$0xff]  }
 0x528   :  { %v1378_v14 = vadd.f32 %v1377_v10, %v1120_v4 }
 0x52a   :  { %5586 = vtanh.f32 %v1378_v14 }
 0x534   :  { %v5587_v25 = vpop.eup %5586 }
 0x535   :  { %v1381_v26 = vmul.f32 %v5587_v25, %v1380_v22  ;;  %v5418_v25 = vld [vmem:[%s7134_s1 + $0x8] ss:$12 sps:$4 sm:$0xff]  }
 0x537   :  { %v6306_v28 = vadd.f32 %v1382_v27, %v1381_v26  ;;  %v5419_v26 = vld [vmem:[%s7134_s1 + $0x20] ss:$12 sps:$4 sm:$0xff]   ;;  %v5420_v27 = vld [vmem:[%s7134_s1 + $0x38] ss:$12 sps:$4 sm:$0xff]  }
 0x539   :  { %v1384_v29 = vpack.c.bf16 %v6306_v28, %v6306_v28 }
 0x53b   :  { %4526 = vst [vmem:[%s7137_s3 + $0x10] sm:$0xf] %v1384_v29  ;;  %1586 = vmatmul.mubr.bf16.vlgmr.msra.gmra.mrb[20].mxu0 %v1384_v29  ;;  %5107 = vmatmul.mubr.bf16.vlgmr.msra.gmra.mrb[20].mxu1 %v1384_v29  ;;  %v5422_v29 = vld [vmem:[%s7134_s1 + $0x68] ss:$12 sps:$4 sm:$0xff]  }
 0x53c   :  { %1826 = vmatpush1.bf16.msra.mxu0 %v6229_v36  ;;  %1857 = vmatprep.mubr.bf16.mxu0 %v5711_v2 }
 0x53d   :  { %1827 = vmatprep.subr.bf16.mxu0 %v6239_v38  ;;  %5126 = vmatprep.mubr.msk.bf16.mxu1 %vm5712_vm0, %v5710_v1 }
 0x53e   :  { %5111 = vmatpush3.bf16.msra.mxu1 %v5410_v12  ;;  %v5423_v12 = vld [vmem:[%s7134_s1 + $0x80] ss:$12 sps:$4 sm:$0xff]  }
 0x53f   :  { %5112 = vmatprep.subr.bf16.mxu1 %v5710_v1 }
 0x540   :  { %1828 = vmatpush1.bf16.msra.mxu0 %v6245_v39 }
 0x541   :  { %1829 = vmatprep.subr.bf16.mxu0 %v6255_v41 }
 0x542   :  { %5113 = vmatpush3.bf16.msra.mxu1 %v5411_v30  ;;  %v5424_v30 = vld [vmem:[%s7134_s1 + $0x98] ss:$12 sps:$4 sm:$0xff]  }
 0x543   :  { %5114 = vmatprep.subr.bf16.mxu1 %v5710_v1 }
 0x544   :  { %1830 = vmatpush1.bf16.msra.mxu0 %v6261_v43 }
 0x545   :  { %1831 = vmatprep.subr.bf16.mxu0 %v6122_v49 }
 0x546   :  { %5115 = vmatpush3.bf16.msra.mxu1 %v5412_v31  ;;  %v5425_v31 = vld [vmem:[%s7134_s1 + $0xb0] ss:$12 sps:$4 sm:$0xff]  }
 0x547   :  { %5116 = vmatprep.subr.bf16.mxu1 %v5710_v1 }
 0x548   :  { %1832 = vmatpush1.bf16.msra.mxu0 %v6128_v50 }
 0x549   :  { %1833 = vmatprep.subr.bf16.mxu0 %v6138_v9 }
 0x54a   :  { %5117 = vmatpush3.bf16.msra.mxu1 %v5413_v32  ;;  %v4556_v32 = vld [vmem:[%s7135_s0 + $0x48] sm:$0xff] }
 0x54b   :  { %5118 = vmatprep.subr.bf16.mxu1 %v5710_v1 }
 0x54c   :  { %1834 = vmatpush1.bf16.msra.mxu0 %v6144_v52 }
 0x54d   :  { %1835 = vmatprep.subr.bf16.mxu0 %v6153_v54 }
 0x54e   :  { %5119 = vmatpush3.bf16.msra.mxu1 %v5414_v33  ;;  %v1662_v33 = vunpack.c.l.bf16 %v4556_v32 }
 0x54f   :  { %5120 = vmatprep.subr.bf16.mxu1 %v5710_v1 }
 0x550   :  { %1836 = vmatpush1.bf16.msra.mxu0 %v6159_v56 }
 0x551   :  { %1837 = vmatprep.subr.bf16.mxu0 %v6169_v58 }
 0x552   :  { %5121 = vmatpush3.bf16.msra.mxu1 %v5415_v34 }
 0x553   :  { %5122 = vmatprep.subr.bf16.mxu1 %v5710_v1 }
 0x554   :  { %1838 = vmatpush1.bf16.msra.mxu0 %v6175_v59 }
 0x555   :  { %1839 = vmatprep.subr.bf16.mxu0 %v6185_v61 }
 0x556   :  { %5123 = vmatpush3.bf16.msra.mxu1 %v5416_v37 }
 0x557   :  { %5124 = vmatprep.subr.bf16.mxu1 %v5710_v1 }
 0x558   :  { %1840 = vmatpush1.bf16.msra.mxu0 %v6191_v62 }
 0x559   :  { %2097 = vmatprep.subr.bf16.mxu0 %v6224_v35 }
 0x55a   :  { %5125 = vmatpush3.bf16.msra.mxu1 %v5417_v40  ;;  %v1663_v40 = vunpack.c.h.bf16 %v4556_v32  ;;  %v6503_v32 = vld [vmem:[%s7135_s0 + $0x5c] ss:$12 sps:$4 sm:$0xff]  }
 0x55b   :  { %5130 = vmatprep.subr.bf16.mxu1 %v5710_v1 }
 0x60e   :  { %v1587_v45 = vpop.f32.mrb[20].mxu0  ;;  %v1628_v46 = vpop.f32.mrb[20].mxu1 }
 0x60f   :  { %v1634_v48 = vadd.f32 %v1587_v45, %v1390_v44  ;;  %v1589_v51 = vpop.f32.mrb[21].mxu0  ;;  %v5108_v53 = vpop.f32.mrb[21].mxu1  ;;  %v1648_v13 = vadd.f32 %v5924_v55, %v1628_v46 }
 0x610   :  { %v1591_v57 = vpop.f32.mrb[22].mxu0  ;;  %v1631_v60 = vpop.f32.mrb[22].mxu1  ;;  %v1641_v17 = vadd.f32 %v1589_v51, %v1391_v47 }
 0x611   :  { %v4553_v8 = vmul.f32 -1.442695, %v1634_v48  ;;  %v1592_v63 = vpop.f32.mrb[23].mxu0  ;;  %v5109_v6 = vpop.f32.mrb[23].mxu1 }
 0x612   :  { %v4554_v18 = vmul.f32 -1.442695, %v1641_v17 }
 0x613   :  { %5588 = vpow2.f32 %v4553_v8 }
 0x614   :  { %5590 = vpow2.f32 %v4554_v18  ;;  %v1664_v18 = vunpack.c.h.bf16 %v6370_v24 }
 0x61d   :  { %v5589_v19 = vpop.eup %5588 }
 0x61e   :  { %v1638_v21 = vadd.f32 1.0, %v5589_v19  ;;  %v5591_v23 = vpop.eup %5590 }
 0x61f   :  { %v1645_v7 = vadd.f32 1.0, %v5591_v23 }
 0x620   :  { %5592 = vrcp.f32 %v1638_v21 }
 0x621   :  { %5594 = vrcp.f32 %v1645_v7 }
 0x62a   :  { %v5593_v16 = vpop.eup %5592 }
 0x62b   :  { %v1649_v20 = vmul.f32 %v5593_v16, %v1648_v13  ;;  %v5595_v4 = vpop.eup %5594 }
 0x62c   :  { %v1652_v5 = vsub.f32 1.0, %v5595_v4  ;;  %v1654_v14 = vmul.f32 %v5595_v4, %v6306_v28  ;;  %v5421_v28 = vld [vmem:[%s7134_s1 + $0x50] ss:$12 sps:$4 sm:$0xff]  }
 0x62d   :  { %v1650_v3 = vadd.f32 %v1649_v20, %v1392_v11 }
 0x62f   :  { %5596 = vtanh.f32 %v1650_v3 }
 0x639   :  { %v5597_v0 = vpop.eup %5596 }
 0x63a   :  { %v1653_v10 = vmul.f32 %v5597_v0, %v1652_v5 }
 0x63c   :  { %v6375_v15 = vadd.f32 %v1654_v14, %v1653_v10 }
 0x63e   :  { %v1656_v22 = vpack.c.bf16 %v6375_v15, %v6375_v15 }
 0x640   :  { %4555 = vst [vmem:[%s7137_s3 + $0x14] sm:$0xf] %v1656_v22  ;;  %1858 = vmatmul.mubr.bf16.vlgmr.msra.gmra.mrb[24].mxu0 %v1656_v22  ;;  %5127 = vmatmul.mubr.bf16.vlgmr.msra.gmra.mrb[24].mxu1 %v1656_v22 }
 0x641   :  { %2098 = vmatpush1.bf16.msra.mxu0 %v6229_v36  ;;  %2129 = vmatprep.mubr.bf16.mxu0 %v5711_v2 }
 0x642   :  { %2099 = vmatprep.subr.bf16.mxu0 %v6239_v38  ;;  %5146 = vmatprep.mubr.msk.bf16.mxu1 %vm5712_vm0, %v5710_v1 }
 0x643   :  { %5131 = vmatpush3.bf16.msra.mxu1 %v5418_v25 }
 0x644   :  { %5132 = vmatprep.subr.bf16.mxu1 %v5710_v1 }
 0x645   :  { %2100 = vmatpush1.bf16.msra.mxu0 %v6245_v39 }
 0x646   :  { %2101 = vmatprep.subr.bf16.mxu0 %v6255_v41 }
 0x647   :  { %5133 = vmatpush3.bf16.msra.mxu1 %v5419_v26 }
 0x648   :  { %5134 = vmatprep.subr.bf16.mxu1 %v5710_v1 }
 0x649   :  { %2102 = vmatpush1.bf16.msra.mxu0 %v6261_v43 }
 0x64a   :  { %2103 = vmatprep.subr.bf16.mxu0 %v6122_v49 }
 0x64b   :  { %5135 = vmatpush3.bf16.msra.mxu1 %v5420_v27 }
 0x64c   :  { %5136 = vmatprep.subr.bf16.mxu1 %v5710_v1 }
 0x64d   :  { %2104 = vmatpush1.bf16.msra.mxu0 %v6128_v50 }
 0x64e   :  { %2105 = vmatprep.subr.bf16.mxu0 %v6138_v9 }
 0x64f   :  { %5137 = vmatpush3.bf16.msra.mxu1 %v5421_v28 }
 0x650   :  { %5138 = vmatprep.subr.bf16.mxu1 %v5710_v1 }
 0x651   :  { %2106 = vmatpush1.bf16.msra.mxu0 %v6144_v52 }
 0x652   :  { %2107 = vmatprep.subr.bf16.mxu0 %v6153_v54 }
 0x653   :  { %5139 = vmatpush3.bf16.msra.mxu1 %v5422_v29 }
 0x654   :  { %5140 = vmatprep.subr.bf16.mxu1 %v5710_v1 }
 0x655   :  { %2108 = vmatpush1.bf16.msra.mxu0 %v6159_v56 }
 0x656   :  { %2109 = vmatprep.subr.bf16.mxu0 %v6169_v58 }
 0x657   :  { %5141 = vmatpush3.bf16.msra.mxu1 %v5423_v12 }
 0x658   :  { %5142 = vmatprep.subr.bf16.mxu1 %v5710_v1 }
 0x659   :  { %2110 = vmatpush1.bf16.msra.mxu0 %v6175_v59 }
 0x65a   :  { %2111 = vmatprep.subr.bf16.mxu0 %v6185_v61 }
 0x65b   :  { %5143 = vmatpush3.bf16.msra.mxu1 %v5424_v30 }
 0x65c   :  { %5144 = vmatprep.subr.bf16.mxu1 %v5710_v1 }
 0x65d   :  { %2112 = vmatpush1.bf16.msra.mxu0 %v6191_v62 }
 0x65e   :  { %2369 = vmatprep.subr.bf16.mxu0 %v6224_v35 }
 0x65f   :  { %5145 = vmatpush3.bf16.msra.mxu1 %v5425_v31 }
 0x660   :  { %5150 = vmatprep.subr.bf16.mxu1 %v5710_v1 }
 0x713   :  { %v1859_v34 = vpop.f32.mrb[24].mxu0  ;;  %v1900_v37 = vpop.f32.mrb[24].mxu1 }
 0x714   :  { %v1906_v42 = vadd.f32 %v1859_v34, %v1662_v33  ;;  %v1861_v44 = vpop.f32.mrb[25].mxu0  ;;  %v5128_v45 = vpop.f32.mrb[25].mxu1  ;;  %v1920_v19 = vadd.f32 %v5924_v55, %v1900_v37  ;;  %v5426_v55 = vld [vmem:[%s7134_s1 + $0x8] ss:$12 sps:$4 sm:$0xff]   ;;  %v1936_v34 = vunpack.c.l.bf16 %v6503_v32  ;;  %v6509_v37 = vld [vmem:[%s7136_s2] ss:$0 sm:$0xff] }
 0x715   :  { %v1863_v46 = vpop.f32.mrb[26].mxu0  ;;  %v1903_v47 = vpop.f32.mrb[26].mxu1  ;;  %v1913_v57 = vadd.f32 %v1861_v44, %v1663_v40 }
 0x716   :  { %v4582_v48 = vmul.f32 -1.442695, %v1906_v42  ;;  %v1864_v51 = vpop.f32.mrb[27].mxu0  ;;  %v5129_v53 = vpop.f32.mrb[27].mxu1 }
 0x717   :  { %v4583_v60 = vmul.f32 -1.442695, %v1913_v57 }
 0x718   :  { %5598 = vpow2.f32 %v4582_v48 }
 0x719   :  { %5600 = vpow2.f32 %v4583_v60 }
 0x722   :  { %v5599_v8 = vpop.eup %5598 }
 0x723   :  { %v1910_v63 = vadd.f32 1.0, %v5599_v8  ;;  %v5601_v6 = vpop.eup %5600  ;;  %v5434_v8 = vld [vmem:[%s7134_s1 + $0x8] ss:$12 sps:$4 sm:$0xff]  }
 0x724   :  { %v1917_v17 = vadd.f32 1.0, %v5601_v6  ;;  %v6564_v6 = vld [vmem:[%s7134_s1 + $0x60] ss:$12 sps:$4 sm:$0xff]  }
 0x725   :  { %5602 = vrcp.f32 %v1910_v63  ;;  %v6558_v63 = vld [vmem:[%s7134_s1 + $0x64] ss:$12 sps:$4 sm:$0xff]  }
 0x726   :  { %5604 = vrcp.f32 %v1917_v17  ;;  %v5444_v17 = vld [vmem:[%s7134_s1 + $0x68] ss:$12 sps:$4 sm:$0xff]  }
 0x72f   :  { %v5603_v21 = vpop.eup %5602 }
 0x730   :  { %v1921_v23 = vmul.f32 %v5603_v21, %v1920_v19  ;;  %v5605_v11 = vpop.eup %5604  ;;  %v6579_v19 = vld [vmem:[%s7134_s1 + $0x78] ss:$12 sps:$4 sm:$0xff]   ;;  %v5448_v21 = vld [vmem:[%s7134_s1 + $0x80] ss:$12 sps:$4 sm:$0xff]  }
 0x731   :  { %v1924_v13 = vsub.f32 1.0, %v5605_v11  ;;  %v1926_v3 = vmul.f32 %v5605_v11, %v6375_v15  ;;  %v5452_v11 = vld [vmem:[%s7134_s1 + $0x98] ss:$12 sps:$4 sm:$0xff]  }
 0x732   :  { %v1922_v7 = vadd.f32 %v1921_v23, %v1664_v18  ;;  %v6573_v18 = vld [vmem:[%s7134_s1 + $0x7c] ss:$12 sps:$4 sm:$0xff]   ;;  %v6589_v23 = vld [vmem:[%s7134_s1 + $0x94] ss:$12 sps:$4 sm:$0xff]  }
 0x734   :  { %5606 = vtanh.f32 %v1922_v7  ;;  %v6595_v7 = vld [vmem:[%s7134_s1 + $0x90] ss:$12 sps:$4 sm:$0xff]  }
 0x73e   :  { %v5607_v16 = vpop.eup %5606 }
 0x73f   :  { %v1925_v20 = vmul.f32 %v5607_v16, %v1924_v13  ;;  %v6605_v13 = vld [vmem:[%s7134_s1 + $0xac] ss:$12 sps:$4 sm:$0xff]   ;;  %v6611_v16 = vld [vmem:[%s7134_s1 + $0xa8] ss:$12 sps:$4 sm:$0xff]  }
 0x741   :  { %v6439_v4 = vadd.f32 %v1926_v3, %v1925_v20  ;;  %v5456_v20 = vld [vmem:[%s7134_s1 + $0xb0] ss:$12 sps:$4 sm:$0xff]   ;;  %v4614_v3 = vld [vmem:[%s7135_s0 + $0x60] sm:$0xff] }
 0x743   :  { %v1928_v5 = vpack.c.bf16 %v6439_v4, %v6439_v4 }
 0x745   :  { %4584 = vst [vmem:[%s7137_s3 + $0x18] sm:$0xf] %v1928_v5  ;;  %2130 = vmatmul.mubr.bf16.vlgmr.msra.gmra.mrb[28].mxu0 %v1928_v5  ;;  %5147 = vmatmul.mubr.bf16.vlgmr.msra.gmra.mrb[28].mxu1 %v1928_v5 }
 0x746   :  { %2370 = vmatpush1.bf16.msra.mxu0 %v6229_v36  ;;  %2401 = vmatprep.mubr.bf16.mxu0 %v5711_v2 }
 0x747   :  { %2371 = vmatprep.subr.bf16.mxu0 %v6239_v38  ;;  %5166 = vmatprep.mubr.msk.bf16.mxu1 %vm5712_vm0, %v5710_v1 }
 0x748   :  { %5151 = vmatpush3.bf16.msra.mxu1 %v5426_v55 }
 0x749   :  { %5152 = vmatprep.subr.bf16.mxu1 %v5710_v1 }
 0x74a   :  { %2372 = vmatpush1.bf16.msra.mxu0 %v6245_v39 }
 0x74b   :  { %2373 = vmatprep.subr.bf16.mxu0 %v6255_v41 }
 0x74e   :  { %2374 = vmatpush1.bf16.msra.mxu0 %v6261_v43 }
 0x74f   :  { %2375 = vmatprep.subr.bf16.mxu0 %v6122_v49  ;;  %v5427_v49 = vld [vmem:[%s7134_s1 + $0x20] ss:$12 sps:$4 sm:$0xff]  }
 0x750   :  { %5153 = vmatpush3.bf16.msra.mxu1 %v5427_v49  ;;  %v2207_v49 = vunpack.c.h.bf16 %v4614_v3 }
 0x751   :  { %5154 = vmatprep.subr.bf16.mxu1 %v5710_v1 }
 0x752   :  { %2376 = vmatpush1.bf16.msra.mxu0 %v6128_v50  ;;  %v5428_v50 = vld [vmem:[%s7134_s1 + $0x38] ss:$12 sps:$4 sm:$0xff]  }
 0x753   :  { %2377 = vmatprep.subr.bf16.mxu0 %v6138_v9  ;;  %v5429_v9 = vld [vmem:[%s7134_s1 + $0x50] ss:$12 sps:$4 sm:$0xff]  }
 0x754   :  { %5155 = vmatpush3.bf16.msra.mxu1 %v5428_v50 }
 0x755   :  { %5156 = vmatprep.subr.bf16.mxu1 %v5710_v1 }
 0x756   :  { %2378 = vmatpush1.bf16.msra.mxu0 %v6144_v52  ;;  %v5430_v52 = vld [vmem:[%s7134_s1 + $0x68] ss:$12 sps:$4 sm:$0xff]  }
 0x757   :  { %2379 = vmatprep.subr.bf16.mxu0 %v6153_v54  ;;  %v5431_v54 = vld [vmem:[%s7134_s1 + $0x80] ss:$12 sps:$4 sm:$0xff]  }
 0x758   :  { %5157 = vmatpush3.bf16.msra.mxu1 %v5429_v9 }
 0x759   :  { %5158 = vmatprep.subr.bf16.mxu1 %v5710_v1 }
 0x75a   :  { %2380 = vmatpush1.bf16.msra.mxu0 %v6159_v56  ;;  %v5432_v56 = vld [vmem:[%s7134_s1 + $0x98] ss:$12 sps:$4 sm:$0xff]  }
 0x75b   :  { %2381 = vmatprep.subr.bf16.mxu0 %v6169_v58  ;;  %v5433_v58 = vld [vmem:[%s7134_s1 + $0xb0] ss:$12 sps:$4 sm:$0xff]  }
 0x75c   :  { %5159 = vmatpush3.bf16.msra.mxu1 %v5430_v52 }
 0x75d   :  { %5160 = vmatprep.subr.bf16.mxu1 %v5710_v1 }
 0x75e   :  { %2382 = vmatpush1.bf16.msra.mxu0 %v6175_v59  ;;  %v4585_v59 = vld [vmem:[%s7135_s0 + $0x54] sm:$0xff] }
 0x75f   :  { %2383 = vmatprep.subr.bf16.mxu0 %v6185_v61  ;;  %v1934_v61 = vunpack.c.l.bf16 %v4585_v59  ;;  %v1935_v24 = vunpack.c.h.bf16 %v4585_v59 }
 0x760   :  { %5161 = vmatpush3.bf16.msra.mxu1 %v5431_v54 }
 0x761   :  { %5162 = vmatprep.subr.bf16.mxu1 %v5710_v1 }
 0x762   :  { %2384 = vmatpush1.bf16.msra.mxu0 %v6191_v62 }
 0x763   :  { %2641 = vmatprep.subr.bf16.mxu0 %v6224_v35 }
 0x764   :  { %5163 = vmatpush3.bf16.msra.mxu1 %v5432_v56 }
 0x765   :  { %5164 = vmatprep.subr.bf16.mxu1 %v5710_v1 }
 0x768   :  { %5165 = vmatpush3.bf16.msra.mxu1 %v5433_v58 }
 0x769   :  { %5170 = vmatprep.subr.bf16.mxu1 %v5710_v1 }
 0x818   :  { %v2131_v62 = vpop.f32.mrb[28].mxu0  ;;  %v2172_v35 = vpop.f32.mrb[28].mxu1 }
 0x819   :  { %v2178_v0 = vadd.f32 %v2131_v62, %v1934_v61  ;;  %v2133_v10 = vpop.f32.mrb[29].mxu0  ;;  %v5148_v14 = vpop.f32.mrb[29].mxu1  ;;  %v2192_v40 = vadd.f32 %v6509_v37, %v2172_v35 }
 0x81a   :  { %v2135_v15 = vpop.f32.mrb[30].mxu0  ;;  %v2175_v22 = vpop.f32.mrb[30].mxu1  ;;  %v2185_v28 = vadd.f32 %v2133_v10, %v1935_v24 }
 0x81b   :  { %v4611_v25 = vmul.f32 -1.442695, %v2178_v0  ;;  %v2136_v26 = vpop.f32.mrb[31].mxu0  ;;  %v5149_v27 = vpop.f32.mrb[31].mxu1  ;;  %v2208_v15 = vunpack.c.h.bf16 %v6503_v32  ;;  %v6639_v32 = vld [vmem:[%s7134_s1 + $0x4] ss:$12 sps:$4 sm:$0xff]  }
 0x81c   :  { %v4612_v29 = vmul.f32 -1.442695, %v2185_v28 }
 0x81d   :  { %5608 = vpow2.f32 %v4611_v25 }
 0x81e   :  { %5610 = vpow2.f32 %v4612_v29 }
 0x827   :  { %v5609_v12 = vpop.eup %5608 }
 0x828   :  { %v2182_v30 = vadd.f32 1.0, %v5609_v12  ;;  %v5611_v31 = vpop.eup %5610 }
 0x829   :  { %v2189_v33 = vadd.f32 1.0, %v5611_v31 }
 0x82a   :  { %5612 = vrcp.f32 %v2182_v30 }
 0x82b   :  { %5614 = vrcp.f32 %v2189_v33 }
 0x834   :  { %v5613_v42 = vpop.eup %5612 }
 0x835   :  { %v2193_v44 = vmul.f32 %v5613_v42, %v2192_v40  ;;  %v5615_v46 = vpop.eup %5614  ;;  %v6644_v40 = vld [vmem:[%s7134_s1] ss:$12 sps:$4 sm:$0xff]   ;;  %v5460_v42 = vld [vmem:[%s7134_s1 + $0x8] ss:$12 sps:$4 sm:$0xff]  }
 0x836   :  { %v2196_v47 = vsub.f32 1.0, %v5615_v46  ;;  %v2198_v53 = vmul.f32 %v5615_v46, %v6439_v4  ;;  %v2206_v4 = vunpack.c.l.bf16 %v4614_v3  ;;  %v5464_v46 = vld [vmem:[%s7134_s1 + $0x20] ss:$12 sps:$4 sm:$0xff]  }
 0x837   :  { %v2194_v45 = vadd.f32 %v2193_v44, %v1936_v34  ;;  %v6654_v44 = vld [vmem:[%s7134_s1 + $0x1c] ss:$12 sps:$4 sm:$0xff]  }
 0x839   :  { %5616 = vtanh.f32 %v2194_v45  ;;  %v6660_v45 = vld [vmem:[%s7134_s1 + $0x18] ss:$12 sps:$4 sm:$0xff]  }
 0x843   :  { %v5617_v48 = vpop.eup %5616 }
 0x844   :  { %v2197_v51 = vmul.f32 %v5617_v48, %v2196_v47  ;;  %v6670_v47 = vld [vmem:[%s7134_s1 + $0x34] ss:$12 sps:$4 sm:$0xff]   ;;  %v6676_v48 = vld [vmem:[%s7134_s1 + $0x30] ss:$12 sps:$4 sm:$0xff]  }
 0x846   :  { %v6513_v57 = vadd.f32 %v2198_v53, %v2197_v51  ;;  %v5468_v51 = vld [vmem:[%s7134_s1 + $0x38] ss:$12 sps:$4 sm:$0xff]   ;;  %v5469_v53 = vld [vmem:[%s7134_s1 + $0x50] ss:$12 sps:$4 sm:$0xff]  }
 0x848   :  { %v2200_v60 = vpack.c.bf16 %v6513_v57, %v6513_v57 }
 0x84a   :  { %4613 = vst [vmem:[%s7137_s3 + $0x1c] sm:$0xf] %v2200_v60  ;;  %2402 = vmatmul.mubr.bf16.vlgmr.msra.gmra.mrb[32].mxu0 %v2200_v60  ;;  %5167 = vmatmul.mubr.bf16.vlgmr.msra.gmra.mrb[32].mxu1 %v2200_v60  ;;  %v5471_v60 = vld [vmem:[%s7134_s1 + $0x80] ss:$12 sps:$4 sm:$0xff]  }
 0x84b   :  { %2642 = vmatpush1.bf16.msra.mxu0 %v6229_v36  ;;  %2673 = vmatprep.mubr.bf16.mxu0 %v5711_v2  ;;  %v5435_v36 = vld [vmem:[%s7134_s1 + $0x20] ss:$12 sps:$4 sm:$0xff]  }
 0x84c   :  { %2643 = vmatprep.subr.bf16.mxu0 %v6239_v38  ;;  %5186 = vmatprep.mubr.msk.bf16.mxu1 %vm5712_vm0, %v5710_v1  ;;  %v5436_v38 = vld [vmem:[%s7134_s1 + $0x38] ss:$12 sps:$4 sm:$0xff]  }
 0x84d   :  { %5171 = vmatpush3.bf16.msra.mxu1 %v5434_v8  ;;  %v5472_v8 = vld [vmem:[%s7134_s1 + $0x98] ss:$12 sps:$4 sm:$0xff]  }
 0x84e   :  { %5172 = vmatprep.subr.bf16.mxu1 %v5710_v1 }
 0x84f   :  { %2644 = vmatpush1.bf16.msra.mxu0 %v6245_v39  ;;  %v6542_v39 = vld [vmem:[%s7134_s1 + $0x4c] ss:$12 sps:$4 sm:$0xff]  }
 0x850   :  { %2645 = vmatprep.subr.bf16.mxu0 %v6255_v41  ;;  %v6548_v41 = vld [vmem:[%s7134_s1 + $0x48] ss:$12 sps:$4 sm:$0xff]  }
 0x851   :  { %5173 = vmatpush3.bf16.msra.mxu1 %v5435_v36  ;;  %v5473_v36 = vld [vmem:[%s7134_s1 + $0xb0] ss:$12 sps:$4 sm:$0xff]  }
 0x852   :  { %5174 = vmatprep.subr.bf16.mxu1 %v5710_v1 }
 0x853   :  { %2646 = vmatpush1.bf16.msra.mxu0 %v6261_v43  ;;  %v5440_v43 = vld [vmem:[%s7134_s1 + $0x50] ss:$12 sps:$4 sm:$0xff]  }
 0x854   :  { %2647 = vmatprep.subr.bf16.mxu0 %v6542_v39 }
 0x855   :  { %5175 = vmatpush3.bf16.msra.mxu1 %v5436_v38  ;;  %v4643_v38 = vld [vmem:[%s7135_s0 + $0x6c] sm:$0xff] }
 0x856   :  { %5176 = vmatprep.subr.bf16.mxu1 %v5710_v1 }
 0x857   :  { %2648 = vmatpush1.bf16.msra.mxu0 %v6548_v41 }
 0x858   :  { %2649 = vmatprep.subr.bf16.mxu0 %v6558_v63 }
 0x859   :  { %5177 = vmatpush3.bf16.msra.mxu1 %v5440_v43  ;;  %v2478_v43 = vunpack.c.l.bf16 %v4643_v38 }
 0x85a   :  { %5178 = vmatprep.subr.bf16.mxu1 %v5710_v1 }
 0x85b   :  { %2650 = vmatpush1.bf16.msra.mxu0 %v6564_v6 }
 0x85c   :  { %2651 = vmatprep.subr.bf16.mxu0 %v6573_v18 }
 0x85d   :  { %5179 = vmatpush3.bf16.msra.mxu1 %v5444_v17 }
 0x85e   :  { %5180 = vmatprep.subr.bf16.mxu1 %v5710_v1 }
 0x85f   :  { %2652 = vmatpush1.bf16.msra.mxu0 %v6579_v19 }
 0x860   :  { %2653 = vmatprep.subr.bf16.mxu0 %v6589_v23 }
 0x861   :  { %5181 = vmatpush3.bf16.msra.mxu1 %v5448_v21 }
 0x862   :  { %5182 = vmatprep.subr.bf16.mxu1 %v5710_v1 }
 0x863   :  { %2654 = vmatpush1.bf16.msra.mxu0 %v6595_v7 }
 0x864   :  { %2655 = vmatprep.subr.bf16.mxu0 %v6605_v13 }
 0x865   :  { %5183 = vmatpush3.bf16.msra.mxu1 %v5452_v11  ;;  %v2479_v11 = vunpack.c.h.bf16 %v4643_v38 }
 0x866   :  { %5184 = vmatprep.subr.bf16.mxu1 %v5710_v1 }
 0x867   :  { %2656 = vmatpush1.bf16.msra.mxu0 %v6611_v16 }
 0x868   :  { %2913 = vmatprep.subr.bf16.mxu0 %v6639_v32 }
 0x869   :  { %5185 = vmatpush3.bf16.msra.mxu1 %v5456_v20 }
 0x86a   :  { %5190 = vmatprep.subr.bf16.mxu1 %v5710_v1 }
 0x91d   :  { %v2403_v5 = vpop.f32.mrb[32].mxu0  ;;  %v2444_v55 = vpop.f32.mrb[32].mxu1 }
 0x91e   :  { %v2450_v50 = vadd.f32 %v2403_v5, %v2206_v4  ;;  %v2405_v9 = vpop.f32.mrb[33].mxu0  ;;  %v5168_v52 = vpop.f32.mrb[33].mxu1  ;;  %v2464_v22 = vadd.f32 %v6509_v37, %v2444_v55 }
 0x91f   :  { %v2407_v54 = vpop.f32.mrb[34].mxu0  ;;  %v2447_v56 = vpop.f32.mrb[34].mxu1  ;;  %v2457_v62 = vadd.f32 %v2405_v9, %v2207_v49 }
 0x920   :  { %v4640_v58 = vmul.f32 -1.442695, %v2450_v50  ;;  %v2408_v59 = vpop.f32.mrb[35].mxu0  ;;  %v5169_v61 = vpop.f32.mrb[35].mxu1 }
 0x921   :  { %v4641_v35 = vmul.f32 -1.442695, %v2457_v62  ;;  %v6721_v61 = vld [vmem:[%s7135_s0 + $0x74] ss:$12 sps:$4 sm:$0xff]  }
 0x922   :  { %5618 = vpow2.f32 %v4640_v58 }
 0x923   :  { %5620 = vpow2.f32 %v4641_v35  ;;  %v2480_v35 = vunpack.c.l.bf16 %v6721_v61 }
 0x92c   :  { %v5619_v24 = vpop.eup %5618 }
 0x92d   :  { %v2454_v0 = vadd.f32 1.0, %v5619_v24  ;;  %v5621_v10 = vpop.eup %5620 }
 0x92e   :  { %v2461_v14 = vadd.f32 1.0, %v5621_v10 }
 0x92f   :  { %5622 = vrcp.f32 %v2454_v0 }
 0x930   :  { %5624 = vrcp.f32 %v2461_v14 }
 0x939   :  { %v5623_v25 = vpop.eup %5622 }
 0x93a   :  { %v2465_v26 = vmul.f32 %v5623_v25, %v2464_v22  ;;  %v5625_v28 = vpop.eup %5624 }
 0x93b   :  { %v2468_v29 = vsub.f32 1.0, %v5625_v28  ;;  %v2470_v31 = vmul.f32 %v5625_v28, %v6513_v57  ;;  %v5470_v57 = vld [vmem:[%s7134_s1 + $0x68] ss:$12 sps:$4 sm:$0xff]  }
 0x93c   :  { %v2466_v27 = vadd.f32 %v2465_v26, %v2208_v15 }
 0x93e   :  { %5626 = vtanh.f32 %v2466_v27 }
 0x948   :  { %v5627_v12 = vpop.eup %5626 }
 0x949   :  { %v2469_v30 = vmul.f32 %v5627_v12, %v2468_v29  ;;  %v5474_v12 = vld [vmem:[%s7134_s1 + $0x8] ss:$12 sps:$4 sm:$0xff]  }
 0x94b   :  { %v6626_v33 = vadd.f32 %v2470_v31, %v2469_v30  ;;  %v5475_v30 = vld [vmem:[%s7134_s1 + $0x20] ss:$12 sps:$4 sm:$0xff]   ;;  %v5476_v31 = vld [vmem:[%s7134_s1 + $0x38] ss:$12 sps:$4 sm:$0xff]  }
 0x94d   :  { %v2472_v34 = vpack.c.bf16 %v6626_v33, %v6626_v33 }
 0x94f   :  { %4642 = vst [vmem:[%s7137_s3 + $0x20] sm:$0xf] %v2472_v34  ;;  %2674 = vmatmul.mubr.bf16.vlgmr.msra.gmra.mrb[36].mxu0 %v2472_v34  ;;  %5187 = vmatmul.mubr.bf16.vlgmr.msra.gmra.mrb[36].mxu1 %v2472_v34  ;;  %v5478_v34 = vld [vmem:[%s7134_s1 + $0x68] ss:$12 sps:$4 sm:$0xff]  }
 0x950   :  { %2945 = vmatprep.mubr.bf16.mxu0 %v5711_v2  ;;  %5206 = vmatprep.mubr.msk.bf16.mxu1 %vm5712_vm0, %v5710_v1 }
 0x951   :  { %2914 = vmatpush1.bf16.msra.mxu0 %v6644_v40  ;;  %5191 = vmatpush3.bf16.msra.mxu1 %v5460_v42  ;;  %v5479_v42 = vld [vmem:[%s7134_s1 + $0x80] ss:$12 sps:$4 sm:$0xff]  }
 0x952   :  { %5192 = vmatprep.subr.bf16.mxu1 %v5710_v1  ;;  %2915 = vmatprep.subr.bf16.mxu0 %v6654_v44 }
 0x955   :  { %2916 = vmatpush1.bf16.msra.mxu0 %v6660_v45  ;;  %5193 = vmatpush3.bf16.msra.mxu1 %v5464_v46  ;;  %v5480_v46 = vld [vmem:[%s7134_s1 + $0x98] ss:$12 sps:$4 sm:$0xff]  }
 0x956   :  { %5194 = vmatprep.subr.bf16.mxu1 %v5710_v1  ;;  %2917 = vmatprep.subr.bf16.mxu0 %v6670_v47 }
 0x959   :  { %2918 = vmatpush1.bf16.msra.mxu0 %v6676_v48  ;;  %5195 = vmatpush3.bf16.msra.mxu1 %v5468_v51  ;;  %v5481_v51 = vld [vmem:[%s7134_s1 + $0xb0] ss:$12 sps:$4 sm:$0xff]  }
 0x95a   :  { %2919 = vmatprep.subr.bf16.mxu0 %v6542_v39  ;;  %5196 = vmatprep.subr.bf16.mxu1 %v5710_v1 }
 0x95d   :  { %2920 = vmatpush1.bf16.msra.mxu0 %v6548_v41  ;;  %5197 = vmatpush3.bf16.msra.mxu1 %v5469_v53  ;;  %v4672_v53 = vld [vmem:[%s7135_s0 + $0x78] sm:$0xff] }
 0x95e   :  { %2921 = vmatprep.subr.bf16.mxu0 %v6558_v63  ;;  %5198 = vmatprep.subr.bf16.mxu1 %v5710_v1 }
 0x961   :  { %2922 = vmatpush1.bf16.msra.mxu0 %v6564_v6  ;;  %5199 = vmatpush3.bf16.msra.mxu1 %v5470_v57  ;;  %v2750_v57 = vunpack.c.l.bf16 %v4672_v53 }
 0x962   :  { %2923 = vmatprep.subr.bf16.mxu0 %v6573_v18  ;;  %5200 = vmatprep.subr.bf16.mxu1 %v5710_v1 }
 0x965   :  { %2924 = vmatpush1.bf16.msra.mxu0 %v6579_v19  ;;  %5201 = vmatpush3.bf16.msra.mxu1 %v5471_v60 }
 0x966   :  { %2925 = vmatprep.subr.bf16.mxu0 %v6589_v23  ;;  %5202 = vmatprep.subr.bf16.mxu1 %v5710_v1 }
 0x969   :  { %2926 = vmatpush1.bf16.msra.mxu0 %v6595_v7  ;;  %5203 = vmatpush3.bf16.msra.mxu1 %v5472_v8 }
 0x96a   :  { %2927 = vmatprep.subr.bf16.mxu0 %v6605_v13  ;;  %5204 = vmatprep.subr.bf16.mxu1 %v5710_v1 }
 0x96d   :  { %2928 = vmatpush1.bf16.msra.mxu0 %v6611_v16  ;;  %5205 = vmatpush3.bf16.msra.mxu1 %v5473_v36  ;;  %v2751_v36 = vunpack.c.h.bf16 %v4672_v53 }
 0x96e   :  { %3185 = vmatprep.subr.bf16.mxu0 %v6639_v32  ;;  %5210 = vmatprep.subr.bf16.mxu1 %v5710_v1 }
 0xa22   :  { %v2675_v17 = vpop.f32.mrb[36].mxu0  ;;  %v2716_v21 = vpop.f32.mrb[36].mxu1 }
 0xa23   :  { %v2722_v20 = vadd.f32 %v2675_v17, %v2478_v43  ;;  %v2677_v3 = vpop.f32.mrb[37].mxu0  ;;  %v5188_v4 = vpop.f32.mrb[37].mxu1  ;;  %v2736_v24 = vadd.f32 %v6509_v37, %v2716_v21 }
 0xa24   :  { %v2679_v5 = vpop.f32.mrb[38].mxu0  ;;  %v2719_v55 = vpop.f32.mrb[38].mxu1  ;;  %v2729_v52 = vadd.f32 %v2677_v3, %v2479_v11 }
 0xa25   :  { %v4669_v49 = vmul.f32 -1.442695, %v2722_v20  ;;  %v2680_v50 = vpop.f32.mrb[39].mxu0  ;;  %v5189_v9 = vpop.f32.mrb[39].mxu1 }
 0xa26   :  { %v4670_v54 = vmul.f32 -1.442695, %v2729_v52 }
 0xa27   :  { %5628 = vpow2.f32 %v4669_v49 }
 0xa28   :  { %5630 = vpow2.f32 %v4670_v54  ;;  %v2752_v54 = vunpack.c.h.bf16 %v6721_v61  ;;  %v5482_v61 = vld [vmem:[%s7134_s1 + $0x8] ss:$12 sps:$4 sm:$0xff]  }
 0xa31   :  { %v5629_v56 = vpop.eup %5628 }
 0xa32   :  { %v2726_v58 = vadd.f32 1.0, %v5629_v56  ;;  %v5631_v59 = vpop.eup %5630 }
 0xa33   :  { %v2733_v62 = vadd.f32 1.0, %v5631_v59 }
 0xa34   :  { %5632 = vrcp.f32 %v2726_v58 }
 0xa35   :  { %5634 = vrcp.f32 %v2733_v62 }
 0xa3e   :  { %v5633_v0 = vpop.eup %5632 }
 0xa3f   :  { %v2737_v10 = vmul.f32 %v5633_v0, %v2736_v24  ;;  %v5635_v15 = vpop.eup %5634 }
 0xa40   :  { %v2740_v22 = vsub.f32 1.0, %v5635_v15  ;;  %v2742_v27 = vmul.f32 %v5635_v15, %v6626_v33  ;;  %v5477_v33 = vld [vmem:[%s7134_s1 + $0x50] ss:$12 sps:$4 sm:$0xff]  }
 0xa41   :  { %v2738_v14 = vadd.f32 %v2737_v10, %v2480_v35 }
 0xa43   :  { %5636 = vtanh.f32 %v2738_v14 }
 0xa4d   :  { %v5637_v25 = vpop.eup %5636 }
 0xa4e   :  { %v2741_v26 = vmul.f32 %v5637_v25, %v2740_v22  ;;  %v5483_v25 = vld [vmem:[%s7134_s1 + $0x20] ss:$12 sps:$4 sm:$0xff]  }
 0xa50   :  { %v6726_v28 = vadd.f32 %v2742_v27, %v2741_v26  ;;  %v5484_v26 = vld [vmem:[%s7134_s1 + $0x38] ss:$12 sps:$4 sm:$0xff]   ;;  %v5485_v27 = vld [vmem:[%s7134_s1 + $0x50] ss:$12 sps:$4 sm:$0xff]  }
 0xa52   :  { %v2744_v29 = vpack.c.bf16 %v6726_v28, %v6726_v28 }
 0xa54   :  { %4671 = vst [vmem:[%s7137_s3 + $0x24] sm:$0xf] %v2744_v29  ;;  %2946 = vmatmul.mubr.bf16.vlgmr.msra.gmra.mrb[40].mxu0 %v2744_v29  ;;  %5207 = vmatmul.mubr.bf16.vlgmr.msra.gmra.mrb[40].mxu1 %v2744_v29  ;;  %v5487_v29 = vld [vmem:[%s7134_s1 + $0x80] ss:$12 sps:$4 sm:$0xff]  }
 0xa55   :  { %3186 = vmatpush1.bf16.msra.mxu0 %v6644_v40  ;;  %3217 = vmatprep.mubr.bf16.mxu0 %v5711_v2 }
 0xa56   :  { %3187 = vmatprep.subr.bf16.mxu0 %v6654_v44  ;;  %5226 = vmatprep.mubr.msk.bf16.mxu1 %vm5712_vm0, %v5710_v1 }
 0xa57   :  { %5211 = vmatpush3.bf16.msra.mxu1 %v5474_v12  ;;  %v5488_v12 = vld [vmem:[%s7134_s1 + $0x98] ss:$12 sps:$4 sm:$0xff]  }
 0xa58   :  { %5212 = vmatprep.subr.bf16.mxu1 %v5710_v1 }
 0xa59   :  { %3188 = vmatpush1.bf16.msra.mxu0 %v6660_v45 }
 0xa5a   :  { %3189 = vmatprep.subr.bf16.mxu0 %v6670_v47 }
 0xa5b   :  { %5213 = vmatpush3.bf16.msra.mxu1 %v5475_v30  ;;  %v5489_v30 = vld [vmem:[%s7134_s1 + $0xb0] ss:$12 sps:$4 sm:$0xff]  }
 0xa5c   :  { %5214 = vmatprep.subr.bf16.mxu1 %v5710_v1 }
 0xa5d   :  { %3190 = vmatpush1.bf16.msra.mxu0 %v6676_v48 }
 0xa5e   :  { %3191 = vmatprep.subr.bf16.mxu0 %v6542_v39 }
 0xa5f   :  { %5215 = vmatpush3.bf16.msra.mxu1 %v5476_v31  ;;  %v4701_v31 = vld [vmem:[%s7135_s0 + $0x84] sm:$0xff] }
 0xa60   :  { %5216 = vmatprep.subr.bf16.mxu1 %v5710_v1 }
 0xa61   :  { %3192 = vmatpush1.bf16.msra.mxu0 %v6548_v41 }
 0xa62   :  { %3193 = vmatprep.subr.bf16.mxu0 %v6558_v63 }
 0xa63   :  { %5217 = vmatpush3.bf16.msra.mxu1 %v5477_v33  ;;  %v3022_v33 = vunpack.c.l.bf16 %v4701_v31 }
 0xa64   :  { %5218 = vmatprep.subr.bf16.mxu1 %v5710_v1 }
 0xa65   :  { %3194 = vmatpush1.bf16.msra.mxu0 %v6564_v6 }
 0xa66   :  { %3195 = vmatprep.subr.bf16.mxu0 %v6573_v18 }
 0xa67   :  { %5219 = vmatpush3.bf16.msra.mxu1 %v5478_v34 }
 0xa68   :  { %5220 = vmatprep.subr.bf16.mxu1 %v5710_v1 }
 0xa69   :  { %3196 = vmatpush1.bf16.msra.mxu0 %v6579_v19 }
 0xa6a   :  { %3197 = vmatprep.subr.bf16.mxu0 %v6589_v23 }
 0xa6b   :  { %5221 = vmatpush3.bf16.msra.mxu1 %v5479_v42 }
 0xa6c   :  { %5222 = vmatprep.subr.bf16.mxu1 %v5710_v1 }
 0xa6d   :  { %3198 = vmatpush1.bf16.msra.mxu0 %v6595_v7 }
 0xa6e   :  { %3199 = vmatprep.subr.bf16.mxu0 %v6605_v13 }
 0xa6f   :  { %5223 = vmatpush3.bf16.msra.mxu1 %v5480_v46  ;;  %v3023_v46 = vunpack.c.h.bf16 %v4701_v31 }
 0xa70   :  { %5224 = vmatprep.subr.bf16.mxu1 %v5710_v1 }
 0xa71   :  { %3200 = vmatpush1.bf16.msra.mxu0 %v6611_v16 }
 0xa72   :  { %3457 = vmatprep.subr.bf16.mxu0 %v6639_v32 }
 0xa73   :  { %5225 = vmatpush3.bf16.msra.mxu1 %v5481_v51 }
 0xa74   :  { %5230 = vmatprep.subr.bf16.mxu1 %v5710_v1 }
 0xb27   :  { %v2947_v60 = vpop.f32.mrb[40].mxu0  ;;  %v2988_v8 = vpop.f32.mrb[40].mxu1 }
 0xb28   :  { %v2994_v38 = vadd.f32 %v2947_v60, %v2750_v57  ;;  %v2949_v43 = vpop.f32.mrb[41].mxu0  ;;  %v5208_v17 = vpop.f32.mrb[41].mxu1  ;;  %v3008_v56 = vadd.f32 %v6509_v37, %v2988_v8 }
 0xb29   :  { %v2951_v21 = vpop.f32.mrb[42].mxu0  ;;  %v2991_v11 = vpop.f32.mrb[42].mxu1  ;;  %v3001_v5 = vadd.f32 %v2949_v43, %v2751_v36 }
 0xb2a   :  { %v4698_v20 = vmul.f32 -1.442695, %v2994_v38  ;;  %v2952_v3 = vpop.f32.mrb[43].mxu0  ;;  %v5209_v4 = vpop.f32.mrb[43].mxu1 }
 0xb2b   :  { %v4699_v55 = vmul.f32 -1.442695, %v3001_v5  ;;  %v6854_v4 = vld [vmem:[%s7135_s0 + $0x8c] ss:$12 sps:$4 sm:$0xff]  }
 0xb2c   :  { %5638 = vpow2.f32 %v4698_v20 }
 0xb2d   :  { %5640 = vpow2.f32 %v4699_v55  ;;  %v3024_v55 = vunpack.c.l.bf16 %v6854_v4 }
 0xb36   :  { %v5639_v49 = vpop.eup %5638 }
 0xb37   :  { %v2998_v50 = vadd.f32 1.0, %v5639_v49  ;;  %v5641_v9 = vpop.eup %5640 }
 0xb38   :  { %v3005_v52 = vadd.f32 1.0, %v5641_v9 }
 0xb39   :  { %5642 = vrcp.f32 %v2998_v50 }
 0xb3a   :  { %5644 = vrcp.f32 %v3005_v52 }
 0xb43   :  { %v5643_v58 = vpop.eup %5642 }
 0xb44   :  { %v3009_v59 = vmul.f32 %v5643_v58, %v3008_v56  ;;  %v5645_v35 = vpop.eup %5644 }
 0xb45   :  { %v3012_v24 = vsub.f32 1.0, %v5645_v35  ;;  %v3014_v14 = vmul.f32 %v5645_v35, %v6726_v28  ;;  %v5486_v28 = vld [vmem:[%s7134_s1 + $0x68] ss:$12 sps:$4 sm:$0xff]  }
 0xb46   :  { %v3010_v62 = vadd.f32 %v3009_v59, %v2752_v54 }
 0xb48   :  { %5646 = vtanh.f32 %v3010_v62 }
 0xb52   :  { %v5647_v0 = vpop.eup %5646 }
 0xb53   :  { %v3013_v10 = vmul.f32 %v5647_v0, %v3012_v24 }
 0xb55   :  { %v6790_v15 = vadd.f32 %v3014_v14, %v3013_v10 }
 0xb57   :  { %v3016_v22 = vpack.c.bf16 %v6790_v15, %v6790_v15 }
 0xb59   :  { %4700 = vst [vmem:[%s7137_s3 + $0x28] sm:$0xf] %v3016_v22  ;;  %3218 = vmatmul.mubr.bf16.vlgmr.msra.gmra.mrb[44].mxu0 %v3016_v22  ;;  %5227 = vmatmul.mubr.bf16.vlgmr.msra.gmra.mrb[44].mxu1 %v3016_v22 }
 0xb5a   :  { %3458 = vmatpush1.bf16.msra.mxu0 %v6644_v40  ;;  %3489 = vmatprep.mubr.bf16.mxu0 %v5711_v2 }
 0xb5b   :  { %3459 = vmatprep.subr.bf16.mxu0 %v6654_v44  ;;  %5246 = vmatprep.mubr.msk.bf16.mxu1 %vm5712_vm0, %v5710_v1 }
 0xb5c   :  { %5231 = vmatpush3.bf16.msra.mxu1 %v5482_v61 }
 0xb5d   :  { %5232 = vmatprep.subr.bf16.mxu1 %v5710_v1 }
 0xb5e   :  { %3460 = vmatpush1.bf16.msra.mxu0 %v6660_v45 }
 0xb5f   :  { %3461 = vmatprep.subr.bf16.mxu0 %v6670_v47 }
 0xb60   :  { %5233 = vmatpush3.bf16.msra.mxu1 %v5483_v25 }
 0xb61   :  { %5234 = vmatprep.subr.bf16.mxu1 %v5710_v1 }
 0xb62   :  { %3462 = vmatpush1.bf16.msra.mxu0 %v6676_v48 }
 0xb63   :  { %3463 = vmatprep.subr.bf16.mxu0 %v6542_v39 }
 0xb64   :  { %5235 = vmatpush3.bf16.msra.mxu1 %v5484_v26 }
 0xb65   :  { %5236 = vmatprep.subr.bf16.mxu1 %v5710_v1 }
 0xb66   :  { %3464 = vmatpush1.bf16.msra.mxu0 %v6548_v41 }
 0xb67   :  { %3465 = vmatprep.subr.bf16.mxu0 %v6558_v63 }
 0xb68   :  { %5237 = vmatpush3.bf16.msra.mxu1 %v5485_v27 }
 0xb69   :  { %5238 = vmatprep.subr.bf16.mxu1 %v5710_v1 }
 0xb6a   :  { %3466 = vmatpush1.bf16.msra.mxu0 %v6564_v6 }
 0xb6b   :  { %3467 = vmatprep.subr.bf16.mxu0 %v6573_v18 }
 0xb6c   :  { %5239 = vmatpush3.bf16.msra.mxu1 %v5486_v28 }
 0xb6d   :  { %5240 = vmatprep.subr.bf16.mxu1 %v5710_v1 }
 0xb6e   :  { %3468 = vmatpush1.bf16.msra.mxu0 %v6579_v19 }
 0xb6f   :  { %3469 = vmatprep.subr.bf16.mxu0 %v6589_v23 }
 0xb70   :  { %5241 = vmatpush3.bf16.msra.mxu1 %v5487_v29 }
 0xb71   :  { %5242 = vmatprep.subr.bf16.mxu1 %v5710_v1 }
 0xb72   :  { %3470 = vmatpush1.bf16.msra.mxu0 %v6595_v7 }
 0xb73   :  { %3471 = vmatprep.subr.bf16.mxu0 %v6605_v13 }
 0xb74   :  { %5243 = vmatpush3.bf16.msra.mxu1 %v5488_v12 }
 0xb75   :  { %5244 = vmatprep.subr.bf16.mxu1 %v5710_v1 }
 0xb76   :  { %3472 = vmatpush1.bf16.msra.mxu0 %v6611_v16 }
 0xb77   :  { %3729 = vmatprep.subr.bf16.mxu0 %v6639_v32 }
 0xb78   :  { %5245 = vmatpush3.bf16.msra.mxu1 %v5489_v30 }
 0xb79   :  { %5250 = vmatprep.subr.bf16.mxu1 %v5710_v1 }
 0xc2c   :  { %v3219_v34 = vpop.f32.mrb[44].mxu0  ;;  %v3260_v42 = vpop.f32.mrb[44].mxu1 }
 0xc2d   :  { %v3266_v51 = vadd.f32 %v3219_v34, %v3022_v33  ;;  %v3221_v53 = vpop.f32.mrb[45].mxu0  ;;  %v5228_v57 = vpop.f32.mrb[45].mxu1  ;;  %v3280_v49 = vadd.f32 %v6509_v37, %v3260_v42  ;;  %v3296_v42 = vunpack.c.h.bf16 %v6854_v4  ;;  %v6983_v4 = vld [vmem:[%s7134_s1 + $0x7c] ss:$12 sps:$4 sm:$0xff]  }
 0xc2e   :  { %v3223_v60 = vpop.f32.mrb[46].mxu0  ;;  %v3263_v8 = vpop.f32.mrb[46].mxu1  ;;  %v3273_v17 = vadd.f32 %v3221_v53, %v3023_v46 }
 0xc2f   :  { %v4727_v36 = vmul.f32 -1.442695, %v3266_v51  ;;  %v3224_v38 = vpop.f32.mrb[47].mxu0  ;;  %v5229_v43 = vpop.f32.mrb[47].mxu1 }
 0xc30   :  { %v4728_v21 = vmul.f32 -1.442695, %v3273_v17 }
 0xc31   :  { %5648 = vpow2.f32 %v4727_v36 }
 0xc32   :  { %5650 = vpow2.f32 %v4728_v21 }
 0xc3b   :  { %v5649_v11 = vpop.eup %5648 }
 0xc3c   :  { %v3270_v20 = vadd.f32 1.0, %v5649_v11  ;;  %v5651_v3 = vpop.eup %5650  ;;  %v6968_v11 = vld [vmem:[%s7134_s1 + $0x64] ss:$12 sps:$4 sm:$0xff]  }
 0xc3d   :  { %v3277_v5 = vadd.f32 1.0, %v5651_v3  ;;  %v5508_v3 = vld [vmem:[%s7134_s1 + $0x68] ss:$12 sps:$4 sm:$0xff]  }
 0xc3e   :  { %5652 = vrcp.f32 %v3270_v20  ;;  %v6974_v20 = vld [vmem:[%s7134_s1 + $0x60] ss:$12 sps:$4 sm:$0xff]  }
 0xc3f   :  { %5654 = vrcp.f32 %v3277_v5  ;;  %v6989_v5 = vld [vmem:[%s7134_s1 + $0x78] ss:$12 sps:$4 sm:$0xff]  }
 0xc48   :  { %v5653_v50 = vpop.eup %5652 }
 0xc49   :  { %v3281_v9 = vmul.f32 %v5653_v50, %v3280_v49  ;;  %v5655_v54 = vpop.eup %5654  ;;  %v6999_v49 = vld [vmem:[%s7134_s1 + $0x94] ss:$12 sps:$4 sm:$0xff]   ;;  %v7005_v50 = vld [vmem:[%s7134_s1 + $0x90] ss:$12 sps:$4 sm:$0xff]  }
 0xc4a   :  { %v3284_v56 = vsub.f32 1.0, %v5655_v54  ;;  %v3286_v62 = vmul.f32 %v5655_v54, %v6790_v15  ;;  %v7021_v54 = vld [vmem:[%s7134_s1 + $0xa8] ss:$12 sps:$4 sm:$0xff]  }
 0xc4b   :  { %v3282_v52 = vadd.f32 %v3281_v9, %v3024_v55  ;;  %v5512_v55 = vld [vmem:[%s7134_s1 + $0x80] ss:$12 sps:$4 sm:$0xff]   ;;  %v5516_v9 = vld [vmem:[%s7134_s1 + $0x98] ss:$12 sps:$4 sm:$0xff]  }
 0xc4d   :  { %5656 = vtanh.f32 %v3282_v52  ;;  %v7015_v52 = vld [vmem:[%s7134_s1 + $0xac] ss:$12 sps:$4 sm:$0xff]  }
 0xc57   :  { %v5657_v58 = vpop.eup %5656 }
 0xc58   :  { %v3285_v59 = vmul.f32 %v5657_v58, %v3284_v56  ;;  %v5520_v56 = vld [vmem:[%s7134_s1 + $0xb0] ss:$12 sps:$4 sm:$0xff]  }
 0xc59   :  { %v4759_v58 = vld [vmem:[%s7135_s0 + $0x9c] sm:$0xff] }
 0xc5a   :  { %v6859_v35 = vadd.f32 %v3286_v62, %v3285_v59  ;;  %v3566_v59 = vunpack.c.l.bf16 %v4759_v58 }
 0xc5c   :  { %v3288_v24 = vpack.c.bf16 %v6859_v35, %v6859_v35 }
 0xc5e   :  { %4729 = vst [vmem:[%s7137_s3 + $0x2c] sm:$0xf] %v3288_v24  ;;  %3490 = vmatmul.mubr.bf16.vlgmr.msra.gmra.mrb[48].mxu0 %v3288_v24  ;;  %5247 = vmatmul.mubr.bf16.vlgmr.msra.gmra.mrb[48].mxu1 %v3288_v24  ;;  %v3567_v24 = vunpack.c.h.bf16 %v4759_v58 }
 0xc5f   :  { %3730 = vmatpush1.bf16.msra.mxu0 %v6644_v40  ;;  %3761 = vmatprep.mubr.bf16.mxu0 %v5711_v2 }
 0xc60   :  { %3731 = vmatprep.subr.bf16.mxu0 %v6654_v44  ;;  %5266 = vmatprep.mubr.msk.bf16.mxu1 %vm5712_vm0, %v5710_v1 }
 0xc63   :  { %3732 = vmatpush1.bf16.msra.mxu0 %v6660_v45 }
 0xc64   :  { %3733 = vmatprep.subr.bf16.mxu0 %v6670_v47 }
 0xc67   :  { %3734 = vmatpush1.bf16.msra.mxu0 %v6676_v48 }
 0xc68   :  { %3735 = vmatprep.subr.bf16.mxu0 %v6542_v39  ;;  %v5490_v39 = vld [vmem:[%s7134_s1 + $0x8] ss:$12 sps:$4 sm:$0xff]  }
 0xc69   :  { %5251 = vmatpush3.bf16.msra.mxu1 %v5490_v39 }
 0xc6a   :  { %5252 = vmatprep.subr.bf16.mxu1 %v5710_v1 }
 0xc6b   :  { %3736 = vmatpush1.bf16.msra.mxu0 %v6548_v41  ;;  %v5491_v41 = vld [vmem:[%s7134_s1 + $0x20] ss:$12 sps:$4 sm:$0xff]  }
 0xc6c   :  { %3737 = vmatprep.subr.bf16.mxu0 %v6558_v63  ;;  %v5492_v63 = vld [vmem:[%s7134_s1 + $0x38] ss:$12 sps:$4 sm:$0xff]  }
 0xc6d   :  { %5253 = vmatpush3.bf16.msra.mxu1 %v5491_v41 }
 0xc6e   :  { %5254 = vmatprep.subr.bf16.mxu1 %v5710_v1 }
 0xc6f   :  { %3738 = vmatpush1.bf16.msra.mxu0 %v6564_v6  ;;  %v5493_v6 = vld [vmem:[%s7134_s1 + $0x50] ss:$12 sps:$4 sm:$0xff]  }
 0xc70   :  { %3739 = vmatprep.subr.bf16.mxu0 %v6573_v18  ;;  %v5494_v18 = vld [vmem:[%s7134_s1 + $0x68] ss:$12 sps:$4 sm:$0xff]  }
 0xc71   :  { %5255 = vmatpush3.bf16.msra.mxu1 %v5492_v63 }
 0xc72   :  { %5256 = vmatprep.subr.bf16.mxu1 %v5710_v1 }
 0xc73   :  { %3740 = vmatpush1.bf16.msra.mxu0 %v6579_v19  ;;  %v5495_v19 = vld [vmem:[%s7134_s1 + $0x80] ss:$12 sps:$4 sm:$0xff]  }
 0xc74   :  { %3741 = vmatprep.subr.bf16.mxu0 %v6589_v23  ;;  %v5496_v23 = vld [vmem:[%s7134_s1 + $0x98] ss:$12 sps:$4 sm:$0xff]  }
 0xc75   :  { %5257 = vmatpush3.bf16.msra.mxu1 %v5493_v6 }
 0xc76   :  { %5258 = vmatprep.subr.bf16.mxu1 %v5710_v1 }
 0xc77   :  { %3742 = vmatpush1.bf16.msra.mxu0 %v6595_v7  ;;  %v5497_v7 = vld [vmem:[%s7134_s1 + $0xb0] ss:$12 sps:$4 sm:$0xff]  }
 0xc78   :  { %3743 = vmatprep.subr.bf16.mxu0 %v6605_v13  ;;  %v4730_v13 = vld [vmem:[%s7135_s0 + $0x90] sm:$0xff] }
 0xc79   :  { %5259 = vmatpush3.bf16.msra.mxu1 %v5494_v18  ;;  %v3295_v10 = vunpack.c.h.bf16 %v4730_v13 }
 0xc7a   :  { %5260 = vmatprep.subr.bf16.mxu1 %v5710_v1 }
 0xc7b   :  { %3744 = vmatpush1.bf16.msra.mxu0 %v6611_v16  ;;  %v3294_v16 = vunpack.c.l.bf16 %v4730_v13 }
 0xc7c   :  { %4001 = vmatprep.subr.bf16.mxu0 %v6639_v32 }
 0xc7d   :  { %5261 = vmatpush3.bf16.msra.mxu1 %v5495_v19 }
 0xc7e   :  { %5262 = vmatprep.subr.bf16.mxu1 %v5710_v1 }
 0xc81   :  { %5263 = vmatpush3.bf16.msra.mxu1 %v5496_v23 }
 0xc82   :  { %5264 = vmatprep.subr.bf16.mxu1 %v5710_v1 }
 0xc85   :  { %5265 = vmatpush3.bf16.msra.mxu1 %v5497_v7 }
 0xc86   :  { %5270 = vmatprep.subr.bf16.mxu1 %v5710_v1 }
 0xd31   :  { %v3491_v32 = vpop.f32.mrb[48].mxu0  ;;  %v3532_v0 = vpop.f32.mrb[48].mxu1 }
 0xd32   :  { %v3538_v14 = vadd.f32 %v3491_v32, %v3294_v16  ;;  %v3493_v15 = vpop.f32.mrb[49].mxu0  ;;  %v5248_v22 = vpop.f32.mrb[49].mxu1  ;;  %v3552_v46 = vadd.f32 %v6509_v37, %v3532_v0  ;;  %v5498_v37 = vld [vmem:[%s7134_s1 + $0x8] ss:$12 sps:$4 sm:$0xff]  }
 0xd33   :  { %v3495_v61 = vpop.f32.mrb[50].mxu0  ;;  %v3535_v25 = vpop.f32.mrb[50].mxu1  ;;  %v3545_v29 = vadd.f32 %v3493_v15, %v3295_v10 }
 0xd34   :  { %v4756_v26 = vmul.f32 -1.442695, %v3538_v14  ;;  %v3496_v27 = vpop.f32.mrb[51].mxu0  ;;  %v5249_v28 = vpop.f32.mrb[51].mxu1  ;;  %v7036_v14 = vld [vmem:[%s7135_s0 + $0xa4] ss:$12 sps:$4 sm:$0xff]  }
 0xd35   :  { %v4757_v12 = vmul.f32 -1.442695, %v3545_v29  ;;  %v3568_v22 = vunpack.c.l.bf16 %v7036_v14  ;;  %v7042_v61 = vld [vmem:[%s7136_s2] ss:$0 sm:$0xff] }
 0xd36   :  { %5658 = vpow2.f32 %v4756_v26 }
 0xd37   :  { %5660 = vpow2.f32 %v4757_v12 }
 0xd40   :  { %v5659_v30 = vpop.eup %5658 }
 0xd41   :  { %v3542_v31 = vadd.f32 1.0, %v5659_v30  ;;  %v5661_v33 = vpop.eup %5660 }
 0xd42   :  { %v3549_v34 = vadd.f32 1.0, %v5661_v33 }
 0xd43   :  { %5662 = vrcp.f32 %v3542_v31 }
 0xd44   :  { %5664 = vrcp.f32 %v3549_v34 }
 0xd4d   :  { %v5663_v51 = vpop.eup %5662 }
 0xd4e   :  { %v3553_v53 = vmul.f32 %v5663_v51, %v3552_v46  ;;  %v5665_v60 = vpop.eup %5664  ;;  %v5523_v46 = vld [vmem:[%s7134_s1 + $0x4] ss:$12 sps:$4 sm:$0xff]   ;;  %v5521_v51 = vld [vmem:[%s7134_s1] ss:$12 sps:$4 sm:$0xff]  }
 0xd4f   :  { %v3556_v8 = vsub.f32 1.0, %v5665_v60  ;;  %v3558_v43 = vmul.f32 %v5665_v60, %v6859_v35  ;;  %v5528_v60 = vld [vmem:[%s7134_s1 + $0x20] ss:$12 sps:$4 sm:$0xff]  }
 0xd50   :  { %v3554_v57 = vadd.f32 %v3553_v53, %v3296_v42  ;;  %v5524_v53 = vld [vmem:[%s7134_s1 + $0x8] ss:$12 sps:$4 sm:$0xff]  }
 0xd52   :  { %5666 = vtanh.f32 %v3554_v57  ;;  %v5525_v57 = vld [vmem:[%s7134_s1 + $0x18] ss:$12 sps:$4 sm:$0xff]  }
 0xd5c   :  { %v5667_v36 = vpop.eup %5666 }
 0xd5d   :  { %v3557_v38 = vmul.f32 %v5667_v36, %v3556_v8  ;;  %v5531_v8 = vld [vmem:[%s7134_s1 + $0x34] ss:$12 sps:$4 sm:$0xff]   ;;  %v5529_v36 = vld [vmem:[%s7134_s1 + $0x30] ss:$12 sps:$4 sm:$0xff]  }
 0xd5f   :  { %v6923_v17 = vadd.f32 %v3558_v43, %v3557_v38  ;;  %v5532_v38 = vld [vmem:[%s7134_s1 + $0x38] ss:$12 sps:$4 sm:$0xff]   ;;  %v5533_v43 = vld [vmem:[%s7134_s1 + $0x50] ss:$12 sps:$4 sm:$0xff]  }
 0xd61   :  { %v3560_v21 = vpack.c.bf16 %v6923_v17, %v6923_v17 }
 0xd63   :  { %4758 = vst [vmem:[%s7137_s3 + $0x30] sm:$0xf] %v3560_v21  ;;  %3762 = vmatmul.mubr.bf16.vlgmr.msra.gmra.mrb[52].mxu0 %v3560_v21  ;;  %5267 = vmatmul.mubr.bf16.vlgmr.msra.gmra.mrb[52].mxu1 %v3560_v21  ;;  %v5535_v21 = vld [vmem:[%s7134_s1 + $0x80] ss:$12 sps:$4 sm:$0xff]  }
 0xd64   :  { %4002 = vmatpush1.bf16.msra.mxu0 %v6644_v40  ;;  %4033 = vmatprep.mubr.bf16.mxu0 %v5711_v2  ;;  %v5499_v40 = vld [vmem:[%s7134_s1 + $0x20] ss:$12 sps:$4 sm:$0xff]  }
 0xd65   :  { %4003 = vmatprep.subr.bf16.mxu0 %v6654_v44  ;;  %5286 = vmatprep.mubr.msk.bf16.mxu1 %vm5712_vm0, %v5710_v1  ;;  %v5500_v44 = vld [vmem:[%s7134_s1 + $0x38] ss:$12 sps:$4 sm:$0xff]  }
 0xd66   :  { %5271 = vmatpush3.bf16.msra.mxu1 %v5498_v37  ;;  %v5536_v37 = vld [vmem:[%s7134_s1 + $0x98] ss:$12 sps:$4 sm:$0xff]  }
 0xd67   :  { %5272 = vmatprep.subr.bf16.mxu1 %v5710_v1 }
 0xd68   :  { %4004 = vmatpush1.bf16.msra.mxu0 %v6660_v45  ;;  %v6952_v45 = vld [vmem:[%s7134_s1 + $0x4c] ss:$12 sps:$4 sm:$0xff]  }
 0xd69   :  { %4005 = vmatprep.subr.bf16.mxu0 %v6670_v47  ;;  %v6958_v47 = vld [vmem:[%s7134_s1 + $0x48] ss:$12 sps:$4 sm:$0xff]  }
 0xd6a   :  { %5273 = vmatpush3.bf16.msra.mxu1 %v5499_v40  ;;  %v5537_v40 = vld [vmem:[%s7134_s1 + $0xb0] ss:$12 sps:$4 sm:$0xff]  }
 0xd6b   :  { %5274 = vmatprep.subr.bf16.mxu1 %v5710_v1 }
 0xd6c   :  { %4006 = vmatpush1.bf16.msra.mxu0 %v6676_v48  ;;  %v5504_v48 = vld [vmem:[%s7134_s1 + $0x50] ss:$12 sps:$4 sm:$0xff]  }
 0xd6d   :  { %4007 = vmatprep.subr.bf16.mxu0 %v6952_v45 }
 0xd6e   :  { %5275 = vmatpush3.bf16.msra.mxu1 %v5500_v44  ;;  %v4788_v44 = vld [vmem:[%s7135_s0 + $0xa8] sm:$0xff] }
 0xd6f   :  { %5276 = vmatprep.subr.bf16.mxu1 %v5710_v1 }
 0xd70   :  { %4008 = vmatpush1.bf16.msra.mxu0 %v6958_v47 }
 0xd71   :  { %4009 = vmatprep.subr.bf16.mxu0 %v6968_v11 }
 0xd72   :  { %5277 = vmatpush3.bf16.msra.mxu1 %v5504_v48 }
 0xd73   :  { %5278 = vmatprep.subr.bf16.mxu1 %v5710_v1 }
 0xd74   :  { %4010 = vmatpush1.bf16.msra.mxu0 %v6974_v20 }
 0xd75   :  { %4011 = vmatprep.subr.bf16.mxu0 %v6983_v4 }
 0xd76   :  { %5279 = vmatpush3.bf16.msra.mxu1 %v5508_v3 }
 0xd77   :  { %5280 = vmatprep.subr.bf16.mxu1 %v5710_v1 }
 0xd78   :  { %4012 = vmatpush1.bf16.msra.mxu0 %v6989_v5 }
 0xd79   :  { %4013 = vmatprep.subr.bf16.mxu0 %v6999_v49 }
 0xd7a   :  { %5281 = vmatpush3.bf16.msra.mxu1 %v5512_v55 }
 0xd7b   :  { %5282 = vmatprep.subr.bf16.mxu1 %v5710_v1 }
 0xd7c   :  { %4014 = vmatpush1.bf16.msra.mxu0 %v7005_v50 }
 0xd7d   :  { %4015 = vmatprep.subr.bf16.mxu0 %v7015_v52 }
 0xd7e   :  { %5283 = vmatpush3.bf16.msra.mxu1 %v5516_v9 }
 0xd7f   :  { %5284 = vmatprep.subr.bf16.mxu1 %v5710_v1 }
 0xd80   :  { %4016 = vmatpush1.bf16.msra.mxu0 %v7021_v54 }
 0xd81   :  { %4273 = vmatprep.subr.bf16.mxu0 %v5523_v46  ;;  %v4818_v46 = vld [vmem:[%s7135_s0 + $0xbc] sm:$0xf] }
 0xd82   :  { %5285 = vmatpush3.bf16.msra.mxu1 %v5520_v56 }
 0xd83   :  { %5290 = vmatprep.subr.bf16.mxu1 %v5710_v1 }
 0xe36   :  { %v3763_v62 = vpop.f32.mrb[52].mxu0  ;;  %v3804_v35 = vpop.f32.mrb[52].mxu1 }
 0xe37   :  { %v3810_v39 = vadd.f32 %v3763_v62, %v3566_v59  ;;  %v3765_v41 = vpop.f32.mrb[53].mxu0  ;;  %v5268_v63 = vpop.f32.mrb[53].mxu1  ;;  %v3824_v25 = vadd.f32 %v7042_v61, %v3804_v35  ;;  %v3840_v62 = vunpack.c.h.bf16 %v7036_v14 }
 0xe38   :  { %v3767_v6 = vpop.f32.mrb[54].mxu0  ;;  %v3807_v18 = vpop.f32.mrb[54].mxu1  ;;  %v3817_v13 = vadd.f32 %v3765_v41, %v3567_v24 }
 0xe39   :  { %v4785_v19 = vmul.f32 -1.442695, %v3810_v39  ;;  %v3768_v23 = vpop.f32.mrb[55].mxu0  ;;  %v5269_v7 = vpop.f32.mrb[55].mxu1 }
 0xe3a   :  { %v4786_v16 = vmul.f32 -1.442695, %v3817_v13 }
 0xe3b   :  { %5668 = vpow2.f32 %v4785_v19 }
 0xe3c   :  { %5670 = vpow2.f32 %v4786_v16  ;;  %v4817_v16 = vld [vmem:[%s7135_s0 + $0xb4] sm:$0xff] }
 0xe3d   :  { %v4111_v14 = vunpack.c.h.bf16 %v4817_v16 }
 0xe45   :  { %v5669_v32 = vpop.eup %5668 }
 0xe46   :  { %v3814_v0 = vadd.f32 1.0, %v5669_v32  ;;  %v5671_v10 = vpop.eup %5670  ;;  %v4110_v32 = vunpack.c.l.bf16 %v4817_v16 }
 0xe47   :  { %v3821_v15 = vadd.f32 1.0, %v5671_v10 }
 0xe48   :  { %5672 = vrcp.f32 %v3814_v0 }
 0xe49   :  { %5674 = vrcp.f32 %v3821_v15 }
 0xe52   :  { %v5673_v26 = vpop.eup %5672 }
 0xe53   :  { %v3825_v27 = vmul.f32 %v5673_v26, %v3824_v25  ;;  %v5675_v29 = vpop.eup %5674 }
 0xe54   :  { %v3828_v12 = vsub.f32 1.0, %v5675_v29  ;;  %v3830_v33 = vmul.f32 %v5675_v29, %v6923_v17  ;;  %v5534_v17 = vld [vmem:[%s7134_s1 + $0x68] ss:$12 sps:$4 sm:$0xff]  }
 0xe55   :  { %v3826_v28 = vadd.f32 %v3825_v27, %v3568_v22 }
 0xe57   :  { %5676 = vtanh.f32 %v3826_v28 }
 0xe61   :  { %v5677_v30 = vpop.eup %5676 }
 0xe62   :  { %v3829_v31 = vmul.f32 %v5677_v30, %v3828_v12 }
 0xe64   :  { %v7046_v34 = vadd.f32 %v3830_v33, %v3829_v31 }
 0xe66   :  { %v3832_v42 = vpack.c.bf16 %v7046_v34, %v7046_v34 }
 0xe68   :  { %4787 = vst [vmem:[%s7137_s3 + $0x34] sm:$0xf] %v3832_v42  ;;  %4034 = vmatmul.mubr.bf16.vlgmr.msra.gmra.mrb[56].mxu0 %v3832_v42  ;;  %5287 = vmatmul.mubr.bf16.vlgmr.msra.gmra.mrb[56].mxu1 %v3832_v42 }
 0xe69   :  { %4305 = vmatprep.mubr.bf16.mxu0 %v5711_v2  ;;  %5306 = vmatprep.mubr.msk.bf16.mxu1 %vm5712_vm0, %v5710_v1  ;;  %v5527_v2 = vld [vmem:[%s7134_s1 + $0x1c] ss:$12 sps:$4 sm:$0xff]  }
 0xe6a   :  { %4274 = vmatpush1.bf16.msra.mxu0 %v5521_v51  ;;  %5291 = vmatpush3.bf16.msra.mxu1 %v5524_v53  ;;  %v4112_v53 = vunpack.c.l.bf16 %v4818_v46 }
 0xe6b   :  { %5292 = vmatprep.subr.bf16.mxu1 %v5710_v1  ;;  %4275 = vmatprep.subr.bf16.mxu0 %v5527_v2 }
 0xe6e   :  { %4276 = vmatpush1.bf16.msra.mxu0 %v5525_v57  ;;  %5293 = vmatpush3.bf16.msra.mxu1 %v5528_v60 }
 0xe6f   :  { %5294 = vmatprep.subr.bf16.mxu1 %v5710_v1  ;;  %4277 = vmatprep.subr.bf16.mxu0 %v5531_v8 }
 0xe72   :  { %4278 = vmatpush1.bf16.msra.mxu0 %v5529_v36  ;;  %5295 = vmatpush3.bf16.msra.mxu1 %v5532_v38 }
 0xe73   :  { %4279 = vmatprep.subr.bf16.mxu0 %v6952_v45  ;;  %5296 = vmatprep.subr.bf16.mxu1 %v5710_v1  ;;  %v3838_v45 = vunpack.c.l.bf16 %v4788_v44 }
 0xe76   :  { %4280 = vmatpush1.bf16.msra.mxu0 %v6958_v47  ;;  %5297 = vmatpush3.bf16.msra.mxu1 %v5533_v43 }
 0xe77   :  { %4281 = vmatprep.subr.bf16.mxu0 %v6968_v11  ;;  %5298 = vmatprep.subr.bf16.mxu1 %v5710_v1  ;;  %v3839_v11 = vunpack.c.h.bf16 %v4788_v44 }
 0xe7a   :  { %4282 = vmatpush1.bf16.msra.mxu0 %v6974_v20  ;;  %5299 = vmatpush3.bf16.msra.mxu1 %v5534_v17 }
 0xe7b   :  { %4283 = vmatprep.subr.bf16.mxu0 %v6983_v4  ;;  %5300 = vmatprep.subr.bf16.mxu1 %v5710_v1 }
 0xe7e   :  { %4284 = vmatpush1.bf16.msra.mxu0 %v6989_v5  ;;  %5301 = vmatpush3.bf16.msra.mxu1 %v5535_v21 }
 0xe7f   :  { %4285 = vmatprep.subr.bf16.mxu0 %v6999_v49  ;;  %5302 = vmatprep.subr.bf16.mxu1 %v5710_v1 }
 0xe82   :  { %4286 = vmatpush1.bf16.msra.mxu0 %v7005_v50  ;;  %5303 = vmatpush3.bf16.msra.mxu1 %v5536_v37 }
 0xe83   :  { %4287 = vmatprep.subr.bf16.mxu0 %v7015_v52  ;;  %5304 = vmatprep.subr.bf16.mxu1 %v5710_v1 }
 0xe86   :  { %4288 = vmatpush1.bf16.msra.mxu0 %v7021_v54  ;;  %5305 = vmatpush3.bf16.msra.mxu1 %v5537_v40 }
 0xf3b   :  { %v4035_v47 = vpop.f32.mrb[56].mxu0  ;;  %v4076_v48 = vpop.f32.mrb[56].mxu1 }
 0xf3c   :  { %v4082_v20 = vadd.f32 %v4035_v47, %v3838_v45  ;;  %v4037_v3 = vpop.f32.mrb[57].mxu0  ;;  %v5288_v4 = vpop.f32.mrb[57].mxu1  ;;  %v4096_v35 = vadd.f32 %v7042_v61, %v4076_v48 }
 0xf3d   :  { %v4039_v5 = vpop.f32.mrb[58].mxu0  ;;  %v4079_v55 = vpop.f32.mrb[58].mxu1  ;;  %v4089_v1 = vadd.f32 %v4037_v3, %v3839_v11 }
 0xf3e   :  { %v4814_v49 = vmul.f32 -1.442695, %v4082_v20  ;;  %v4040_v50 = vpop.f32.mrb[59].mxu0  ;;  %v5289_v9 = vpop.f32.mrb[59].mxu1 }
 0xf3f   :  { %v4815_v52 = vmul.f32 -1.442695, %v4089_v1 }
 0xf40   :  { %5678 = vpow2.f32 %v4814_v49 }
 0xf41   :  { %5680 = vpow2.f32 %v4815_v52 }
 0xf4a   :  { %v5679_v54 = vpop.eup %5678 }
 0xf4b   :  { %v4086_v56 = vadd.f32 1.0, %v5679_v54  ;;  %v5681_v58 = vpop.eup %5680 }
 0xf4c   :  { %v4093_v59 = vadd.f32 1.0, %v5681_v58 }
 0xf4d   :  { %5682 = vrcp.f32 %v4086_v56 }
 0xf4e   :  { %5684 = vrcp.f32 %v4093_v59 }
 0xf57   :  { %v5683_v24 = vpop.eup %5682 }
 0xf58   :  { %v4097_v39 = vmul.f32 %v5683_v24, %v4096_v35  ;;  %v5685_v63 = vpop.eup %5684 }
 0xf59   :  { %v4100_v6 = vsub.f32 1.0, %v5685_v63  ;;  %v4102_v23 = vmul.f32 %v5685_v63, %v7046_v34 }
 0xf5a   :  { %v4098_v41 = vadd.f32 %v4097_v39, %v3840_v62 }
 0xf5c   :  { %5686 = vtanh.f32 %v4098_v41 }
 0xf66   :  { %v5687_v18 = vpop.eup %5686 }
 0xf67   :  { %v4101_v19 = vmul.f32 %v5687_v18, %v4100_v6 }
 0xf69   :  { %v4103_v7 = vadd.f32 %v4102_v23, %v4101_v19 }
 0xf6b   :  { %v4104_v13 = vpack.c.bf16 %v4103_v7, %v4103_v7 }
 0xf6d   :  { %4816 = vst [vmem:[%s7137_s3 + $0x38] sm:$0xf] %v4104_v13  ;;  %4306 = vmatmul.mubr.bf16.vlgmr.msra.gmra.mrb[60].mxu0 %v4104_v13  ;;  %5307 = vmatmul.mubr.bf16.vlgmr.msra.gmra.mrb[60].mxu1 %v4104_v13 }
0x1040   :  { %v4307_v0 = vpop.f32.mrb[60].mxu0  ;;  %v4348_v10 = vpop.f32.mrb[60].mxu1 }
0x1041   :  { %v4354_v15 = vadd.f32 %v4307_v0, %v4110_v32  ;;  %v4309_v22 = vpop.f32.mrb[61].mxu0  ;;  %v5308_v25 = vpop.f32.mrb[61].mxu1  ;;  %v4368_v2 = vadd.f32 %v7042_v61, %v4348_v10 }
0x1042   :  { %v4311_v26 = vpop.f32.mrb[62].mxu0  ;;  %v4351_v27 = vpop.f32.mrb[62].mxu1  ;;  %v4361_v30 = vadd.f32 %v4309_v22, %v4111_v14 }
0x1043   :  { %v4843_v28 = vmul.f32 -1.442695, %v4354_v15  ;;  %v4312_v29 = vpop.f32.mrb[63].mxu0  ;;  %v5309_v12 = vpop.f32.mrb[63].mxu1 }
0x1044   :  { %v4844_v31 = vmul.f32 -1.442695, %v4361_v30 }
0x1045   :  { %5688 = vpow2.f32 %v4843_v28 }
0x1046   :  { %5690 = vpow2.f32 %v4844_v31 }
0x104f   :  { %v5689_v33 = vpop.eup %5688 }
0x1050   :  { %v4358_v34 = vadd.f32 1.0, %v5689_v33  ;;  %v5691_v42 = vpop.eup %5690 }
0x1051   :  { %v4365_v51 = vadd.f32 1.0, %v5691_v42 }
0x1052   :  { %5692 = vrcp.f32 %v4358_v34 }
0x1053   :  { %5694 = vrcp.f32 %v4365_v51 }
0x105c   :  { %v5693_v57 = vpop.eup %5692 }
0x105d   :  { %v4369_v60 = vmul.f32 %v5693_v57, %v4368_v2  ;;  %v5695_v36 = vpop.eup %5694 }
0x105e   :  { %v4372_v38 = vsub.f32 1.0, %v5695_v36  ;;  %v4374_v21 = vmul.f32 %v5695_v36, %v4103_v7 }
0x105f   :  { %v4370_v8 = vadd.f32 %v4369_v60, %v4112_v53 }
0x1061   :  { %5696 = vtanh.f32 %v4370_v8 }
0x106b   :  { %v5697_v43 = vpop.eup %5696 }
0x106c   :  { %v4373_v17 = vmul.f32 %v5697_v43, %v4372_v38 }
0x106e   :  { %v4375_v37 = vadd.f32 %v4374_v21, %v4373_v17 }
0x1070   :  { %v4376_v40 = vpack.c.bf16 %v4375_v37, %v4375_v37 }
0x1072   :  { %4845 = vst [vmem:[%s7137_s3 + $0x3c] sm:$0xf] %v4376_v40 }

</bundles_post_ra>
